<compile_context>
chip_gen: v6e
topology: v6e:2x2x1
jax: 0.10.0
libtpu: 0.0.40
codegen_flags: <defaults>
</compile_context>

<pallas_src>
import functools
import math

import jax
import jax.numpy as jnp
from jax.experimental import pallas as pl
from jax.experimental.pallas import tpu as pltpu


# ----------------------------------------------------------------------------
# GRU gate math (PyTorch nn.GRUCell semantics), gate order r | z | n on lanes.
# ----------------------------------------------------------------------------
def _gru_gates(gi, gh, h, H):
    r = jax.nn.sigmoid(gi[:, 0 * H:1 * H] + gh[:, 0 * H:1 * H])
    z = jax.nn.sigmoid(gi[:, 1 * H:2 * H] + gh[:, 1 * H:2 * H])
    n = jnp.tanh(gi[:, 2 * H:3 * H] + r * gh[:, 2 * H:3 * H])
    return (1.0 - z) * n + z * h


# ----------------------------------------------------------------------------
# Fused DialogueRNN kernel: whole sequence in one invocation (grid=(1,)).
# ----------------------------------------------------------------------------
def _dialogue_rnn_kernel(
    u_ref, qm_ref, pe_ref, attw_ref,
    wih_g_ref, whh_g_ref, bih_g_ref, bhh_g_ref,
    wih_p_ref, whh_p_ref, bih_p_ref, bhh_p_ref,
    wih_e_ref, whh_e_ref, bih_e_ref, bhh_e_ref,
    e_out_ref, alpha_out_ref,
    g_hist_sc,
    *, B, Pn, T, D_m, D_g, D_p, D_e,
):
    f32 = jnp.float32
    cdt = wih_g_ref.dtype                       # bf16 matmul operand dtype

    # Rows >= current t are multiplied by alpha == 0; zero them so 0 * garbage
    # from uninitialised VMEM can never produce NaN.
    g_hist_sc[...] = jnp.zeros_like(g_hist_sc)

    attw = attw_ref[...]                        # (1, D_g)
    lane_t = jax.lax.broadcasted_iota(jnp.int32, (B, T), 1)
    neg_big = jnp.float32(-1e30)

    def mm(x, w):                               # bf16 MXU operands, f32 accum
        return jnp.dot(x.astype(cdt), w, preferred_element_type=f32)

    # Carried state (lives in vregs across the unrolled loop).
    g_prev = jnp.zeros((B, D_g), f32)
    q_flat = jnp.zeros((Pn * B, D_p), f32)      # row p*B + b == (party p, batch b)
    e_prev = jnp.zeros((B, D_e), f32)
    logit_cache = jnp.zeros((B, T), f32)        # lane-dense attention logits

    # NOTE: gate slices sit at lane offsets H/2H inside one vreg for H=32;
    # for realistic sizes keep H a multiple of 128 (or pad per-gate chunks).
    for t in range(T):                           # static unroll (T small here)
        u = u_ref[t]                             # (B, D_m)
        qm = qm_ref[t]                           # (B, Pn)
        u_bf = u.astype(cdt)                     # cast once, shared by g/p cells

        # ---- first-max one-hot speaker selection (== torch.argmax here) ----
        mx = jnp.max(qm, axis=1, keepdims=True)
        taken = jnp.zeros((B, 1), f32)
        sel = []
        for p in range(Pn):
            hit = jnp.where((qm[:, p:p + 1] >= mx) & (taken < 0.5), 1.0, 0.0)
            sel.append(hit)
            taken = taken + hit

        q0_sel = jnp.zeros((B, D_p), f32)
        for p in range(Pn):
            q0_sel = q0_sel + sel[p] * q_flat[p * B:(p + 1) * B, :]

        # ---- global GRU: g_ = GRU_g([u, q0_sel], g_prev) --------------------
        x_g = jnp.concatenate([u_bf, q0_sel.astype(cdt)], axis=1)
        gi_g = mm(x_g, wih_g_ref[...]) + bih_g_ref[...]
        gh_g = mm(g_prev, whh_g_ref[...]) + bhh_g_ref[...]
        g_ = _gru_gates(gi_g, gh_g, g_prev, D_g)

        # ---- attention (incremental caches; PE added once at store time) ----
        g_pe = g_ + pe_ref[t]                                   # (B, D_g)
        g_hist_sc[:, t:t + 1, :] = g_pe[:, None, :]
        scale_t = jnp.sum(g_pe * attw, axis=-1, keepdims=True)  # (B, 1)
        logit_cache = jnp.where(lane_t == t, scale_t, logit_cache)

        valid = lane_t < t                                      # strictly past
        logits = jnp.where(valid, logit_cache, neg_big)
        m = jnp.max(logits, axis=1, keepdims=True)
        ex = jnp.where(valid, jnp.exp(logits - m), 0.0)
        denom = jnp.sum(ex, axis=1, keepdims=True)              # 0 at t == 0
        alpha = ex / jnp.maximum(denom, 1e-30)                  # (B, T) lane-dense
        alpha_out_ref[t] = alpha                                # no transpose

        M = g_hist_sc[...]                                      # (B, T, D_g)
        c_ = jnp.einsum('bqs,bsd->bqd', alpha[:, None, :], M,
                        preferred_element_type=f32)[:, 0, :]    # (B, D_g)

        # ---- party GRU: one batched hidden matmul over all parties ----------
        x_p = jnp.concatenate([u_bf, c_.astype(cdt)], axis=1)   # (B, D_m+D_g)
        gi_p = mm(x_p, wih_p_ref[...]) + bih_p_ref[...]         # (B, 3*D_p)
        gi_p_all = jnp.concatenate([gi_p] * Pn, axis=0)         # (Pn*B, 3*D_p)
        gh_p_all = mm(q_flat, whh_p_ref[...]) + bhh_p_ref[...]  # (Pn*B, 3*D_p)
        qs_all = _gru_gates(gi_p_all, gh_p_all, q_flat, D_p)
        w_all = jnp.concatenate([qm[:, p:p + 1] for p in range(Pn)], axis=0)
        q_flat = q_flat * (1.0 - w_all) + qs_all * w_all        # listener_state=False

        q_sel = jnp.zeros((B, D_p), f32)
        for p in range(Pn):
            q_sel = q_sel + sel[p] * q_flat[p * B:(p + 1) * B, :]

        # ---- emotion GRU -----------------------------------------------------
        gi_e = mm(q_sel, wih_e_ref[...]) + bih_e_ref[...]
        gh_e = mm(e_prev, whh_e_ref[...]) + bhh_e_ref[...]
        e_prev = _gru_gates(gi_e, gh_e, e_prev, D_e)
        e_out_ref[t] = e_prev

        g_prev = g_


# ----------------------------------------------------------------------------
# Parameters (mirror torch.nn.GRUCell init; weights transposed & gate-stacked)
# ----------------------------------------------------------------------------
def init_gru_params(key, in_dim, hidden, matmul_dtype=jnp.bfloat16):
    k = 1.0 / math.sqrt(hidden)
    ks = jax.random.split(key, 4)
    wih = jax.random.uniform(ks[0], (in_dim, 3 * hidden), jnp.float32, -k, k)
    whh = jax.random.uniform(ks[1], (hidden, 3 * hidden), jnp.float32, -k, k)
    bih = jax.random.uniform(ks[2], (1, 3 * hidden), jnp.float32, -k, k)
    bhh = jax.random.uniform(ks[3], (1, 3 * hidden), jnp.float32, -k, k)
    return {"wih": wih.astype(matmul_dtype), "whh": whh.astype(matmul_dtype),
            "bih": bih, "bhh": bhh}


def make_positional_encoding(num_hiddens, max_len=1000):
    pos = jnp.arange(max_len, dtype=jnp.float32)[:, None]
    div = jnp.power(10000.0,
                    jnp.arange(0, num_hiddens, 2, dtype=jnp.float32) / num_hiddens)
    X = pos / div
    P = jnp.zeros((max_len, num_hiddens), dtype=jnp.float32)
    P = P.at[:, 0::2].set(jnp.sin(X))
    P = P.at[:, 1::2].set(jnp.cos(X))
    return P


def init_dialogue_rnn_params(key, D_m, D_g, D_p, D_e,
                             matmul_dtype=jnp.bfloat16, max_len=1000):
    ks = jax.random.split(key, 4)
    kd = 1.0 / math.sqrt(D_g)
    return {
        "g_cell": init_gru_params(ks[0], D_m + D_p, D_g, matmul_dtype),
        "p_cell": init_gru_params(ks[1], D_m + D_g, D_p, matmul_dtype),
        "e_cell": init_gru_params(ks[2], D_p, D_e, matmul_dtype),
        # SimpleAttention: Linear(D_g, 1, bias=False) stored as (1, D_g)
        "att_w": jax.random.uniform(ks[3], (1, D_g), jnp.float32, -kd, kd),
        "pos_P": make_positional_encoding(D_g, max_len),
    }


# ----------------------------------------------------------------------------
# DialogueRNN.forward (inference): U (T,B,D_m), qmask (T,B,party)
#   returns e (T,B,D_e) and alpha (T,B,T)  (alpha[t,b,s] nonzero only for s<t;
#   row t=0 is all zeros, matching alpha=None at the first step).
# ----------------------------------------------------------------------------
def dialogue_rnn_forward(params, U, qmask):
    T, B, D_m = U.shape
    Pn = qmask.shape[2]
    gc, pc, ec = params["g_cell"], params["p_cell"], params["e_cell"]
    D_g = gc["whh"].shape[0]
    D_p = pc["whh"].shape[0]
    D_e = ec["whh"].shape[0]
    assert params["pos_P"].shape[0] >= T
    pe = params["pos_P"][:T][:, None, :]              # (T, 1, D_g)

    def const(shape):
        return pl.BlockSpec(shape, lambda i, n=len(shape): (0,) * n)

    kernel = functools.partial(_dialogue_rnn_kernel, B=B, Pn=Pn, T=T,
                               D_m=D_m, D_g=D_g, D_p=D_p, D_e=D_e)

    grid_spec = pltpu.PrefetchScalarGridSpec(
        num_scalar_prefetch=0,
        grid=(1,),                                    # whole sequence in one call
        in_specs=[
            const((T, B, D_m)),                       # U (fully resident; tiny)
            const((T, B, Pn)),                        # qmask
            const((T, 1, D_g)),                       # positional encoding
            const((1, D_g)),                          # attention weight
            const(gc["wih"].shape), const(gc["whh"].shape),
            const(gc["bih"].shape), const(gc["bhh"].shape),
            const(pc["wih"].shape), const(pc["whh"].shape),
            const(pc["bih"].shape), const(pc["bhh"].shape),
            const(ec["wih"].shape), const(ec["whh"].shape),
            const(ec["bih"].shape), const(ec["bhh"].shape),
        ],
        out_specs=(
            const((T, B, D_e)),                       # e, row-written per step
            const((T, B, T)),                         # alpha, lane-dense rows
        ),
        scratch_shapes=[
            pltpu.VMEM((B, T, D_g), jnp.float32),     # PE-added history (batch-major)
        ],
    )

    e_seq, alpha = pl.pallas_call(
        kernel,
        out_shape=(jax.ShapeDtypeStruct((T, B, D_e), jnp.float32),
                   jax.ShapeDtypeStruct((T, B, T), jnp.float32)),
        grid_spec=grid_spec,
        compiler_params=pltpu.CompilerParams(
            dimension_semantics=("arbitrary",),
            vmem_limit_bytes=32 * 1024 * 1024),       # raise for realistic sizes
    )(U, qmask, pe, params["att_w"],
      gc["wih"], gc["whh"], gc["bih"], gc["bhh"],
      pc["wih"], pc["whh"], pc["bih"], pc["bhh"],
      ec["wih"], ec["whh"], ec["bih"], ec["bhh"])
    return e_seq, alpha


# ----------------------------------------------------------------------------
# Pure-JAX reference (direct transcription of the PyTorch forward, inference)
# ----------------------------------------------------------------------------
def _ref_gru(x, h, cell):
    cdt = cell["wih"].dtype
    gi = jnp.dot(x.astype(cdt), cell["wih"], preferred_element_type=jnp.float32) + cell["bih"]
    gh = jnp.dot(h.astype(cdt), cell["whh"], preferred_element_type=jnp.float32) + cell["bhh"]
    H = h.shape[-1]
    r = jax.nn.sigmoid(gi[:, :H] + gh[:, :H])
    z = jax.nn.sigmoid(gi[:, H:2 * H] + gh[:, H:2 * H])
    n = jnp.tanh(gi[:, 2 * H:] + r * gh[:, 2 * H:])
    return (1.0 - z) * n + z * h


def dialogue_rnn_reference(params, U, qmask):
    T, B, _ = U.shape
    Pn = qmask.shape[2]
    D_g = params["g_cell"]["whh"].shape[0]
    D_p = params["p_cell"]["whh"].shape[0]
    D_e = params["e_cell"]["whh"].shape[0]
    g_hist = jnp.zeros((0, B, D_g), jnp.float32)
    q = jnp.zeros((B, Pn, D_p), jnp.float32)
    e = jnp.zeros((B, D_e), jnp.float32)
    e_seq, alpha_seq = [], []
    for t in range(T):
        u, qm = U[t], qmask[t]
        idx = jnp.argmax(qm, axis=1)
        q0_sel = q[jnp.arange(B), idx]
        g_prev = jnp.zeros((B, D_g), jnp.float32) if t == 0 else g_hist[-1]
        g_ = _ref_gru(jnp.concatenate([u, q0_sel], axis=1), g_prev, params["g_cell"])
        if t == 0:
            c_ = jnp.zeros((B, D_g), jnp.float32)
            alpha_row = jnp.zeros((B, T), jnp.float32)
        else:
            M = g_hist + params["pos_P"][:t][:, None, :]
            scale = jnp.sum(M * params["att_w"], axis=-1)       # (t, B)
            a = jax.nn.softmax(scale, axis=0)
            c_ = jnp.sum(a[:, :, None] * M, axis=0)
            alpha_row = jnp.zeros((B, T), jnp.float32).at[:, :t].set(a.T)
        Uc = jnp.concatenate([u, c_], axis=1)
        Uc_exp = jnp.broadcast_to(Uc[:, None, :], (B, Pn, Uc.shape[1])).reshape(B * Pn, -1)
        qs = _ref_gru(Uc_exp, q.reshape(B * Pn, D_p), params["p_cell"]).reshape(B, Pn, D_p)
        q = q * (1.0 - qm[:, :, None]) + qs * qm[:, :, None]
        q_sel = q[jnp.arange(B), idx]
        e = _ref_gru(q_sel, e, params["e_cell"])
        e_seq.append(e)
        alpha_seq.append(alpha_row)
        g_hist = jnp.concatenate([g_hist, g_[None]], axis=0)
    return jnp.stack(e_seq), jnp.stack(alpha_seq)


if __name__ == "__main__":
    key = jax.random.PRNGKey(0)
    T, B, Pn = 8, 2, 2
    D_m, D_g, D_p, D_e = 32, 32, 32, 32

    kp, ku, ks = jax.random.split(key, 3)
    params = init_dialogue_rnn_params(kp, D_m, D_g, D_p, D_e)

    U = jax.random.normal(ku, (T, B, D_m), jnp.float32)
    speakers = jax.random.randint(ks, (T, B), 0, Pn)
    qmask = jax.nn.one_hot(speakers, Pn, dtype=jnp.float32)       # (T, B, Pn)

    e_seq, alpha = dialogue_rnn_forward(params, U, qmask)
    jax.block_until_ready((e_seq, alpha))

    assert e_seq.shape == (T, B, D_e)
    assert alpha.shape == (T, B, T)

    # Correctness check against the pure-JAX replica of the PyTorch forward.
    e_ref, alpha_ref = dialogue_rnn_reference(params, U, qmask)
    e_err = float(jnp.max(jnp.abs(e_seq - e_ref)))
    a_err = float(jnp.max(jnp.abs(alpha - alpha_ref)))
    assert e_err < 2e-2 and a_err < 2e-2, (e_err, a_err)

    print("KERNEL_OK")
</pallas_src>

<mosaic_0001>
module attributes {stable_mosaic.version = 11 : i64} {
  func.func @_dialogue_rnn_kernel(%arg0: i32, %arg1: memref<8x2x32xf32, #tpu.memory_space<vmem>>, %arg2: memref<8x2x2xf32, #tpu.memory_space<vmem>>, %arg3: memref<8x1x32xf32, #tpu.memory_space<vmem>>, %arg4: memref<1x32xf32, #tpu.memory_space<vmem>>, %arg5: memref<64x96xbf16, #tpu.memory_space<vmem>>, %arg6: memref<32x96xbf16, #tpu.memory_space<vmem>>, %arg7: memref<1x96xf32, #tpu.memory_space<vmem>>, %arg8: memref<1x96xf32, #tpu.memory_space<vmem>>, %arg9: memref<64x96xbf16, #tpu.memory_space<vmem>>, %arg10: memref<32x96xbf16, #tpu.memory_space<vmem>>, %arg11: memref<1x96xf32, #tpu.memory_space<vmem>>, %arg12: memref<1x96xf32, #tpu.memory_space<vmem>>, %arg13: memref<32x96xbf16, #tpu.memory_space<vmem>>, %arg14: memref<32x96xbf16, #tpu.memory_space<vmem>>, %arg15: memref<1x96xf32, #tpu.memory_space<vmem>>, %arg16: memref<1x96xf32, #tpu.memory_space<vmem>>, %arg17: memref<8x2x32xf32, #tpu.memory_space<vmem>>, %arg18: memref<8x2x8xf32, #tpu.memory_space<vmem>>, %arg19: memref<2x8x32xf32, #tpu.memory_space<vmem>>) attributes {dimension_semantics = [#tpu.dimension_semantics<arbitrary>], iteration_bounds = array<i64: 1>, scalar_prefetch = 0 : i64, scratch_operands = 1 : i64, tpu.core_type = #tpu.core_type<tc>, window_params = [{pipeline_mode = #tpu.pipeline_mode<synchronous>, transform_indices = @transform_0, window_bounds = array<i64: 8, 2, 32>}, {pipeline_mode = #tpu.pipeline_mode<synchronous>, transform_indices = @transform_1, window_bounds = array<i64: 8, 2, 2>}, {pipeline_mode = #tpu.pipeline_mode<synchronous>, transform_indices = @transform_2, window_bounds = array<i64: 8, 1, 32>}, {pipeline_mode = #tpu.pipeline_mode<synchronous>, transform_indices = @transform_3, window_bounds = array<i64: 1, 32>}, {pipeline_mode = #tpu.pipeline_mode<synchronous>, transform_indices = @transform_4, window_bounds = array<i64: 64, 96>}, {pipeline_mode = #tpu.pipeline_mode<synchronous>, transform_indices = @transform_5, window_bounds = array<i64: 32, 96>}, {pipeline_mode = #tpu.pipeline_mode<synchronous>, transform_indices = @transform_6, window_bounds = array<i64: 1, 96>}, {pipeline_mode = #tpu.pipeline_mode<synchronous>, transform_indices = @transform_7, window_bounds = array<i64: 1, 96>}, {pipeline_mode = #tpu.pipeline_mode<synchronous>, transform_indices = @transform_8, window_bounds = array<i64: 64, 96>}, {pipeline_mode = #tpu.pipeline_mode<synchronous>, transform_indices = @transform_9, window_bounds = array<i64: 32, 96>}, {pipeline_mode = #tpu.pipeline_mode<synchronous>, transform_indices = @transform_10, window_bounds = array<i64: 1, 96>}, {pipeline_mode = #tpu.pipeline_mode<synchronous>, transform_indices = @transform_11, window_bounds = array<i64: 1, 96>}, {pipeline_mode = #tpu.pipeline_mode<synchronous>, transform_indices = @transform_12, window_bounds = array<i64: 32, 96>}, {pipeline_mode = #tpu.pipeline_mode<synchronous>, transform_indices = @transform_13, window_bounds = array<i64: 32, 96>}, {pipeline_mode = #tpu.pipeline_mode<synchronous>, transform_indices = @transform_14, window_bounds = array<i64: 1, 96>}, {pipeline_mode = #tpu.pipeline_mode<synchronous>, transform_indices = @transform_15, window_bounds = array<i64: 1, 96>}, {pipeline_mode = #tpu.pipeline_mode<synchronous>, transform_indices = @transform_16, window_bounds = array<i64: 8, 2, 32>}, {pipeline_mode = #tpu.pipeline_mode<synchronous>, transform_indices = @transform_17, window_bounds = array<i64: 8, 2, 8>}]} {
    %cst = arith.constant 0.000000e+00 : f32
    %0 = vector.broadcast %cst : f32 to vector<2x8x32xf32>
    %c0 = arith.constant 0 : index
    %c0_0 = arith.constant 0 : index
    %c0_1 = arith.constant 0 : index
    %1 = vector.load %arg19[%c0, %c0_0, %c0_1] : memref<2x8x32xf32, #tpu.memory_space<vmem>>, vector<2x8x32xf32>
    tpu.vector_store %arg19[%c0, %c0_0, %c0_1], %0 {strides = array<i32>} : memref<2x8x32xf32, #tpu.memory_space<vmem>>, vector<2x8x32xf32>,
    %c0_2 = arith.constant 0 : index
    %c0_3 = arith.constant 0 : index
    %2 = vector.load %arg4[%c0_2, %c0_3] : memref<1x32xf32, #tpu.memory_space<vmem>>, vector<1x32xf32>
    %3 = tpu.iota {dimensions = array<i32: 1>} : vector<2x8xi32>
    %cst_4 = arith.constant 0.000000e+00 : f32
    %4 = vector.broadcast %cst_4 : f32 to vector<2x32xf32>
    %cst_5 = arith.constant 0.000000e+00 : f32
    %5 = vector.broadcast %cst_5 : f32 to vector<4x32xf32>
    %cst_6 = arith.constant 0.000000e+00 : f32
    %6 = vector.broadcast %cst_6 : f32 to vector<2x32xf32>
    %cst_7 = arith.constant 0.000000e+00 : f32
    %7 = vector.broadcast %cst_7 : f32 to vector<2x8xf32>
    %c0_8 = arith.constant 0 : index
    %c0_9 = arith.constant 0 : index
    %c0_10 = arith.constant 0 : index
    %8 = vector.load %arg1[%c0_8, %c0_9, %c0_10] : memref<8x2x32xf32, #tpu.memory_space<vmem>>, vector<1x2x32xf32>
    %9 = vector.shape_cast %8 : vector<1x2x32xf32> to vector<2x32xf32>
    %c0_11 = arith.constant 0 : index
    %c0_12 = arith.constant 0 : index
    %c0_13 = arith.constant 0 : index
    %10 = vector.load %arg2[%c0_11, %c0_12, %c0_13] : memref<8x2x2xf32, #tpu.memory_space<vmem>>, vector<1x2x2xf32>
    %11 = vector.shape_cast %10 : vector<1x2x2xf32> to vector<2x2xf32>
    %12 = arith.truncf %9 : vector<2x32xf32> to vector<2x32xbf16>
    %cst_14 = arith.constant dense<0xFF800000> : vector<2xf32>
    %13 = vector.multi_reduction <maximumf>, %11, %cst_14 [1] : vector<2x2xf32> to vector<2xf32>
    %14 = vector.shape_cast %13 : vector<2xf32> to vector<2x1xf32>
    %cst_15 = arith.constant 0.000000e+00 : f32
    %15 = vector.broadcast %cst_15 : f32 to vector<2x1xf32>
    %16 = vector.extract_strided_slice %11 {offsets = [0, 0], sizes = [2, 1], strides = [1, 1]} : vector<2x2xf32> to vector<2x1xf32>
    %17 = arith.cmpf oge, %16, %14 : vector<2x1xf32>
    %cst_16 = arith.constant 5.000000e-01 : f32
    %18 = vector.broadcast %cst_16 : f32 to vector<2x1xf32>
    %19 = arith.cmpf olt, %15, %18 : vector<2x1xf32>
    %20 = arith.andi %17, %19 : vector<2x1xi1>
    %cst_17 = arith.constant 1.000000e+00 : f32
    %cst_18 = arith.constant 0.000000e+00 : f32
    %21 = vector.broadcast %cst_17 : f32 to vector<2x1xf32>
    %22 = vector.broadcast %cst_18 : f32 to vector<2x1xf32>
    %23 = arith.select %20, %21, %22 : vector<2x1xi1>, vector<2x1xf32>
    %24 = arith.addf %15, %23 : vector<2x1xf32>
    %25 = vector.extract_strided_slice %11 {offsets = [0, 1], sizes = [2, 1], strides = [1, 1]} : vector<2x2xf32> to vector<2x1xf32>
    %26 = arith.cmpf oge, %25, %14 : vector<2x1xf32>
    %cst_19 = arith.constant 5.000000e-01 : f32
    %27 = vector.broadcast %cst_19 : f32 to vector<2x1xf32>
    %28 = arith.cmpf olt, %24, %27 : vector<2x1xf32>
    %29 = arith.andi %26, %28 : vector<2x1xi1>
    %cst_20 = arith.constant 1.000000e+00 : f32
    %cst_21 = arith.constant 0.000000e+00 : f32
    %30 = vector.broadcast %cst_20 : f32 to vector<2x1xf32>
    %31 = vector.broadcast %cst_21 : f32 to vector<2x1xf32>
    %32 = arith.select %29, %30, %31 : vector<2x1xi1>, vector<2x1xf32>
    %cst_22 = arith.constant 0.000000e+00 : f32
    %33 = vector.broadcast %cst_22 : f32 to vector<2x32xf32>
    %34 = vector.extract_strided_slice %5 {offsets = [0, 0], sizes = [2, 32], strides = [1, 1]} : vector<4x32xf32> to vector<2x32xf32>
    %35 = vector.broadcast %23 : vector<2x1xf32> to vector<2x32xf32>
    %36 = arith.mulf %35, %34 : vector<2x32xf32>
    %37 = arith.addf %33, %36 : vector<2x32xf32>
    %38 = vector.extract_strided_slice %5 {offsets = [2, 0], sizes = [2, 32], strides = [1, 1]} : vector<4x32xf32> to vector<2x32xf32>
    %39 = vector.broadcast %32 : vector<2x1xf32> to vector<2x32xf32>
    %40 = arith.mulf %39, %38 : vector<2x32xf32>
    %41 = arith.addf %37, %40 : vector<2x32xf32>
    %42 = arith.truncf %41 : vector<2x32xf32> to vector<2x32xbf16>
    %43 = tpu.concatenate %12, %42 in 1 : vector<2x32xbf16>, vector<2x32xbf16> -> vector<2x64xbf16>
    %c0_23 = arith.constant 0 : index
    %c0_24 = arith.constant 0 : index
    %44 = vector.load %arg5[%c0_23, %c0_24] : memref<64x96xbf16, #tpu.memory_space<vmem>>, vector<64x96xbf16>
    %cst_25 = arith.constant dense<0.000000e+00> : vector<2x96xf32>
    %45 = tpu.matmul %43, %44, %cst_25 {dimension_numbers = #tpu.dot_dimension_numbers<[1], [0], [0], [1], [0, 0, 1, 1], [], []>} : vector<2x64xbf16>, vector<64x96xbf16>, vector<2x96xf32> -> vector<2x96xf32>
    %c0_26 = arith.constant 0 : index
    %c0_27 = arith.constant 0 : index
    %46 = vector.load %arg7[%c0_26, %c0_27] : memref<1x96xf32, #tpu.memory_space<vmem>>, vector<1x96xf32>
    %47 = vector.broadcast %46 : vector<1x96xf32> to vector<2x96xf32>
    %48 = arith.addf %45, %47 : vector<2x96xf32>
    %c0_28 = arith.constant 0 : index
    %c0_29 = arith.constant 0 : index
    %49 = vector.load %arg6[%c0_28, %c0_29] : memref<32x96xbf16, #tpu.memory_space<vmem>>, vector<32x96xbf16>
    %50 = arith.truncf %4 : vector<2x32xf32> to vector<2x32xbf16>
    %cst_30 = arith.constant dense<0.000000e+00> : vector<2x96xf32>
    %51 = tpu.matmul %50, %49, %cst_30 {dimension_numbers = #tpu.dot_dimension_numbers<[1], [0], [0], [1], [0, 0, 1, 1], [], []>} : vector<2x32xbf16>, vector<32x96xbf16>, vector<2x96xf32> -> vector<2x96xf32>
    %c0_31 = arith.constant 0 : index
    %c0_32 = arith.constant 0 : index
    %52 = vector.load %arg8[%c0_31, %c0_32] : memref<1x96xf32, #tpu.memory_space<vmem>>, vector<1x96xf32>
    %53 = vector.broadcast %52 : vector<1x96xf32> to vector<2x96xf32>
    %54 = arith.addf %51, %53 : vector<2x96xf32>
    %55 = vector.extract_strided_slice %48 {offsets = [0, 0], sizes = [2, 32], strides = [1, 1]} : vector<2x96xf32> to vector<2x32xf32>
    %56 = vector.extract_strided_slice %54 {offsets = [0, 0], sizes = [2, 32], strides = [1, 1]} : vector<2x96xf32> to vector<2x32xf32>
    %57 = arith.addf %55, %56 : vector<2x32xf32>
    %58 = arith.negf %57 : vector<2x32xf32>
    %59 = math.exp %58 : vector<2x32xf32>
    %cst_33 = arith.constant 1.000000e+00 : f32
    %60 = vector.broadcast %cst_33 : f32 to vector<2x32xf32>
    %61 = arith.addf %60, %59 : vector<2x32xf32>
    %62 = arith.divf %60, %61 : vector<2x32xf32>
    %63 = vector.extract_strided_slice %48 {offsets = [0, 32], sizes = [2, 32], strides = [1, 1]} : vector<2x96xf32> to vector<2x32xf32>
    %64 = vector.extract_strided_slice %54 {offsets = [0, 32], sizes = [2, 32], strides = [1, 1]} : vector<2x96xf32> to vector<2x32xf32>
    %65 = arith.addf %63, %64 : vector<2x32xf32>
    %66 = arith.negf %65 : vector<2x32xf32>
    %67 = math.exp %66 : vector<2x32xf32>
    %cst_34 = arith.constant 1.000000e+00 : f32
    %68 = vector.broadcast %cst_34 : f32 to vector<2x32xf32>
    %69 = arith.addf %68, %67 : vector<2x32xf32>
    %70 = arith.divf %68, %69 : vector<2x32xf32>
    %71 = vector.extract_strided_slice %48 {offsets = [0, 64], sizes = [2, 32], strides = [1, 1]} : vector<2x96xf32> to vector<2x32xf32>
    %72 = vector.extract_strided_slice %54 {offsets = [0, 64], sizes = [2, 32], strides = [1, 1]} : vector<2x96xf32> to vector<2x32xf32>
    %73 = arith.mulf %62, %72 : vector<2x32xf32>
    %74 = arith.addf %71, %73 : vector<2x32xf32>
    %75 = math.tanh %74 : vector<2x32xf32>
    %cst_35 = arith.constant 1.000000e+00 : f32
    %76 = vector.broadcast %cst_35 : f32 to vector<2x32xf32>
    %77 = arith.subf %76, %70 : vector<2x32xf32>
    %78 = arith.mulf %77, %75 : vector<2x32xf32>
    %79 = arith.mulf %70, %4 : vector<2x32xf32>
    %80 = arith.addf %78, %79 : vector<2x32xf32>
    %c0_36 = arith.constant 0 : index
    %c0_37 = arith.constant 0 : index
    %c0_38 = arith.constant 0 : index
    %81 = vector.load %arg3[%c0_36, %c0_37, %c0_38] : memref<8x1x32xf32, #tpu.memory_space<vmem>>, vector<1x1x32xf32>
    %82 = vector.shape_cast %81 : vector<1x1x32xf32> to vector<1x32xf32>
    %83 = vector.broadcast %82 : vector<1x32xf32> to vector<2x32xf32>
    %84 = arith.addf %80, %83 : vector<2x32xf32>
    %85 = vector.shape_cast %84 : vector<2x32xf32> to vector<2x1x32xf32>
    %c0_39 = arith.constant 0 : index
    %c0_40 = arith.constant 0 : index
    %c0_41 = arith.constant 0 : index
    %86 = vector.load %arg19[%c0_39, %c0_40, %c0_41] : memref<2x8x32xf32, #tpu.memory_space<vmem>>, vector<2x1x32xf32>
    tpu.vector_store %arg19[%c0_39, %c0_40, %c0_41], %85 {strides = array<i32>} : memref<2x8x32xf32, #tpu.memory_space<vmem>>, vector<2x1x32xf32>,
    %87 = vector.broadcast %2 : vector<1x32xf32> to vector<2x32xf32>
    %88 = arith.mulf %84, %87 : vector<2x32xf32>
    %cst_42 = arith.constant dense<0.000000e+00> : vector<2xf32>
    %89 = vector.multi_reduction <add>, %88, %cst_42 [1] : vector<2x32xf32> to vector<2xf32>
    %90 = vector.shape_cast %89 : vector<2xf32> to vector<2x1xf32>
    %c0_i32 = arith.constant 0 : i32
    %91 = vector.broadcast %c0_i32 : i32 to vector<2x8xi32>
    %92 = arith.cmpi eq, %3, %91 : vector<2x8xi32>
    %93 = vector.shape_cast %90 : vector<2x1xf32> to vector<2x1xf32>
    %94 = vector.broadcast %93 : vector<2x1xf32> to vector<2x8xf32>
    %95 = arith.select %92, %94, %7 : vector<2x8xi1>, vector<2x8xf32>
    %c0_i32_43 = arith.constant 0 : i32
    %96 = vector.broadcast %c0_i32_43 : i32 to vector<2x8xi32>
    %97 = arith.cmpi slt, %3, %96 : vector<2x8xi32>
    %cst_44 = arith.constant -1.000000e+30 : f32
    %98 = vector.broadcast %cst_44 : f32 to vector<2x8xf32>
    %99 = arith.select %97, %95, %98 : vector<2x8xi1>, vector<2x8xf32>
    %cst_45 = arith.constant dense<0xFF800000> : vector<2xf32>
    %100 = vector.multi_reduction <maximumf>, %99, %cst_45 [1] : vector<2x8xf32> to vector<2xf32>
    %101 = vector.shape_cast %100 : vector<2xf32> to vector<2x1xf32>
    %102 = vector.broadcast %101 : vector<2x1xf32> to vector<2x8xf32>
    %103 = arith.subf %99, %102 : vector<2x8xf32>
    %104 = math.exp %103 : vector<2x8xf32>
    %cst_46 = arith.constant 0.000000e+00 : f32
    %105 = vector.broadcast %cst_46 : f32 to vector<2x8xf32>
    %106 = arith.select %97, %104, %105 : vector<2x8xi1>, vector<2x8xf32>
    %cst_47 = arith.constant dense<0.000000e+00> : vector<2xf32>
    %107 = vector.multi_reduction <add>, %106, %cst_47 [1] : vector<2x8xf32> to vector<2xf32>
    %108 = vector.shape_cast %107 : vector<2xf32> to vector<2x1xf32>
    %cst_48 = arith.constant 1.000000e-30 : f32
    %109 = vector.broadcast %cst_48 : f32 to vector<2x1xf32>
    %110 = arith.maximumf %108, %109 : vector<2x1xf32>
    %111 = vector.broadcast %110 : vector<2x1xf32> to vector<2x8xf32>
    %112 = arith.divf %106, %111 : vector<2x8xf32>
    %c0_49 = arith.constant 0 : index
    %c0_50 = arith.constant 0 : index
    %c0_51 = arith.constant 0 : index
    %113 = vector.load %arg18[%c0_49, %c0_50, %c0_51] : memref<8x2x8xf32, #tpu.memory_space<vmem>>, vector<1x2x8xf32>
    %114 = vector.shape_cast %113 : vector<1x2x8xf32> to vector<2x8xf32>
    %115 = vector.shape_cast %112 : vector<2x8xf32> to vector<1x2x8xf32>
    tpu.vector_store %arg18[%c0_49, %c0_50, %c0_51], %115 {strides = array<i32>} : memref<8x2x8xf32, #tpu.memory_space<vmem>>, vector<1x2x8xf32>,
    %c0_52 = arith.constant 0 : index
    %c0_53 = arith.constant 0 : index
    %c0_54 = arith.constant 0 : index
    %116 = vector.load %arg19[%c0_52, %c0_53, %c0_54] : memref<2x8x32xf32, #tpu.memory_space<vmem>>, vector<2x8x32xf32>
    %117 = vector.shape_cast %112 : vector<2x8xf32> to vector<2x1x8xf32>
    "tpu.trace_start"() <{level = 10 : i32, message = "bqs,bsd->bqd"}> : () -> ()
    %cst_55 = arith.constant dense<0.000000e+00> : vector<2x1x32xf32>
    %118 = tpu.matmul %117, %116, %cst_55 {dimension_numbers = #tpu.dot_dimension_numbers<[2], [1], [1], [2], [0, 0, 0, 1, 1, 2], [0], [0]>} : vector<2x1x8xf32>, vector<2x8x32xf32>, vector<2x1x32xf32> -> vector<2x1x32xf32>
    "tpu.trace_stop"() : () -> ()
    %119 = vector.shape_cast %118 : vector<2x1x32xf32> to vector<2x32xf32>
    %120 = arith.truncf %119 : vector<2x32xf32> to vector<2x32xbf16>
    %121 = tpu.concatenate %12, %120 in 1 : vector<2x32xbf16>, vector<2x32xbf16> -> vector<2x64xbf16>
    %c0_56 = arith.constant 0 : index
    %c0_57 = arith.constant 0 : index
    %122 = vector.load %arg9[%c0_56, %c0_57] : memref<64x96xbf16, #tpu.memory_space<vmem>>, vector<64x96xbf16>
    %cst_58 = arith.constant dense<0.000000e+00> : vector<2x96xf32>
    %123 = tpu.matmul %121, %122, %cst_58 {dimension_numbers = #tpu.dot_dimension_numbers<[1], [0], [0], [1], [0, 0, 1, 1], [], []>} : vector<2x64xbf16>, vector<64x96xbf16>, vector<2x96xf32> -> vector<2x96xf32>
    %c0_59 = arith.constant 0 : index
    %c0_60 = arith.constant 0 : index
    %124 = vector.load %arg11[%c0_59, %c0_60] : memref<1x96xf32, #tpu.memory_space<vmem>>, vector<1x96xf32>
    %125 = vector.broadcast %124 : vector<1x96xf32> to vector<2x96xf32>
    %126 = arith.addf %123, %125 : vector<2x96xf32>
    %127 = tpu.concatenate %126, %126 in 0 : vector<2x96xf32>, vector<2x96xf32> -> vector<4x96xf32>
    %c0_61 = arith.constant 0 : index
    %c0_62 = arith.constant 0 : index
    %128 = vector.load %arg10[%c0_61, %c0_62] : memref<32x96xbf16, #tpu.memory_space<vmem>>, vector<32x96xbf16>
    %129 = arith.truncf %5 : vector<4x32xf32> to vector<4x32xbf16>
    %cst_63 = arith.constant dense<0.000000e+00> : vector<4x96xf32>
    %130 = tpu.matmul %129, %128, %cst_63 {dimension_numbers = #tpu.dot_dimension_numbers<[1], [0], [0], [1], [0, 0, 1, 1], [], []>} : vector<4x32xbf16>, vector<32x96xbf16>, vector<4x96xf32> -> vector<4x96xf32>
    %c0_64 = arith.constant 0 : index
    %c0_65 = arith.constant 0 : index
    %131 = vector.load %arg12[%c0_64, %c0_65] : memref<1x96xf32, #tpu.memory_space<vmem>>, vector<1x96xf32>
    %132 = vector.broadcast %131 : vector<1x96xf32> to vector<4x96xf32>
    %133 = arith.addf %130, %132 : vector<4x96xf32>
    %134 = vector.extract_strided_slice %127 {offsets = [0, 0], sizes = [4, 32], strides = [1, 1]} : vector<4x96xf32> to vector<4x32xf32>
    %135 = vector.extract_strided_slice %133 {offsets = [0, 0], sizes = [4, 32], strides = [1, 1]} : vector<4x96xf32> to vector<4x32xf32>
    %136 = arith.addf %134, %135 : vector<4x32xf32>
    %137 = arith.negf %136 : vector<4x32xf32>
    %138 = math.exp %137 : vector<4x32xf32>
    %cst_66 = arith.constant 1.000000e+00 : f32
    %139 = vector.broadcast %cst_66 : f32 to vector<4x32xf32>
    %140 = arith.addf %139, %138 : vector<4x32xf32>
    %141 = arith.divf %139, %140 : vector<4x32xf32>
    %142 = vector.extract_strided_slice %127 {offsets = [0, 32], sizes = [4, 32], strides = [1, 1]} : vector<4x96xf32> to vector<4x32xf32>
    %143 = vector.extract_strided_slice %133 {offsets = [0, 32], sizes = [4, 32], strides = [1, 1]} : vector<4x96xf32> to vector<4x32xf32>
    %144 = arith.addf %142, %143 : vector<4x32xf32>
    %145 = arith.negf %144 : vector<4x32xf32>
    %146 = math.exp %145 : vector<4x32xf32>
    %cst_67 = arith.constant 1.000000e+00 : f32
    %147 = vector.broadcast %cst_67 : f32 to vector<4x32xf32>
    %148 = arith.addf %147, %146 : vector<4x32xf32>
    %149 = arith.divf %147, %148 : vector<4x32xf32>
    %150 = vector.extract_strided_slice %127 {offsets = [0, 64], sizes = [4, 32], strides = [1, 1]} : vector<4x96xf32> to vector<4x32xf32>
    %151 = vector.extract_strided_slice %133 {offsets = [0, 64], sizes = [4, 32], strides = [1, 1]} : vector<4x96xf32> to vector<4x32xf32>
    %152 = arith.mulf %141, %151 : vector<4x32xf32>
    %153 = arith.addf %150, %152 : vector<4x32xf32>
    %154 = math.tanh %153 : vector<4x32xf32>
    %cst_68 = arith.constant 1.000000e+00 : f32
    %155 = vector.broadcast %cst_68 : f32 to vector<4x32xf32>
    %156 = arith.subf %155, %149 : vector<4x32xf32>
    %157 = arith.mulf %156, %154 : vector<4x32xf32>
    %158 = arith.mulf %149, %5 : vector<4x32xf32>
    %159 = arith.addf %157, %158 : vector<4x32xf32>
    %160 = vector.extract_strided_slice %11 {offsets = [0, 0], sizes = [2, 1], strides = [1, 1]} : vector<2x2xf32> to vector<2x1xf32>
    %161 = vector.extract_strided_slice %11 {offsets = [0, 1], sizes = [2, 1], strides = [1, 1]} : vector<2x2xf32> to vector<2x1xf32>
    %162 = tpu.concatenate %160, %161 in 0 : vector<2x1xf32>, vector<2x1xf32> -> vector<4x1xf32>
    %cst_69 = arith.constant 1.000000e+00 : f32
    %163 = vector.broadcast %cst_69 : f32 to vector<4x1xf32>
    %164 = arith.subf %163, %162 : vector<4x1xf32>
    %165 = vector.broadcast %164 : vector<4x1xf32> to vector<4x32xf32>
    %166 = arith.mulf %5, %165 : vector<4x32xf32>
    %167 = vector.broadcast %162 : vector<4x1xf32> to vector<4x32xf32>
    %168 = arith.mulf %159, %167 : vector<4x32xf32>
    %169 = arith.addf %166, %168 : vector<4x32xf32>
    %cst_70 = arith.constant 0.000000e+00 : f32
    %170 = vector.broadcast %cst_70 : f32 to vector<2x32xf32>
    %171 = vector.extract_strided_slice %169 {offsets = [0, 0], sizes = [2, 32], strides = [1, 1]} : vector<4x32xf32> to vector<2x32xf32>
    %172 = vector.broadcast %23 : vector<2x1xf32> to vector<2x32xf32>
    %173 = arith.mulf %172, %171 : vector<2x32xf32>
    %174 = arith.addf %170, %173 : vector<2x32xf32>
    %175 = vector.extract_strided_slice %169 {offsets = [2, 0], sizes = [2, 32], strides = [1, 1]} : vector<4x32xf32> to vector<2x32xf32>
    %176 = vector.broadcast %32 : vector<2x1xf32> to vector<2x32xf32>
    %177 = arith.mulf %176, %175 : vector<2x32xf32>
    %178 = arith.addf %174, %177 : vector<2x32xf32>
    %c0_71 = arith.constant 0 : index
    %c0_72 = arith.constant 0 : index
    %179 = vector.load %arg13[%c0_71, %c0_72] : memref<32x96xbf16, #tpu.memory_space<vmem>>, vector<32x96xbf16>
    %180 = arith.truncf %178 : vector<2x32xf32> to vector<2x32xbf16>
    %cst_73 = arith.constant dense<0.000000e+00> : vector<2x96xf32>
    %181 = tpu.matmul %180, %179, %cst_73 {dimension_numbers = #tpu.dot_dimension_numbers<[1], [0], [0], [1], [0, 0, 1, 1], [], []>} : vector<2x32xbf16>, vector<32x96xbf16>, vector<2x96xf32> -> vector<2x96xf32>
    %c0_74 = arith.constant 0 : index
    %c0_75 = arith.constant 0 : index
    %182 = vector.load %arg15[%c0_74, %c0_75] : memref<1x96xf32, #tpu.memory_space<vmem>>, vector<1x96xf32>
    %183 = vector.broadcast %182 : vector<1x96xf32> to vector<2x96xf32>
    %184 = arith.addf %181, %183 : vector<2x96xf32>
    %c0_76 = arith.constant 0 : index
    %c0_77 = arith.constant 0 : index
    %185 = vector.load %arg14[%c0_76, %c0_77] : memref<32x96xbf16, #tpu.memory_space<vmem>>, vector<32x96xbf16>
    %186 = arith.truncf %6 : vector<2x32xf32> to vector<2x32xbf16>
    %cst_78 = arith.constant dense<0.000000e+00> : vector<2x96xf32>
    %187 = tpu.matmul %186, %185, %cst_78 {dimension_numbers = #tpu.dot_dimension_numbers<[1], [0], [0], [1], [0, 0, 1, 1], [], []>} : vector<2x32xbf16>, vector<32x96xbf16>, vector<2x96xf32> -> vector<2x96xf32>
    %c0_79 = arith.constant 0 : index
    %c0_80 = arith.constant 0 : index
    %188 = vector.load %arg16[%c0_79, %c0_80] : memref<1x96xf32, #tpu.memory_space<vmem>>, vector<1x96xf32>
    %189 = vector.broadcast %188 : vector<1x96xf32> to vector<2x96xf32>
    %190 = arith.addf %187, %189 : vector<2x96xf32>
    %191 = vector.extract_strided_slice %184 {offsets = [0, 0], sizes = [2, 32], strides = [1, 1]} : vector<2x96xf32> to vector<2x32xf32>
    %192 = vector.extract_strided_slice %190 {offsets = [0, 0], sizes = [2, 32], strides = [1, 1]} : vector<2x96xf32> to vector<2x32xf32>
    %193 = arith.addf %191, %192 : vector<2x32xf32>
    %194 = arith.negf %193 : vector<2x32xf32>
    %195 = math.exp %194 : vector<2x32xf32>
    %cst_81 = arith.constant 1.000000e+00 : f32
    %196 = vector.broadcast %cst_81 : f32 to vector<2x32xf32>
    %197 = arith.addf %196, %195 : vector<2x32xf32>
    %198 = arith.divf %196, %197 : vector<2x32xf32>
    %199 = vector.extract_strided_slice %184 {offsets = [0, 32], sizes = [2, 32], strides = [1, 1]} : vector<2x96xf32> to vector<2x32xf32>
    %200 = vector.extract_strided_slice %190 {offsets = [0, 32], sizes = [2, 32], strides = [1, 1]} : vector<2x96xf32> to vector<2x32xf32>
    %201 = arith.addf %199, %200 : vector<2x32xf32>
    %202 = arith.negf %201 : vector<2x32xf32>
    %203 = math.exp %202 : vector<2x32xf32>
    %cst_82 = arith.constant 1.000000e+00 : f32
    %204 = vector.broadcast %cst_82 : f32 to vector<2x32xf32>
    %205 = arith.addf %204, %203 : vector<2x32xf32>
    %206 = arith.divf %204, %205 : vector<2x32xf32>
    %207 = vector.extract_strided_slice %184 {offsets = [0, 64], sizes = [2, 32], strides = [1, 1]} : vector<2x96xf32> to vector<2x32xf32>
    %208 = vector.extract_strided_slice %190 {offsets = [0, 64], sizes = [2, 32], strides = [1, 1]} : vector<2x96xf32> to vector<2x32xf32>
    %209 = arith.mulf %198, %208 : vector<2x32xf32>
    %210 = arith.addf %207, %209 : vector<2x32xf32>
    %211 = math.tanh %210 : vector<2x32xf32>
    %cst_83 = arith.constant 1.000000e+00 : f32
    %212 = vector.broadcast %cst_83 : f32 to vector<2x32xf32>
    %213 = arith.subf %212, %206 : vector<2x32xf32>
    %214 = arith.mulf %213, %211 : vector<2x32xf32>
    %215 = arith.mulf %206, %6 : vector<2x32xf32>
    %216 = arith.addf %214, %215 : vector<2x32xf32>
    %c0_84 = arith.constant 0 : index
    %c0_85 = arith.constant 0 : index
    %c0_86 = arith.constant 0 : index
    %217 = vector.load %arg17[%c0_84, %c0_85, %c0_86] : memref<8x2x32xf32, #tpu.memory_space<vmem>>, vector<1x2x32xf32>
    %218 = vector.shape_cast %217 : vector<1x2x32xf32> to vector<2x32xf32>
    %219 = vector.shape_cast %216 : vector<2x32xf32> to vector<1x2x32xf32>
    tpu.vector_store %arg17[%c0_84, %c0_85, %c0_86], %219 {strides = array<i32>} : memref<8x2x32xf32, #tpu.memory_space<vmem>>, vector<1x2x32xf32>,
    %c1 = arith.constant 1 : index
    %c0_87 = arith.constant 0 : index
    %c0_88 = arith.constant 0 : index
    %220 = vector.load %arg1[%c1, %c0_87, %c0_88] : memref<8x2x32xf32, #tpu.memory_space<vmem>>, vector<1x2x32xf32>
    %221 = vector.shape_cast %220 : vector<1x2x32xf32> to vector<2x32xf32>
    %c1_89 = arith.constant 1 : index
    %c0_90 = arith.constant 0 : index
    %c0_91 = arith.constant 0 : index
    %222 = vector.load %arg2[%c1_89, %c0_90, %c0_91] : memref<8x2x2xf32, #tpu.memory_space<vmem>>, vector<1x2x2xf32>
    %223 = vector.shape_cast %222 : vector<1x2x2xf32> to vector<2x2xf32>
    %224 = arith.truncf %221 : vector<2x32xf32> to vector<2x32xbf16>
    %cst_92 = arith.constant dense<0xFF800000> : vector<2xf32>
    %225 = vector.multi_reduction <maximumf>, %223, %cst_92 [1] : vector<2x2xf32> to vector<2xf32>
    %226 = vector.shape_cast %225 : vector<2xf32> to vector<2x1xf32>
    %cst_93 = arith.constant 0.000000e+00 : f32
    %227 = vector.broadcast %cst_93 : f32 to vector<2x1xf32>
    %228 = vector.extract_strided_slice %223 {offsets = [0, 0], sizes = [2, 1], strides = [1, 1]} : vector<2x2xf32> to vector<2x1xf32>
    %229 = arith.cmpf oge, %228, %226 : vector<2x1xf32>
    %cst_94 = arith.constant 5.000000e-01 : f32
    %230 = vector.broadcast %cst_94 : f32 to vector<2x1xf32>
    %231 = arith.cmpf olt, %227, %230 : vector<2x1xf32>
    %232 = arith.andi %229, %231 : vector<2x1xi1>
    %cst_95 = arith.constant 1.000000e+00 : f32
    %cst_96 = arith.constant 0.000000e+00 : f32
    %233 = vector.broadcast %cst_95 : f32 to vector<2x1xf32>
    %234 = vector.broadcast %cst_96 : f32 to vector<2x1xf32>
    %235 = arith.select %232, %233, %234 : vector<2x1xi1>, vector<2x1xf32>
    %236 = arith.addf %227, %235 : vector<2x1xf32>
    %237 = vector.extract_strided_slice %223 {offsets = [0, 1], sizes = [2, 1], strides = [1, 1]} : vector<2x2xf32> to vector<2x1xf32>
    %238 = arith.cmpf oge, %237, %226 : vector<2x1xf32>
    %cst_97 = arith.constant 5.000000e-01 : f32
    %239 = vector.broadcast %cst_97 : f32 to vector<2x1xf32>
    %240 = arith.cmpf olt, %236, %239 : vector<2x1xf32>
    %241 = arith.andi %238, %240 : vector<2x1xi1>
    %cst_98 = arith.constant 1.000000e+00 : f32
    %cst_99 = arith.constant 0.000000e+00 : f32
    %242 = vector.broadcast %cst_98 : f32 to vector<2x1xf32>
    %243 = vector.broadcast %cst_99 : f32 to vector<2x1xf32>
    %244 = arith.select %241, %242, %243 : vector<2x1xi1>, vector<2x1xf32>
    %cst_100 = arith.constant 0.000000e+00 : f32
    %245 = vector.broadcast %cst_100 : f32 to vector<2x32xf32>
    %246 = vector.extract_strided_slice %169 {offsets = [0, 0], sizes = [2, 32], strides = [1, 1]} : vector<4x32xf32> to vector<2x32xf32>
    %247 = vector.broadcast %235 : vector<2x1xf32> to vector<2x32xf32>
    %248 = arith.mulf %247, %246 : vector<2x32xf32>
    %249 = arith.addf %245, %248 : vector<2x32xf32>
    %250 = vector.extract_strided_slice %169 {offsets = [2, 0], sizes = [2, 32], strides = [1, 1]} : vector<4x32xf32> to vector<2x32xf32>
    %251 = vector.broadcast %244 : vector<2x1xf32> to vector<2x32xf32>
    %252 = arith.mulf %251, %250 : vector<2x32xf32>
    %253 = arith.addf %249, %252 : vector<2x32xf32>
    %254 = arith.truncf %253 : vector<2x32xf32> to vector<2x32xbf16>
    %255 = tpu.concatenate %224, %254 in 1 : vector<2x32xbf16>, vector<2x32xbf16> -> vector<2x64xbf16>
    %c0_101 = arith.constant 0 : index
    %c0_102 = arith.constant 0 : index
    %256 = vector.load %arg5[%c0_101, %c0_102] : memref<64x96xbf16, #tpu.memory_space<vmem>>, vector<64x96xbf16>
    %cst_103 = arith.constant dense<0.000000e+00> : vector<2x96xf32>
    %257 = tpu.matmul %255, %256, %cst_103 {dimension_numbers = #tpu.dot_dimension_numbers<[1], [0], [0], [1], [0, 0, 1, 1], [], []>} : vector<2x64xbf16>, vector<64x96xbf16>, vector<2x96xf32> -> vector<2x96xf32>
    %c0_104 = arith.constant 0 : index
    %c0_105 = arith.constant 0 : index
    %258 = vector.load %arg7[%c0_104, %c0_105] : memref<1x96xf32, #tpu.memory_space<vmem>>, vector<1x96xf32>
    %259 = vector.broadcast %258 : vector<1x96xf32> to vector<2x96xf32>
    %260 = arith.addf %257, %259 : vector<2x96xf32>
    %c0_106 = arith.constant 0 : index
    %c0_107 = arith.constant 0 : index
    %261 = vector.load %arg6[%c0_106, %c0_107] : memref<32x96xbf16, #tpu.memory_space<vmem>>, vector<32x96xbf16>
    %262 = arith.truncf %80 : vector<2x32xf32> to vector<2x32xbf16>
    %cst_108 = arith.constant dense<0.000000e+00> : vector<2x96xf32>
    %263 = tpu.matmul %262, %261, %cst_108 {dimension_numbers = #tpu.dot_dimension_numbers<[1], [0], [0], [1], [0, 0, 1, 1], [], []>} : vector<2x32xbf16>, vector<32x96xbf16>, vector<2x96xf32> -> vector<2x96xf32>
    %c0_109 = arith.constant 0 : index
    %c0_110 = arith.constant 0 : index
    %264 = vector.load %arg8[%c0_109, %c0_110] : memref<1x96xf32, #tpu.memory_space<vmem>>, vector<1x96xf32>
    %265 = vector.broadcast %264 : vector<1x96xf32> to vector<2x96xf32>
    %266 = arith.addf %263, %265 : vector<2x96xf32>
    %267 = vector.extract_strided_slice %260 {offsets = [0, 0], sizes = [2, 32], strides = [1, 1]} : vector<2x96xf32> to vector<2x32xf32>
    %268 = vector.extract_strided_slice %266 {offsets = [0, 0], sizes = [2, 32], strides = [1, 1]} : vector<2x96xf32> to vector<2x32xf32>
    %269 = arith.addf %267, %268 : vector<2x32xf32>
    %270 = arith.negf %269 : vector<2x32xf32>
    %271 = math.exp %270 : vector<2x32xf32>
    %cst_111 = arith.constant 1.000000e+00 : f32
    %272 = vector.broadcast %cst_111 : f32 to vector<2x32xf32>
    %273 = arith.addf %272, %271 : vector<2x32xf32>
    %274 = arith.divf %272, %273 : vector<2x32xf32>
    %275 = vector.extract_strided_slice %260 {offsets = [0, 32], sizes = [2, 32], strides = [1, 1]} : vector<2x96xf32> to vector<2x32xf32>
    %276 = vector.extract_strided_slice %266 {offsets = [0, 32], sizes = [2, 32], strides = [1, 1]} : vector<2x96xf32> to vector<2x32xf32>
    %277 = arith.addf %275, %276 : vector<2x32xf32>
    %278 = arith.negf %277 : vector<2x32xf32>
    %279 = math.exp %278 : vector<2x32xf32>
    %cst_112 = arith.constant 1.000000e+00 : f32
    %280 = vector.broadcast %cst_112 : f32 to vector<2x32xf32>
    %281 = arith.addf %280, %279 : vector<2x32xf32>
    %282 = arith.divf %280, %281 : vector<2x32xf32>
    %283 = vector.extract_strided_slice %260 {offsets = [0, 64], sizes = [2, 32], strides = [1, 1]} : vector<2x96xf32> to vector<2x32xf32>
    %284 = vector.extract_strided_slice %266 {offsets = [0, 64], sizes = [2, 32], strides = [1, 1]} : vector<2x96xf32> to vector<2x32xf32>
    %285 = arith.mulf %274, %284 : vector<2x32xf32>
    %286 = arith.addf %283, %285 : vector<2x32xf32>
    %287 = math.tanh %286 : vector<2x32xf32>
    %cst_113 = arith.constant 1.000000e+00 : f32
    %288 = vector.broadcast %cst_113 : f32 to vector<2x32xf32>
    %289 = arith.subf %288, %282 : vector<2x32xf32>
    %290 = arith.mulf %289, %287 : vector<2x32xf32>
    %291 = arith.mulf %282, %80 : vector<2x32xf32>
    %292 = arith.addf %290, %291 : vector<2x32xf32>
    %c1_114 = arith.constant 1 : index
    %c0_115 = arith.constant 0 : index
    %c0_116 = arith.constant 0 : index
    %293 = vector.load %arg3[%c1_114, %c0_115, %c0_116] : memref<8x1x32xf32, #tpu.memory_space<vmem>>, vector<1x1x32xf32>
    %294 = vector.shape_cast %293 : vector<1x1x32xf32> to vector<1x32xf32>
    %295 = vector.broadcast %294 : vector<1x32xf32> to vector<2x32xf32>
    %296 = arith.addf %292, %295 : vector<2x32xf32>
    %297 = vector.shape_cast %296 : vector<2x32xf32> to vector<2x1x32xf32>
    %c0_117 = arith.constant 0 : index
    %c1_118 = arith.constant 1 : index
    %c0_119 = arith.constant 0 : index
    %298 = vector.load %arg19[%c0_117, %c1_118, %c0_119] : memref<2x8x32xf32, #tpu.memory_space<vmem>>, vector<2x1x32xf32>
    tpu.vector_store %arg19[%c0_117, %c1_118, %c0_119], %297 {strides = array<i32>} : memref<2x8x32xf32, #tpu.memory_space<vmem>>, vector<2x1x32xf32>,
    %299 = vector.broadcast %2 : vector<1x32xf32> to vector<2x32xf32>
    %300 = arith.mulf %296, %299 : vector<2x32xf32>
    %cst_120 = arith.constant dense<0.000000e+00> : vector<2xf32>
    %301 = vector.multi_reduction <add>, %300, %cst_120 [1] : vector<2x32xf32> to vector<2xf32>
    %302 = vector.shape_cast %301 : vector<2xf32> to vector<2x1xf32>
    %c1_i32 = arith.constant 1 : i32
    %303 = vector.broadcast %c1_i32 : i32 to vector<2x8xi32>
    %304 = arith.cmpi eq, %3, %303 : vector<2x8xi32>
    %305 = vector.shape_cast %302 : vector<2x1xf32> to vector<2x1xf32>
    %306 = vector.broadcast %305 : vector<2x1xf32> to vector<2x8xf32>
    %307 = arith.select %304, %306, %95 : vector<2x8xi1>, vector<2x8xf32>
    %c1_i32_121 = arith.constant 1 : i32
    %308 = vector.broadcast %c1_i32_121 : i32 to vector<2x8xi32>
    %309 = arith.cmpi slt, %3, %308 : vector<2x8xi32>
    %cst_122 = arith.constant -1.000000e+30 : f32
    %310 = vector.broadcast %cst_122 : f32 to vector<2x8xf32>
    %311 = arith.select %309, %307, %310 : vector<2x8xi1>, vector<2x8xf32>
    %cst_123 = arith.constant dense<0xFF800000> : vector<2xf32>
    %312 = vector.multi_reduction <maximumf>, %311, %cst_123 [1] : vector<2x8xf32> to vector<2xf32>
    %313 = vector.shape_cast %312 : vector<2xf32> to vector<2x1xf32>
    %314 = vector.broadcast %313 : vector<2x1xf32> to vector<2x8xf32>
    %315 = arith.subf %311, %314 : vector<2x8xf32>
    %316 = math.exp %315 : vector<2x8xf32>
    %cst_124 = arith.constant 0.000000e+00 : f32
    %317 = vector.broadcast %cst_124 : f32 to vector<2x8xf32>
    %318 = arith.select %309, %316, %317 : vector<2x8xi1>, vector<2x8xf32>
    %cst_125 = arith.constant dense<0.000000e+00> : vector<2xf32>
    %319 = vector.multi_reduction <add>, %318, %cst_125 [1] : vector<2x8xf32> to vector<2xf32>
    %320 = vector.shape_cast %319 : vector<2xf32> to vector<2x1xf32>
    %cst_126 = arith.constant 1.000000e-30 : f32
    %321 = vector.broadcast %cst_126 : f32 to vector<2x1xf32>
    %322 = arith.maximumf %320, %321 : vector<2x1xf32>
    %323 = vector.broadcast %322 : vector<2x1xf32> to vector<2x8xf32>
    %324 = arith.divf %318, %323 : vector<2x8xf32>
    %c1_127 = arith.constant 1 : index
    %c0_128 = arith.constant 0 : index
    %c0_129 = arith.constant 0 : index
    %325 = vector.load %arg18[%c1_127, %c0_128, %c0_129] : memref<8x2x8xf32, #tpu.memory_space<vmem>>, vector<1x2x8xf32>
    %326 = vector.shape_cast %325 : vector<1x2x8xf32> to vector<2x8xf32>
    %327 = vector.shape_cast %324 : vector<2x8xf32> to vector<1x2x8xf32>
    tpu.vector_store %arg18[%c1_127, %c0_128, %c0_129], %327 {strides = array<i32>} : memref<8x2x8xf32, #tpu.memory_space<vmem>>, vector<1x2x8xf32>,
    %c0_130 = arith.constant 0 : index
    %c0_131 = arith.constant 0 : index
    %c0_132 = arith.constant 0 : index
    %328 = vector.load %arg19[%c0_130, %c0_131, %c0_132] : memref<2x8x32xf32, #tpu.memory_space<vmem>>, vector<2x8x32xf32>
    %329 = vector.shape_cast %324 : vector<2x8xf32> to vector<2x1x8xf32>
    "tpu.trace_start"() <{level = 10 : i32, message = "bqs,bsd->bqd"}> : () -> ()
    %cst_133 = arith.constant dense<0.000000e+00> : vector<2x1x32xf32>
    %330 = tpu.matmul %329, %328, %cst_133 {dimension_numbers = #tpu.dot_dimension_numbers<[2], [1], [1], [2], [0, 0, 0, 1, 1, 2], [0], [0]>} : vector<2x1x8xf32>, vector<2x8x32xf32>, vector<2x1x32xf32> -> vector<2x1x32xf32>
    "tpu.trace_stop"() : () -> ()
    %331 = vector.shape_cast %330 : vector<2x1x32xf32> to vector<2x32xf32>
    %332 = arith.truncf %331 : vector<2x32xf32> to vector<2x32xbf16>
    %333 = tpu.concatenate %224, %332 in 1 : vector<2x32xbf16>, vector<2x32xbf16> -> vector<2x64xbf16>
    %c0_134 = arith.constant 0 : index
    %c0_135 = arith.constant 0 : index
    %334 = vector.load %arg9[%c0_134, %c0_135] : memref<64x96xbf16, #tpu.memory_space<vmem>>, vector<64x96xbf16>
    %cst_136 = arith.constant dense<0.000000e+00> : vector<2x96xf32>
    %335 = tpu.matmul %333, %334, %cst_136 {dimension_numbers = #tpu.dot_dimension_numbers<[1], [0], [0], [1], [0, 0, 1, 1], [], []>} : vector<2x64xbf16>, vector<64x96xbf16>, vector<2x96xf32> -> vector<2x96xf32>
    %c0_137 = arith.constant 0 : index
    %c0_138 = arith.constant 0 : index
    %336 = vector.load %arg11[%c0_137, %c0_138] : memref<1x96xf32, #tpu.memory_space<vmem>>, vector<1x96xf32>
    %337 = vector.broadcast %336 : vector<1x96xf32> to vector<2x96xf32>
    %338 = arith.addf %335, %337 : vector<2x96xf32>
    %339 = tpu.concatenate %338, %338 in 0 : vector<2x96xf32>, vector<2x96xf32> -> vector<4x96xf32>
    %c0_139 = arith.constant 0 : index
    %c0_140 = arith.constant 0 : index
    %340 = vector.load %arg10[%c0_139, %c0_140] : memref<32x96xbf16, #tpu.memory_space<vmem>>, vector<32x96xbf16>
    %341 = arith.truncf %169 : vector<4x32xf32> to vector<4x32xbf16>
    %cst_141 = arith.constant dense<0.000000e+00> : vector<4x96xf32>
    %342 = tpu.matmul %341, %340, %cst_141 {dimension_numbers = #tpu.dot_dimension_numbers<[1], [0], [0], [1], [0, 0, 1, 1], [], []>} : vector<4x32xbf16>, vector<32x96xbf16>, vector<4x96xf32> -> vector<4x96xf32>
    %c0_142 = arith.constant 0 : index
    %c0_143 = arith.constant 0 : index
    %343 = vector.load %arg12[%c0_142, %c0_143] : memref<1x96xf32, #tpu.memory_space<vmem>>, vector<1x96xf32>
    %344 = vector.broadcast %343 : vector<1x96xf32> to vector<4x96xf32>
    %345 = arith.addf %342, %344 : vector<4x96xf32>
    %346 = vector.extract_strided_slice %339 {offsets = [0, 0], sizes = [4, 32], strides = [1, 1]} : vector<4x96xf32> to vector<4x32xf32>
    %347 = vector.extract_strided_slice %345 {offsets = [0, 0], sizes = [4, 32], strides = [1, 1]} : vector<4x96xf32> to vector<4x32xf32>
    %348 = arith.addf %346, %347 : vector<4x32xf32>
    %349 = arith.negf %348 : vector<4x32xf32>
    %350 = math.exp %349 : vector<4x32xf32>
    %cst_144 = arith.constant 1.000000e+00 : f32
    %351 = vector.broadcast %cst_144 : f32 to vector<4x32xf32>
    %352 = arith.addf %351, %350 : vector<4x32xf32>
    %353 = arith.divf %351, %352 : vector<4x32xf32>
    %354 = vector.extract_strided_slice %339 {offsets = [0, 32], sizes = [4, 32], strides = [1, 1]} : vector<4x96xf32> to vector<4x32xf32>
    %355 = vector.extract_strided_slice %345 {offsets = [0, 32], sizes = [4, 32], strides = [1, 1]} : vector<4x96xf32> to vector<4x32xf32>
    %356 = arith.addf %354, %355 : vector<4x32xf32>
    %357 = arith.negf %356 : vector<4x32xf32>
    %358 = math.exp %357 : vector<4x32xf32>
    %cst_145 = arith.constant 1.000000e+00 : f32
    %359 = vector.broadcast %cst_145 : f32 to vector<4x32xf32>
    %360 = arith.addf %359, %358 : vector<4x32xf32>
    %361 = arith.divf %359, %360 : vector<4x32xf32>
    %362 = vector.extract_strided_slice %339 {offsets = [0, 64], sizes = [4, 32], strides = [1, 1]} : vector<4x96xf32> to vector<4x32xf32>
    %363 = vector.extract_strided_slice %345 {offsets = [0, 64], sizes = [4, 32], strides = [1, 1]} : vector<4x96xf32> to vector<4x32xf32>
    %364 = arith.mulf %353, %363 : vector<4x32xf32>
    %365 = arith.addf %362, %364 : vector<4x32xf32>
    %366 = math.tanh %365 : vector<4x32xf32>
    %cst_146 = arith.constant 1.000000e+00 : f32
    %367 = vector.broadcast %cst_146 : f32 to vector<4x32xf32>
    %368 = arith.subf %367, %361 : vector<4x32xf32>
    %369 = arith.mulf %368, %366 : vector<4x32xf32>
    %370 = arith.mulf %361, %169 : vector<4x32xf32>
    %371 = arith.addf %369, %370 : vector<4x32xf32>
    %372 = vector.extract_strided_slice %223 {offsets = [0, 0], sizes = [2, 1], strides = [1, 1]} : vector<2x2xf32> to vector<2x1xf32>
    %373 = vector.extract_strided_slice %223 {offsets = [0, 1], sizes = [2, 1], strides = [1, 1]} : vector<2x2xf32> to vector<2x1xf32>
    %374 = tpu.concatenate %372, %373 in 0 : vector<2x1xf32>, vector<2x1xf32> -> vector<4x1xf32>
    %cst_147 = arith.constant 1.000000e+00 : f32
    %375 = vector.broadcast %cst_147 : f32 to vector<4x1xf32>
    %376 = arith.subf %375, %374 : vector<4x1xf32>
    %377 = vector.broadcast %376 : vector<4x1xf32> to vector<4x32xf32>
    %378 = arith.mulf %169, %377 : vector<4x32xf32>
    %379 = vector.broadcast %374 : vector<4x1xf32> to vector<4x32xf32>
    %380 = arith.mulf %371, %379 : vector<4x32xf32>
    %381 = arith.addf %378, %380 : vector<4x32xf32>
    %cst_148 = arith.constant 0.000000e+00 : f32
    %382 = vector.broadcast %cst_148 : f32 to vector<2x32xf32>
    %383 = vector.extract_strided_slice %381 {offsets = [0, 0], sizes = [2, 32], strides = [1, 1]} : vector<4x32xf32> to vector<2x32xf32>
    %384 = vector.broadcast %235 : vector<2x1xf32> to vector<2x32xf32>
    %385 = arith.mulf %384, %383 : vector<2x32xf32>
    %386 = arith.addf %382, %385 : vector<2x32xf32>
    %387 = vector.extract_strided_slice %381 {offsets = [2, 0], sizes = [2, 32], strides = [1, 1]} : vector<4x32xf32> to vector<2x32xf32>
    %388 = vector.broadcast %244 : vector<2x1xf32> to vector<2x32xf32>
    %389 = arith.mulf %388, %387 : vector<2x32xf32>
    %390 = arith.addf %386, %389 : vector<2x32xf32>
    %c0_149 = arith.constant 0 : index
    %c0_150 = arith.constant 0 : index
    %391 = vector.load %arg13[%c0_149, %c0_150] : memref<32x96xbf16, #tpu.memory_space<vmem>>, vector<32x96xbf16>
    %392 = arith.truncf %390 : vector<2x32xf32> to vector<2x32xbf16>
    %cst_151 = arith.constant dense<0.000000e+00> : vector<2x96xf32>
    %393 = tpu.matmul %392, %391, %cst_151 {dimension_numbers = #tpu.dot_dimension_numbers<[1], [0], [0], [1], [0, 0, 1, 1], [], []>} : vector<2x32xbf16>, vector<32x96xbf16>, vector<2x96xf32> -> vector<2x96xf32>
    %c0_152 = arith.constant 0 : index
    %c0_153 = arith.constant 0 : index
    %394 = vector.load %arg15[%c0_152, %c0_153] : memref<1x96xf32, #tpu.memory_space<vmem>>, vector<1x96xf32>
    %395 = vector.broadcast %394 : vector<1x96xf32> to vector<2x96xf32>
    %396 = arith.addf %393, %395 : vector<2x96xf32>
    %c0_154 = arith.constant 0 : index
    %c0_155 = arith.constant 0 : index
    %397 = vector.load %arg14[%c0_154, %c0_155] : memref<32x96xbf16, #tpu.memory_space<vmem>>, vector<32x96xbf16>
    %398 = arith.truncf %216 : vector<2x32xf32> to vector<2x32xbf16>
    %cst_156 = arith.constant dense<0.000000e+00> : vector<2x96xf32>
    %399 = tpu.matmul %398, %397, %cst_156 {dimension_numbers = #tpu.dot_dimension_numbers<[1], [0], [0], [1], [0, 0, 1, 1], [], []>} : vector<2x32xbf16>, vector<32x96xbf16>, vector<2x96xf32> -> vector<2x96xf32>
    %c0_157 = arith.constant 0 : index
    %c0_158 = arith.constant 0 : index
    %400 = vector.load %arg16[%c0_157, %c0_158] : memref<1x96xf32, #tpu.memory_space<vmem>>, vector<1x96xf32>
    %401 = vector.broadcast %400 : vector<1x96xf32> to vector<2x96xf32>
    %402 = arith.addf %399, %401 : vector<2x96xf32>
    %403 = vector.extract_strided_slice %396 {offsets = [0, 0], sizes = [2, 32], strides = [1, 1]} : vector<2x96xf32> to vector<2x32xf32>
    %404 = vector.extract_strided_slice %402 {offsets = [0, 0], sizes = [2, 32], strides = [1, 1]} : vector<2x96xf32> to vector<2x32xf32>
    %405 = arith.addf %403, %404 : vector<2x32xf32>
    %406 = arith.negf %405 : vector<2x32xf32>
    %407 = math.exp %406 : vector<2x32xf32>
    %cst_159 = arith.constant 1.000000e+00 : f32
    %408 = vector.broadcast %cst_159 : f32 to vector<2x32xf32>
    %409 = arith.addf %408, %407 : vector<2x32xf32>
    %410 = arith.divf %408, %409 : vector<2x32xf32>
    %411 = vector.extract_strided_slice %396 {offsets = [0, 32], sizes = [2, 32], strides = [1, 1]} : vector<2x96xf32> to vector<2x32xf32>
    %412 = vector.extract_strided_slice %402 {offsets = [0, 32], sizes = [2, 32], strides = [1, 1]} : vector<2x96xf32> to vector<2x32xf32>
    %413 = arith.addf %411, %412 : vector<2x32xf32>
    %414 = arith.negf %413 : vector<2x32xf32>
    %415 = math.exp %414 : vector<2x32xf32>
    %cst_160 = arith.constant 1.000000e+00 : f32
    %416 = vector.broadcast %cst_160 : f32 to vector<2x32xf32>
    %417 = arith.addf %416, %415 : vector<2x32xf32>
    %418 = arith.divf %416, %417 : vector<2x32xf32>
    %419 = vector.extract_strided_slice %396 {offsets = [0, 64], sizes = [2, 32], strides = [1, 1]} : vector<2x96xf32> to vector<2x32xf32>
    %420 = vector.extract_strided_slice %402 {offsets = [0, 64], sizes = [2, 32], strides = [1, 1]} : vector<2x96xf32> to vector<2x32xf32>
    %421 = arith.mulf %410, %420 : vector<2x32xf32>
    %422 = arith.addf %419, %421 : vector<2x32xf32>
    %423 = math.tanh %422 : vector<2x32xf32>
    %cst_161 = arith.constant 1.000000e+00 : f32
    %424 = vector.broadcast %cst_161 : f32 to vector<2x32xf32>
    %425 = arith.subf %424, %418 : vector<2x32xf32>
    %426 = arith.mulf %425, %423 : vector<2x32xf32>
    %427 = arith.mulf %418, %216 : vector<2x32xf32>
    %428 = arith.addf %426, %427 : vector<2x32xf32>
    %c1_162 = arith.constant 1 : index
    %c0_163 = arith.constant 0 : index
    %c0_164 = arith.constant 0 : index
    %429 = vector.load %arg17[%c1_162, %c0_163, %c0_164] : memref<8x2x32xf32, #tpu.memory_space<vmem>>, vector<1x2x32xf32>
    %430 = vector.shape_cast %429 : vector<1x2x32xf32> to vector<2x32xf32>
    %431 = vector.shape_cast %428 : vector<2x32xf32> to vector<1x2x32xf32>
    tpu.vector_store %arg17[%c1_162, %c0_163, %c0_164], %431 {strides = array<i32>} : memref<8x2x32xf32, #tpu.memory_space<vmem>>, vector<1x2x32xf32>,
    %c2 = arith.constant 2 : index
    %c0_165 = arith.constant 0 : index
    %c0_166 = arith.constant 0 : index
    %432 = vector.load %arg1[%c2, %c0_165, %c0_166] : memref<8x2x32xf32, #tpu.memory_space<vmem>>, vector<1x2x32xf32>
    %433 = vector.shape_cast %432 : vector<1x2x32xf32> to vector<2x32xf32>
    %c2_167 = arith.constant 2 : index
    %c0_168 = arith.constant 0 : index
    %c0_169 = arith.constant 0 : index
    %434 = vector.load %arg2[%c2_167, %c0_168, %c0_169] : memref<8x2x2xf32, #tpu.memory_space<vmem>>, vector<1x2x2xf32>
    %435 = vector.shape_cast %434 : vector<1x2x2xf32> to vector<2x2xf32>
    %436 = arith.truncf %433 : vector<2x32xf32> to vector<2x32xbf16>
    %cst_170 = arith.constant dense<0xFF800000> : vector<2xf32>
    %437 = vector.multi_reduction <maximumf>, %435, %cst_170 [1] : vector<2x2xf32> to vector<2xf32>
    %438 = vector.shape_cast %437 : vector<2xf32> to vector<2x1xf32>
    %cst_171 = arith.constant 0.000000e+00 : f32
    %439 = vector.broadcast %cst_171 : f32 to vector<2x1xf32>
    %440 = vector.extract_strided_slice %435 {offsets = [0, 0], sizes = [2, 1], strides = [1, 1]} : vector<2x2xf32> to vector<2x1xf32>
    %441 = arith.cmpf oge, %440, %438 : vector<2x1xf32>
    %cst_172 = arith.constant 5.000000e-01 : f32
    %442 = vector.broadcast %cst_172 : f32 to vector<2x1xf32>
    %443 = arith.cmpf olt, %439, %442 : vector<2x1xf32>
    %444 = arith.andi %441, %443 : vector<2x1xi1>
    %cst_173 = arith.constant 1.000000e+00 : f32
    %cst_174 = arith.constant 0.000000e+00 : f32
    %445 = vector.broadcast %cst_173 : f32 to vector<2x1xf32>
    %446 = vector.broadcast %cst_174 : f32 to vector<2x1xf32>
    %447 = arith.select %444, %445, %446 : vector<2x1xi1>, vector<2x1xf32>
    %448 = arith.addf %439, %447 : vector<2x1xf32>
    %449 = vector.extract_strided_slice %435 {offsets = [0, 1], sizes = [2, 1], strides = [1, 1]} : vector<2x2xf32> to vector<2x1xf32>
    %450 = arith.cmpf oge, %449, %438 : vector<2x1xf32>
    %cst_175 = arith.constant 5.000000e-01 : f32
    %451 = vector.broadcast %cst_175 : f32 to vector<2x1xf32>
    %452 = arith.cmpf olt, %448, %451 : vector<2x1xf32>
    %453 = arith.andi %450, %452 : vector<2x1xi1>
    %cst_176 = arith.constant 1.000000e+00 : f32
    %cst_177 = arith.constant 0.000000e+00 : f32
    %454 = vector.broadcast %cst_176 : f32 to vector<2x1xf32>
    %455 = vector.broadcast %cst_177 : f32 to vector<2x1xf32>
    %456 = arith.select %453, %454, %455 : vector<2x1xi1>, vector<2x1xf32>
    %cst_178 = arith.constant 0.000000e+00 : f32
    %457 = vector.broadcast %cst_178 : f32 to vector<2x32xf32>
    %458 = vector.extract_strided_slice %381 {offsets = [0, 0], sizes = [2, 32], strides = [1, 1]} : vector<4x32xf32> to vector<2x32xf32>
    %459 = vector.broadcast %447 : vector<2x1xf32> to vector<2x32xf32>
    %460 = arith.mulf %459, %458 : vector<2x32xf32>
    %461 = arith.addf %457, %460 : vector<2x32xf32>
    %462 = vector.extract_strided_slice %381 {offsets = [2, 0], sizes = [2, 32], strides = [1, 1]} : vector<4x32xf32> to vector<2x32xf32>
    %463 = vector.broadcast %456 : vector<2x1xf32> to vector<2x32xf32>
    %464 = arith.mulf %463, %462 : vector<2x32xf32>
    %465 = arith.addf %461, %464 : vector<2x32xf32>
    %466 = arith.truncf %465 : vector<2x32xf32> to vector<2x32xbf16>
    %467 = tpu.concatenate %436, %466 in 1 : vector<2x32xbf16>, vector<2x32xbf16> -> vector<2x64xbf16>
    %c0_179 = arith.constant 0 : index
    %c0_180 = arith.constant 0 : index
    %468 = vector.load %arg5[%c0_179, %c0_180] : memref<64x96xbf16, #tpu.memory_space<vmem>>, vector<64x96xbf16>
    %cst_181 = arith.constant dense<0.000000e+00> : vector<2x96xf32>
    %469 = tpu.matmul %467, %468, %cst_181 {dimension_numbers = #tpu.dot_dimension_numbers<[1], [0], [0], [1], [0, 0, 1, 1], [], []>} : vector<2x64xbf16>, vector<64x96xbf16>, vector<2x96xf32> -> vector<2x96xf32>
    %c0_182 = arith.constant 0 : index
    %c0_183 = arith.constant 0 : index
    %470 = vector.load %arg7[%c0_182, %c0_183] : memref<1x96xf32, #tpu.memory_space<vmem>>, vector<1x96xf32>
    %471 = vector.broadcast %470 : vector<1x96xf32> to vector<2x96xf32>
    %472 = arith.addf %469, %471 : vector<2x96xf32>
    %c0_184 = arith.constant 0 : index
    %c0_185 = arith.constant 0 : index
    %473 = vector.load %arg6[%c0_184, %c0_185] : memref<32x96xbf16, #tpu.memory_space<vmem>>, vector<32x96xbf16>
    %474 = arith.truncf %292 : vector<2x32xf32> to vector<2x32xbf16>
    %cst_186 = arith.constant dense<0.000000e+00> : vector<2x96xf32>
    %475 = tpu.matmul %474, %473, %cst_186 {dimension_numbers = #tpu.dot_dimension_numbers<[1], [0], [0], [1], [0, 0, 1, 1], [], []>} : vector<2x32xbf16>, vector<32x96xbf16>, vector<2x96xf32> -> vector<2x96xf32>
    %c0_187 = arith.constant 0 : index
    %c0_188 = arith.constant 0 : index
    %476 = vector.load %arg8[%c0_187, %c0_188] : memref<1x96xf32, #tpu.memory_space<vmem>>, vector<1x96xf32>
    %477 = vector.broadcast %476 : vector<1x96xf32> to vector<2x96xf32>
    %478 = arith.addf %475, %477 : vector<2x96xf32>
    %479 = vector.extract_strided_slice %472 {offsets = [0, 0], sizes = [2, 32], strides = [1, 1]} : vector<2x96xf32> to vector<2x32xf32>
    %480 = vector.extract_strided_slice %478 {offsets = [0, 0], sizes = [2, 32], strides = [1, 1]} : vector<2x96xf32> to vector<2x32xf32>
    %481 = arith.addf %479, %480 : vector<2x32xf32>
    %482 = arith.negf %481 : vector<2x32xf32>
    %483 = math.exp %482 : vector<2x32xf32>
    %cst_189 = arith.constant 1.000000e+00 : f32
    %484 = vector.broadcast %cst_189 : f32 to vector<2x32xf32>
    %485 = arith.addf %484, %483 : vector<2x32xf32>
    %486 = arith.divf %484, %485 : vector<2x32xf32>
    %487 = vector.extract_strided_slice %472 {offsets = [0, 32], sizes = [2, 32], strides = [1, 1]} : vector<2x96xf32> to vector<2x32xf32>
    %488 = vector.extract_strided_slice %478 {offsets = [0, 32], sizes = [2, 32], strides = [1, 1]} : vector<2x96xf32> to vector<2x32xf32>
    %489 = arith.addf %487, %488 : vector<2x32xf32>
    %490 = arith.negf %489 : vector<2x32xf32>
    %491 = math.exp %490 : vector<2x32xf32>
    %cst_190 = arith.constant 1.000000e+00 : f32
    %492 = vector.broadcast %cst_190 : f32 to vector<2x32xf32>
    %493 = arith.addf %492, %491 : vector<2x32xf32>
    %494 = arith.divf %492, %493 : vector<2x32xf32>
    %495 = vector.extract_strided_slice %472 {offsets = [0, 64], sizes = [2, 32], strides = [1, 1]} : vector<2x96xf32> to vector<2x32xf32>
    %496 = vector.extract_strided_slice %478 {offsets = [0, 64], sizes = [2, 32], strides = [1, 1]} : vector<2x96xf32> to vector<2x32xf32>
    %497 = arith.mulf %486, %496 : vector<2x32xf32>
    %498 = arith.addf %495, %497 : vector<2x32xf32>
    %499 = math.tanh %498 : vector<2x32xf32>
    %cst_191 = arith.constant 1.000000e+00 : f32
    %500 = vector.broadcast %cst_191 : f32 to vector<2x32xf32>
    %501 = arith.subf %500, %494 : vector<2x32xf32>
    %502 = arith.mulf %501, %499 : vector<2x32xf32>
    %503 = arith.mulf %494, %292 : vector<2x32xf32>
    %504 = arith.addf %502, %503 : vector<2x32xf32>
    %c2_192 = arith.constant 2 : index
    %c0_193 = arith.constant 0 : index
    %c0_194 = arith.constant 0 : index
    %505 = vector.load %arg3[%c2_192, %c0_193, %c0_194] : memref<8x1x32xf32, #tpu.memory_space<vmem>>, vector<1x1x32xf32>
    %506 = vector.shape_cast %505 : vector<1x1x32xf32> to vector<1x32xf32>
    %507 = vector.broadcast %506 : vector<1x32xf32> to vector<2x32xf32>
    %508 = arith.addf %504, %507 : vector<2x32xf32>
    %509 = vector.shape_cast %508 : vector<2x32xf32> to vector<2x1x32xf32>
    %c0_195 = arith.constant 0 : index
    %c2_196 = arith.constant 2 : index
    %c0_197 = arith.constant 0 : index
    %510 = vector.load %arg19[%c0_195, %c2_196, %c0_197] : memref<2x8x32xf32, #tpu.memory_space<vmem>>, vector<2x1x32xf32>
    tpu.vector_store %arg19[%c0_195, %c2_196, %c0_197], %509 {strides = array<i32>} : memref<2x8x32xf32, #tpu.memory_space<vmem>>, vector<2x1x32xf32>,
    %511 = vector.broadcast %2 : vector<1x32xf32> to vector<2x32xf32>
    %512 = arith.mulf %508, %511 : vector<2x32xf32>
    %cst_198 = arith.constant dense<0.000000e+00> : vector<2xf32>
    %513 = vector.multi_reduction <add>, %512, %cst_198 [1] : vector<2x32xf32> to vector<2xf32>
    %514 = vector.shape_cast %513 : vector<2xf32> to vector<2x1xf32>
    %c2_i32 = arith.constant 2 : i32
    %515 = vector.broadcast %c2_i32 : i32 to vector<2x8xi32>
    %516 = arith.cmpi eq, %3, %515 : vector<2x8xi32>
    %517 = vector.shape_cast %514 : vector<2x1xf32> to vector<2x1xf32>
    %518 = vector.broadcast %517 : vector<2x1xf32> to vector<2x8xf32>
    %519 = arith.select %516, %518, %307 : vector<2x8xi1>, vector<2x8xf32>
    %c2_i32_199 = arith.constant 2 : i32
    %520 = vector.broadcast %c2_i32_199 : i32 to vector<2x8xi32>
    %521 = arith.cmpi slt, %3, %520 : vector<2x8xi32>
    %cst_200 = arith.constant -1.000000e+30 : f32
    %522 = vector.broadcast %cst_200 : f32 to vector<2x8xf32>
    %523 = arith.select %521, %519, %522 : vector<2x8xi1>, vector<2x8xf32>
    %cst_201 = arith.constant dense<0xFF800000> : vector<2xf32>
    %524 = vector.multi_reduction <maximumf>, %523, %cst_201 [1] : vector<2x8xf32> to vector<2xf32>
    %525 = vector.shape_cast %524 : vector<2xf32> to vector<2x1xf32>
    %526 = vector.broadcast %525 : vector<2x1xf32> to vector<2x8xf32>
    %527 = arith.subf %523, %526 : vector<2x8xf32>
    %528 = math.exp %527 : vector<2x8xf32>
    %cst_202 = arith.constant 0.000000e+00 : f32
    %529 = vector.broadcast %cst_202 : f32 to vector<2x8xf32>
    %530 = arith.select %521, %528, %529 : vector<2x8xi1>, vector<2x8xf32>
    %cst_203 = arith.constant dense<0.000000e+00> : vector<2xf32>
    %531 = vector.multi_reduction <add>, %530, %cst_203 [1] : vector<2x8xf32> to vector<2xf32>
    %532 = vector.shape_cast %531 : vector<2xf32> to vector<2x1xf32>
    %cst_204 = arith.constant 1.000000e-30 : f32
    %533 = vector.broadcast %cst_204 : f32 to vector<2x1xf32>
    %534 = arith.maximumf %532, %533 : vector<2x1xf32>
    %535 = vector.broadcast %534 : vector<2x1xf32> to vector<2x8xf32>
    %536 = arith.divf %530, %535 : vector<2x8xf32>
    %c2_205 = arith.constant 2 : index
    %c0_206 = arith.constant 0 : index
    %c0_207 = arith.constant 0 : index
    %537 = vector.load %arg18[%c2_205, %c0_206, %c0_207] : memref<8x2x8xf32, #tpu.memory_space<vmem>>, vector<1x2x8xf32>
    %538 = vector.shape_cast %537 : vector<1x2x8xf32> to vector<2x8xf32>
    %539 = vector.shape_cast %536 : vector<2x8xf32> to vector<1x2x8xf32>
    tpu.vector_store %arg18[%c2_205, %c0_206, %c0_207], %539 {strides = array<i32>} : memref<8x2x8xf32, #tpu.memory_space<vmem>>, vector<1x2x8xf32>,
    %c0_208 = arith.constant 0 : index
    %c0_209 = arith.constant 0 : index
    %c0_210 = arith.constant 0 : index
    %540 = vector.load %arg19[%c0_208, %c0_209, %c0_210] : memref<2x8x32xf32, #tpu.memory_space<vmem>>, vector<2x8x32xf32>
    %541 = vector.shape_cast %536 : vector<2x8xf32> to vector<2x1x8xf32>
    "tpu.trace_start"() <{level = 10 : i32, message = "bqs,bsd->bqd"}> : () -> ()
    %cst_211 = arith.constant dense<0.000000e+00> : vector<2x1x32xf32>
    %542 = tpu.matmul %541, %540, %cst_211 {dimension_numbers = #tpu.dot_dimension_numbers<[2], [1], [1], [2], [0, 0, 0, 1, 1, 2], [0], [0]>} : vector<2x1x8xf32>, vector<2x8x32xf32>, vector<2x1x32xf32> -> vector<2x1x32xf32>
    "tpu.trace_stop"() : () -> ()
    %543 = vector.shape_cast %542 : vector<2x1x32xf32> to vector<2x32xf32>
    %544 = arith.truncf %543 : vector<2x32xf32> to vector<2x32xbf16>
    %545 = tpu.concatenate %436, %544 in 1 : vector<2x32xbf16>, vector<2x32xbf16> -> vector<2x64xbf16>
    %c0_212 = arith.constant 0 : index
    %c0_213 = arith.constant 0 : index
    %546 = vector.load %arg9[%c0_212, %c0_213] : memref<64x96xbf16, #tpu.memory_space<vmem>>, vector<64x96xbf16>
    %cst_214 = arith.constant dense<0.000000e+00> : vector<2x96xf32>
    %547 = tpu.matmul %545, %546, %cst_214 {dimension_numbers = #tpu.dot_dimension_numbers<[1], [0], [0], [1], [0, 0, 1, 1], [], []>} : vector<2x64xbf16>, vector<64x96xbf16>, vector<2x96xf32> -> vector<2x96xf32>
    %c0_215 = arith.constant 0 : index
    %c0_216 = arith.constant 0 : index
    %548 = vector.load %arg11[%c0_215, %c0_216] : memref<1x96xf32, #tpu.memory_space<vmem>>, vector<1x96xf32>
    %549 = vector.broadcast %548 : vector<1x96xf32> to vector<2x96xf32>
    %550 = arith.addf %547, %549 : vector<2x96xf32>
    %551 = tpu.concatenate %550, %550 in 0 : vector<2x96xf32>, vector<2x96xf32> -> vector<4x96xf32>
    %c0_217 = arith.constant 0 : index
    %c0_218 = arith.constant 0 : index
    %552 = vector.load %arg10[%c0_217, %c0_218] : memref<32x96xbf16, #tpu.memory_space<vmem>>, vector<32x96xbf16>
    %553 = arith.truncf %381 : vector<4x32xf32> to vector<4x32xbf16>
    %cst_219 = arith.constant dense<0.000000e+00> : vector<4x96xf32>
    %554 = tpu.matmul %553, %552, %cst_219 {dimension_numbers = #tpu.dot_dimension_numbers<[1], [0], [0], [1], [0, 0, 1, 1], [], []>} : vector<4x32xbf16>, vector<32x96xbf16>, vector<4x96xf32> -> vector<4x96xf32>
    %c0_220 = arith.constant 0 : index
    %c0_221 = arith.constant 0 : index
    %555 = vector.load %arg12[%c0_220, %c0_221] : memref<1x96xf32, #tpu.memory_space<vmem>>, vector<1x96xf32>
    %556 = vector.broadcast %555 : vector<1x96xf32> to vector<4x96xf32>
    %557 = arith.addf %554, %556 : vector<4x96xf32>
    %558 = vector.extract_strided_slice %551 {offsets = [0, 0], sizes = [4, 32], strides = [1, 1]} : vector<4x96xf32> to vector<4x32xf32>
    %559 = vector.extract_strided_slice %557 {offsets = [0, 0], sizes = [4, 32], strides = [1, 1]} : vector<4x96xf32> to vector<4x32xf32>
    %560 = arith.addf %558, %559 : vector<4x32xf32>
    %561 = arith.negf %560 : vector<4x32xf32>
    %562 = math.exp %561 : vector<4x32xf32>
    %cst_222 = arith.constant 1.000000e+00 : f32
    %563 = vector.broadcast %cst_222 : f32 to vector<4x32xf32>
    %564 = arith.addf %563, %562 : vector<4x32xf32>
    %565 = arith.divf %563, %564 : vector<4x32xf32>
    %566 = vector.extract_strided_slice %551 {offsets = [0, 32], sizes = [4, 32], strides = [1, 1]} : vector<4x96xf32> to vector<4x32xf32>
    %567 = vector.extract_strided_slice %557 {offsets = [0, 32], sizes = [4, 32], strides = [1, 1]} : vector<4x96xf32> to vector<4x32xf32>
    %568 = arith.addf %566, %567 : vector<4x32xf32>
    %569 = arith.negf %568 : vector<4x32xf32>
    %570 = math.exp %569 : vector<4x32xf32>
    %cst_223 = arith.constant 1.000000e+00 : f32
    %571 = vector.broadcast %cst_223 : f32 to vector<4x32xf32>
    %572 = arith.addf %571, %570 : vector<4x32xf32>
    %573 = arith.divf %571, %572 : vector<4x32xf32>
    %574 = vector.extract_strided_slice %551 {offsets = [0, 64], sizes = [4, 32], strides = [1, 1]} : vector<4x96xf32> to vector<4x32xf32>
    %575 = vector.extract_strided_slice %557 {offsets = [0, 64], sizes = [4, 32], strides = [1, 1]} : vector<4x96xf32> to vector<4x32xf32>
    %576 = arith.mulf %565, %575 : vector<4x32xf32>
    %577 = arith.addf %574, %576 : vector<4x32xf32>
    %578 = math.tanh %577 : vector<4x32xf32>
    %cst_224 = arith.constant 1.000000e+00 : f32
    %579 = vector.broadcast %cst_224 : f32 to vector<4x32xf32>
    %580 = arith.subf %579, %573 : vector<4x32xf32>
    %581 = arith.mulf %580, %578 : vector<4x32xf32>
    %582 = arith.mulf %573, %381 : vector<4x32xf32>
    %583 = arith.addf %581, %582 : vector<4x32xf32>
    %584 = vector.extract_strided_slice %435 {offsets = [0, 0], sizes = [2, 1], strides = [1, 1]} : vector<2x2xf32> to vector<2x1xf32>
    %585 = vector.extract_strided_slice %435 {offsets = [0, 1], sizes = [2, 1], strides = [1, 1]} : vector<2x2xf32> to vector<2x1xf32>
    %586 = tpu.concatenate %584, %585 in 0 : vector<2x1xf32>, vector<2x1xf32> -> vector<4x1xf32>
    %cst_225 = arith.constant 1.000000e+00 : f32
    %587 = vector.broadcast %cst_225 : f32 to vector<4x1xf32>
    %588 = arith.subf %587, %586 : vector<4x1xf32>
    %589 = vector.broadcast %588 : vector<4x1xf32> to vector<4x32xf32>
    %590 = arith.mulf %381, %589 : vector<4x32xf32>
    %591 = vector.broadcast %586 : vector<4x1xf32> to vector<4x32xf32>
    %592 = arith.mulf %583, %591 : vector<4x32xf32>
    %593 = arith.addf %590, %592 : vector<4x32xf32>
    %cst_226 = arith.constant 0.000000e+00 : f32
    %594 = vector.broadcast %cst_226 : f32 to vector<2x32xf32>
    %595 = vector.extract_strided_slice %593 {offsets = [0, 0], sizes = [2, 32], strides = [1, 1]} : vector<4x32xf32> to vector<2x32xf32>
    %596 = vector.broadcast %447 : vector<2x1xf32> to vector<2x32xf32>
    %597 = arith.mulf %596, %595 : vector<2x32xf32>
    %598 = arith.addf %594, %597 : vector<2x32xf32>
    %599 = vector.extract_strided_slice %593 {offsets = [2, 0], sizes = [2, 32], strides = [1, 1]} : vector<4x32xf32> to vector<2x32xf32>
    %600 = vector.broadcast %456 : vector<2x1xf32> to vector<2x32xf32>
    %601 = arith.mulf %600, %599 : vector<2x32xf32>
    %602 = arith.addf %598, %601 : vector<2x32xf32>
    %c0_227 = arith.constant 0 : index
    %c0_228 = arith.constant 0 : index
    %603 = vector.load %arg13[%c0_227, %c0_228] : memref<32x96xbf16, #tpu.memory_space<vmem>>, vector<32x96xbf16>
    %604 = arith.truncf %602 : vector<2x32xf32> to vector<2x32xbf16>
    %cst_229 = arith.constant dense<0.000000e+00> : vector<2x96xf32>
    %605 = tpu.matmul %604, %603, %cst_229 {dimension_numbers = #tpu.dot_dimension_numbers<[1], [0], [0], [1], [0, 0, 1, 1], [], []>} : vector<2x32xbf16>, vector<32x96xbf16>, vector<2x96xf32> -> vector<2x96xf32>
    %c0_230 = arith.constant 0 : index
    %c0_231 = arith.constant 0 : index
    %606 = vector.load %arg15[%c0_230, %c0_231] : memref<1x96xf32, #tpu.memory_space<vmem>>, vector<1x96xf32>
    %607 = vector.broadcast %606 : vector<1x96xf32> to vector<2x96xf32>
    %608 = arith.addf %605, %607 : vector<2x96xf32>
    %c0_232 = arith.constant 0 : index
    %c0_233 = arith.constant 0 : index
    %609 = vector.load %arg14[%c0_232, %c0_233] : memref<32x96xbf16, #tpu.memory_space<vmem>>, vector<32x96xbf16>
    %610 = arith.truncf %428 : vector<2x32xf32> to vector<2x32xbf16>
    %cst_234 = arith.constant dense<0.000000e+00> : vector<2x96xf32>
    %611 = tpu.matmul %610, %609, %cst_234 {dimension_numbers = #tpu.dot_dimension_numbers<[1], [0], [0], [1], [0, 0, 1, 1], [], []>} : vector<2x32xbf16>, vector<32x96xbf16>, vector<2x96xf32> -> vector<2x96xf32>
    %c0_235 = arith.constant 0 : index
    %c0_236 = arith.constant 0 : index
    %612 = vector.load %arg16[%c0_235, %c0_236] : memref<1x96xf32, #tpu.memory_space<vmem>>, vector<1x96xf32>
    %613 = vector.broadcast %612 : vector<1x96xf32> to vector<2x96xf32>
    %614 = arith.addf %611, %613 : vector<2x96xf32>
    %615 = vector.extract_strided_slice %608 {offsets = [0, 0], sizes = [2, 32], strides = [1, 1]} : vector<2x96xf32> to vector<2x32xf32>
    %616 = vector.extract_strided_slice %614 {offsets = [0, 0], sizes = [2, 32], strides = [1, 1]} : vector<2x96xf32> to vector<2x32xf32>
    %617 = arith.addf %615, %616 : vector<2x32xf32>
    %618 = arith.negf %617 : vector<2x32xf32>
    %619 = math.exp %618 : vector<2x32xf32>
    %cst_237 = arith.constant 1.000000e+00 : f32
    %620 = vector.broadcast %cst_237 : f32 to vector<2x32xf32>
    %621 = arith.addf %620, %619 : vector<2x32xf32>
    %622 = arith.divf %620, %621 : vector<2x32xf32>
    %623 = vector.extract_strided_slice %608 {offsets = [0, 32], sizes = [2, 32], strides = [1, 1]} : vector<2x96xf32> to vector<2x32xf32>
    %624 = vector.extract_strided_slice %614 {offsets = [0, 32], sizes = [2, 32], strides = [1, 1]} : vector<2x96xf32> to vector<2x32xf32>
    %625 = arith.addf %623, %624 : vector<2x32xf32>
    %626 = arith.negf %625 : vector<2x32xf32>
    %627 = math.exp %626 : vector<2x32xf32>
    %cst_238 = arith.constant 1.000000e+00 : f32
    %628 = vector.broadcast %cst_238 : f32 to vector<2x32xf32>
    %629 = arith.addf %628, %627 : vector<2x32xf32>
    %630 = arith.divf %628, %629 : vector<2x32xf32>
    %631 = vector.extract_strided_slice %608 {offsets = [0, 64], sizes = [2, 32], strides = [1, 1]} : vector<2x96xf32> to vector<2x32xf32>
    %632 = vector.extract_strided_slice %614 {offsets = [0, 64], sizes = [2, 32], strides = [1, 1]} : vector<2x96xf32> to vector<2x32xf32>
    %633 = arith.mulf %622, %632 : vector<2x32xf32>
    %634 = arith.addf %631, %633 : vector<2x32xf32>
    %635 = math.tanh %634 : vector<2x32xf32>
    %cst_239 = arith.constant 1.000000e+00 : f32
    %636 = vector.broadcast %cst_239 : f32 to vector<2x32xf32>
    %637 = arith.subf %636, %630 : vector<2x32xf32>
    %638 = arith.mulf %637, %635 : vector<2x32xf32>
    %639 = arith.mulf %630, %428 : vector<2x32xf32>
    %640 = arith.addf %638, %639 : vector<2x32xf32>
    %c2_240 = arith.constant 2 : index
    %c0_241 = arith.constant 0 : index
    %c0_242 = arith.constant 0 : index
    %641 = vector.load %arg17[%c2_240, %c0_241, %c0_242] : memref<8x2x32xf32, #tpu.memory_space<vmem>>, vector<1x2x32xf32>
    %642 = vector.shape_cast %641 : vector<1x2x32xf32> to vector<2x32xf32>
    %643 = vector.shape_cast %640 : vector<2x32xf32> to vector<1x2x32xf32>
    tpu.vector_store %arg17[%c2_240, %c0_241, %c0_242], %643 {strides = array<i32>} : memref<8x2x32xf32, #tpu.memory_space<vmem>>, vector<1x2x32xf32>,
    %c3 = arith.constant 3 : index
    %c0_243 = arith.constant 0 : index
    %c0_244 = arith.constant 0 : index
    %644 = vector.load %arg1[%c3, %c0_243, %c0_244] : memref<8x2x32xf32, #tpu.memory_space<vmem>>, vector<1x2x32xf32>
    %645 = vector.shape_cast %644 : vector<1x2x32xf32> to vector<2x32xf32>
    %c3_245 = arith.constant 3 : index
    %c0_246 = arith.constant 0 : index
    %c0_247 = arith.constant 0 : index
    %646 = vector.load %arg2[%c3_245, %c0_246, %c0_247] : memref<8x2x2xf32, #tpu.memory_space<vmem>>, vector<1x2x2xf32>
    %647 = vector.shape_cast %646 : vector<1x2x2xf32> to vector<2x2xf32>
    %648 = arith.truncf %645 : vector<2x32xf32> to vector<2x32xbf16>
    %cst_248 = arith.constant dense<0xFF800000> : vector<2xf32>
    %649 = vector.multi_reduction <maximumf>, %647, %cst_248 [1] : vector<2x2xf32> to vector<2xf32>
    %650 = vector.shape_cast %649 : vector<2xf32> to vector<2x1xf32>
    %cst_249 = arith.constant 0.000000e+00 : f32
    %651 = vector.broadcast %cst_249 : f32 to vector<2x1xf32>
    %652 = vector.extract_strided_slice %647 {offsets = [0, 0], sizes = [2, 1], strides = [1, 1]} : vector<2x2xf32> to vector<2x1xf32>
    %653 = arith.cmpf oge, %652, %650 : vector<2x1xf32>
    %cst_250 = arith.constant 5.000000e-01 : f32
    %654 = vector.broadcast %cst_250 : f32 to vector<2x1xf32>
    %655 = arith.cmpf olt, %651, %654 : vector<2x1xf32>
    %656 = arith.andi %653, %655 : vector<2x1xi1>
    %cst_251 = arith.constant 1.000000e+00 : f32
    %cst_252 = arith.constant 0.000000e+00 : f32
    %657 = vector.broadcast %cst_251 : f32 to vector<2x1xf32>
    %658 = vector.broadcast %cst_252 : f32 to vector<2x1xf32>
    %659 = arith.select %656, %657, %658 : vector<2x1xi1>, vector<2x1xf32>
    %660 = arith.addf %651, %659 : vector<2x1xf32>
    %661 = vector.extract_strided_slice %647 {offsets = [0, 1], sizes = [2, 1], strides = [1, 1]} : vector<2x2xf32> to vector<2x1xf32>
    %662 = arith.cmpf oge, %661, %650 : vector<2x1xf32>
    %cst_253 = arith.constant 5.000000e-01 : f32
    %663 = vector.broadcast %cst_253 : f32 to vector<2x1xf32>
    %664 = arith.cmpf olt, %660, %663 : vector<2x1xf32>
    %665 = arith.andi %662, %664 : vector<2x1xi1>
    %cst_254 = arith.constant 1.000000e+00 : f32
    %cst_255 = arith.constant 0.000000e+00 : f32
    %666 = vector.broadcast %cst_254 : f32 to vector<2x1xf32>
    %667 = vector.broadcast %cst_255 : f32 to vector<2x1xf32>
    %668 = arith.select %665, %666, %667 : vector<2x1xi1>, vector<2x1xf32>
    %cst_256 = arith.constant 0.000000e+00 : f32
    %669 = vector.broadcast %cst_256 : f32 to vector<2x32xf32>
    %670 = vector.extract_strided_slice %593 {offsets = [0, 0], sizes = [2, 32], strides = [1, 1]} : vector<4x32xf32> to vector<2x32xf32>
    %671 = vector.broadcast %659 : vector<2x1xf32> to vector<2x32xf32>
    %672 = arith.mulf %671, %670 : vector<2x32xf32>
    %673 = arith.addf %669, %672 : vector<2x32xf32>
    %674 = vector.extract_strided_slice %593 {offsets = [2, 0], sizes = [2, 32], strides = [1, 1]} : vector<4x32xf32> to vector<2x32xf32>
    %675 = vector.broadcast %668 : vector<2x1xf32> to vector<2x32xf32>
    %676 = arith.mulf %675, %674 : vector<2x32xf32>
    %677 = arith.addf %673, %676 : vector<2x32xf32>
    %678 = arith.truncf %677 : vector<2x32xf32> to vector<2x32xbf16>
    %679 = tpu.concatenate %648, %678 in 1 : vector<2x32xbf16>, vector<2x32xbf16> -> vector<2x64xbf16>
    %c0_257 = arith.constant 0 : index
    %c0_258 = arith.constant 0 : index
    %680 = vector.load %arg5[%c0_257, %c0_258] : memref<64x96xbf16, #tpu.memory_space<vmem>>, vector<64x96xbf16>
    %cst_259 = arith.constant dense<0.000000e+00> : vector<2x96xf32>
    %681 = tpu.matmul %679, %680, %cst_259 {dimension_numbers = #tpu.dot_dimension_numbers<[1], [0], [0], [1], [0, 0, 1, 1], [], []>} : vector<2x64xbf16>, vector<64x96xbf16>, vector<2x96xf32> -> vector<2x96xf32>
    %c0_260 = arith.constant 0 : index
    %c0_261 = arith.constant 0 : index
    %682 = vector.load %arg7[%c0_260, %c0_261] : memref<1x96xf32, #tpu.memory_space<vmem>>, vector<1x96xf32>
    %683 = vector.broadcast %682 : vector<1x96xf32> to vector<2x96xf32>
    %684 = arith.addf %681, %683 : vector<2x96xf32>
    %c0_262 = arith.constant 0 : index
    %c0_263 = arith.constant 0 : index
    %685 = vector.load %arg6[%c0_262, %c0_263] : memref<32x96xbf16, #tpu.memory_space<vmem>>, vector<32x96xbf16>
    %686 = arith.truncf %504 : vector<2x32xf32> to vector<2x32xbf16>
    %cst_264 = arith.constant dense<0.000000e+00> : vector<2x96xf32>
    %687 = tpu.matmul %686, %685, %cst_264 {dimension_numbers = #tpu.dot_dimension_numbers<[1], [0], [0], [1], [0, 0, 1, 1], [], []>} : vector<2x32xbf16>, vector<32x96xbf16>, vector<2x96xf32> -> vector<2x96xf32>
    %c0_265 = arith.constant 0 : index
    %c0_266 = arith.constant 0 : index
    %688 = vector.load %arg8[%c0_265, %c0_266] : memref<1x96xf32, #tpu.memory_space<vmem>>, vector<1x96xf32>
    %689 = vector.broadcast %688 : vector<1x96xf32> to vector<2x96xf32>
    %690 = arith.addf %687, %689 : vector<2x96xf32>
    %691 = vector.extract_strided_slice %684 {offsets = [0, 0], sizes = [2, 32], strides = [1, 1]} : vector<2x96xf32> to vector<2x32xf32>
    %692 = vector.extract_strided_slice %690 {offsets = [0, 0], sizes = [2, 32], strides = [1, 1]} : vector<2x96xf32> to vector<2x32xf32>
    %693 = arith.addf %691, %692 : vector<2x32xf32>
    %694 = arith.negf %693 : vector<2x32xf32>
    %695 = math.exp %694 : vector<2x32xf32>
    %cst_267 = arith.constant 1.000000e+00 : f32
    %696 = vector.broadcast %cst_267 : f32 to vector<2x32xf32>
    %697 = arith.addf %696, %695 : vector<2x32xf32>
    %698 = arith.divf %696, %697 : vector<2x32xf32>
    %699 = vector.extract_strided_slice %684 {offsets = [0, 32], sizes = [2, 32], strides = [1, 1]} : vector<2x96xf32> to vector<2x32xf32>
    %700 = vector.extract_strided_slice %690 {offsets = [0, 32], sizes = [2, 32], strides = [1, 1]} : vector<2x96xf32> to vector<2x32xf32>
    %701 = arith.addf %699, %700 : vector<2x32xf32>
    %702 = arith.negf %701 : vector<2x32xf32>
    %703 = math.exp %702 : vector<2x32xf32>
    %cst_268 = arith.constant 1.000000e+00 : f32
    %704 = vector.broadcast %cst_268 : f32 to vector<2x32xf32>
    %705 = arith.addf %704, %703 : vector<2x32xf32>
    %706 = arith.divf %704, %705 : vector<2x32xf32>
    %707 = vector.extract_strided_slice %684 {offsets = [0, 64], sizes = [2, 32], strides = [1, 1]} : vector<2x96xf32> to vector<2x32xf32>
    %708 = vector.extract_strided_slice %690 {offsets = [0, 64], sizes = [2, 32], strides = [1, 1]} : vector<2x96xf32> to vector<2x32xf32>
    %709 = arith.mulf %698, %708 : vector<2x32xf32>
    %710 = arith.addf %707, %709 : vector<2x32xf32>
    %711 = math.tanh %710 : vector<2x32xf32>
    %cst_269 = arith.constant 1.000000e+00 : f32
    %712 = vector.broadcast %cst_269 : f32 to vector<2x32xf32>
    %713 = arith.subf %712, %706 : vector<2x32xf32>
    %714 = arith.mulf %713, %711 : vector<2x32xf32>
    %715 = arith.mulf %706, %504 : vector<2x32xf32>
    %716 = arith.addf %714, %715 : vector<2x32xf32>
    %c3_270 = arith.constant 3 : index
    %c0_271 = arith.constant 0 : index
    %c0_272 = arith.constant 0 : index
    %717 = vector.load %arg3[%c3_270, %c0_271, %c0_272] : memref<8x1x32xf32, #tpu.memory_space<vmem>>, vector<1x1x32xf32>
    %718 = vector.shape_cast %717 : vector<1x1x32xf32> to vector<1x32xf32>
    %719 = vector.broadcast %718 : vector<1x32xf32> to vector<2x32xf32>
    %720 = arith.addf %716, %719 : vector<2x32xf32>
    %721 = vector.shape_cast %720 : vector<2x32xf32> to vector<2x1x32xf32>
    %c0_273 = arith.constant 0 : index
    %c3_274 = arith.constant 3 : index
    %c0_275 = arith.constant 0 : index
    %722 = vector.load %arg19[%c0_273, %c3_274, %c0_275] : memref<2x8x32xf32, #tpu.memory_space<vmem>>, vector<2x1x32xf32>
    tpu.vector_store %arg19[%c0_273, %c3_274, %c0_275], %721 {strides = array<i32>} : memref<2x8x32xf32, #tpu.memory_space<vmem>>, vector<2x1x32xf32>,
    %723 = vector.broadcast %2 : vector<1x32xf32> to vector<2x32xf32>
    %724 = arith.mulf %720, %723 : vector<2x32xf32>
    %cst_276 = arith.constant dense<0.000000e+00> : vector<2xf32>
    %725 = vector.multi_reduction <add>, %724, %cst_276 [1] : vector<2x32xf32> to vector<2xf32>
    %726 = vector.shape_cast %725 : vector<2xf32> to vector<2x1xf32>
    %c3_i32 = arith.constant 3 : i32
    %727 = vector.broadcast %c3_i32 : i32 to vector<2x8xi32>
    %728 = arith.cmpi eq, %3, %727 : vector<2x8xi32>
    %729 = vector.shape_cast %726 : vector<2x1xf32> to vector<2x1xf32>
    %730 = vector.broadcast %729 : vector<2x1xf32> to vector<2x8xf32>
    %731 = arith.select %728, %730, %519 : vector<2x8xi1>, vector<2x8xf32>
    %c3_i32_277 = arith.constant 3 : i32
    %732 = vector.broadcast %c3_i32_277 : i32 to vector<2x8xi32>
    %733 = arith.cmpi slt, %3, %732 : vector<2x8xi32>
    %cst_278 = arith.constant -1.000000e+30 : f32
    %734 = vector.broadcast %cst_278 : f32 to vector<2x8xf32>
    %735 = arith.select %733, %731, %734 : vector<2x8xi1>, vector<2x8xf32>
    %cst_279 = arith.constant dense<0xFF800000> : vector<2xf32>
    %736 = vector.multi_reduction <maximumf>, %735, %cst_279 [1] : vector<2x8xf32> to vector<2xf32>
    %737 = vector.shape_cast %736 : vector<2xf32> to vector<2x1xf32>
    %738 = vector.broadcast %737 : vector<2x1xf32> to vector<2x8xf32>
    %739 = arith.subf %735, %738 : vector<2x8xf32>
    %740 = math.exp %739 : vector<2x8xf32>
    %cst_280 = arith.constant 0.000000e+00 : f32
    %741 = vector.broadcast %cst_280 : f32 to vector<2x8xf32>
    %742 = arith.select %733, %740, %741 : vector<2x8xi1>, vector<2x8xf32>
    %cst_281 = arith.constant dense<0.000000e+00> : vector<2xf32>
    %743 = vector.multi_reduction <add>, %742, %cst_281 [1] : vector<2x8xf32> to vector<2xf32>
    %744 = vector.shape_cast %743 : vector<2xf32> to vector<2x1xf32>
    %cst_282 = arith.constant 1.000000e-30 : f32
    %745 = vector.broadcast %cst_282 : f32 to vector<2x1xf32>
    %746 = arith.maximumf %744, %745 : vector<2x1xf32>
    %747 = vector.broadcast %746 : vector<2x1xf32> to vector<2x8xf32>
    %748 = arith.divf %742, %747 : vector<2x8xf32>
    %c3_283 = arith.constant 3 : index
    %c0_284 = arith.constant 0 : index
    %c0_285 = arith.constant 0 : index
    %749 = vector.load %arg18[%c3_283, %c0_284, %c0_285] : memref<8x2x8xf32, #tpu.memory_space<vmem>>, vector<1x2x8xf32>
    %750 = vector.shape_cast %749 : vector<1x2x8xf32> to vector<2x8xf32>
    %751 = vector.shape_cast %748 : vector<2x8xf32> to vector<1x2x8xf32>
    tpu.vector_store %arg18[%c3_283, %c0_284, %c0_285], %751 {strides = array<i32>} : memref<8x2x8xf32, #tpu.memory_space<vmem>>, vector<1x2x8xf32>,
    %c0_286 = arith.constant 0 : index
    %c0_287 = arith.constant 0 : index
    %c0_288 = arith.constant 0 : index
    %752 = vector.load %arg19[%c0_286, %c0_287, %c0_288] : memref<2x8x32xf32, #tpu.memory_space<vmem>>, vector<2x8x32xf32>
    %753 = vector.shape_cast %748 : vector<2x8xf32> to vector<2x1x8xf32>
    "tpu.trace_start"() <{level = 10 : i32, message = "bqs,bsd->bqd"}> : () -> ()
    %cst_289 = arith.constant dense<0.000000e+00> : vector<2x1x32xf32>
    %754 = tpu.matmul %753, %752, %cst_289 {dimension_numbers = #tpu.dot_dimension_numbers<[2], [1], [1], [2], [0, 0, 0, 1, 1, 2], [0], [0]>} : vector<2x1x8xf32>, vector<2x8x32xf32>, vector<2x1x32xf32> -> vector<2x1x32xf32>
    "tpu.trace_stop"() : () -> ()
    %755 = vector.shape_cast %754 : vector<2x1x32xf32> to vector<2x32xf32>
    %756 = arith.truncf %755 : vector<2x32xf32> to vector<2x32xbf16>
    %757 = tpu.concatenate %648, %756 in 1 : vector<2x32xbf16>, vector<2x32xbf16> -> vector<2x64xbf16>
    %c0_290 = arith.constant 0 : index
    %c0_291 = arith.constant 0 : index
    %758 = vector.load %arg9[%c0_290, %c0_291] : memref<64x96xbf16, #tpu.memory_space<vmem>>, vector<64x96xbf16>
    %cst_292 = arith.constant dense<0.000000e+00> : vector<2x96xf32>
    %759 = tpu.matmul %757, %758, %cst_292 {dimension_numbers = #tpu.dot_dimension_numbers<[1], [0], [0], [1], [0, 0, 1, 1], [], []>} : vector<2x64xbf16>, vector<64x96xbf16>, vector<2x96xf32> -> vector<2x96xf32>
    %c0_293 = arith.constant 0 : index
    %c0_294 = arith.constant 0 : index
    %760 = vector.load %arg11[%c0_293, %c0_294] : memref<1x96xf32, #tpu.memory_space<vmem>>, vector<1x96xf32>
    %761 = vector.broadcast %760 : vector<1x96xf32> to vector<2x96xf32>
    %762 = arith.addf %759, %761 : vector<2x96xf32>
    %763 = tpu.concatenate %762, %762 in 0 : vector<2x96xf32>, vector<2x96xf32> -> vector<4x96xf32>
    %c0_295 = arith.constant 0 : index
    %c0_296 = arith.constant 0 : index
    %764 = vector.load %arg10[%c0_295, %c0_296] : memref<32x96xbf16, #tpu.memory_space<vmem>>, vector<32x96xbf16>
    %765 = arith.truncf %593 : vector<4x32xf32> to vector<4x32xbf16>
    %cst_297 = arith.constant dense<0.000000e+00> : vector<4x96xf32>
    %766 = tpu.matmul %765, %764, %cst_297 {dimension_numbers = #tpu.dot_dimension_numbers<[1], [0], [0], [1], [0, 0, 1, 1], [], []>} : vector<4x32xbf16>, vector<32x96xbf16>, vector<4x96xf32> -> vector<4x96xf32>
    %c0_298 = arith.constant 0 : index
    %c0_299 = arith.constant 0 : index
    %767 = vector.load %arg12[%c0_298, %c0_299] : memref<1x96xf32, #tpu.memory_space<vmem>>, vector<1x96xf32>
    %768 = vector.broadcast %767 : vector<1x96xf32> to vector<4x96xf32>
    %769 = arith.addf %766, %768 : vector<4x96xf32>
    %770 = vector.extract_strided_slice %763 {offsets = [0, 0], sizes = [4, 32], strides = [1, 1]} : vector<4x96xf32> to vector<4x32xf32>
    %771 = vector.extract_strided_slice %769 {offsets = [0, 0], sizes = [4, 32], strides = [1, 1]} : vector<4x96xf32> to vector<4x32xf32>
    %772 = arith.addf %770, %771 : vector<4x32xf32>
    %773 = arith.negf %772 : vector<4x32xf32>
    %774 = math.exp %773 : vector<4x32xf32>
    %cst_300 = arith.constant 1.000000e+00 : f32
    %775 = vector.broadcast %cst_300 : f32 to vector<4x32xf32>
    %776 = arith.addf %775, %774 : vector<4x32xf32>
    %777 = arith.divf %775, %776 : vector<4x32xf32>
    %778 = vector.extract_strided_slice %763 {offsets = [0, 32], sizes = [4, 32], strides = [1, 1]} : vector<4x96xf32> to vector<4x32xf32>
    %779 = vector.extract_strided_slice %769 {offsets = [0, 32], sizes = [4, 32], strides = [1, 1]} : vector<4x96xf32> to vector<4x32xf32>
    %780 = arith.addf %778, %779 : vector<4x32xf32>
    %781 = arith.negf %780 : vector<4x32xf32>
    %782 = math.exp %781 : vector<4x32xf32>
    %cst_301 = arith.constant 1.000000e+00 : f32
    %783 = vector.broadcast %cst_301 : f32 to vector<4x32xf32>
    %784 = arith.addf %783, %782 : vector<4x32xf32>
    %785 = arith.divf %783, %784 : vector<4x32xf32>
    %786 = vector.extract_strided_slice %763 {offsets = [0, 64], sizes = [4, 32], strides = [1, 1]} : vector<4x96xf32> to vector<4x32xf32>
    %787 = vector.extract_strided_slice %769 {offsets = [0, 64], sizes = [4, 32], strides = [1, 1]} : vector<4x96xf32> to vector<4x32xf32>
    %788 = arith.mulf %777, %787 : vector<4x32xf32>
    %789 = arith.addf %786, %788 : vector<4x32xf32>
    %790 = math.tanh %789 : vector<4x32xf32>
    %cst_302 = arith.constant 1.000000e+00 : f32
    %791 = vector.broadcast %cst_302 : f32 to vector<4x32xf32>
    %792 = arith.subf %791, %785 : vector<4x32xf32>
    %793 = arith.mulf %792, %790 : vector<4x32xf32>
    %794 = arith.mulf %785, %593 : vector<4x32xf32>
    %795 = arith.addf %793, %794 : vector<4x32xf32>
    %796 = vector.extract_strided_slice %647 {offsets = [0, 0], sizes = [2, 1], strides = [1, 1]} : vector<2x2xf32> to vector<2x1xf32>
    %797 = vector.extract_strided_slice %647 {offsets = [0, 1], sizes = [2, 1], strides = [1, 1]} : vector<2x2xf32> to vector<2x1xf32>
    %798 = tpu.concatenate %796, %797 in 0 : vector<2x1xf32>, vector<2x1xf32> -> vector<4x1xf32>
    %cst_303 = arith.constant 1.000000e+00 : f32
    %799 = vector.broadcast %cst_303 : f32 to vector<4x1xf32>
    %800 = arith.subf %799, %798 : vector<4x1xf32>
    %801 = vector.broadcast %800 : vector<4x1xf32> to vector<4x32xf32>
    %802 = arith.mulf %593, %801 : vector<4x32xf32>
    %803 = vector.broadcast %798 : vector<4x1xf32> to vector<4x32xf32>
    %804 = arith.mulf %795, %803 : vector<4x32xf32>
    %805 = arith.addf %802, %804 : vector<4x32xf32>
    %cst_304 = arith.constant 0.000000e+00 : f32
    %806 = vector.broadcast %cst_304 : f32 to vector<2x32xf32>
    %807 = vector.extract_strided_slice %805 {offsets = [0, 0], sizes = [2, 32], strides = [1, 1]} : vector<4x32xf32> to vector<2x32xf32>
    %808 = vector.broadcast %659 : vector<2x1xf32> to vector<2x32xf32>
    %809 = arith.mulf %808, %807 : vector<2x32xf32>
    %810 = arith.addf %806, %809 : vector<2x32xf32>
    %811 = vector.extract_strided_slice %805 {offsets = [2, 0], sizes = [2, 32], strides = [1, 1]} : vector<4x32xf32> to vector<2x32xf32>
    %812 = vector.broadcast %668 : vector<2x1xf32> to vector<2x32xf32>
    %813 = arith.mulf %812, %811 : vector<2x32xf32>
    %814 = arith.addf %810, %813 : vector<2x32xf32>
    %c0_305 = arith.constant 0 : index
    %c0_306 = arith.constant 0 : index
    %815 = vector.load %arg13[%c0_305, %c0_306] : memref<32x96xbf16, #tpu.memory_space<vmem>>, vector<32x96xbf16>
    %816 = arith.truncf %814 : vector<2x32xf32> to vector<2x32xbf16>
    %cst_307 = arith.constant dense<0.000000e+00> : vector<2x96xf32>
    %817 = tpu.matmul %816, %815, %cst_307 {dimension_numbers = #tpu.dot_dimension_numbers<[1], [0], [0], [1], [0, 0, 1, 1], [], []>} : vector<2x32xbf16>, vector<32x96xbf16>, vector<2x96xf32> -> vector<2x96xf32>
    %c0_308 = arith.constant 0 : index
    %c0_309 = arith.constant 0 : index
    %818 = vector.load %arg15[%c0_308, %c0_309] : memref<1x96xf32, #tpu.memory_space<vmem>>, vector<1x96xf32>
    %819 = vector.broadcast %818 : vector<1x96xf32> to vector<2x96xf32>
    %820 = arith.addf %817, %819 : vector<2x96xf32>
    %c0_310 = arith.constant 0 : index
    %c0_311 = arith.constant 0 : index
    %821 = vector.load %arg14[%c0_310, %c0_311] : memref<32x96xbf16, #tpu.memory_space<vmem>>, vector<32x96xbf16>
    %822 = arith.truncf %640 : vector<2x32xf32> to vector<2x32xbf16>
    %cst_312 = arith.constant dense<0.000000e+00> : vector<2x96xf32>
    %823 = tpu.matmul %822, %821, %cst_312 {dimension_numbers = #tpu.dot_dimension_numbers<[1], [0], [0], [1], [0, 0, 1, 1], [], []>} : vector<2x32xbf16>, vector<32x96xbf16>, vector<2x96xf32> -> vector<2x96xf32>
    %c0_313 = arith.constant 0 : index
    %c0_314 = arith.constant 0 : index
    %824 = vector.load %arg16[%c0_313, %c0_314] : memref<1x96xf32, #tpu.memory_space<vmem>>, vector<1x96xf32>
    %825 = vector.broadcast %824 : vector<1x96xf32> to vector<2x96xf32>
    %826 = arith.addf %823, %825 : vector<2x96xf32>
    %827 = vector.extract_strided_slice %820 {offsets = [0, 0], sizes = [2, 32], strides = [1, 1]} : vector<2x96xf32> to vector<2x32xf32>
    %828 = vector.extract_strided_slice %826 {offsets = [0, 0], sizes = [2, 32], strides = [1, 1]} : vector<2x96xf32> to vector<2x32xf32>
    %829 = arith.addf %827, %828 : vector<2x32xf32>
    %830 = arith.negf %829 : vector<2x32xf32>
    %831 = math.exp %830 : vector<2x32xf32>
    %cst_315 = arith.constant 1.000000e+00 : f32
    %832 = vector.broadcast %cst_315 : f32 to vector<2x32xf32>
    %833 = arith.addf %832, %831 : vector<2x32xf32>
    %834 = arith.divf %832, %833 : vector<2x32xf32>
    %835 = vector.extract_strided_slice %820 {offsets = [0, 32], sizes = [2, 32], strides = [1, 1]} : vector<2x96xf32> to vector<2x32xf32>
    %836 = vector.extract_strided_slice %826 {offsets = [0, 32], sizes = [2, 32], strides = [1, 1]} : vector<2x96xf32> to vector<2x32xf32>
    %837 = arith.addf %835, %836 : vector<2x32xf32>
    %838 = arith.negf %837 : vector<2x32xf32>
    %839 = math.exp %838 : vector<2x32xf32>
    %cst_316 = arith.constant 1.000000e+00 : f32
    %840 = vector.broadcast %cst_316 : f32 to vector<2x32xf32>
    %841 = arith.addf %840, %839 : vector<2x32xf32>
    %842 = arith.divf %840, %841 : vector<2x32xf32>
    %843 = vector.extract_strided_slice %820 {offsets = [0, 64], sizes = [2, 32], strides = [1, 1]} : vector<2x96xf32> to vector<2x32xf32>
    %844 = vector.extract_strided_slice %826 {offsets = [0, 64], sizes = [2, 32], strides = [1, 1]} : vector<2x96xf32> to vector<2x32xf32>
    %845 = arith.mulf %834, %844 : vector<2x32xf32>
    %846 = arith.addf %843, %845 : vector<2x32xf32>
    %847 = math.tanh %846 : vector<2x32xf32>
    %cst_317 = arith.constant 1.000000e+00 : f32
    %848 = vector.broadcast %cst_317 : f32 to vector<2x32xf32>
    %849 = arith.subf %848, %842 : vector<2x32xf32>
    %850 = arith.mulf %849, %847 : vector<2x32xf32>
    %851 = arith.mulf %842, %640 : vector<2x32xf32>
    %852 = arith.addf %850, %851 : vector<2x32xf32>
    %c3_318 = arith.constant 3 : index
    %c0_319 = arith.constant 0 : index
    %c0_320 = arith.constant 0 : index
    %853 = vector.load %arg17[%c3_318, %c0_319, %c0_320] : memref<8x2x32xf32, #tpu.memory_space<vmem>>, vector<1x2x32xf32>
    %854 = vector.shape_cast %853 : vector<1x2x32xf32> to vector<2x32xf32>
    %855 = vector.shape_cast %852 : vector<2x32xf32> to vector<1x2x32xf32>
    tpu.vector_store %arg17[%c3_318, %c0_319, %c0_320], %855 {strides = array<i32>} : memref<8x2x32xf32, #tpu.memory_space<vmem>>, vector<1x2x32xf32>,
    %c4 = arith.constant 4 : index
    %c0_321 = arith.constant 0 : index
    %c0_322 = arith.constant 0 : index
    %856 = vector.load %arg1[%c4, %c0_321, %c0_322] : memref<8x2x32xf32, #tpu.memory_space<vmem>>, vector<1x2x32xf32>
    %857 = vector.shape_cast %856 : vector<1x2x32xf32> to vector<2x32xf32>
    %c4_323 = arith.constant 4 : index
    %c0_324 = arith.constant 0 : index
    %c0_325 = arith.constant 0 : index
    %858 = vector.load %arg2[%c4_323, %c0_324, %c0_325] : memref<8x2x2xf32, #tpu.memory_space<vmem>>, vector<1x2x2xf32>
    %859 = vector.shape_cast %858 : vector<1x2x2xf32> to vector<2x2xf32>
    %860 = arith.truncf %857 : vector<2x32xf32> to vector<2x32xbf16>
    %cst_326 = arith.constant dense<0xFF800000> : vector<2xf32>
    %861 = vector.multi_reduction <maximumf>, %859, %cst_326 [1] : vector<2x2xf32> to vector<2xf32>
    %862 = vector.shape_cast %861 : vector<2xf32> to vector<2x1xf32>
    %cst_327 = arith.constant 0.000000e+00 : f32
    %863 = vector.broadcast %cst_327 : f32 to vector<2x1xf32>
    %864 = vector.extract_strided_slice %859 {offsets = [0, 0], sizes = [2, 1], strides = [1, 1]} : vector<2x2xf32> to vector<2x1xf32>
    %865 = arith.cmpf oge, %864, %862 : vector<2x1xf32>
    %cst_328 = arith.constant 5.000000e-01 : f32
    %866 = vector.broadcast %cst_328 : f32 to vector<2x1xf32>
    %867 = arith.cmpf olt, %863, %866 : vector<2x1xf32>
    %868 = arith.andi %865, %867 : vector<2x1xi1>
    %cst_329 = arith.constant 1.000000e+00 : f32
    %cst_330 = arith.constant 0.000000e+00 : f32
    %869 = vector.broadcast %cst_329 : f32 to vector<2x1xf32>
    %870 = vector.broadcast %cst_330 : f32 to vector<2x1xf32>
    %871 = arith.select %868, %869, %870 : vector<2x1xi1>, vector<2x1xf32>
    %872 = arith.addf %863, %871 : vector<2x1xf32>
    %873 = vector.extract_strided_slice %859 {offsets = [0, 1], sizes = [2, 1], strides = [1, 1]} : vector<2x2xf32> to vector<2x1xf32>
    %874 = arith.cmpf oge, %873, %862 : vector<2x1xf32>
    %cst_331 = arith.constant 5.000000e-01 : f32
    %875 = vector.broadcast %cst_331 : f32 to vector<2x1xf32>
    %876 = arith.cmpf olt, %872, %875 : vector<2x1xf32>
    %877 = arith.andi %874, %876 : vector<2x1xi1>
    %cst_332 = arith.constant 1.000000e+00 : f32
    %cst_333 = arith.constant 0.000000e+00 : f32
    %878 = vector.broadcast %cst_332 : f32 to vector<2x1xf32>
    %879 = vector.broadcast %cst_333 : f32 to vector<2x1xf32>
    %880 = arith.select %877, %878, %879 : vector<2x1xi1>, vector<2x1xf32>
    %cst_334 = arith.constant 0.000000e+00 : f32
    %881 = vector.broadcast %cst_334 : f32 to vector<2x32xf32>
    %882 = vector.extract_strided_slice %805 {offsets = [0, 0], sizes = [2, 32], strides = [1, 1]} : vector<4x32xf32> to vector<2x32xf32>
    %883 = vector.broadcast %871 : vector<2x1xf32> to vector<2x32xf32>
    %884 = arith.mulf %883, %882 : vector<2x32xf32>
    %885 = arith.addf %881, %884 : vector<2x32xf32>
    %886 = vector.extract_strided_slice %805 {offsets = [2, 0], sizes = [2, 32], strides = [1, 1]} : vector<4x32xf32> to vector<2x32xf32>
    %887 = vector.broadcast %880 : vector<2x1xf32> to vector<2x32xf32>
    %888 = arith.mulf %887, %886 : vector<2x32xf32>
    %889 = arith.addf %885, %888 : vector<2x32xf32>
    %890 = arith.truncf %889 : vector<2x32xf32> to vector<2x32xbf16>
    %891 = tpu.concatenate %860, %890 in 1 : vector<2x32xbf16>, vector<2x32xbf16> -> vector<2x64xbf16>
    %c0_335 = arith.constant 0 : index
    %c0_336 = arith.constant 0 : index
    %892 = vector.load %arg5[%c0_335, %c0_336] : memref<64x96xbf16, #tpu.memory_space<vmem>>, vector<64x96xbf16>
    %cst_337 = arith.constant dense<0.000000e+00> : vector<2x96xf32>
    %893 = tpu.matmul %891, %892, %cst_337 {dimension_numbers = #tpu.dot_dimension_numbers<[1], [0], [0], [1], [0, 0, 1, 1], [], []>} : vector<2x64xbf16>, vector<64x96xbf16>, vector<2x96xf32> -> vector<2x96xf32>
    %c0_338 = arith.constant 0 : index
    %c0_339 = arith.constant 0 : index
    %894 = vector.load %arg7[%c0_338, %c0_339] : memref<1x96xf32, #tpu.memory_space<vmem>>, vector<1x96xf32>
    %895 = vector.broadcast %894 : vector<1x96xf32> to vector<2x96xf32>
    %896 = arith.addf %893, %895 : vector<2x96xf32>
    %c0_340 = arith.constant 0 : index
    %c0_341 = arith.constant 0 : index
    %897 = vector.load %arg6[%c0_340, %c0_341] : memref<32x96xbf16, #tpu.memory_space<vmem>>, vector<32x96xbf16>
    %898 = arith.truncf %716 : vector<2x32xf32> to vector<2x32xbf16>
    %cst_342 = arith.constant dense<0.000000e+00> : vector<2x96xf32>
    %899 = tpu.matmul %898, %897, %cst_342 {dimension_numbers = #tpu.dot_dimension_numbers<[1], [0], [0], [1], [0, 0, 1, 1], [], []>} : vector<2x32xbf16>, vector<32x96xbf16>, vector<2x96xf32> -> vector<2x96xf32>
    %c0_343 = arith.constant 0 : index
    %c0_344 = arith.constant 0 : index
    %900 = vector.load %arg8[%c0_343, %c0_344] : memref<1x96xf32, #tpu.memory_space<vmem>>, vector<1x96xf32>
    %901 = vector.broadcast %900 : vector<1x96xf32> to vector<2x96xf32>
    %902 = arith.addf %899, %901 : vector<2x96xf32>
    %903 = vector.extract_strided_slice %896 {offsets = [0, 0], sizes = [2, 32], strides = [1, 1]} : vector<2x96xf32> to vector<2x32xf32>
    %904 = vector.extract_strided_slice %902 {offsets = [0, 0], sizes = [2, 32], strides = [1, 1]} : vector<2x96xf32> to vector<2x32xf32>
    %905 = arith.addf %903, %904 : vector<2x32xf32>
    %906 = arith.negf %905 : vector<2x32xf32>
    %907 = math.exp %906 : vector<2x32xf32>
    %cst_345 = arith.constant 1.000000e+00 : f32
    %908 = vector.broadcast %cst_345 : f32 to vector<2x32xf32>
    %909 = arith.addf %908, %907 : vector<2x32xf32>
    %910 = arith.divf %908, %909 : vector<2x32xf32>
    %911 = vector.extract_strided_slice %896 {offsets = [0, 32], sizes = [2, 32], strides = [1, 1]} : vector<2x96xf32> to vector<2x32xf32>
    %912 = vector.extract_strided_slice %902 {offsets = [0, 32], sizes = [2, 32], strides = [1, 1]} : vector<2x96xf32> to vector<2x32xf32>
    %913 = arith.addf %911, %912 : vector<2x32xf32>
    %914 = arith.negf %913 : vector<2x32xf32>
    %915 = math.exp %914 : vector<2x32xf32>
    %cst_346 = arith.constant 1.000000e+00 : f32
    %916 = vector.broadcast %cst_346 : f32 to vector<2x32xf32>
    %917 = arith.addf %916, %915 : vector<2x32xf32>
    %918 = arith.divf %916, %917 : vector<2x32xf32>
    %919 = vector.extract_strided_slice %896 {offsets = [0, 64], sizes = [2, 32], strides = [1, 1]} : vector<2x96xf32> to vector<2x32xf32>
    %920 = vector.extract_strided_slice %902 {offsets = [0, 64], sizes = [2, 32], strides = [1, 1]} : vector<2x96xf32> to vector<2x32xf32>
    %921 = arith.mulf %910, %920 : vector<2x32xf32>
    %922 = arith.addf %919, %921 : vector<2x32xf32>
    %923 = math.tanh %922 : vector<2x32xf32>
    %cst_347 = arith.constant 1.000000e+00 : f32
    %924 = vector.broadcast %cst_347 : f32 to vector<2x32xf32>
    %925 = arith.subf %924, %918 : vector<2x32xf32>
    %926 = arith.mulf %925, %923 : vector<2x32xf32>
    %927 = arith.mulf %918, %716 : vector<2x32xf32>
    %928 = arith.addf %926, %927 : vector<2x32xf32>
    %c4_348 = arith.constant 4 : index
    %c0_349 = arith.constant 0 : index
    %c0_350 = arith.constant 0 : index
    %929 = vector.load %arg3[%c4_348, %c0_349, %c0_350] : memref<8x1x32xf32, #tpu.memory_space<vmem>>, vector<1x1x32xf32>
    %930 = vector.shape_cast %929 : vector<1x1x32xf32> to vector<1x32xf32>
    %931 = vector.broadcast %930 : vector<1x32xf32> to vector<2x32xf32>
    %932 = arith.addf %928, %931 : vector<2x32xf32>
    %933 = vector.shape_cast %932 : vector<2x32xf32> to vector<2x1x32xf32>
    %c0_351 = arith.constant 0 : index
    %c4_352 = arith.constant 4 : index
    %c0_353 = arith.constant 0 : index
    %934 = vector.load %arg19[%c0_351, %c4_352, %c0_353] : memref<2x8x32xf32, #tpu.memory_space<vmem>>, vector<2x1x32xf32>
    tpu.vector_store %arg19[%c0_351, %c4_352, %c0_353], %933 {strides = array<i32>} : memref<2x8x32xf32, #tpu.memory_space<vmem>>, vector<2x1x32xf32>,
    %935 = vector.broadcast %2 : vector<1x32xf32> to vector<2x32xf32>
    %936 = arith.mulf %932, %935 : vector<2x32xf32>
    %cst_354 = arith.constant dense<0.000000e+00> : vector<2xf32>
    %937 = vector.multi_reduction <add>, %936, %cst_354 [1] : vector<2x32xf32> to vector<2xf32>
    %938 = vector.shape_cast %937 : vector<2xf32> to vector<2x1xf32>
    %c4_i32 = arith.constant 4 : i32
    %939 = vector.broadcast %c4_i32 : i32 to vector<2x8xi32>
    %940 = arith.cmpi eq, %3, %939 : vector<2x8xi32>
    %941 = vector.shape_cast %938 : vector<2x1xf32> to vector<2x1xf32>
    %942 = vector.broadcast %941 : vector<2x1xf32> to vector<2x8xf32>
    %943 = arith.select %940, %942, %731 : vector<2x8xi1>, vector<2x8xf32>
    %c4_i32_355 = arith.constant 4 : i32
    %944 = vector.broadcast %c4_i32_355 : i32 to vector<2x8xi32>
    %945 = arith.cmpi slt, %3, %944 : vector<2x8xi32>
    %cst_356 = arith.constant -1.000000e+30 : f32
    %946 = vector.broadcast %cst_356 : f32 to vector<2x8xf32>
    %947 = arith.select %945, %943, %946 : vector<2x8xi1>, vector<2x8xf32>
    %cst_357 = arith.constant dense<0xFF800000> : vector<2xf32>
    %948 = vector.multi_reduction <maximumf>, %947, %cst_357 [1] : vector<2x8xf32> to vector<2xf32>
    %949 = vector.shape_cast %948 : vector<2xf32> to vector<2x1xf32>
    %950 = vector.broadcast %949 : vector<2x1xf32> to vector<2x8xf32>
    %951 = arith.subf %947, %950 : vector<2x8xf32>
    %952 = math.exp %951 : vector<2x8xf32>
    %cst_358 = arith.constant 0.000000e+00 : f32
    %953 = vector.broadcast %cst_358 : f32 to vector<2x8xf32>
    %954 = arith.select %945, %952, %953 : vector<2x8xi1>, vector<2x8xf32>
    %cst_359 = arith.constant dense<0.000000e+00> : vector<2xf32>
    %955 = vector.multi_reduction <add>, %954, %cst_359 [1] : vector<2x8xf32> to vector<2xf32>
    %956 = vector.shape_cast %955 : vector<2xf32> to vector<2x1xf32>
    %cst_360 = arith.constant 1.000000e-30 : f32
    %957 = vector.broadcast %cst_360 : f32 to vector<2x1xf32>
    %958 = arith.maximumf %956, %957 : vector<2x1xf32>
    %959 = vector.broadcast %958 : vector<2x1xf32> to vector<2x8xf32>
    %960 = arith.divf %954, %959 : vector<2x8xf32>
    %c4_361 = arith.constant 4 : index
    %c0_362 = arith.constant 0 : index
    %c0_363 = arith.constant 0 : index
    %961 = vector.load %arg18[%c4_361, %c0_362, %c0_363] : memref<8x2x8xf32, #tpu.memory_space<vmem>>, vector<1x2x8xf32>
    %962 = vector.shape_cast %961 : vector<1x2x8xf32> to vector<2x8xf32>
    %963 = vector.shape_cast %960 : vector<2x8xf32> to vector<1x2x8xf32>
    tpu.vector_store %arg18[%c4_361, %c0_362, %c0_363], %963 {strides = array<i32>} : memref<8x2x8xf32, #tpu.memory_space<vmem>>, vector<1x2x8xf32>,
    %c0_364 = arith.constant 0 : index
    %c0_365 = arith.constant 0 : index
    %c0_366 = arith.constant 0 : index
    %964 = vector.load %arg19[%c0_364, %c0_365, %c0_366] : memref<2x8x32xf32, #tpu.memory_space<vmem>>, vector<2x8x32xf32>
    %965 = vector.shape_cast %960 : vector<2x8xf32> to vector<2x1x8xf32>
    "tpu.trace_start"() <{level = 10 : i32, message = "bqs,bsd->bqd"}> : () -> ()
    %cst_367 = arith.constant dense<0.000000e+00> : vector<2x1x32xf32>
    %966 = tpu.matmul %965, %964, %cst_367 {dimension_numbers = #tpu.dot_dimension_numbers<[2], [1], [1], [2], [0, 0, 0, 1, 1, 2], [0], [0]>} : vector<2x1x8xf32>, vector<2x8x32xf32>, vector<2x1x32xf32> -> vector<2x1x32xf32>
    "tpu.trace_stop"() : () -> ()
    %967 = vector.shape_cast %966 : vector<2x1x32xf32> to vector<2x32xf32>
    %968 = arith.truncf %967 : vector<2x32xf32> to vector<2x32xbf16>
    %969 = tpu.concatenate %860, %968 in 1 : vector<2x32xbf16>, vector<2x32xbf16> -> vector<2x64xbf16>
    %c0_368 = arith.constant 0 : index
    %c0_369 = arith.constant 0 : index
    %970 = vector.load %arg9[%c0_368, %c0_369] : memref<64x96xbf16, #tpu.memory_space<vmem>>, vector<64x96xbf16>
    %cst_370 = arith.constant dense<0.000000e+00> : vector<2x96xf32>
    %971 = tpu.matmul %969, %970, %cst_370 {dimension_numbers = #tpu.dot_dimension_numbers<[1], [0], [0], [1], [0, 0, 1, 1], [], []>} : vector<2x64xbf16>, vector<64x96xbf16>, vector<2x96xf32> -> vector<2x96xf32>
    %c0_371 = arith.constant 0 : index
    %c0_372 = arith.constant 0 : index
    %972 = vector.load %arg11[%c0_371, %c0_372] : memref<1x96xf32, #tpu.memory_space<vmem>>, vector<1x96xf32>
    %973 = vector.broadcast %972 : vector<1x96xf32> to vector<2x96xf32>
    %974 = arith.addf %971, %973 : vector<2x96xf32>
    %975 = tpu.concatenate %974, %974 in 0 : vector<2x96xf32>, vector<2x96xf32> -> vector<4x96xf32>
    %c0_373 = arith.constant 0 : index
    %c0_374 = arith.constant 0 : index
    %976 = vector.load %arg10[%c0_373, %c0_374] : memref<32x96xbf16, #tpu.memory_space<vmem>>, vector<32x96xbf16>
    %977 = arith.truncf %805 : vector<4x32xf32> to vector<4x32xbf16>
    %cst_375 = arith.constant dense<0.000000e+00> : vector<4x96xf32>
    %978 = tpu.matmul %977, %976, %cst_375 {dimension_numbers = #tpu.dot_dimension_numbers<[1], [0], [0], [1], [0, 0, 1, 1], [], []>} : vector<4x32xbf16>, vector<32x96xbf16>, vector<4x96xf32> -> vector<4x96xf32>
    %c0_376 = arith.constant 0 : index
    %c0_377 = arith.constant 0 : index
    %979 = vector.load %arg12[%c0_376, %c0_377] : memref<1x96xf32, #tpu.memory_space<vmem>>, vector<1x96xf32>
    %980 = vector.broadcast %979 : vector<1x96xf32> to vector<4x96xf32>
    %981 = arith.addf %978, %980 : vector<4x96xf32>
    %982 = vector.extract_strided_slice %975 {offsets = [0, 0], sizes = [4, 32], strides = [1, 1]} : vector<4x96xf32> to vector<4x32xf32>
    %983 = vector.extract_strided_slice %981 {offsets = [0, 0], sizes = [4, 32], strides = [1, 1]} : vector<4x96xf32> to vector<4x32xf32>
    %984 = arith.addf %982, %983 : vector<4x32xf32>
    %985 = arith.negf %984 : vector<4x32xf32>
    %986 = math.exp %985 : vector<4x32xf32>
    %cst_378 = arith.constant 1.000000e+00 : f32
    %987 = vector.broadcast %cst_378 : f32 to vector<4x32xf32>
    %988 = arith.addf %987, %986 : vector<4x32xf32>
    %989 = arith.divf %987, %988 : vector<4x32xf32>
    %990 = vector.extract_strided_slice %975 {offsets = [0, 32], sizes = [4, 32], strides = [1, 1]} : vector<4x96xf32> to vector<4x32xf32>
    %991 = vector.extract_strided_slice %981 {offsets = [0, 32], sizes = [4, 32], strides = [1, 1]} : vector<4x96xf32> to vector<4x32xf32>
    %992 = arith.addf %990, %991 : vector<4x32xf32>
    %993 = arith.negf %992 : vector<4x32xf32>
    %994 = math.exp %993 : vector<4x32xf32>
    %cst_379 = arith.constant 1.000000e+00 : f32
    %995 = vector.broadcast %cst_379 : f32 to vector<4x32xf32>
    %996 = arith.addf %995, %994 : vector<4x32xf32>
    %997 = arith.divf %995, %996 : vector<4x32xf32>
    %998 = vector.extract_strided_slice %975 {offsets = [0, 64], sizes = [4, 32], strides = [1, 1]} : vector<4x96xf32> to vector<4x32xf32>
    %999 = vector.extract_strided_slice %981 {offsets = [0, 64], sizes = [4, 32], strides = [1, 1]} : vector<4x96xf32> to vector<4x32xf32>
    %1000 = arith.mulf %989, %999 : vector<4x32xf32>
    %1001 = arith.addf %998, %1000 : vector<4x32xf32>
    %1002 = math.tanh %1001 : vector<4x32xf32>
    %cst_380 = arith.constant 1.000000e+00 : f32
    %1003 = vector.broadcast %cst_380 : f32 to vector<4x32xf32>
    %1004 = arith.subf %1003, %997 : vector<4x32xf32>
    %1005 = arith.mulf %1004, %1002 : vector<4x32xf32>
    %1006 = arith.mulf %997, %805 : vector<4x32xf32>
    %1007 = arith.addf %1005, %1006 : vector<4x32xf32>
    %1008 = vector.extract_strided_slice %859 {offsets = [0, 0], sizes = [2, 1], strides = [1, 1]} : vector<2x2xf32> to vector<2x1xf32>
    %1009 = vector.extract_strided_slice %859 {offsets = [0, 1], sizes = [2, 1], strides = [1, 1]} : vector<2x2xf32> to vector<2x1xf32>
    %1010 = tpu.concatenate %1008, %1009 in 0 : vector<2x1xf32>, vector<2x1xf32> -> vector<4x1xf32>
    %cst_381 = arith.constant 1.000000e+00 : f32
    %1011 = vector.broadcast %cst_381 : f32 to vector<4x1xf32>
    %1012 = arith.subf %1011, %1010 : vector<4x1xf32>
    %1013 = vector.broadcast %1012 : vector<4x1xf32> to vector<4x32xf32>
    %1014 = arith.mulf %805, %1013 : vector<4x32xf32>
    %1015 = vector.broadcast %1010 : vector<4x1xf32> to vector<4x32xf32>
    %1016 = arith.mulf %1007, %1015 : vector<4x32xf32>
    %1017 = arith.addf %1014, %1016 : vector<4x32xf32>
    %cst_382 = arith.constant 0.000000e+00 : f32
    %1018 = vector.broadcast %cst_382 : f32 to vector<2x32xf32>
    %1019 = vector.extract_strided_slice %1017 {offsets = [0, 0], sizes = [2, 32], strides = [1, 1]} : vector<4x32xf32> to vector<2x32xf32>
    %1020 = vector.broadcast %871 : vector<2x1xf32> to vector<2x32xf32>
    %1021 = arith.mulf %1020, %1019 : vector<2x32xf32>
    %1022 = arith.addf %1018, %1021 : vector<2x32xf32>
    %1023 = vector.extract_strided_slice %1017 {offsets = [2, 0], sizes = [2, 32], strides = [1, 1]} : vector<4x32xf32> to vector<2x32xf32>
    %1024 = vector.broadcast %880 : vector<2x1xf32> to vector<2x32xf32>
    %1025 = arith.mulf %1024, %1023 : vector<2x32xf32>
    %1026 = arith.addf %1022, %1025 : vector<2x32xf32>
    %c0_383 = arith.constant 0 : index
    %c0_384 = arith.constant 0 : index
    %1027 = vector.load %arg13[%c0_383, %c0_384] : memref<32x96xbf16, #tpu.memory_space<vmem>>, vector<32x96xbf16>
    %1028 = arith.truncf %1026 : vector<2x32xf32> to vector<2x32xbf16>
    %cst_385 = arith.constant dense<0.000000e+00> : vector<2x96xf32>
    %1029 = tpu.matmul %1028, %1027, %cst_385 {dimension_numbers = #tpu.dot_dimension_numbers<[1], [0], [0], [1], [0, 0, 1, 1], [], []>} : vector<2x32xbf16>, vector<32x96xbf16>, vector<2x96xf32> -> vector<2x96xf32>
    %c0_386 = arith.constant 0 : index
    %c0_387 = arith.constant 0 : index
    %1030 = vector.load %arg15[%c0_386, %c0_387] : memref<1x96xf32, #tpu.memory_space<vmem>>, vector<1x96xf32>
    %1031 = vector.broadcast %1030 : vector<1x96xf32> to vector<2x96xf32>
    %1032 = arith.addf %1029, %1031 : vector<2x96xf32>
    %c0_388 = arith.constant 0 : index
    %c0_389 = arith.constant 0 : index
    %1033 = vector.load %arg14[%c0_388, %c0_389] : memref<32x96xbf16, #tpu.memory_space<vmem>>, vector<32x96xbf16>
    %1034 = arith.truncf %852 : vector<2x32xf32> to vector<2x32xbf16>
    %cst_390 = arith.constant dense<0.000000e+00> : vector<2x96xf32>
    %1035 = tpu.matmul %1034, %1033, %cst_390 {dimension_numbers = #tpu.dot_dimension_numbers<[1], [0], [0], [1], [0, 0, 1, 1], [], []>} : vector<2x32xbf16>, vector<32x96xbf16>, vector<2x96xf32> -> vector<2x96xf32>
    %c0_391 = arith.constant 0 : index
    %c0_392 = arith.constant 0 : index
    %1036 = vector.load %arg16[%c0_391, %c0_392] : memref<1x96xf32, #tpu.memory_space<vmem>>, vector<1x96xf32>
    %1037 = vector.broadcast %1036 : vector<1x96xf32> to vector<2x96xf32>
    %1038 = arith.addf %1035, %1037 : vector<2x96xf32>
    %1039 = vector.extract_strided_slice %1032 {offsets = [0, 0], sizes = [2, 32], strides = [1, 1]} : vector<2x96xf32> to vector<2x32xf32>
    %1040 = vector.extract_strided_slice %1038 {offsets = [0, 0], sizes = [2, 32], strides = [1, 1]} : vector<2x96xf32> to vector<2x32xf32>
    %1041 = arith.addf %1039, %1040 : vector<2x32xf32>
    %1042 = arith.negf %1041 : vector<2x32xf32>
    %1043 = math.exp %1042 : vector<2x32xf32>
    %cst_393 = arith.constant 1.000000e+00 : f32
    %1044 = vector.broadcast %cst_393 : f32 to vector<2x32xf32>
    %1045 = arith.addf %1044, %1043 : vector<2x32xf32>
    %1046 = arith.divf %1044, %1045 : vector<2x32xf32>
    %1047 = vector.extract_strided_slice %1032 {offsets = [0, 32], sizes = [2, 32], strides = [1, 1]} : vector<2x96xf32> to vector<2x32xf32>
    %1048 = vector.extract_strided_slice %1038 {offsets = [0, 32], sizes = [2, 32], strides = [1, 1]} : vector<2x96xf32> to vector<2x32xf32>
    %1049 = arith.addf %1047, %1048 : vector<2x32xf32>
    %1050 = arith.negf %1049 : vector<2x32xf32>
    %1051 = math.exp %1050 : vector<2x32xf32>
    %cst_394 = arith.constant 1.000000e+00 : f32
    %1052 = vector.broadcast %cst_394 : f32 to vector<2x32xf32>
    %1053 = arith.addf %1052, %1051 : vector<2x32xf32>
    %1054 = arith.divf %1052, %1053 : vector<2x32xf32>
    %1055 = vector.extract_strided_slice %1032 {offsets = [0, 64], sizes = [2, 32], strides = [1, 1]} : vector<2x96xf32> to vector<2x32xf32>
    %1056 = vector.extract_strided_slice %1038 {offsets = [0, 64], sizes = [2, 32], strides = [1, 1]} : vector<2x96xf32> to vector<2x32xf32>
    %1057 = arith.mulf %1046, %1056 : vector<2x32xf32>
    %1058 = arith.addf %1055, %1057 : vector<2x32xf32>
    %1059 = math.tanh %1058 : vector<2x32xf32>
    %cst_395 = arith.constant 1.000000e+00 : f32
    %1060 = vector.broadcast %cst_395 : f32 to vector<2x32xf32>
    %1061 = arith.subf %1060, %1054 : vector<2x32xf32>
    %1062 = arith.mulf %1061, %1059 : vector<2x32xf32>
    %1063 = arith.mulf %1054, %852 : vector<2x32xf32>
    %1064 = arith.addf %1062, %1063 : vector<2x32xf32>
    %c4_396 = arith.constant 4 : index
    %c0_397 = arith.constant 0 : index
    %c0_398 = arith.constant 0 : index
    %1065 = vector.load %arg17[%c4_396, %c0_397, %c0_398] : memref<8x2x32xf32, #tpu.memory_space<vmem>>, vector<1x2x32xf32>
    %1066 = vector.shape_cast %1065 : vector<1x2x32xf32> to vector<2x32xf32>
    %1067 = vector.shape_cast %1064 : vector<2x32xf32> to vector<1x2x32xf32>
    tpu.vector_store %arg17[%c4_396, %c0_397, %c0_398], %1067 {strides = array<i32>} : memref<8x2x32xf32, #tpu.memory_space<vmem>>, vector<1x2x32xf32>,
    %c5 = arith.constant 5 : index
    %c0_399 = arith.constant 0 : index
    %c0_400 = arith.constant 0 : index
    %1068 = vector.load %arg1[%c5, %c0_399, %c0_400] : memref<8x2x32xf32, #tpu.memory_space<vmem>>, vector<1x2x32xf32>
    %1069 = vector.shape_cast %1068 : vector<1x2x32xf32> to vector<2x32xf32>
    %c5_401 = arith.constant 5 : index
    %c0_402 = arith.constant 0 : index
    %c0_403 = arith.constant 0 : index
    %1070 = vector.load %arg2[%c5_401, %c0_402, %c0_403] : memref<8x2x2xf32, #tpu.memory_space<vmem>>, vector<1x2x2xf32>
    %1071 = vector.shape_cast %1070 : vector<1x2x2xf32> to vector<2x2xf32>
    %1072 = arith.truncf %1069 : vector<2x32xf32> to vector<2x32xbf16>
    %cst_404 = arith.constant dense<0xFF800000> : vector<2xf32>
    %1073 = vector.multi_reduction <maximumf>, %1071, %cst_404 [1] : vector<2x2xf32> to vector<2xf32>
    %1074 = vector.shape_cast %1073 : vector<2xf32> to vector<2x1xf32>
    %cst_405 = arith.constant 0.000000e+00 : f32
    %1075 = vector.broadcast %cst_405 : f32 to vector<2x1xf32>
    %1076 = vector.extract_strided_slice %1071 {offsets = [0, 0], sizes = [2, 1], strides = [1, 1]} : vector<2x2xf32> to vector<2x1xf32>
    %1077 = arith.cmpf oge, %1076, %1074 : vector<2x1xf32>
    %cst_406 = arith.constant 5.000000e-01 : f32
    %1078 = vector.broadcast %cst_406 : f32 to vector<2x1xf32>
    %1079 = arith.cmpf olt, %1075, %1078 : vector<2x1xf32>
    %1080 = arith.andi %1077, %1079 : vector<2x1xi1>
    %cst_407 = arith.constant 1.000000e+00 : f32
    %cst_408 = arith.constant 0.000000e+00 : f32
    %1081 = vector.broadcast %cst_407 : f32 to vector<2x1xf32>
    %1082 = vector.broadcast %cst_408 : f32 to vector<2x1xf32>
    %1083 = arith.select %1080, %1081, %1082 : vector<2x1xi1>, vector<2x1xf32>
    %1084 = arith.addf %1075, %1083 : vector<2x1xf32>
    %1085 = vector.extract_strided_slice %1071 {offsets = [0, 1], sizes = [2, 1], strides = [1, 1]} : vector<2x2xf32> to vector<2x1xf32>
    %1086 = arith.cmpf oge, %1085, %1074 : vector<2x1xf32>
    %cst_409 = arith.constant 5.000000e-01 : f32
    %1087 = vector.broadcast %cst_409 : f32 to vector<2x1xf32>
    %1088 = arith.cmpf olt, %1084, %1087 : vector<2x1xf32>
    %1089 = arith.andi %1086, %1088 : vector<2x1xi1>
    %cst_410 = arith.constant 1.000000e+00 : f32
    %cst_411 = arith.constant 0.000000e+00 : f32
    %1090 = vector.broadcast %cst_410 : f32 to vector<2x1xf32>
    %1091 = vector.broadcast %cst_411 : f32 to vector<2x1xf32>
    %1092 = arith.select %1089, %1090, %1091 : vector<2x1xi1>, vector<2x1xf32>
    %cst_412 = arith.constant 0.000000e+00 : f32
    %1093 = vector.broadcast %cst_412 : f32 to vector<2x32xf32>
    %1094 = vector.extract_strided_slice %1017 {offsets = [0, 0], sizes = [2, 32], strides = [1, 1]} : vector<4x32xf32> to vector<2x32xf32>
    %1095 = vector.broadcast %1083 : vector<2x1xf32> to vector<2x32xf32>
    %1096 = arith.mulf %1095, %1094 : vector<2x32xf32>
    %1097 = arith.addf %1093, %1096 : vector<2x32xf32>
    %1098 = vector.extract_strided_slice %1017 {offsets = [2, 0], sizes = [2, 32], strides = [1, 1]} : vector<4x32xf32> to vector<2x32xf32>
    %1099 = vector.broadcast %1092 : vector<2x1xf32> to vector<2x32xf32>
    %1100 = arith.mulf %1099, %1098 : vector<2x32xf32>
    %1101 = arith.addf %1097, %1100 : vector<2x32xf32>
    %1102 = arith.truncf %1101 : vector<2x32xf32> to vector<2x32xbf16>
    %1103 = tpu.concatenate %1072, %1102 in 1 : vector<2x32xbf16>, vector<2x32xbf16> -> vector<2x64xbf16>
    %c0_413 = arith.constant 0 : index
    %c0_414 = arith.constant 0 : index
    %1104 = vector.load %arg5[%c0_413, %c0_414] : memref<64x96xbf16, #tpu.memory_space<vmem>>, vector<64x96xbf16>
    %cst_415 = arith.constant dense<0.000000e+00> : vector<2x96xf32>
    %1105 = tpu.matmul %1103, %1104, %cst_415 {dimension_numbers = #tpu.dot_dimension_numbers<[1], [0], [0], [1], [0, 0, 1, 1], [], []>} : vector<2x64xbf16>, vector<64x96xbf16>, vector<2x96xf32> -> vector<2x96xf32>
    %c0_416 = arith.constant 0 : index
    %c0_417 = arith.constant 0 : index
    %1106 = vector.load %arg7[%c0_416, %c0_417] : memref<1x96xf32, #tpu.memory_space<vmem>>, vector<1x96xf32>
    %1107 = vector.broadcast %1106 : vector<1x96xf32> to vector<2x96xf32>
    %1108 = arith.addf %1105, %1107 : vector<2x96xf32>
    %c0_418 = arith.constant 0 : index
    %c0_419 = arith.constant 0 : index
    %1109 = vector.load %arg6[%c0_418, %c0_419] : memref<32x96xbf16, #tpu.memory_space<vmem>>, vector<32x96xbf16>
    %1110 = arith.truncf %928 : vector<2x32xf32> to vector<2x32xbf16>
    %cst_420 = arith.constant dense<0.000000e+00> : vector<2x96xf32>
    %1111 = tpu.matmul %1110, %1109, %cst_420 {dimension_numbers = #tpu.dot_dimension_numbers<[1], [0], [0], [1], [0, 0, 1, 1], [], []>} : vector<2x32xbf16>, vector<32x96xbf16>, vector<2x96xf32> -> vector<2x96xf32>
    %c0_421 = arith.constant 0 : index
    %c0_422 = arith.constant 0 : index
    %1112 = vector.load %arg8[%c0_421, %c0_422] : memref<1x96xf32, #tpu.memory_space<vmem>>, vector<1x96xf32>
    %1113 = vector.broadcast %1112 : vector<1x96xf32> to vector<2x96xf32>
    %1114 = arith.addf %1111, %1113 : vector<2x96xf32>
    %1115 = vector.extract_strided_slice %1108 {offsets = [0, 0], sizes = [2, 32], strides = [1, 1]} : vector<2x96xf32> to vector<2x32xf32>
    %1116 = vector.extract_strided_slice %1114 {offsets = [0, 0], sizes = [2, 32], strides = [1, 1]} : vector<2x96xf32> to vector<2x32xf32>
    %1117 = arith.addf %1115, %1116 : vector<2x32xf32>
    %1118 = arith.negf %1117 : vector<2x32xf32>
    %1119 = math.exp %1118 : vector<2x32xf32>
    %cst_423 = arith.constant 1.000000e+00 : f32
    %1120 = vector.broadcast %cst_423 : f32 to vector<2x32xf32>
    %1121 = arith.addf %1120, %1119 : vector<2x32xf32>
    %1122 = arith.divf %1120, %1121 : vector<2x32xf32>
    %1123 = vector.extract_strided_slice %1108 {offsets = [0, 32], sizes = [2, 32], strides = [1, 1]} : vector<2x96xf32> to vector<2x32xf32>
    %1124 = vector.extract_strided_slice %1114 {offsets = [0, 32], sizes = [2, 32], strides = [1, 1]} : vector<2x96xf32> to vector<2x32xf32>
    %1125 = arith.addf %1123, %1124 : vector<2x32xf32>
    %1126 = arith.negf %1125 : vector<2x32xf32>
    %1127 = math.exp %1126 : vector<2x32xf32>
    %cst_424 = arith.constant 1.000000e+00 : f32
    %1128 = vector.broadcast %cst_424 : f32 to vector<2x32xf32>
    %1129 = arith.addf %1128, %1127 : vector<2x32xf32>
    %1130 = arith.divf %1128, %1129 : vector<2x32xf32>
    %1131 = vector.extract_strided_slice %1108 {offsets = [0, 64], sizes = [2, 32], strides = [1, 1]} : vector<2x96xf32> to vector<2x32xf32>
    %1132 = vector.extract_strided_slice %1114 {offsets = [0, 64], sizes = [2, 32], strides = [1, 1]} : vector<2x96xf32> to vector<2x32xf32>
    %1133 = arith.mulf %1122, %1132 : vector<2x32xf32>
    %1134 = arith.addf %1131, %1133 : vector<2x32xf32>
    %1135 = math.tanh %1134 : vector<2x32xf32>
    %cst_425 = arith.constant 1.000000e+00 : f32
    %1136 = vector.broadcast %cst_425 : f32 to vector<2x32xf32>
    %1137 = arith.subf %1136, %1130 : vector<2x32xf32>
    %1138 = arith.mulf %1137, %1135 : vector<2x32xf32>
    %1139 = arith.mulf %1130, %928 : vector<2x32xf32>
    %1140 = arith.addf %1138, %1139 : vector<2x32xf32>
    %c5_426 = arith.constant 5 : index
    %c0_427 = arith.constant 0 : index
    %c0_428 = arith.constant 0 : index
    %1141 = vector.load %arg3[%c5_426, %c0_427, %c0_428] : memref<8x1x32xf32, #tpu.memory_space<vmem>>, vector<1x1x32xf32>
    %1142 = vector.shape_cast %1141 : vector<1x1x32xf32> to vector<1x32xf32>
    %1143 = vector.broadcast %1142 : vector<1x32xf32> to vector<2x32xf32>
    %1144 = arith.addf %1140, %1143 : vector<2x32xf32>
    %1145 = vector.shape_cast %1144 : vector<2x32xf32> to vector<2x1x32xf32>
    %c0_429 = arith.constant 0 : index
    %c5_430 = arith.constant 5 : index
    %c0_431 = arith.constant 0 : index
    %1146 = vector.load %arg19[%c0_429, %c5_430, %c0_431] : memref<2x8x32xf32, #tpu.memory_space<vmem>>, vector<2x1x32xf32>
    tpu.vector_store %arg19[%c0_429, %c5_430, %c0_431], %1145 {strides = array<i32>} : memref<2x8x32xf32, #tpu.memory_space<vmem>>, vector<2x1x32xf32>,
    %1147 = vector.broadcast %2 : vector<1x32xf32> to vector<2x32xf32>
    %1148 = arith.mulf %1144, %1147 : vector<2x32xf32>
    %cst_432 = arith.constant dense<0.000000e+00> : vector<2xf32>
    %1149 = vector.multi_reduction <add>, %1148, %cst_432 [1] : vector<2x32xf32> to vector<2xf32>
    %1150 = vector.shape_cast %1149 : vector<2xf32> to vector<2x1xf32>
    %c5_i32 = arith.constant 5 : i32
    %1151 = vector.broadcast %c5_i32 : i32 to vector<2x8xi32>
    %1152 = arith.cmpi eq, %3, %1151 : vector<2x8xi32>
    %1153 = vector.shape_cast %1150 : vector<2x1xf32> to vector<2x1xf32>
    %1154 = vector.broadcast %1153 : vector<2x1xf32> to vector<2x8xf32>
    %1155 = arith.select %1152, %1154, %943 : vector<2x8xi1>, vector<2x8xf32>
    %c5_i32_433 = arith.constant 5 : i32
    %1156 = vector.broadcast %c5_i32_433 : i32 to vector<2x8xi32>
    %1157 = arith.cmpi slt, %3, %1156 : vector<2x8xi32>
    %cst_434 = arith.constant -1.000000e+30 : f32
    %1158 = vector.broadcast %cst_434 : f32 to vector<2x8xf32>
    %1159 = arith.select %1157, %1155, %1158 : vector<2x8xi1>, vector<2x8xf32>
    %cst_435 = arith.constant dense<0xFF800000> : vector<2xf32>
    %1160 = vector.multi_reduction <maximumf>, %1159, %cst_435 [1] : vector<2x8xf32> to vector<2xf32>
    %1161 = vector.shape_cast %1160 : vector<2xf32> to vector<2x1xf32>
    %1162 = vector.broadcast %1161 : vector<2x1xf32> to vector<2x8xf32>
    %1163 = arith.subf %1159, %1162 : vector<2x8xf32>
    %1164 = math.exp %1163 : vector<2x8xf32>
    %cst_436 = arith.constant 0.000000e+00 : f32
    %1165 = vector.broadcast %cst_436 : f32 to vector<2x8xf32>
    %1166 = arith.select %1157, %1164, %1165 : vector<2x8xi1>, vector<2x8xf32>
    %cst_437 = arith.constant dense<0.000000e+00> : vector<2xf32>
    %1167 = vector.multi_reduction <add>, %1166, %cst_437 [1] : vector<2x8xf32> to vector<2xf32>
    %1168 = vector.shape_cast %1167 : vector<2xf32> to vector<2x1xf32>
    %cst_438 = arith.constant 1.000000e-30 : f32
    %1169 = vector.broadcast %cst_438 : f32 to vector<2x1xf32>
    %1170 = arith.maximumf %1168, %1169 : vector<2x1xf32>
    %1171 = vector.broadcast %1170 : vector<2x1xf32> to vector<2x8xf32>
    %1172 = arith.divf %1166, %1171 : vector<2x8xf32>
    %c5_439 = arith.constant 5 : index
    %c0_440 = arith.constant 0 : index
    %c0_441 = arith.constant 0 : index
    %1173 = vector.load %arg18[%c5_439, %c0_440, %c0_441] : memref<8x2x8xf32, #tpu.memory_space<vmem>>, vector<1x2x8xf32>
    %1174 = vector.shape_cast %1173 : vector<1x2x8xf32> to vector<2x8xf32>
    %1175 = vector.shape_cast %1172 : vector<2x8xf32> to vector<1x2x8xf32>
    tpu.vector_store %arg18[%c5_439, %c0_440, %c0_441], %1175 {strides = array<i32>} : memref<8x2x8xf32, #tpu.memory_space<vmem>>, vector<1x2x8xf32>,
    %c0_442 = arith.constant 0 : index
    %c0_443 = arith.constant 0 : index
    %c0_444 = arith.constant 0 : index
    %1176 = vector.load %arg19[%c0_442, %c0_443, %c0_444] : memref<2x8x32xf32, #tpu.memory_space<vmem>>, vector<2x8x32xf32>
    %1177 = vector.shape_cast %1172 : vector<2x8xf32> to vector<2x1x8xf32>
    "tpu.trace_start"() <{level = 10 : i32, message = "bqs,bsd->bqd"}> : () -> ()
    %cst_445 = arith.constant dense<0.000000e+00> : vector<2x1x32xf32>
    %1178 = tpu.matmul %1177, %1176, %cst_445 {dimension_numbers = #tpu.dot_dimension_numbers<[2], [1], [1], [2], [0, 0, 0, 1, 1, 2], [0], [0]>} : vector<2x1x8xf32>, vector<2x8x32xf32>, vector<2x1x32xf32> -> vector<2x1x32xf32>
    "tpu.trace_stop"() : () -> ()
    %1179 = vector.shape_cast %1178 : vector<2x1x32xf32> to vector<2x32xf32>
    %1180 = arith.truncf %1179 : vector<2x32xf32> to vector<2x32xbf16>
    %1181 = tpu.concatenate %1072, %1180 in 1 : vector<2x32xbf16>, vector<2x32xbf16> -> vector<2x64xbf16>
    %c0_446 = arith.constant 0 : index
    %c0_447 = arith.constant 0 : index
    %1182 = vector.load %arg9[%c0_446, %c0_447] : memref<64x96xbf16, #tpu.memory_space<vmem>>, vector<64x96xbf16>
    %cst_448 = arith.constant dense<0.000000e+00> : vector<2x96xf32>
    %1183 = tpu.matmul %1181, %1182, %cst_448 {dimension_numbers = #tpu.dot_dimension_numbers<[1], [0], [0], [1], [0, 0, 1, 1], [], []>} : vector<2x64xbf16>, vector<64x96xbf16>, vector<2x96xf32> -> vector<2x96xf32>
    %c0_449 = arith.constant 0 : index
    %c0_450 = arith.constant 0 : index
    %1184 = vector.load %arg11[%c0_449, %c0_450] : memref<1x96xf32, #tpu.memory_space<vmem>>, vector<1x96xf32>
    %1185 = vector.broadcast %1184 : vector<1x96xf32> to vector<2x96xf32>
    %1186 = arith.addf %1183, %1185 : vector<2x96xf32>
    %1187 = tpu.concatenate %1186, %1186 in 0 : vector<2x96xf32>, vector<2x96xf32> -> vector<4x96xf32>
    %c0_451 = arith.constant 0 : index
    %c0_452 = arith.constant 0 : index
    %1188 = vector.load %arg10[%c0_451, %c0_452] : memref<32x96xbf16, #tpu.memory_space<vmem>>, vector<32x96xbf16>
    %1189 = arith.truncf %1017 : vector<4x32xf32> to vector<4x32xbf16>
    %cst_453 = arith.constant dense<0.000000e+00> : vector<4x96xf32>
    %1190 = tpu.matmul %1189, %1188, %cst_453 {dimension_numbers = #tpu.dot_dimension_numbers<[1], [0], [0], [1], [0, 0, 1, 1], [], []>} : vector<4x32xbf16>, vector<32x96xbf16>, vector<4x96xf32> -> vector<4x96xf32>
    %c0_454 = arith.constant 0 : index
    %c0_455 = arith.constant 0 : index
    %1191 = vector.load %arg12[%c0_454, %c0_455] : memref<1x96xf32, #tpu.memory_space<vmem>>, vector<1x96xf32>
    %1192 = vector.broadcast %1191 : vector<1x96xf32> to vector<4x96xf32>
    %1193 = arith.addf %1190, %1192 : vector<4x96xf32>
    %1194 = vector.extract_strided_slice %1187 {offsets = [0, 0], sizes = [4, 32], strides = [1, 1]} : vector<4x96xf32> to vector<4x32xf32>
    %1195 = vector.extract_strided_slice %1193 {offsets = [0, 0], sizes = [4, 32], strides = [1, 1]} : vector<4x96xf32> to vector<4x32xf32>
    %1196 = arith.addf %1194, %1195 : vector<4x32xf32>
    %1197 = arith.negf %1196 : vector<4x32xf32>
    %1198 = math.exp %1197 : vector<4x32xf32>
    %cst_456 = arith.constant 1.000000e+00 : f32
    %1199 = vector.broadcast %cst_456 : f32 to vector<4x32xf32>
    %1200 = arith.addf %1199, %1198 : vector<4x32xf32>
    %1201 = arith.divf %1199, %1200 : vector<4x32xf32>
    %1202 = vector.extract_strided_slice %1187 {offsets = [0, 32], sizes = [4, 32], strides = [1, 1]} : vector<4x96xf32> to vector<4x32xf32>
    %1203 = vector.extract_strided_slice %1193 {offsets = [0, 32], sizes = [4, 32], strides = [1, 1]} : vector<4x96xf32> to vector<4x32xf32>
    %1204 = arith.addf %1202, %1203 : vector<4x32xf32>
    %1205 = arith.negf %1204 : vector<4x32xf32>
    %1206 = math.exp %1205 : vector<4x32xf32>
    %cst_457 = arith.constant 1.000000e+00 : f32
    %1207 = vector.broadcast %cst_457 : f32 to vector<4x32xf32>
    %1208 = arith.addf %1207, %1206 : vector<4x32xf32>
    %1209 = arith.divf %1207, %1208 : vector<4x32xf32>
    %1210 = vector.extract_strided_slice %1187 {offsets = [0, 64], sizes = [4, 32], strides = [1, 1]} : vector<4x96xf32> to vector<4x32xf32>
    %1211 = vector.extract_strided_slice %1193 {offsets = [0, 64], sizes = [4, 32], strides = [1, 1]} : vector<4x96xf32> to vector<4x32xf32>
    %1212 = arith.mulf %1201, %1211 : vector<4x32xf32>
    %1213 = arith.addf %1210, %1212 : vector<4x32xf32>
    %1214 = math.tanh %1213 : vector<4x32xf32>
    %cst_458 = arith.constant 1.000000e+00 : f32
    %1215 = vector.broadcast %cst_458 : f32 to vector<4x32xf32>
    %1216 = arith.subf %1215, %1209 : vector<4x32xf32>
    %1217 = arith.mulf %1216, %1214 : vector<4x32xf32>
    %1218 = arith.mulf %1209, %1017 : vector<4x32xf32>
    %1219 = arith.addf %1217, %1218 : vector<4x32xf32>
    %1220 = vector.extract_strided_slice %1071 {offsets = [0, 0], sizes = [2, 1], strides = [1, 1]} : vector<2x2xf32> to vector<2x1xf32>
    %1221 = vector.extract_strided_slice %1071 {offsets = [0, 1], sizes = [2, 1], strides = [1, 1]} : vector<2x2xf32> to vector<2x1xf32>
    %1222 = tpu.concatenate %1220, %1221 in 0 : vector<2x1xf32>, vector<2x1xf32> -> vector<4x1xf32>
    %cst_459 = arith.constant 1.000000e+00 : f32
    %1223 = vector.broadcast %cst_459 : f32 to vector<4x1xf32>
    %1224 = arith.subf %1223, %1222 : vector<4x1xf32>
    %1225 = vector.broadcast %1224 : vector<4x1xf32> to vector<4x32xf32>
    %1226 = arith.mulf %1017, %1225 : vector<4x32xf32>
    %1227 = vector.broadcast %1222 : vector<4x1xf32> to vector<4x32xf32>
    %1228 = arith.mulf %1219, %1227 : vector<4x32xf32>
    %1229 = arith.addf %1226, %1228 : vector<4x32xf32>
    %cst_460 = arith.constant 0.000000e+00 : f32
    %1230 = vector.broadcast %cst_460 : f32 to vector<2x32xf32>
    %1231 = vector.extract_strided_slice %1229 {offsets = [0, 0], sizes = [2, 32], strides = [1, 1]} : vector<4x32xf32> to vector<2x32xf32>
    %1232 = vector.broadcast %1083 : vector<2x1xf32> to vector<2x32xf32>
    %1233 = arith.mulf %1232, %1231 : vector<2x32xf32>
    %1234 = arith.addf %1230, %1233 : vector<2x32xf32>
    %1235 = vector.extract_strided_slice %1229 {offsets = [2, 0], sizes = [2, 32], strides = [1, 1]} : vector<4x32xf32> to vector<2x32xf32>
    %1236 = vector.broadcast %1092 : vector<2x1xf32> to vector<2x32xf32>
    %1237 = arith.mulf %1236, %1235 : vector<2x32xf32>
    %1238 = arith.addf %1234, %1237 : vector<2x32xf32>
    %c0_461 = arith.constant 0 : index
    %c0_462 = arith.constant 0 : index
    %1239 = vector.load %arg13[%c0_461, %c0_462] : memref<32x96xbf16, #tpu.memory_space<vmem>>, vector<32x96xbf16>
    %1240 = arith.truncf %1238 : vector<2x32xf32> to vector<2x32xbf16>
    %cst_463 = arith.constant dense<0.000000e+00> : vector<2x96xf32>
    %1241 = tpu.matmul %1240, %1239, %cst_463 {dimension_numbers = #tpu.dot_dimension_numbers<[1], [0], [0], [1], [0, 0, 1, 1], [], []>} : vector<2x32xbf16>, vector<32x96xbf16>, vector<2x96xf32> -> vector<2x96xf32>
    %c0_464 = arith.constant 0 : index
    %c0_465 = arith.constant 0 : index
    %1242 = vector.load %arg15[%c0_464, %c0_465] : memref<1x96xf32, #tpu.memory_space<vmem>>, vector<1x96xf32>
    %1243 = vector.broadcast %1242 : vector<1x96xf32> to vector<2x96xf32>
    %1244 = arith.addf %1241, %1243 : vector<2x96xf32>
    %c0_466 = arith.constant 0 : index
    %c0_467 = arith.constant 0 : index
    %1245 = vector.load %arg14[%c0_466, %c0_467] : memref<32x96xbf16, #tpu.memory_space<vmem>>, vector<32x96xbf16>
    %1246 = arith.truncf %1064 : vector<2x32xf32> to vector<2x32xbf16>
    %cst_468 = arith.constant dense<0.000000e+00> : vector<2x96xf32>
    %1247 = tpu.matmul %1246, %1245, %cst_468 {dimension_numbers = #tpu.dot_dimension_numbers<[1], [0], [0], [1], [0, 0, 1, 1], [], []>} : vector<2x32xbf16>, vector<32x96xbf16>, vector<2x96xf32> -> vector<2x96xf32>
    %c0_469 = arith.constant 0 : index
    %c0_470 = arith.constant 0 : index
    %1248 = vector.load %arg16[%c0_469, %c0_470] : memref<1x96xf32, #tpu.memory_space<vmem>>, vector<1x96xf32>
    %1249 = vector.broadcast %1248 : vector<1x96xf32> to vector<2x96xf32>
    %1250 = arith.addf %1247, %1249 : vector<2x96xf32>
    %1251 = vector.extract_strided_slice %1244 {offsets = [0, 0], sizes = [2, 32], strides = [1, 1]} : vector<2x96xf32> to vector<2x32xf32>
    %1252 = vector.extract_strided_slice %1250 {offsets = [0, 0], sizes = [2, 32], strides = [1, 1]} : vector<2x96xf32> to vector<2x32xf32>
    %1253 = arith.addf %1251, %1252 : vector<2x32xf32>
    %1254 = arith.negf %1253 : vector<2x32xf32>
    %1255 = math.exp %1254 : vector<2x32xf32>
    %cst_471 = arith.constant 1.000000e+00 : f32
    %1256 = vector.broadcast %cst_471 : f32 to vector<2x32xf32>
    %1257 = arith.addf %1256, %1255 : vector<2x32xf32>
    %1258 = arith.divf %1256, %1257 : vector<2x32xf32>
    %1259 = vector.extract_strided_slice %1244 {offsets = [0, 32], sizes = [2, 32], strides = [1, 1]} : vector<2x96xf32> to vector<2x32xf32>
    %1260 = vector.extract_strided_slice %1250 {offsets = [0, 32], sizes = [2, 32], strides = [1, 1]} : vector<2x96xf32> to vector<2x32xf32>
    %1261 = arith.addf %1259, %1260 : vector<2x32xf32>
    %1262 = arith.negf %1261 : vector<2x32xf32>
    %1263 = math.exp %1262 : vector<2x32xf32>
    %cst_472 = arith.constant 1.000000e+00 : f32
    %1264 = vector.broadcast %cst_472 : f32 to vector<2x32xf32>
    %1265 = arith.addf %1264, %1263 : vector<2x32xf32>
    %1266 = arith.divf %1264, %1265 : vector<2x32xf32>
    %1267 = vector.extract_strided_slice %1244 {offsets = [0, 64], sizes = [2, 32], strides = [1, 1]} : vector<2x96xf32> to vector<2x32xf32>
    %1268 = vector.extract_strided_slice %1250 {offsets = [0, 64], sizes = [2, 32], strides = [1, 1]} : vector<2x96xf32> to vector<2x32xf32>
    %1269 = arith.mulf %1258, %1268 : vector<2x32xf32>
    %1270 = arith.addf %1267, %1269 : vector<2x32xf32>
    %1271 = math.tanh %1270 : vector<2x32xf32>
    %cst_473 = arith.constant 1.000000e+00 : f32
    %1272 = vector.broadcast %cst_473 : f32 to vector<2x32xf32>
    %1273 = arith.subf %1272, %1266 : vector<2x32xf32>
    %1274 = arith.mulf %1273, %1271 : vector<2x32xf32>
    %1275 = arith.mulf %1266, %1064 : vector<2x32xf32>
    %1276 = arith.addf %1274, %1275 : vector<2x32xf32>
    %c5_474 = arith.constant 5 : index
    %c0_475 = arith.constant 0 : index
    %c0_476 = arith.constant 0 : index
    %1277 = vector.load %arg17[%c5_474, %c0_475, %c0_476] : memref<8x2x32xf32, #tpu.memory_space<vmem>>, vector<1x2x32xf32>
    %1278 = vector.shape_cast %1277 : vector<1x2x32xf32> to vector<2x32xf32>
    %1279 = vector.shape_cast %1276 : vector<2x32xf32> to vector<1x2x32xf32>
    tpu.vector_store %arg17[%c5_474, %c0_475, %c0_476], %1279 {strides = array<i32>} : memref<8x2x32xf32, #tpu.memory_space<vmem>>, vector<1x2x32xf32>,
    %c6 = arith.constant 6 : index
    %c0_477 = arith.constant 0 : index
    %c0_478 = arith.constant 0 : index
    %1280 = vector.load %arg1[%c6, %c0_477, %c0_478] : memref<8x2x32xf32, #tpu.memory_space<vmem>>, vector<1x2x32xf32>
    %1281 = vector.shape_cast %1280 : vector<1x2x32xf32> to vector<2x32xf32>
    %c6_479 = arith.constant 6 : index
    %c0_480 = arith.constant 0 : index
    %c0_481 = arith.constant 0 : index
    %1282 = vector.load %arg2[%c6_479, %c0_480, %c0_481] : memref<8x2x2xf32, #tpu.memory_space<vmem>>, vector<1x2x2xf32>
    %1283 = vector.shape_cast %1282 : vector<1x2x2xf32> to vector<2x2xf32>
    %1284 = arith.truncf %1281 : vector<2x32xf32> to vector<2x32xbf16>
    %cst_482 = arith.constant dense<0xFF800000> : vector<2xf32>
    %1285 = vector.multi_reduction <maximumf>, %1283, %cst_482 [1] : vector<2x2xf32> to vector<2xf32>
    %1286 = vector.shape_cast %1285 : vector<2xf32> to vector<2x1xf32>
    %cst_483 = arith.constant 0.000000e+00 : f32
    %1287 = vector.broadcast %cst_483 : f32 to vector<2x1xf32>
    %1288 = vector.extract_strided_slice %1283 {offsets = [0, 0], sizes = [2, 1], strides = [1, 1]} : vector<2x2xf32> to vector<2x1xf32>
    %1289 = arith.cmpf oge, %1288, %1286 : vector<2x1xf32>
    %cst_484 = arith.constant 5.000000e-01 : f32
    %1290 = vector.broadcast %cst_484 : f32 to vector<2x1xf32>
    %1291 = arith.cmpf olt, %1287, %1290 : vector<2x1xf32>
    %1292 = arith.andi %1289, %1291 : vector<2x1xi1>
    %cst_485 = arith.constant 1.000000e+00 : f32
    %cst_486 = arith.constant 0.000000e+00 : f32
    %1293 = vector.broadcast %cst_485 : f32 to vector<2x1xf32>
    %1294 = vector.broadcast %cst_486 : f32 to vector<2x1xf32>
    %1295 = arith.select %1292, %1293, %1294 : vector<2x1xi1>, vector<2x1xf32>
    %1296 = arith.addf %1287, %1295 : vector<2x1xf32>
    %1297 = vector.extract_strided_slice %1283 {offsets = [0, 1], sizes = [2, 1], strides = [1, 1]} : vector<2x2xf32> to vector<2x1xf32>
    %1298 = arith.cmpf oge, %1297, %1286 : vector<2x1xf32>
    %cst_487 = arith.constant 5.000000e-01 : f32
    %1299 = vector.broadcast %cst_487 : f32 to vector<2x1xf32>
    %1300 = arith.cmpf olt, %1296, %1299 : vector<2x1xf32>
    %1301 = arith.andi %1298, %1300 : vector<2x1xi1>
    %cst_488 = arith.constant 1.000000e+00 : f32
    %cst_489 = arith.constant 0.000000e+00 : f32
    %1302 = vector.broadcast %cst_488 : f32 to vector<2x1xf32>
    %1303 = vector.broadcast %cst_489 : f32 to vector<2x1xf32>
    %1304 = arith.select %1301, %1302, %1303 : vector<2x1xi1>, vector<2x1xf32>
    %cst_490 = arith.constant 0.000000e+00 : f32
    %1305 = vector.broadcast %cst_490 : f32 to vector<2x32xf32>
    %1306 = vector.extract_strided_slice %1229 {offsets = [0, 0], sizes = [2, 32], strides = [1, 1]} : vector<4x32xf32> to vector<2x32xf32>
    %1307 = vector.broadcast %1295 : vector<2x1xf32> to vector<2x32xf32>
    %1308 = arith.mulf %1307, %1306 : vector<2x32xf32>
    %1309 = arith.addf %1305, %1308 : vector<2x32xf32>
    %1310 = vector.extract_strided_slice %1229 {offsets = [2, 0], sizes = [2, 32], strides = [1, 1]} : vector<4x32xf32> to vector<2x32xf32>
    %1311 = vector.broadcast %1304 : vector<2x1xf32> to vector<2x32xf32>
    %1312 = arith.mulf %1311, %1310 : vector<2x32xf32>
    %1313 = arith.addf %1309, %1312 : vector<2x32xf32>
    %1314 = arith.truncf %1313 : vector<2x32xf32> to vector<2x32xbf16>
    %1315 = tpu.concatenate %1284, %1314 in 1 : vector<2x32xbf16>, vector<2x32xbf16> -> vector<2x64xbf16>
    %c0_491 = arith.constant 0 : index
    %c0_492 = arith.constant 0 : index
    %1316 = vector.load %arg5[%c0_491, %c0_492] : memref<64x96xbf16, #tpu.memory_space<vmem>>, vector<64x96xbf16>
    %cst_493 = arith.constant dense<0.000000e+00> : vector<2x96xf32>
    %1317 = tpu.matmul %1315, %1316, %cst_493 {dimension_numbers = #tpu.dot_dimension_numbers<[1], [0], [0], [1], [0, 0, 1, 1], [], []>} : vector<2x64xbf16>, vector<64x96xbf16>, vector<2x96xf32> -> vector<2x96xf32>
    %c0_494 = arith.constant 0 : index
    %c0_495 = arith.constant 0 : index
    %1318 = vector.load %arg7[%c0_494, %c0_495] : memref<1x96xf32, #tpu.memory_space<vmem>>, vector<1x96xf32>
    %1319 = vector.broadcast %1318 : vector<1x96xf32> to vector<2x96xf32>
    %1320 = arith.addf %1317, %1319 : vector<2x96xf32>
    %c0_496 = arith.constant 0 : index
    %c0_497 = arith.constant 0 : index
    %1321 = vector.load %arg6[%c0_496, %c0_497] : memref<32x96xbf16, #tpu.memory_space<vmem>>, vector<32x96xbf16>
    %1322 = arith.truncf %1140 : vector<2x32xf32> to vector<2x32xbf16>
    %cst_498 = arith.constant dense<0.000000e+00> : vector<2x96xf32>
    %1323 = tpu.matmul %1322, %1321, %cst_498 {dimension_numbers = #tpu.dot_dimension_numbers<[1], [0], [0], [1], [0, 0, 1, 1], [], []>} : vector<2x32xbf16>, vector<32x96xbf16>, vector<2x96xf32> -> vector<2x96xf32>
    %c0_499 = arith.constant 0 : index
    %c0_500 = arith.constant 0 : index
    %1324 = vector.load %arg8[%c0_499, %c0_500] : memref<1x96xf32, #tpu.memory_space<vmem>>, vector<1x96xf32>
    %1325 = vector.broadcast %1324 : vector<1x96xf32> to vector<2x96xf32>
    %1326 = arith.addf %1323, %1325 : vector<2x96xf32>
    %1327 = vector.extract_strided_slice %1320 {offsets = [0, 0], sizes = [2, 32], strides = [1, 1]} : vector<2x96xf32> to vector<2x32xf32>
    %1328 = vector.extract_strided_slice %1326 {offsets = [0, 0], sizes = [2, 32], strides = [1, 1]} : vector<2x96xf32> to vector<2x32xf32>
    %1329 = arith.addf %1327, %1328 : vector<2x32xf32>
    %1330 = arith.negf %1329 : vector<2x32xf32>
    %1331 = math.exp %1330 : vector<2x32xf32>
    %cst_501 = arith.constant 1.000000e+00 : f32
    %1332 = vector.broadcast %cst_501 : f32 to vector<2x32xf32>
    %1333 = arith.addf %1332, %1331 : vector<2x32xf32>
    %1334 = arith.divf %1332, %1333 : vector<2x32xf32>
    %1335 = vector.extract_strided_slice %1320 {offsets = [0, 32], sizes = [2, 32], strides = [1, 1]} : vector<2x96xf32> to vector<2x32xf32>
    %1336 = vector.extract_strided_slice %1326 {offsets = [0, 32], sizes = [2, 32], strides = [1, 1]} : vector<2x96xf32> to vector<2x32xf32>
    %1337 = arith.addf %1335, %1336 : vector<2x32xf32>
    %1338 = arith.negf %1337 : vector<2x32xf32>
    %1339 = math.exp %1338 : vector<2x32xf32>
    %cst_502 = arith.constant 1.000000e+00 : f32
    %1340 = vector.broadcast %cst_502 : f32 to vector<2x32xf32>
    %1341 = arith.addf %1340, %1339 : vector<2x32xf32>
    %1342 = arith.divf %1340, %1341 : vector<2x32xf32>
    %1343 = vector.extract_strided_slice %1320 {offsets = [0, 64], sizes = [2, 32], strides = [1, 1]} : vector<2x96xf32> to vector<2x32xf32>
    %1344 = vector.extract_strided_slice %1326 {offsets = [0, 64], sizes = [2, 32], strides = [1, 1]} : vector<2x96xf32> to vector<2x32xf32>
    %1345 = arith.mulf %1334, %1344 : vector<2x32xf32>
    %1346 = arith.addf %1343, %1345 : vector<2x32xf32>
    %1347 = math.tanh %1346 : vector<2x32xf32>
    %cst_503 = arith.constant 1.000000e+00 : f32
    %1348 = vector.broadcast %cst_503 : f32 to vector<2x32xf32>
    %1349 = arith.subf %1348, %1342 : vector<2x32xf32>
    %1350 = arith.mulf %1349, %1347 : vector<2x32xf32>
    %1351 = arith.mulf %1342, %1140 : vector<2x32xf32>
    %1352 = arith.addf %1350, %1351 : vector<2x32xf32>
    %c6_504 = arith.constant 6 : index
    %c0_505 = arith.constant 0 : index
    %c0_506 = arith.constant 0 : index
    %1353 = vector.load %arg3[%c6_504, %c0_505, %c0_506] : memref<8x1x32xf32, #tpu.memory_space<vmem>>, vector<1x1x32xf32>
    %1354 = vector.shape_cast %1353 : vector<1x1x32xf32> to vector<1x32xf32>
    %1355 = vector.broadcast %1354 : vector<1x32xf32> to vector<2x32xf32>
    %1356 = arith.addf %1352, %1355 : vector<2x32xf32>
    %1357 = vector.shape_cast %1356 : vector<2x32xf32> to vector<2x1x32xf32>
    %c0_507 = arith.constant 0 : index
    %c6_508 = arith.constant 6 : index
    %c0_509 = arith.constant 0 : index
    %1358 = vector.load %arg19[%c0_507, %c6_508, %c0_509] : memref<2x8x32xf32, #tpu.memory_space<vmem>>, vector<2x1x32xf32>
    tpu.vector_store %arg19[%c0_507, %c6_508, %c0_509], %1357 {strides = array<i32>} : memref<2x8x32xf32, #tpu.memory_space<vmem>>, vector<2x1x32xf32>,
    %1359 = vector.broadcast %2 : vector<1x32xf32> to vector<2x32xf32>
    %1360 = arith.mulf %1356, %1359 : vector<2x32xf32>
    %cst_510 = arith.constant dense<0.000000e+00> : vector<2xf32>
    %1361 = vector.multi_reduction <add>, %1360, %cst_510 [1] : vector<2x32xf32> to vector<2xf32>
    %1362 = vector.shape_cast %1361 : vector<2xf32> to vector<2x1xf32>
    %c6_i32 = arith.constant 6 : i32
    %1363 = vector.broadcast %c6_i32 : i32 to vector<2x8xi32>
    %1364 = arith.cmpi eq, %3, %1363 : vector<2x8xi32>
    %1365 = vector.shape_cast %1362 : vector<2x1xf32> to vector<2x1xf32>
    %1366 = vector.broadcast %1365 : vector<2x1xf32> to vector<2x8xf32>
    %1367 = arith.select %1364, %1366, %1155 : vector<2x8xi1>, vector<2x8xf32>
    %c6_i32_511 = arith.constant 6 : i32
    %1368 = vector.broadcast %c6_i32_511 : i32 to vector<2x8xi32>
    %1369 = arith.cmpi slt, %3, %1368 : vector<2x8xi32>
    %cst_512 = arith.constant -1.000000e+30 : f32
    %1370 = vector.broadcast %cst_512 : f32 to vector<2x8xf32>
    %1371 = arith.select %1369, %1367, %1370 : vector<2x8xi1>, vector<2x8xf32>
    %cst_513 = arith.constant dense<0xFF800000> : vector<2xf32>
    %1372 = vector.multi_reduction <maximumf>, %1371, %cst_513 [1] : vector<2x8xf32> to vector<2xf32>
    %1373 = vector.shape_cast %1372 : vector<2xf32> to vector<2x1xf32>
    %1374 = vector.broadcast %1373 : vector<2x1xf32> to vector<2x8xf32>
    %1375 = arith.subf %1371, %1374 : vector<2x8xf32>
    %1376 = math.exp %1375 : vector<2x8xf32>
    %cst_514 = arith.constant 0.000000e+00 : f32
    %1377 = vector.broadcast %cst_514 : f32 to vector<2x8xf32>
    %1378 = arith.select %1369, %1376, %1377 : vector<2x8xi1>, vector<2x8xf32>
    %cst_515 = arith.constant dense<0.000000e+00> : vector<2xf32>
    %1379 = vector.multi_reduction <add>, %1378, %cst_515 [1] : vector<2x8xf32> to vector<2xf32>
    %1380 = vector.shape_cast %1379 : vector<2xf32> to vector<2x1xf32>
    %cst_516 = arith.constant 1.000000e-30 : f32
    %1381 = vector.broadcast %cst_516 : f32 to vector<2x1xf32>
    %1382 = arith.maximumf %1380, %1381 : vector<2x1xf32>
    %1383 = vector.broadcast %1382 : vector<2x1xf32> to vector<2x8xf32>
    %1384 = arith.divf %1378, %1383 : vector<2x8xf32>
    %c6_517 = arith.constant 6 : index
    %c0_518 = arith.constant 0 : index
    %c0_519 = arith.constant 0 : index
    %1385 = vector.load %arg18[%c6_517, %c0_518, %c0_519] : memref<8x2x8xf32, #tpu.memory_space<vmem>>, vector<1x2x8xf32>
    %1386 = vector.shape_cast %1385 : vector<1x2x8xf32> to vector<2x8xf32>
    %1387 = vector.shape_cast %1384 : vector<2x8xf32> to vector<1x2x8xf32>
    tpu.vector_store %arg18[%c6_517, %c0_518, %c0_519], %1387 {strides = array<i32>} : memref<8x2x8xf32, #tpu.memory_space<vmem>>, vector<1x2x8xf32>,
    %c0_520 = arith.constant 0 : index
    %c0_521 = arith.constant 0 : index
    %c0_522 = arith.constant 0 : index
    %1388 = vector.load %arg19[%c0_520, %c0_521, %c0_522] : memref<2x8x32xf32, #tpu.memory_space<vmem>>, vector<2x8x32xf32>
    %1389 = vector.shape_cast %1384 : vector<2x8xf32> to vector<2x1x8xf32>
    "tpu.trace_start"() <{level = 10 : i32, message = "bqs,bsd->bqd"}> : () -> ()
    %cst_523 = arith.constant dense<0.000000e+00> : vector<2x1x32xf32>
    %1390 = tpu.matmul %1389, %1388, %cst_523 {dimension_numbers = #tpu.dot_dimension_numbers<[2], [1], [1], [2], [0, 0, 0, 1, 1, 2], [0], [0]>} : vector<2x1x8xf32>, vector<2x8x32xf32>, vector<2x1x32xf32> -> vector<2x1x32xf32>
    "tpu.trace_stop"() : () -> ()
    %1391 = vector.shape_cast %1390 : vector<2x1x32xf32> to vector<2x32xf32>
    %1392 = arith.truncf %1391 : vector<2x32xf32> to vector<2x32xbf16>
    %1393 = tpu.concatenate %1284, %1392 in 1 : vector<2x32xbf16>, vector<2x32xbf16> -> vector<2x64xbf16>
    %c0_524 = arith.constant 0 : index
    %c0_525 = arith.constant 0 : index
    %1394 = vector.load %arg9[%c0_524, %c0_525] : memref<64x96xbf16, #tpu.memory_space<vmem>>, vector<64x96xbf16>
    %cst_526 = arith.constant dense<0.000000e+00> : vector<2x96xf32>
    %1395 = tpu.matmul %1393, %1394, %cst_526 {dimension_numbers = #tpu.dot_dimension_numbers<[1], [0], [0], [1], [0, 0, 1, 1], [], []>} : vector<2x64xbf16>, vector<64x96xbf16>, vector<2x96xf32> -> vector<2x96xf32>
    %c0_527 = arith.constant 0 : index
    %c0_528 = arith.constant 0 : index
    %1396 = vector.load %arg11[%c0_527, %c0_528] : memref<1x96xf32, #tpu.memory_space<vmem>>, vector<1x96xf32>
    %1397 = vector.broadcast %1396 : vector<1x96xf32> to vector<2x96xf32>
    %1398 = arith.addf %1395, %1397 : vector<2x96xf32>
    %1399 = tpu.concatenate %1398, %1398 in 0 : vector<2x96xf32>, vector<2x96xf32> -> vector<4x96xf32>
    %c0_529 = arith.constant 0 : index
    %c0_530 = arith.constant 0 : index
    %1400 = vector.load %arg10[%c0_529, %c0_530] : memref<32x96xbf16, #tpu.memory_space<vmem>>, vector<32x96xbf16>
    %1401 = arith.truncf %1229 : vector<4x32xf32> to vector<4x32xbf16>
    %cst_531 = arith.constant dense<0.000000e+00> : vector<4x96xf32>
    %1402 = tpu.matmul %1401, %1400, %cst_531 {dimension_numbers = #tpu.dot_dimension_numbers<[1], [0], [0], [1], [0, 0, 1, 1], [], []>} : vector<4x32xbf16>, vector<32x96xbf16>, vector<4x96xf32> -> vector<4x96xf32>
    %c0_532 = arith.constant 0 : index
    %c0_533 = arith.constant 0 : index
    %1403 = vector.load %arg12[%c0_532, %c0_533] : memref<1x96xf32, #tpu.memory_space<vmem>>, vector<1x96xf32>
    %1404 = vector.broadcast %1403 : vector<1x96xf32> to vector<4x96xf32>
    %1405 = arith.addf %1402, %1404 : vector<4x96xf32>
    %1406 = vector.extract_strided_slice %1399 {offsets = [0, 0], sizes = [4, 32], strides = [1, 1]} : vector<4x96xf32> to vector<4x32xf32>
    %1407 = vector.extract_strided_slice %1405 {offsets = [0, 0], sizes = [4, 32], strides = [1, 1]} : vector<4x96xf32> to vector<4x32xf32>
    %1408 = arith.addf %1406, %1407 : vector<4x32xf32>
    %1409 = arith.negf %1408 : vector<4x32xf32>
    %1410 = math.exp %1409 : vector<4x32xf32>
    %cst_534 = arith.constant 1.000000e+00 : f32
    %1411 = vector.broadcast %cst_534 : f32 to vector<4x32xf32>
    %1412 = arith.addf %1411, %1410 : vector<4x32xf32>
    %1413 = arith.divf %1411, %1412 : vector<4x32xf32>
    %1414 = vector.extract_strided_slice %1399 {offsets = [0, 32], sizes = [4, 32], strides = [1, 1]} : vector<4x96xf32> to vector<4x32xf32>
    %1415 = vector.extract_strided_slice %1405 {offsets = [0, 32], sizes = [4, 32], strides = [1, 1]} : vector<4x96xf32> to vector<4x32xf32>
    %1416 = arith.addf %1414, %1415 : vector<4x32xf32>
    %1417 = arith.negf %1416 : vector<4x32xf32>
    %1418 = math.exp %1417 : vector<4x32xf32>
    %cst_535 = arith.constant 1.000000e+00 : f32
    %1419 = vector.broadcast %cst_535 : f32 to vector<4x32xf32>
    %1420 = arith.addf %1419, %1418 : vector<4x32xf32>
    %1421 = arith.divf %1419, %1420 : vector<4x32xf32>
    %1422 = vector.extract_strided_slice %1399 {offsets = [0, 64], sizes = [4, 32], strides = [1, 1]} : vector<4x96xf32> to vector<4x32xf32>
    %1423 = vector.extract_strided_slice %1405 {offsets = [0, 64], sizes = [4, 32], strides = [1, 1]} : vector<4x96xf32> to vector<4x32xf32>
    %1424 = arith.mulf %1413, %1423 : vector<4x32xf32>
    %1425 = arith.addf %1422, %1424 : vector<4x32xf32>
    %1426 = math.tanh %1425 : vector<4x32xf32>
    %cst_536 = arith.constant 1.000000e+00 : f32
    %1427 = vector.broadcast %cst_536 : f32 to vector<4x32xf32>
    %1428 = arith.subf %1427, %1421 : vector<4x32xf32>
    %1429 = arith.mulf %1428, %1426 : vector<4x32xf32>
    %1430 = arith.mulf %1421, %1229 : vector<4x32xf32>
    %1431 = arith.addf %1429, %1430 : vector<4x32xf32>
    %1432 = vector.extract_strided_slice %1283 {offsets = [0, 0], sizes = [2, 1], strides = [1, 1]} : vector<2x2xf32> to vector<2x1xf32>
    %1433 = vector.extract_strided_slice %1283 {offsets = [0, 1], sizes = [2, 1], strides = [1, 1]} : vector<2x2xf32> to vector<2x1xf32>
    %1434 = tpu.concatenate %1432, %1433 in 0 : vector<2x1xf32>, vector<2x1xf32> -> vector<4x1xf32>
    %cst_537 = arith.constant 1.000000e+00 : f32
    %1435 = vector.broadcast %cst_537 : f32 to vector<4x1xf32>
    %1436 = arith.subf %1435, %1434 : vector<4x1xf32>
    %1437 = vector.broadcast %1436 : vector<4x1xf32> to vector<4x32xf32>
    %1438 = arith.mulf %1229, %1437 : vector<4x32xf32>
    %1439 = vector.broadcast %1434 : vector<4x1xf32> to vector<4x32xf32>
    %1440 = arith.mulf %1431, %1439 : vector<4x32xf32>
    %1441 = arith.addf %1438, %1440 : vector<4x32xf32>
    %cst_538 = arith.constant 0.000000e+00 : f32
    %1442 = vector.broadcast %cst_538 : f32 to vector<2x32xf32>
    %1443 = vector.extract_strided_slice %1441 {offsets = [0, 0], sizes = [2, 32], strides = [1, 1]} : vector<4x32xf32> to vector<2x32xf32>
    %1444 = vector.broadcast %1295 : vector<2x1xf32> to vector<2x32xf32>
    %1445 = arith.mulf %1444, %1443 : vector<2x32xf32>
    %1446 = arith.addf %1442, %1445 : vector<2x32xf32>
    %1447 = vector.extract_strided_slice %1441 {offsets = [2, 0], sizes = [2, 32], strides = [1, 1]} : vector<4x32xf32> to vector<2x32xf32>
    %1448 = vector.broadcast %1304 : vector<2x1xf32> to vector<2x32xf32>
    %1449 = arith.mulf %1448, %1447 : vector<2x32xf32>
    %1450 = arith.addf %1446, %1449 : vector<2x32xf32>
    %c0_539 = arith.constant 0 : index
    %c0_540 = arith.constant 0 : index
    %1451 = vector.load %arg13[%c0_539, %c0_540] : memref<32x96xbf16, #tpu.memory_space<vmem>>, vector<32x96xbf16>
    %1452 = arith.truncf %1450 : vector<2x32xf32> to vector<2x32xbf16>
    %cst_541 = arith.constant dense<0.000000e+00> : vector<2x96xf32>
    %1453 = tpu.matmul %1452, %1451, %cst_541 {dimension_numbers = #tpu.dot_dimension_numbers<[1], [0], [0], [1], [0, 0, 1, 1], [], []>} : vector<2x32xbf16>, vector<32x96xbf16>, vector<2x96xf32> -> vector<2x96xf32>
    %c0_542 = arith.constant 0 : index
    %c0_543 = arith.constant 0 : index
    %1454 = vector.load %arg15[%c0_542, %c0_543] : memref<1x96xf32, #tpu.memory_space<vmem>>, vector<1x96xf32>
    %1455 = vector.broadcast %1454 : vector<1x96xf32> to vector<2x96xf32>
    %1456 = arith.addf %1453, %1455 : vector<2x96xf32>
    %c0_544 = arith.constant 0 : index
    %c0_545 = arith.constant 0 : index
    %1457 = vector.load %arg14[%c0_544, %c0_545] : memref<32x96xbf16, #tpu.memory_space<vmem>>, vector<32x96xbf16>
    %1458 = arith.truncf %1276 : vector<2x32xf32> to vector<2x32xbf16>
    %cst_546 = arith.constant dense<0.000000e+00> : vector<2x96xf32>
    %1459 = tpu.matmul %1458, %1457, %cst_546 {dimension_numbers = #tpu.dot_dimension_numbers<[1], [0], [0], [1], [0, 0, 1, 1], [], []>} : vector<2x32xbf16>, vector<32x96xbf16>, vector<2x96xf32> -> vector<2x96xf32>
    %c0_547 = arith.constant 0 : index
    %c0_548 = arith.constant 0 : index
    %1460 = vector.load %arg16[%c0_547, %c0_548] : memref<1x96xf32, #tpu.memory_space<vmem>>, vector<1x96xf32>
    %1461 = vector.broadcast %1460 : vector<1x96xf32> to vector<2x96xf32>
    %1462 = arith.addf %1459, %1461 : vector<2x96xf32>
    %1463 = vector.extract_strided_slice %1456 {offsets = [0, 0], sizes = [2, 32], strides = [1, 1]} : vector<2x96xf32> to vector<2x32xf32>
    %1464 = vector.extract_strided_slice %1462 {offsets = [0, 0], sizes = [2, 32], strides = [1, 1]} : vector<2x96xf32> to vector<2x32xf32>
    %1465 = arith.addf %1463, %1464 : vector<2x32xf32>
    %1466 = arith.negf %1465 : vector<2x32xf32>
    %1467 = math.exp %1466 : vector<2x32xf32>
    %cst_549 = arith.constant 1.000000e+00 : f32
    %1468 = vector.broadcast %cst_549 : f32 to vector<2x32xf32>
    %1469 = arith.addf %1468, %1467 : vector<2x32xf32>
    %1470 = arith.divf %1468, %1469 : vector<2x32xf32>
    %1471 = vector.extract_strided_slice %1456 {offsets = [0, 32], sizes = [2, 32], strides = [1, 1]} : vector<2x96xf32> to vector<2x32xf32>
    %1472 = vector.extract_strided_slice %1462 {offsets = [0, 32], sizes = [2, 32], strides = [1, 1]} : vector<2x96xf32> to vector<2x32xf32>
    %1473 = arith.addf %1471, %1472 : vector<2x32xf32>
    %1474 = arith.negf %1473 : vector<2x32xf32>
    %1475 = math.exp %1474 : vector<2x32xf32>
    %cst_550 = arith.constant 1.000000e+00 : f32
    %1476 = vector.broadcast %cst_550 : f32 to vector<2x32xf32>
    %1477 = arith.addf %1476, %1475 : vector<2x32xf32>
    %1478 = arith.divf %1476, %1477 : vector<2x32xf32>
    %1479 = vector.extract_strided_slice %1456 {offsets = [0, 64], sizes = [2, 32], strides = [1, 1]} : vector<2x96xf32> to vector<2x32xf32>
    %1480 = vector.extract_strided_slice %1462 {offsets = [0, 64], sizes = [2, 32], strides = [1, 1]} : vector<2x96xf32> to vector<2x32xf32>
    %1481 = arith.mulf %1470, %1480 : vector<2x32xf32>
    %1482 = arith.addf %1479, %1481 : vector<2x32xf32>
    %1483 = math.tanh %1482 : vector<2x32xf32>
    %cst_551 = arith.constant 1.000000e+00 : f32
    %1484 = vector.broadcast %cst_551 : f32 to vector<2x32xf32>
    %1485 = arith.subf %1484, %1478 : vector<2x32xf32>
    %1486 = arith.mulf %1485, %1483 : vector<2x32xf32>
    %1487 = arith.mulf %1478, %1276 : vector<2x32xf32>
    %1488 = arith.addf %1486, %1487 : vector<2x32xf32>
    %c6_552 = arith.constant 6 : index
    %c0_553 = arith.constant 0 : index
    %c0_554 = arith.constant 0 : index
    %1489 = vector.load %arg17[%c6_552, %c0_553, %c0_554] : memref<8x2x32xf32, #tpu.memory_space<vmem>>, vector<1x2x32xf32>
    %1490 = vector.shape_cast %1489 : vector<1x2x32xf32> to vector<2x32xf32>
    %1491 = vector.shape_cast %1488 : vector<2x32xf32> to vector<1x2x32xf32>
    tpu.vector_store %arg17[%c6_552, %c0_553, %c0_554], %1491 {strides = array<i32>} : memref<8x2x32xf32, #tpu.memory_space<vmem>>, vector<1x2x32xf32>,
    %c7 = arith.constant 7 : index
    %c0_555 = arith.constant 0 : index
    %c0_556 = arith.constant 0 : index
    %1492 = vector.load %arg1[%c7, %c0_555, %c0_556] : memref<8x2x32xf32, #tpu.memory_space<vmem>>, vector<1x2x32xf32>
    %1493 = vector.shape_cast %1492 : vector<1x2x32xf32> to vector<2x32xf32>
    %c7_557 = arith.constant 7 : index
    %c0_558 = arith.constant 0 : index
    %c0_559 = arith.constant 0 : index
    %1494 = vector.load %arg2[%c7_557, %c0_558, %c0_559] : memref<8x2x2xf32, #tpu.memory_space<vmem>>, vector<1x2x2xf32>
    %1495 = vector.shape_cast %1494 : vector<1x2x2xf32> to vector<2x2xf32>
    %1496 = arith.truncf %1493 : vector<2x32xf32> to vector<2x32xbf16>
    %cst_560 = arith.constant dense<0xFF800000> : vector<2xf32>
    %1497 = vector.multi_reduction <maximumf>, %1495, %cst_560 [1] : vector<2x2xf32> to vector<2xf32>
    %1498 = vector.shape_cast %1497 : vector<2xf32> to vector<2x1xf32>
    %cst_561 = arith.constant 0.000000e+00 : f32
    %1499 = vector.broadcast %cst_561 : f32 to vector<2x1xf32>
    %1500 = vector.extract_strided_slice %1495 {offsets = [0, 0], sizes = [2, 1], strides = [1, 1]} : vector<2x2xf32> to vector<2x1xf32>
    %1501 = arith.cmpf oge, %1500, %1498 : vector<2x1xf32>
    %cst_562 = arith.constant 5.000000e-01 : f32
    %1502 = vector.broadcast %cst_562 : f32 to vector<2x1xf32>
    %1503 = arith.cmpf olt, %1499, %1502 : vector<2x1xf32>
    %1504 = arith.andi %1501, %1503 : vector<2x1xi1>
    %cst_563 = arith.constant 1.000000e+00 : f32
    %cst_564 = arith.constant 0.000000e+00 : f32
    %1505 = vector.broadcast %cst_563 : f32 to vector<2x1xf32>
    %1506 = vector.broadcast %cst_564 : f32 to vector<2x1xf32>
    %1507 = arith.select %1504, %1505, %1506 : vector<2x1xi1>, vector<2x1xf32>
    %1508 = arith.addf %1499, %1507 : vector<2x1xf32>
    %1509 = vector.extract_strided_slice %1495 {offsets = [0, 1], sizes = [2, 1], strides = [1, 1]} : vector<2x2xf32> to vector<2x1xf32>
    %1510 = arith.cmpf oge, %1509, %1498 : vector<2x1xf32>
    %cst_565 = arith.constant 5.000000e-01 : f32
    %1511 = vector.broadcast %cst_565 : f32 to vector<2x1xf32>
    %1512 = arith.cmpf olt, %1508, %1511 : vector<2x1xf32>
    %1513 = arith.andi %1510, %1512 : vector<2x1xi1>
    %cst_566 = arith.constant 1.000000e+00 : f32
    %cst_567 = arith.constant 0.000000e+00 : f32
    %1514 = vector.broadcast %cst_566 : f32 to vector<2x1xf32>
    %1515 = vector.broadcast %cst_567 : f32 to vector<2x1xf32>
    %1516 = arith.select %1513, %1514, %1515 : vector<2x1xi1>, vector<2x1xf32>
    %cst_568 = arith.constant 0.000000e+00 : f32
    %1517 = vector.broadcast %cst_568 : f32 to vector<2x32xf32>
    %1518 = vector.extract_strided_slice %1441 {offsets = [0, 0], sizes = [2, 32], strides = [1, 1]} : vector<4x32xf32> to vector<2x32xf32>
    %1519 = vector.broadcast %1507 : vector<2x1xf32> to vector<2x32xf32>
    %1520 = arith.mulf %1519, %1518 : vector<2x32xf32>
    %1521 = arith.addf %1517, %1520 : vector<2x32xf32>
    %1522 = vector.extract_strided_slice %1441 {offsets = [2, 0], sizes = [2, 32], strides = [1, 1]} : vector<4x32xf32> to vector<2x32xf32>
    %1523 = vector.broadcast %1516 : vector<2x1xf32> to vector<2x32xf32>
    %1524 = arith.mulf %1523, %1522 : vector<2x32xf32>
    %1525 = arith.addf %1521, %1524 : vector<2x32xf32>
    %1526 = arith.truncf %1525 : vector<2x32xf32> to vector<2x32xbf16>
    %1527 = tpu.concatenate %1496, %1526 in 1 : vector<2x32xbf16>, vector<2x32xbf16> -> vector<2x64xbf16>
    %c0_569 = arith.constant 0 : index
    %c0_570 = arith.constant 0 : index
    %1528 = vector.load %arg5[%c0_569, %c0_570] : memref<64x96xbf16, #tpu.memory_space<vmem>>, vector<64x96xbf16>
    %cst_571 = arith.constant dense<0.000000e+00> : vector<2x96xf32>
    %1529 = tpu.matmul %1527, %1528, %cst_571 {dimension_numbers = #tpu.dot_dimension_numbers<[1], [0], [0], [1], [0, 0, 1, 1], [], []>} : vector<2x64xbf16>, vector<64x96xbf16>, vector<2x96xf32> -> vector<2x96xf32>
    %c0_572 = arith.constant 0 : index
    %c0_573 = arith.constant 0 : index
    %1530 = vector.load %arg7[%c0_572, %c0_573] : memref<1x96xf32, #tpu.memory_space<vmem>>, vector<1x96xf32>
    %1531 = vector.broadcast %1530 : vector<1x96xf32> to vector<2x96xf32>
    %1532 = arith.addf %1529, %1531 : vector<2x96xf32>
    %c0_574 = arith.constant 0 : index
    %c0_575 = arith.constant 0 : index
    %1533 = vector.load %arg6[%c0_574, %c0_575] : memref<32x96xbf16, #tpu.memory_space<vmem>>, vector<32x96xbf16>
    %1534 = arith.truncf %1352 : vector<2x32xf32> to vector<2x32xbf16>
    %cst_576 = arith.constant dense<0.000000e+00> : vector<2x96xf32>
    %1535 = tpu.matmul %1534, %1533, %cst_576 {dimension_numbers = #tpu.dot_dimension_numbers<[1], [0], [0], [1], [0, 0, 1, 1], [], []>} : vector<2x32xbf16>, vector<32x96xbf16>, vector<2x96xf32> -> vector<2x96xf32>
    %c0_577 = arith.constant 0 : index
    %c0_578 = arith.constant 0 : index
    %1536 = vector.load %arg8[%c0_577, %c0_578] : memref<1x96xf32, #tpu.memory_space<vmem>>, vector<1x96xf32>
    %1537 = vector.broadcast %1536 : vector<1x96xf32> to vector<2x96xf32>
    %1538 = arith.addf %1535, %1537 : vector<2x96xf32>
    %1539 = vector.extract_strided_slice %1532 {offsets = [0, 0], sizes = [2, 32], strides = [1, 1]} : vector<2x96xf32> to vector<2x32xf32>
    %1540 = vector.extract_strided_slice %1538 {offsets = [0, 0], sizes = [2, 32], strides = [1, 1]} : vector<2x96xf32> to vector<2x32xf32>
    %1541 = arith.addf %1539, %1540 : vector<2x32xf32>
    %1542 = arith.negf %1541 : vector<2x32xf32>
    %1543 = math.exp %1542 : vector<2x32xf32>
    %cst_579 = arith.constant 1.000000e+00 : f32
    %1544 = vector.broadcast %cst_579 : f32 to vector<2x32xf32>
    %1545 = arith.addf %1544, %1543 : vector<2x32xf32>
    %1546 = arith.divf %1544, %1545 : vector<2x32xf32>
    %1547 = vector.extract_strided_slice %1532 {offsets = [0, 32], sizes = [2, 32], strides = [1, 1]} : vector<2x96xf32> to vector<2x32xf32>
    %1548 = vector.extract_strided_slice %1538 {offsets = [0, 32], sizes = [2, 32], strides = [1, 1]} : vector<2x96xf32> to vector<2x32xf32>
    %1549 = arith.addf %1547, %1548 : vector<2x32xf32>
    %1550 = arith.negf %1549 : vector<2x32xf32>
    %1551 = math.exp %1550 : vector<2x32xf32>
    %cst_580 = arith.constant 1.000000e+00 : f32
    %1552 = vector.broadcast %cst_580 : f32 to vector<2x32xf32>
    %1553 = arith.addf %1552, %1551 : vector<2x32xf32>
    %1554 = arith.divf %1552, %1553 : vector<2x32xf32>
    %1555 = vector.extract_strided_slice %1532 {offsets = [0, 64], sizes = [2, 32], strides = [1, 1]} : vector<2x96xf32> to vector<2x32xf32>
    %1556 = vector.extract_strided_slice %1538 {offsets = [0, 64], sizes = [2, 32], strides = [1, 1]} : vector<2x96xf32> to vector<2x32xf32>
    %1557 = arith.mulf %1546, %1556 : vector<2x32xf32>
    %1558 = arith.addf %1555, %1557 : vector<2x32xf32>
    %1559 = math.tanh %1558 : vector<2x32xf32>
    %cst_581 = arith.constant 1.000000e+00 : f32
    %1560 = vector.broadcast %cst_581 : f32 to vector<2x32xf32>
    %1561 = arith.subf %1560, %1554 : vector<2x32xf32>
    %1562 = arith.mulf %1561, %1559 : vector<2x32xf32>
    %1563 = arith.mulf %1554, %1352 : vector<2x32xf32>
    %1564 = arith.addf %1562, %1563 : vector<2x32xf32>
    %c7_582 = arith.constant 7 : index
    %c0_583 = arith.constant 0 : index
    %c0_584 = arith.constant 0 : index
    %1565 = vector.load %arg3[%c7_582, %c0_583, %c0_584] : memref<8x1x32xf32, #tpu.memory_space<vmem>>, vector<1x1x32xf32>
    %1566 = vector.shape_cast %1565 : vector<1x1x32xf32> to vector<1x32xf32>
    %1567 = vector.broadcast %1566 : vector<1x32xf32> to vector<2x32xf32>
    %1568 = arith.addf %1564, %1567 : vector<2x32xf32>
    %1569 = vector.shape_cast %1568 : vector<2x32xf32> to vector<2x1x32xf32>
    %c0_585 = arith.constant 0 : index
    %c7_586 = arith.constant 7 : index
    %c0_587 = arith.constant 0 : index
    %1570 = vector.load %arg19[%c0_585, %c7_586, %c0_587] : memref<2x8x32xf32, #tpu.memory_space<vmem>>, vector<2x1x32xf32>
    tpu.vector_store %arg19[%c0_585, %c7_586, %c0_587], %1569 {strides = array<i32>} : memref<2x8x32xf32, #tpu.memory_space<vmem>>, vector<2x1x32xf32>,
    %1571 = vector.broadcast %2 : vector<1x32xf32> to vector<2x32xf32>
    %1572 = arith.mulf %1568, %1571 : vector<2x32xf32>
    %cst_588 = arith.constant dense<0.000000e+00> : vector<2xf32>
    %1573 = vector.multi_reduction <add>, %1572, %cst_588 [1] : vector<2x32xf32> to vector<2xf32>
    %1574 = vector.shape_cast %1573 : vector<2xf32> to vector<2x1xf32>
    %c7_i32 = arith.constant 7 : i32
    %1575 = vector.broadcast %c7_i32 : i32 to vector<2x8xi32>
    %1576 = arith.cmpi eq, %3, %1575 : vector<2x8xi32>
    %1577 = vector.shape_cast %1574 : vector<2x1xf32> to vector<2x1xf32>
    %1578 = vector.broadcast %1577 : vector<2x1xf32> to vector<2x8xf32>
    %1579 = arith.select %1576, %1578, %1367 : vector<2x8xi1>, vector<2x8xf32>
    %c7_i32_589 = arith.constant 7 : i32
    %1580 = vector.broadcast %c7_i32_589 : i32 to vector<2x8xi32>
    %1581 = arith.cmpi slt, %3, %1580 : vector<2x8xi32>
    %cst_590 = arith.constant -1.000000e+30 : f32
    %1582 = vector.broadcast %cst_590 : f32 to vector<2x8xf32>
    %1583 = arith.select %1581, %1579, %1582 : vector<2x8xi1>, vector<2x8xf32>
    %cst_591 = arith.constant dense<0xFF800000> : vector<2xf32>
    %1584 = vector.multi_reduction <maximumf>, %1583, %cst_591 [1] : vector<2x8xf32> to vector<2xf32>
    %1585 = vector.shape_cast %1584 : vector<2xf32> to vector<2x1xf32>
    %1586 = vector.broadcast %1585 : vector<2x1xf32> to vector<2x8xf32>
    %1587 = arith.subf %1583, %1586 : vector<2x8xf32>
    %1588 = math.exp %1587 : vector<2x8xf32>
    %cst_592 = arith.constant 0.000000e+00 : f32
    %1589 = vector.broadcast %cst_592 : f32 to vector<2x8xf32>
    %1590 = arith.select %1581, %1588, %1589 : vector<2x8xi1>, vector<2x8xf32>
    %cst_593 = arith.constant dense<0.000000e+00> : vector<2xf32>
    %1591 = vector.multi_reduction <add>, %1590, %cst_593 [1] : vector<2x8xf32> to vector<2xf32>
    %1592 = vector.shape_cast %1591 : vector<2xf32> to vector<2x1xf32>
    %cst_594 = arith.constant 1.000000e-30 : f32
    %1593 = vector.broadcast %cst_594 : f32 to vector<2x1xf32>
    %1594 = arith.maximumf %1592, %1593 : vector<2x1xf32>
    %1595 = vector.broadcast %1594 : vector<2x1xf32> to vector<2x8xf32>
    %1596 = arith.divf %1590, %1595 : vector<2x8xf32>
    %c7_595 = arith.constant 7 : index
    %c0_596 = arith.constant 0 : index
    %c0_597 = arith.constant 0 : index
    %1597 = vector.load %arg18[%c7_595, %c0_596, %c0_597] : memref<8x2x8xf32, #tpu.memory_space<vmem>>, vector<1x2x8xf32>
    %1598 = vector.shape_cast %1597 : vector<1x2x8xf32> to vector<2x8xf32>
    %1599 = vector.shape_cast %1596 : vector<2x8xf32> to vector<1x2x8xf32>
    tpu.vector_store %arg18[%c7_595, %c0_596, %c0_597], %1599 {strides = array<i32>} : memref<8x2x8xf32, #tpu.memory_space<vmem>>, vector<1x2x8xf32>,
    %c0_598 = arith.constant 0 : index
    %c0_599 = arith.constant 0 : index
    %c0_600 = arith.constant 0 : index
    %1600 = vector.load %arg19[%c0_598, %c0_599, %c0_600] : memref<2x8x32xf32, #tpu.memory_space<vmem>>, vector<2x8x32xf32>
    %1601 = vector.shape_cast %1596 : vector<2x8xf32> to vector<2x1x8xf32>
    "tpu.trace_start"() <{level = 10 : i32, message = "bqs,bsd->bqd"}> : () -> ()
    %cst_601 = arith.constant dense<0.000000e+00> : vector<2x1x32xf32>
    %1602 = tpu.matmul %1601, %1600, %cst_601 {dimension_numbers = #tpu.dot_dimension_numbers<[2], [1], [1], [2], [0, 0, 0, 1, 1, 2], [0], [0]>} : vector<2x1x8xf32>, vector<2x8x32xf32>, vector<2x1x32xf32> -> vector<2x1x32xf32>
    "tpu.trace_stop"() : () -> ()
    %1603 = vector.shape_cast %1602 : vector<2x1x32xf32> to vector<2x32xf32>
    %1604 = arith.truncf %1603 : vector<2x32xf32> to vector<2x32xbf16>
    %1605 = tpu.concatenate %1496, %1604 in 1 : vector<2x32xbf16>, vector<2x32xbf16> -> vector<2x64xbf16>
    %c0_602 = arith.constant 0 : index
    %c0_603 = arith.constant 0 : index
    %1606 = vector.load %arg9[%c0_602, %c0_603] : memref<64x96xbf16, #tpu.memory_space<vmem>>, vector<64x96xbf16>
    %cst_604 = arith.constant dense<0.000000e+00> : vector<2x96xf32>
    %1607 = tpu.matmul %1605, %1606, %cst_604 {dimension_numbers = #tpu.dot_dimension_numbers<[1], [0], [0], [1], [0, 0, 1, 1], [], []>} : vector<2x64xbf16>, vector<64x96xbf16>, vector<2x96xf32> -> vector<2x96xf32>
    %c0_605 = arith.constant 0 : index
    %c0_606 = arith.constant 0 : index
    %1608 = vector.load %arg11[%c0_605, %c0_606] : memref<1x96xf32, #tpu.memory_space<vmem>>, vector<1x96xf32>
    %1609 = vector.broadcast %1608 : vector<1x96xf32> to vector<2x96xf32>
    %1610 = arith.addf %1607, %1609 : vector<2x96xf32>
    %1611 = tpu.concatenate %1610, %1610 in 0 : vector<2x96xf32>, vector<2x96xf32> -> vector<4x96xf32>
    %c0_607 = arith.constant 0 : index
    %c0_608 = arith.constant 0 : index
    %1612 = vector.load %arg10[%c0_607, %c0_608] : memref<32x96xbf16, #tpu.memory_space<vmem>>, vector<32x96xbf16>
    %1613 = arith.truncf %1441 : vector<4x32xf32> to vector<4x32xbf16>
    %cst_609 = arith.constant dense<0.000000e+00> : vector<4x96xf32>
    %1614 = tpu.matmul %1613, %1612, %cst_609 {dimension_numbers = #tpu.dot_dimension_numbers<[1], [0], [0], [1], [0, 0, 1, 1], [], []>} : vector<4x32xbf16>, vector<32x96xbf16>, vector<4x96xf32> -> vector<4x96xf32>
    %c0_610 = arith.constant 0 : index
    %c0_611 = arith.constant 0 : index
    %1615 = vector.load %arg12[%c0_610, %c0_611] : memref<1x96xf32, #tpu.memory_space<vmem>>, vector<1x96xf32>
    %1616 = vector.broadcast %1615 : vector<1x96xf32> to vector<4x96xf32>
    %1617 = arith.addf %1614, %1616 : vector<4x96xf32>
    %1618 = vector.extract_strided_slice %1611 {offsets = [0, 0], sizes = [4, 32], strides = [1, 1]} : vector<4x96xf32> to vector<4x32xf32>
    %1619 = vector.extract_strided_slice %1617 {offsets = [0, 0], sizes = [4, 32], strides = [1, 1]} : vector<4x96xf32> to vector<4x32xf32>
    %1620 = arith.addf %1618, %1619 : vector<4x32xf32>
    %1621 = arith.negf %1620 : vector<4x32xf32>
    %1622 = math.exp %1621 : vector<4x32xf32>
    %cst_612 = arith.constant 1.000000e+00 : f32
    %1623 = vector.broadcast %cst_612 : f32 to vector<4x32xf32>
    %1624 = arith.addf %1623, %1622 : vector<4x32xf32>
    %1625 = arith.divf %1623, %1624 : vector<4x32xf32>
    %1626 = vector.extract_strided_slice %1611 {offsets = [0, 32], sizes = [4, 32], strides = [1, 1]} : vector<4x96xf32> to vector<4x32xf32>
    %1627 = vector.extract_strided_slice %1617 {offsets = [0, 32], sizes = [4, 32], strides = [1, 1]} : vector<4x96xf32> to vector<4x32xf32>
    %1628 = arith.addf %1626, %1627 : vector<4x32xf32>
    %1629 = arith.negf %1628 : vector<4x32xf32>
    %1630 = math.exp %1629 : vector<4x32xf32>
    %cst_613 = arith.constant 1.000000e+00 : f32
    %1631 = vector.broadcast %cst_613 : f32 to vector<4x32xf32>
    %1632 = arith.addf %1631, %1630 : vector<4x32xf32>
    %1633 = arith.divf %1631, %1632 : vector<4x32xf32>
    %1634 = vector.extract_strided_slice %1611 {offsets = [0, 64], sizes = [4, 32], strides = [1, 1]} : vector<4x96xf32> to vector<4x32xf32>
    %1635 = vector.extract_strided_slice %1617 {offsets = [0, 64], sizes = [4, 32], strides = [1, 1]} : vector<4x96xf32> to vector<4x32xf32>
    %1636 = arith.mulf %1625, %1635 : vector<4x32xf32>
    %1637 = arith.addf %1634, %1636 : vector<4x32xf32>
    %1638 = math.tanh %1637 : vector<4x32xf32>
    %cst_614 = arith.constant 1.000000e+00 : f32
    %1639 = vector.broadcast %cst_614 : f32 to vector<4x32xf32>
    %1640 = arith.subf %1639, %1633 : vector<4x32xf32>
    %1641 = arith.mulf %1640, %1638 : vector<4x32xf32>
    %1642 = arith.mulf %1633, %1441 : vector<4x32xf32>
    %1643 = arith.addf %1641, %1642 : vector<4x32xf32>
    %1644 = vector.extract_strided_slice %1495 {offsets = [0, 0], sizes = [2, 1], strides = [1, 1]} : vector<2x2xf32> to vector<2x1xf32>
    %1645 = vector.extract_strided_slice %1495 {offsets = [0, 1], sizes = [2, 1], strides = [1, 1]} : vector<2x2xf32> to vector<2x1xf32>
    %1646 = tpu.concatenate %1644, %1645 in 0 : vector<2x1xf32>, vector<2x1xf32> -> vector<4x1xf32>
    %cst_615 = arith.constant 1.000000e+00 : f32
    %1647 = vector.broadcast %cst_615 : f32 to vector<4x1xf32>
    %1648 = arith.subf %1647, %1646 : vector<4x1xf32>
    %1649 = vector.broadcast %1648 : vector<4x1xf32> to vector<4x32xf32>
    %1650 = arith.mulf %1441, %1649 : vector<4x32xf32>
    %1651 = vector.broadcast %1646 : vector<4x1xf32> to vector<4x32xf32>
    %1652 = arith.mulf %1643, %1651 : vector<4x32xf32>
    %1653 = arith.addf %1650, %1652 : vector<4x32xf32>
    %cst_616 = arith.constant 0.000000e+00 : f32
    %1654 = vector.broadcast %cst_616 : f32 to vector<2x32xf32>
    %1655 = vector.extract_strided_slice %1653 {offsets = [0, 0], sizes = [2, 32], strides = [1, 1]} : vector<4x32xf32> to vector<2x32xf32>
    %1656 = vector.broadcast %1507 : vector<2x1xf32> to vector<2x32xf32>
    %1657 = arith.mulf %1656, %1655 : vector<2x32xf32>
    %1658 = arith.addf %1654, %1657 : vector<2x32xf32>
    %1659 = vector.extract_strided_slice %1653 {offsets = [2, 0], sizes = [2, 32], strides = [1, 1]} : vector<4x32xf32> to vector<2x32xf32>
    %1660 = vector.broadcast %1516 : vector<2x1xf32> to vector<2x32xf32>
    %1661 = arith.mulf %1660, %1659 : vector<2x32xf32>
    %1662 = arith.addf %1658, %1661 : vector<2x32xf32>
    %c0_617 = arith.constant 0 : index
    %c0_618 = arith.constant 0 : index
    %1663 = vector.load %arg13[%c0_617, %c0_618] : memref<32x96xbf16, #tpu.memory_space<vmem>>, vector<32x96xbf16>
    %1664 = arith.truncf %1662 : vector<2x32xf32> to vector<2x32xbf16>
    %cst_619 = arith.constant dense<0.000000e+00> : vector<2x96xf32>
    %1665 = tpu.matmul %1664, %1663, %cst_619 {dimension_numbers = #tpu.dot_dimension_numbers<[1], [0], [0], [1], [0, 0, 1, 1], [], []>} : vector<2x32xbf16>, vector<32x96xbf16>, vector<2x96xf32> -> vector<2x96xf32>
    %c0_620 = arith.constant 0 : index
    %c0_621 = arith.constant 0 : index
    %1666 = vector.load %arg15[%c0_620, %c0_621] : memref<1x96xf32, #tpu.memory_space<vmem>>, vector<1x96xf32>
    %1667 = vector.broadcast %1666 : vector<1x96xf32> to vector<2x96xf32>
    %1668 = arith.addf %1665, %1667 : vector<2x96xf32>
    %c0_622 = arith.constant 0 : index
    %c0_623 = arith.constant 0 : index
    %1669 = vector.load %arg14[%c0_622, %c0_623] : memref<32x96xbf16, #tpu.memory_space<vmem>>, vector<32x96xbf16>
    %1670 = arith.truncf %1488 : vector<2x32xf32> to vector<2x32xbf16>
    %cst_624 = arith.constant dense<0.000000e+00> : vector<2x96xf32>
    %1671 = tpu.matmul %1670, %1669, %cst_624 {dimension_numbers = #tpu.dot_dimension_numbers<[1], [0], [0], [1], [0, 0, 1, 1], [], []>} : vector<2x32xbf16>, vector<32x96xbf16>, vector<2x96xf32> -> vector<2x96xf32>
    %c0_625 = arith.constant 0 : index
    %c0_626 = arith.constant 0 : index
    %1672 = vector.load %arg16[%c0_625, %c0_626] : memref<1x96xf32, #tpu.memory_space<vmem>>, vector<1x96xf32>
    %1673 = vector.broadcast %1672 : vector<1x96xf32> to vector<2x96xf32>
    %1674 = arith.addf %1671, %1673 : vector<2x96xf32>
    %1675 = vector.extract_strided_slice %1668 {offsets = [0, 0], sizes = [2, 32], strides = [1, 1]} : vector<2x96xf32> to vector<2x32xf32>
    %1676 = vector.extract_strided_slice %1674 {offsets = [0, 0], sizes = [2, 32], strides = [1, 1]} : vector<2x96xf32> to vector<2x32xf32>
    %1677 = arith.addf %1675, %1676 : vector<2x32xf32>
    %1678 = arith.negf %1677 : vector<2x32xf32>
    %1679 = math.exp %1678 : vector<2x32xf32>
    %cst_627 = arith.constant 1.000000e+00 : f32
    %1680 = vector.broadcast %cst_627 : f32 to vector<2x32xf32>
    %1681 = arith.addf %1680, %1679 : vector<2x32xf32>
    %1682 = arith.divf %1680, %1681 : vector<2x32xf32>
    %1683 = vector.extract_strided_slice %1668 {offsets = [0, 32], sizes = [2, 32], strides = [1, 1]} : vector<2x96xf32> to vector<2x32xf32>
    %1684 = vector.extract_strided_slice %1674 {offsets = [0, 32], sizes = [2, 32], strides = [1, 1]} : vector<2x96xf32> to vector<2x32xf32>
    %1685 = arith.addf %1683, %1684 : vector<2x32xf32>
    %1686 = arith.negf %1685 : vector<2x32xf32>
    %1687 = math.exp %1686 : vector<2x32xf32>
    %cst_628 = arith.constant 1.000000e+00 : f32
    %1688 = vector.broadcast %cst_628 : f32 to vector<2x32xf32>
    %1689 = arith.addf %1688, %1687 : vector<2x32xf32>
    %1690 = arith.divf %1688, %1689 : vector<2x32xf32>
    %1691 = vector.extract_strided_slice %1668 {offsets = [0, 64], sizes = [2, 32], strides = [1, 1]} : vector<2x96xf32> to vector<2x32xf32>
    %1692 = vector.extract_strided_slice %1674 {offsets = [0, 64], sizes = [2, 32], strides = [1, 1]} : vector<2x96xf32> to vector<2x32xf32>
    %1693 = arith.mulf %1682, %1692 : vector<2x32xf32>
    %1694 = arith.addf %1691, %1693 : vector<2x32xf32>
    %1695 = math.tanh %1694 : vector<2x32xf32>
    %cst_629 = arith.constant 1.000000e+00 : f32
    %1696 = vector.broadcast %cst_629 : f32 to vector<2x32xf32>
    %1697 = arith.subf %1696, %1690 : vector<2x32xf32>
    %1698 = arith.mulf %1697, %1695 : vector<2x32xf32>
    %1699 = arith.mulf %1690, %1488 : vector<2x32xf32>
    %1700 = arith.addf %1698, %1699 : vector<2x32xf32>
    %c7_630 = arith.constant 7 : index
    %c0_631 = arith.constant 0 : index
    %c0_632 = arith.constant 0 : index
    %1701 = vector.load %arg17[%c7_630, %c0_631, %c0_632] : memref<8x2x32xf32, #tpu.memory_space<vmem>>, vector<1x2x32xf32>
    %1702 = vector.shape_cast %1701 : vector<1x2x32xf32> to vector<2x32xf32>
    %1703 = vector.shape_cast %1700 : vector<2x32xf32> to vector<1x2x32xf32>
    tpu.vector_store %arg17[%c7_630, %c0_631, %c0_632], %1703 {strides = array<i32>} : memref<8x2x32xf32, #tpu.memory_space<vmem>>, vector<1x2x32xf32>,
    return
  }
  func.func @transform_0(%arg0: i32) -> (i32, i32, i32) {
    %c0_i32 = arith.constant 0 : i32
    %c0_i32_0 = arith.constant 0 : i32
    %c0_i32_1 = arith.constant 0 : i32
    %c0_i32_2 = arith.constant 0 : i32
    return %c0_i32, %c0_i32_0, %c0_i32_1 : i32, i32, i32
  }
  func.func @transform_1(%arg0: i32) -> (i32, i32, i32) {
    %c0_i32 = arith.constant 0 : i32
    %c0_i32_0 = arith.constant 0 : i32
    %c0_i32_1 = arith.constant 0 : i32
    %c0_i32_2 = arith.constant 0 : i32
    return %c0_i32, %c0_i32_0, %c0_i32_1 : i32, i32, i32
  }
  func.func @transform_2(%arg0: i32) -> (i32, i32, i32) {
    %c0_i32 = arith.constant 0 : i32
    %c0_i32_0 = arith.constant 0 : i32
    %c0_i32_1 = arith.constant 0 : i32
    %c0_i32_2 = arith.constant 0 : i32
    return %c0_i32, %c0_i32_0, %c0_i32_1 : i32, i32, i32
  }
  func.func @transform_3(%arg0: i32) -> (i32, i32) {
    %c0_i32 = arith.constant 0 : i32
    %c0_i32_0 = arith.constant 0 : i32
    %c0_i32_1 = arith.constant 0 : i32
    return %c0_i32, %c0_i32_0 : i32, i32
  }
  func.func @transform_4(%arg0: i32) -> (i32, i32) {
    %c0_i32 = arith.constant 0 : i32
    %c0_i32_0 = arith.constant 0 : i32
    %c0_i32_1 = arith.constant 0 : i32
    return %c0_i32, %c0_i32_0 : i32, i32
  }
  func.func @transform_5(%arg0: i32) -> (i32, i32) {
    %c0_i32 = arith.constant 0 : i32
    %c0_i32_0 = arith.constant 0 : i32
    %c0_i32_1 = arith.constant 0 : i32
    return %c0_i32, %c0_i32_0 : i32, i32
  }
  func.func @transform_6(%arg0: i32) -> (i32, i32) {
    %c0_i32 = arith.constant 0 : i32
    %c0_i32_0 = arith.constant 0 : i32
    %c0_i32_1 = arith.constant 0 : i32
    return %c0_i32, %c0_i32_0 : i32, i32
  }
  func.func @transform_7(%arg0: i32) -> (i32, i32) {
    %c0_i32 = arith.constant 0 : i32
    %c0_i32_0 = arith.constant 0 : i32
    %c0_i32_1 = arith.constant 0 : i32
    return %c0_i32, %c0_i32_0 : i32, i32
  }
  func.func @transform_8(%arg0: i32) -> (i32, i32) {
    %c0_i32 = arith.constant 0 : i32
    %c0_i32_0 = arith.constant 0 : i32
    %c0_i32_1 = arith.constant 0 : i32
    return %c0_i32, %c0_i32_0 : i32, i32
  }
  func.func @transform_9(%arg0: i32) -> (i32, i32) {
    %c0_i32 = arith.constant 0 : i32
    %c0_i32_0 = arith.constant 0 : i32
    %c0_i32_1 = arith.constant 0 : i32
    return %c0_i32, %c0_i32_0 : i32, i32
  }
  func.func @transform_10(%arg0: i32) -> (i32, i32) {
    %c0_i32 = arith.constant 0 : i32
    %c0_i32_0 = arith.constant 0 : i32
    %c0_i32_1 = arith.constant 0 : i32
    return %c0_i32, %c0_i32_0 : i32, i32
  }
  func.func @transform_11(%arg0: i32) -> (i32, i32) {
    %c0_i32 = arith.constant 0 : i32
    %c0_i32_0 = arith.constant 0 : i32
    %c0_i32_1 = arith.constant 0 : i32
    return %c0_i32, %c0_i32_0 : i32, i32
  }
  func.func @transform_12(%arg0: i32) -> (i32, i32) {
    %c0_i32 = arith.constant 0 : i32
    %c0_i32_0 = arith.constant 0 : i32
    %c0_i32_1 = arith.constant 0 : i32
    return %c0_i32, %c0_i32_0 : i32, i32
  }
  func.func @transform_13(%arg0: i32) -> (i32, i32) {
    %c0_i32 = arith.constant 0 : i32
    %c0_i32_0 = arith.constant 0 : i32
    %c0_i32_1 = arith.constant 0 : i32
    return %c0_i32, %c0_i32_0 : i32, i32
  }
  func.func @transform_14(%arg0: i32) -> (i32, i32) {
    %c0_i32 = arith.constant 0 : i32
    %c0_i32_0 = arith.constant 0 : i32
    %c0_i32_1 = arith.constant 0 : i32
    return %c0_i32, %c0_i32_0 : i32, i32
  }
  func.func @transform_15(%arg0: i32) -> (i32, i32) {
    %c0_i32 = arith.constant 0 : i32
    %c0_i32_0 = arith.constant 0 : i32
    %c0_i32_1 = arith.constant 0 : i32
    return %c0_i32, %c0_i32_0 : i32, i32
  }
  func.func @transform_16(%arg0: i32) -> (i32, i32, i32) {
    %c0_i32 = arith.constant 0 : i32
    %c0_i32_0 = arith.constant 0 : i32
    %c0_i32_1 = arith.constant 0 : i32
    %c0_i32_2 = arith.constant 0 : i32
    return %c0_i32, %c0_i32_0, %c0_i32_1 : i32, i32, i32
  }
  func.func @transform_17(%arg0: i32) -> (i32, i32, i32) {
    %c0_i32 = arith.constant 0 : i32
    %c0_i32_0 = arith.constant 0 : i32
    %c0_i32_1 = arith.constant 0 : i32
    %c0_i32_2 = arith.constant 0 : i32
    return %c0_i32, %c0_i32_0, %c0_i32_1 : i32, i32, i32
  }
}

</mosaic_0001>

<bundles_post_ra>
// kernel: tpu_custom_call.1
= control target key start
LH: loop header
LB: loop body
LE: loop exit
PB: predicated region body
PF: predicated region fallthrough
CT: control target
= control target key end

     0   :  { %s10295_s0 = inlined_call_operand.hbm [shape: f32[8,2,32], index: 0, kind: input, shape index: {}]   ;;  %s10296_s1 = inlined_call_operand.vmem [shape: f32[8,2,2], index: 1, kind: input, shape index: {}]   ;;  %s10297_s2 = inlined_call_operand.hbm [shape: f32[8,1,32], index: 2, kind: input, shape index: {}]   ;;  %s10298_s3 = inlined_call_operand.vmem [shape: f32[1,32], index: 3, kind: input, shape index: {}]   ;;  %s10299_s4 = inlined_call_operand.hbm [shape: bf16[64,96], index: 4, kind: input, shape index: {}]   ;;  %s10300_s5 = inlined_call_operand.hbm [shape: bf16[32,96], index: 5, kind: input, shape index: {}]   ;;  %s10301_s6 = inlined_call_operand.vmem [shape: f32[1,96], index: 6, kind: input, shape index: {}]   ;;  %s10302_s7 = inlined_call_operand.hbm [shape: f32[1,96], index: 7, kind: input, shape index: {}]   ;;  %s10303_s8 = inlined_call_operand.vmem [shape: bf16[64,96], index: 8, kind: input, shape index: {}]   ;;  %s10304_s9 = inlined_call_operand.hbm [shape: bf16[32,96], index: 9, kind: input, shape index: {}]   ;;  %s10305_s10 = inlined_call_operand.vmem [shape: f32[1,96], index: 10, kind: input, shape index: {}]   ;;  %s10306_s11 = inlined_call_operand.vmem [shape: f32[1,96], index: 11, kind: input, shape index: {}]   ;;  %s10307_s12 = inlined_call_operand.hbm [shape: bf16[32,96], index: 12, kind: input, shape index: {}]   ;;  %s10308_s13 = inlined_call_operand.hbm [shape: bf16[32,96], index: 13, kind: input, shape index: {}]   ;;  %s10309_s14 = inlined_call_operand.vmem [shape: f32[1,96], index: 14, kind: input, shape index: {}]   ;;  %s10310_s15 = inlined_call_operand.vmem [shape: f32[1,96], index: 15, kind: input, shape index: {}]   ;;  %s10311_s16 = inlined_call_operand.hbm [shape: f32[8,2,32], index: 16, kind: output, shape index: {0}]   ;;  %s10312_s17 = inlined_call_operand.hbm [shape: f32[8,2,8], index: 17, kind: output, shape index: {1}]  }
   0x1   :  { %10314 = sst [smem:[#allocation27_spill]] %s10295_s0 }
   0x2   :  { %10315 = sst [smem:[#allocation28_spill]] %s10296_s1 }
   0x3   :  { %23 = vsyncpa [#allocation4], 0 }
   0x4   :  { %24 = vsyncpa [#allocation7], 0 }
   0x5   :  { %25 = vsyncpa [#allocation10], 0 }
   0x6   :  { %26 = vsyncpa [#allocation13], 0 }
   0x7   :  { %27 = vsyncpa [#allocation16], 0 }
   0x8   :  { %28 = vsyncpa [#allocation5], 0 }
   0x9   :  { %29 = vsyncpa [#allocation19], 0  ;;  %s8670_s24 = smov [#allocation6]  }
   0xa   :  { %s49_s25 = sshll.u32 %s8670_s24, 4  ;;  %s50_s25 = int_to_ptr.vmem [resolvable:$true] %s49_s25 }
   0xb   :  { %s8464_s26 = scalar_lea.vmem %s50_s25, 128  ;;  %p8469_p1 = scmp.lt.s32.totalorder %s50_s25, %s50_s25 }
   0xc   :  { %p8465_p0 = scmp.ne.s32.totalorder %s50_s25, %s8464_s26  ;;  %p8470_p2 = scmp.lt.s32.totalorder %s8464_s26, %s8464_s26 }
   0xe   :  { %p8471_p3 = por %p8470_p2, %p8469_p1 }
  0x10   :  { %p8472_p4 = pnand %p8471_p3, %p8465_p0 }
  0x12   :  { %8475 = shalt.err (!%p8472_p4)
}
  0x13   :  { %s8671_s27 = smov 16   ;;  %s8672_s28 = smov 1  }
  0x14   :  { %55 = dma.hbm_to_vmem [thread:$0]  %s10297_s2, 128, %s50_s25, [#allocation7], %s8671_s27, %s8671_s27, %s8672_s28  }
  0x15   :  { %s8673_s30 = smov [#allocation9]   ;;  %s8674_s19 = smov [#allocation12]  }
  0x16   :  { %s75_s18 = sshll.u32 %s8673_s30, 4  ;;  %s101_s1 = sshll.u32 %s8674_s19, 4  ;;  %s76_s18 = int_to_ptr.vmem [resolvable:$true] %s75_s18  ;;  %s102_s1 = int_to_ptr.vmem [resolvable:$true] %s101_s1 }
  0x17   :  { %s8484_s20 = scalar_lea.vmem %s76_s18, 256  ;;  %p8489_p6 = scmp.lt.s32.totalorder %s76_s18, %s76_s18 }
  0x18   :  { %p8485_p5 = scmp.ne.s32.totalorder %s76_s18, %s8484_s20  ;;  %p8490_p7 = scmp.lt.s32.totalorder %s8484_s20, %s8484_s20 }
  0x1a   :  { %p8491_p8 = por %p8490_p7, %p8489_p6 }
  0x1c   :  { %p8492_p9 = pnand %p8491_p8, %p8485_p5 }
  0x1e   :  { %8495 = shalt.err (!%p8492_p9)
}
  0x1f   :  { %s8675_s21 = smov 64   ;;  %s8676_s22 = smov 4  }
  0x20   :  { %81 = dma.hbm_to_vmem [thread:$0]  %s10300_s5, 256, %s76_s18, [#allocation10], %s8675_s21, %s8675_s21, %s8676_s22  }
  0x21   :  { %s8504_s2 = scalar_lea.vmem %s102_s1, 256  ;;  %p8509_p11 = scmp.lt.s32.totalorder %s102_s1, %s102_s1 }
  0x22   :  { %p8505_p10 = scmp.ne.s32.totalorder %s102_s1, %s8504_s2  ;;  %p8510_p12 = scmp.lt.s32.totalorder %s8504_s2, %s8504_s2 }
  0x24   :  { %p8511_p13 = por %p8510_p12, %p8509_p11 }
  0x26   :  { %p8512_p0 = pnand %p8511_p13, %p8505_p10 }
  0x28   :  { %8515 = shalt.err (!%p8512_p0)
}
  0x29   :  { %107 = dma.hbm_to_vmem [thread:$0]  %s10304_s9, 256, %s102_s1, [#allocation13], %s8675_s21, %s8675_s21, %s8676_s22  }
  0x2a   :  { %s8677_s27 = smov [#allocation3]  }
  0x2b   :  { %s35_s29 = sshll.u32 %s8677_s27, 4  ;;  %s36_s29 = int_to_ptr.vmem [resolvable:$true] %s35_s29 }
  0x2c   :  { %s8524_s0 = scalar_lea.vmem %s36_s29, 256  ;;  %p8529_p2 = scmp.lt.s32.totalorder %s36_s29, %s36_s29 }
  0x2d   :  { %p8525_p1 = scmp.ne.s32.totalorder %s36_s29, %s8524_s0  ;;  %p8530_p3 = scmp.lt.s32.totalorder %s8524_s0, %s8524_s0 }
  0x2f   :  { %p8531_p4 = por %p8530_p3, %p8529_p2 }
  0x31   :  { %p8532_p5 = pnand %p8531_p4, %p8525_p1 }
  0x33   :  { %8535 = shalt.err (!%p8532_p5)
}
  0x34   :  { %s8678_s5 = smov 32   ;;  %s8679_s30 = smov 2  }
  0x35   :  { %s10316_s20 = sld [smem:[#allocation27_spill]]  ;;  %s8680_s9 = smov [#allocation8]  }
  0x36   :  { %s63_s1 = sshll.u32 %s8680_s9, 4  ;;  %s8681_s23 = smov [#allocation11]   ;;  %s64_s1 = int_to_ptr.vmem [resolvable:$true] %s63_s1 }
  0x37   :  { %s90_s24 = sshll.u32 %s8681_s23, 4  ;;  %s8544_s2 = scalar_lea.vmem %s64_s1, 512  ;;  %s91_s24 = int_to_ptr.vmem [resolvable:$true] %s90_s24 }
  0x38   :  { %p8545_p6 = scmp.ne.s32.totalorder %s64_s1, %s8544_s2  ;;  %p8549_p7 = scmp.lt.s32.totalorder %s64_s1, %s64_s1 }
  0x39   :  { %p8550_p8 = scmp.lt.s32.totalorder %s8544_s2, %s8544_s2 }
  0x3b   :  { %41 = dma.hbm_to_vmem [thread:$0]  %s10316_s20, 256, %s36_s29, [#allocation4], %s8678_s5, %s8678_s5, %s8679_s30  }
  0x3c   :  { %p8551_p9 = por %p8550_p8, %p8549_p7 }
  0x3e   :  { %p8552_p10 = pnand %p8551_p9, %p8545_p6 }
  0x40   :  { %8555 = shalt.err (!%p8552_p10)
}
  0x41   :  { %69 = dma.hbm_to_vmem [thread:$0]  %s10299_s4, 512, %s64_s1, [#allocation7], %s8675_s21, %s8675_s21, %s8676_s22  }
  0x42   :  { %s8564_s27 = scalar_lea.vmem %s91_s24, 16  ;;  %s8568_s29 = scalar_lea.vmem %s91_s24, 32 }
  0x43   :  { %p8565_p11 = scmp.ne.s32.totalorder %s91_s24, %s8564_s27  ;;  %p8569_p12 = scmp.lt.s32.totalorder %s91_s24, %s91_s24 }
  0x44   :  { %p8570_p13 = scmp.lt.s32.totalorder %s8568_s29, %s8564_s27 }
  0x46   :  { %p8571_p0 = por %p8570_p13, %p8569_p12 }
  0x48   :  { %p8572_p1 = pnand %p8571_p0, %p8565_p11 }
  0x4a   :  { %8575 = shalt.err (!%p8572_p1)
}
  0x4b   :  { %93 = dma.hbm_to_vmem [thread:$0]  %s10302_s7, 16, %s91_s24, [#allocation10]  }
  0x4c   :  { %s8682_s19 = smov [#allocation14]   ;;  %s8683_s9 = smov [#allocation15]  }
  0x4d   :  { %s117_s20 = sshll.u32 %s8682_s19, 4  ;;  %s129_s23 = sshll.u32 %s8683_s9, 4  ;;  %s118_s20 = int_to_ptr.vmem [resolvable:$true] %s117_s20  ;;  %s130_s23 = int_to_ptr.vmem [resolvable:$true] %s129_s23 }
  0x4e   :  { %s8584_s2 = scalar_lea.vmem %s118_s20, 256  ;;  %p8589_p3 = scmp.lt.s32.totalorder %s118_s20, %s118_s20 }
  0x4f   :  { %p8585_p2 = scmp.ne.s32.totalorder %s118_s20, %s8584_s2  ;;  %p8590_p4 = scmp.lt.s32.totalorder %s8584_s2, %s8584_s2 }
  0x51   :  { %p8591_p5 = por %p8590_p4, %p8589_p3 }
  0x53   :  { %p8592_p6 = pnand %p8591_p5, %p8585_p2 }
  0x55   :  { %8595 = shalt.err (!%p8592_p6)
}
  0x56   :  { %123 = dma.hbm_to_vmem [thread:$0]  %s10307_s12, 256, %s118_s20, [#allocation13], %s8675_s21, %s8675_s21, %s8676_s22  }
  0x57   :  { %s8604_s7 = scalar_lea.vmem %s130_s23, 256  ;;  %p8609_p8 = scmp.lt.s32.totalorder %s130_s23, %s130_s23 }
  0x58   :  { %p8605_p7 = scmp.ne.s32.totalorder %s130_s23, %s8604_s7  ;;  %p8610_p9 = scmp.lt.s32.totalorder %s8604_s7, %s8604_s7 }
  0x5a   :  { %p8611_p10 = por %p8610_p9, %p8609_p8 }
  0x5c   :  { %p8612_p11 = pnand %p8611_p10, %p8605_p7 }
  0x5e   :  { %8615 = shalt.err (!%p8612_p11)
}
  0x5f   :  { %135 = dma.hbm_to_vmem [thread:$0]  %s10308_s13, 256, %s130_s23, [#allocation16], %s8675_s21, %s8675_s21, %s8676_s22  }
  0x60   :  { %8656 = dma.done.wait [#allocation4], 256  }
  0x61   :  { %8657 = vsyncadd [#allocation4], 4294967040 }
  0x62   :  { %8658 = dma.done.wait [#allocation7], 640  }
  0x63   :  { %8659 = vsyncadd [#allocation7], 4294966656 }
  0x64   :  { %8660 = dma.done.wait [#allocation10], 272  }
  0x65   :  { %8661 = vsyncadd [#allocation10], 4294967024 }
  0x66   :  { %8662 = dma.done.wait [#allocation13], 512  }
  0x67   :  { %8663 = vsyncadd [#allocation13], 4294966784 }
  0x68   :  { %8664 = dma.done.wait [#allocation16], 256  }
  0x69   :  { %8665 = vsyncadd [#allocation16], 4294967040  ;;  %vm174_vm0 = vcmask 9216   ;;  %s10317_s27 = sld [smem:[#allocation28_spill]]  ;;  %v8684_v2 = vmov 0   ;;  %v8685_v3 = vmov 0.0   ;;  %v169_v48 = vlaneseq }
  0x6a   :  { %8138 = vset.pattern.permute.xlu1 %v8684_v2  ;;  %7599 = vmatprep.subr.bf16.mxu1 %v8685_v3  ;;  %v8154_v4 = vld [vmem:[#allocation9 + $0x8] sm:$0xff]   ;;  %v8156_v5 = vld [vmem:[#allocation8 + $0x18] sm:$0xff]   ;;  %vm8686_vm1 = vmmov 0   ;;  %v8155_v7 = vld [vmem:[#allocation9] sm:$0xff]   ;;  %v8687_v11 = vmov 1   ;;  %vm165_vm6 = vcmask 261120  }
  0x6b   :  { %7587 = vmatprep.subr.bf16.mxu0 %v8685_v3  ;;  %8140 = vset.pattern.permute.xlu0 %v8684_v2  ;;  %v8157_v9 = vld [vmem:[#allocation8 + $0x10] sm:$0xff]   ;;  %v8158_v12 = vld [vmem:[#allocation8 + $0x8] sm:$0xff]   ;;  %v8159_v14 = vld [vmem:[#allocation8] sm:$0xff]   ;;  %166 = vst.msk [vmem:[#allocation2] sm:$0xff] %vm165_vm6, %v8685_v3  ;;  %vm247_vm7 = vcmask 523264   ;;  %s8688_s29 = smov 96  }
  0x6c   :  { %7603 = vmatprep.mubr.msk.bf16.mxu1 %vm8686_vm1, %v8685_v3  ;;  %7595 = vmatprep.mubr.msk.bf16.mxu0 %vm8686_vm1, %v8685_v3  ;;  %167 = vst.msk [vmem:[#allocation2 + $0x8] sm:$0xff] %vm165_vm6, %v8685_v3  ;;  %v8864_v16 = vld [vmem:[#allocation11] ss:$0 sm:$0xff]  ;;  %v171_v24 = vld [vmem:[#allocation3] sm:$0x3]  ;;  %v397_v53 = vshrl.u32 %v169_v48, 7 }
  0x6d   :  { %7600 = vmatpush3.bf16.msra.mxu1 %v8154_v4  ;;  %7588 = vmatpush3.bf16.msra.mxu0 %v8156_v5  ;;  %v8874_v28 = vpack.c.bf16 %v171_v24, %v171_v24  ;;  %v8884_v31 = vld [vmem:[%s10301_s6] ss:$0 sm:$0xff]  ;;  %v8689_v49 = vmov 1966171168   ;;  %vm453_vm8 = vcmask 58368   ;;  %vm429_vm9 = vcmask 253952  }
  0x6e   :  { %7601 = vmatprep.subr.bf16.mxu1 %v8685_v3  ;;  %7589 = vmatprep.subr.bf16.mxu0 %v8685_v3  ;;  %v7112_v47 = vld [vmem:[#allocation6] ss:$0 sm:$0xff]  ;;  %v394_v50 = vunpack.c.l.s4 %v8689_v49  ;;  %v8901_v62 = vsub.s32 0, %v397_v53  ;;  %vm493_vm10 = vcmask 64512   ;;  %v8162_v24 = vld [vmem:[%s10303_s8 + $0x18] sm:$0xff]   ;;  %vm645_vm11 = vcmask 1041409  }
  0x6f   :  { %v8829_v0 = vld [vmem:[%s10317_s27] sm:$0x3]  ;;  %vm736_vm12 = vcmask 1041408   ;;  %s8690_s12 = smov 127  }
  0x70   :  { %v175_v1 = vsel %vm174_vm0, %v8829_v0, -inf  ;;  %v395_v52 = vunpack.c.0.s8 %v394_v50 }
  0x71   :  { %176 = vmax.xlane.f32.xlu0 %v175_v1  ;;  %7602 = vmatpush3.bf16.msra.mxu1 %v8155_v7 }
  0x72   :  { %7590 = vmatpush3.bf16.msra.mxu0 %v8157_v9  ;;  %7607 = vmatprep.subr.mxu1 %v8685_v3  ;;  %v8894_v58 = vsub.s32 %v395_v52, %v397_v53 }
  0x73   :  { %7591 = vmatprep.subr.bf16.mxu0 %v8685_v3 }
  0x74   :  { %7604 = vmatmul.mubr.bf16.vlgmr.msra.gmra.mxu1 %v8684_v2 }
  0x75   :  { %7609 = vmatprep.mubr.msk.f32.mxu1 %vm8686_vm1, %v8685_v3 }
  0x76   :  { %7592 = vmatpush3.bf16.msra.mxu0 %v8158_v12 }
  0x77   :  { %7593 = vmatprep.subr.bf16.mxu0 %v8685_v3 }
  0x7a   :  { %7594 = vmatpush3.bf16.msra.mxu0 %v8159_v14 }
  0x7b   :  { %7617 = vmatprep.subr.bf16.mxu0 %v8685_v3 }
  0xfa   :  { %v177_v6 = vpop.xlane.xlu0 %176 }
  0xfb   :  { %vm178_vm2 = vcmp.ge.f32.partialorder %v8829_v0, %v177_v6 }
  0xfc   :  { %v181_v8 = vsel %vm178_vm2, 1.0, %v8685_v3 }
  0xfd   :  { %192 = vperm.xlu1 %8138, %v181_v8   ;;  %vm183_vm3 = vcmp.lt.f32.partialorder %v181_v8, 0.5 }
  0xfe   :  { %v184_v10 = vsel %vm183_vm3, 1, %v8684_v2  ;;  %vm445_vm3 = vcmask 254976  }
  0xff   :  { %185 = vrot.lane.b32.xlu0 %v184_v10, %s8672_s28 }
 0x101   :  { %8139 = vset.pattern.permute.xlu1 %v8687_v11 }
 0x134   :  { %v350_v17 = vpop.f32.mrf.mxu1 }
 0x135   :  { %v351_v18 = vadd.f32 %v8864_v16, %v350_v17 }
 0x136   :  { %v7605_v19 = vpop.f32.mrf.mxu1 }
 0x138   :  { %v353_v20 = vpop.f32.mrf.mxu1 }
 0x13a   :  { %v7606_v21 = vpop.f32.mrf.mxu1 }
 0x13b   :  { %v8160_v21 = vld [vmem:[#allocation12 + $0x8] sm:$0xff]  }
 0x171   :  { %v186_v13 = vpop.permute.xlu0 %185 }
 0x172   :  { %vm187_vm4 = vcmp.ne.s32.totalorder %v186_v13, 0 }
 0x173   :  { %vm188_vm5 = vmand %vm178_vm2, %vm187_vm4 }
 0x174   :  { %v189_v15 = vsel %vm188_vm5, 1.0, %v8685_v3 }
 0x175   :  { %199 = vperm.xlu1 %8139, %v189_v15  }
 0x178   :  { %v8868_v22 = vpop.permute.xlu1 %192 }
 0x179   :  { %364 = vrot.lane.b32.xlu1 %v351_v18, %s8675_s21  ;;  %v195_v25 = vmul.f32 0.0, %v8868_v22 }
 0x1f0   :  { %v8870_v23 = vpop.permute.xlu1 %199 }
 0x1f1   :  { %v202_v26 = vmul.f32 0.0, %v8870_v23 }
 0x1f3   :  { %v203_v27 = vadd.f32 %v202_v26, %v195_v25  ;;  %v8161_v25 = vld [vmem:[#allocation12] sm:$0xff]   ;;  %v8163_v26 = vld [vmem:[%s10303_s8 + $0x10] sm:$0xff]  }
 0x1f4   :  { %v365_v41 = vpop.permute.xlu1 %364 }
 0x1f5   :  { %v204_v29 = vpack.c.bf16 %v203_v27, %v203_v27  ;;  %v8164_v27 = vld [vmem:[%s10303_s8 + $0x8] sm:$0xff]  }
 0x1f7   :  { %v207_v30 = vsel %vm165_vm6, %v8874_v28, %v204_v29  ;;  %v8165_v29 = vld [vmem:[%s10303_s8] sm:$0xff]  }
 0x1f8   :  { %7596 = vmatmul.mubr.msk.bf16.vlgmr.msra.gmra.mxu0 %vm247_vm7, %v207_v30 }
 0x1f9   :  { %7625 = vmatprep.mubr.msk.bf16.mxu0 %vm8686_vm1, %v8685_v3  ;;  %7618 = vmatpush3.bf16.msra.mxu0 %v8162_v24 }
 0x1fa   :  { %7619 = vmatprep.subr.bf16.mxu0 %v8685_v3 }
 0x1fd   :  { %7620 = vmatpush3.bf16.msra.mxu0 %v8163_v26 }
 0x1fe   :  { %7621 = vmatprep.subr.bf16.mxu0 %v8685_v3 }
 0x201   :  { %7622 = vmatpush3.bf16.msra.mxu0 %v8164_v27 }
 0x202   :  { %7623 = vmatprep.subr.bf16.mxu0 %v8685_v3 }
 0x205   :  { %7624 = vmatpush3.bf16.msra.mxu0 %v8165_v29 }
 0x206   :  { %7645 = vmatprep.subr.bf16.mxu0 %v8685_v3 }
 0x2b8   :  { %v284_v32 = vpop.f32.mrf.mxu0 }
 0x2b9   :  { %v285_v33 = vadd.f32 %v8884_v31, %v284_v32 }
 0x2ba   :  { %v7597_v34 = vpop.f32.mrf.mxu0 }
 0x2bb   :  { %v356_v35 = vadd.f32 %v351_v18, %v285_v33 }
 0x2bc   :  { %v287_v36 = vpop.f32.mrf.mxu0 }
 0x2bd   :  { %v7111_v37 = vmul.f32 -1.442695, %v356_v35 }
 0x2be   :  { %v7598_v38 = vpop.f32.mrf.mxu0 }
 0x2bf   :  { %8282 = vpow2.f32 %v7111_v37 }
 0x2cc   :  { %v8283_v39 = vpop.eup %8282 }
 0x2cd   :  { %v360_v40 = vadd.f32 1.0, %v8283_v39 }
 0x2cf   :  { %8284 = vrcp.f32 %v360_v40 }
 0x2dc   :  { %v8285_v42 = vpop.eup %8284 }
 0x2dd   :  { %v367_v43 = vmul.f32 %v8285_v42, %v365_v41  ;;  %v374_v51 = vsub.f32 1.0, %v8285_v42  ;;  %v380_v55 = vmul.f32 0.0, %v8285_v42  ;;  %v8949_v42 = vld [vmem:[%s10306_s11] ss:$0 sm:$0xff] }
 0x2df   :  { %369 = vrot.lane.b32.xlu1 %v367_v43, %s8675_s21 }
 0x351   :  { %v370_v44 = vpop.permute.xlu1 %369 }
 0x352   :  { %v372_v45 = vadd.f32 %v370_v44, %v285_v33 }
 0x354   :  { %8286 = vtanh.f32 %v372_v45 }
 0x361   :  { %v8287_v46 = vpop.eup %8286 }
 0x362   :  { %376 = vrot.lane.b32.xlu1 %v8287_v46, %s8688_s29 }
 0x366   :  { %388 = vrot.lane.b32.xlu1 %v7112_v47, %s8678_s5 }
 0x38a   :  { %462 = vadd.xlane.f32.xlu1 %v8685_v3 }
 0x3d4   :  { %v377_v54 = vpop.permute.xlu1 %376 }
 0x3d5   :  { %v379_v56 = vmul.f32 %v377_v54, %v374_v51  ;;  %v8961_v51 = vld [vmem:[%s10305_s10] ss:$0 sm:$0xff] }
 0x3d7   :  { %v8892_v57 = vadd.f32 %v380_v55, %v379_v56 }
 0x3d8   :  { %v389_v59 = vpop.permute.xlu1 %388 }
 0x3d9   :  { %v8897_v60 = vadd.f32 %v389_v59, %v8892_v57  ;;  %v1150_v24 = vpack.c.bf16 %v8892_v57, %v8892_v57 }
 0x3db   :  { %v399_v61 = vrot.slane %v8897_v60, %v8894_v58 }
 0x3dd   :  { %v400_v63 = vcombine.high %v399_v61, %v399_v61  ;;  %v407_v1 = vrot.slane %v399_v61, %v8894_v58 }
 0x3df   :  { %v418_v4 = vrot.slane %v407_v1, %v8901_v62  ;;  %v414_v5 = vrot.slane %v400_v63, %v8894_v58 }
 0x3e1   :  { %423 = vrot.lane.b32.xlu0 %v418_v4, %s8688_s29  ;;  %v422_v6 = vrot.slane %v414_v5, %v8901_v62 }
 0x3e5   :  { %425 = vrot.lane.b32.xlu0 %v422_v6, %s8688_s29 }
 0x413   :  { %v463_v7 = vpop.xlane.xlu1 %462 }
 0x414   :  { %v464_v8 = vmax.f32 %v463_v7, 1e-30 }
 0x416   :  { %8288 = vrcp.f32 %v464_v8  ;;  %v828_v8 = vrot.slane %v8829_v0, 6 }
 0x423   :  { %v8289_v9 = vpop.eup %8288 }
 0x424   :  { %v466_v10 = vmul.f32 0.0, %v8289_v9 }
 0x426   :  { %467 = vst.msk [vmem:[#allocation18] sm:$0x3] %vm453_vm8, %v466_v10  ;;  %v477_v13 = vrot.slane %v466_v10, %v8894_v58 }
 0x428   :  { %v485_v15 = vrot.slane %v477_v13, %v8894_v58  ;;  %v478_v17 = vcombine.high %v477_v13, %v477_v13 }
 0x42a   :  { %v492_v19 = vrot.slane %v478_v17, %v8894_v58 }
 0x453   :  { %v424_v12 = vpop.permute.xlu0 %423 }
 0x454   :  { %430 = vst.msk [vmem:[#allocation2] sm:$0x1] %vm429_vm9, %v424_v12 }
 0x457   :  { %v426_v14 = vpop.permute.xlu0 %425 }
 0x458   :  { %431 = vst.msk [vmem:[#allocation2 + $0x8] sm:$0x1] %vm429_vm9, %v426_v14 }
 0x45b   :  { %v468_v18 = vld [vmem:[#allocation2] sm:$0xff] }
 0x45c   :  { %7608 = vmatpush3.msra.mxu1 %v468_v18  ;;  %v8167_v18 = vld [vmem:[#allocation15] sm:$0xff]  }
 0x45d   :  { %7610 = vmatmul.mubr.msk.f32.vlgmr.msra.gmra.mxu1 %vm493_vm10, %v485_v15  ;;  %7612 = vmatprep.subr.mxu1 %v8685_v3  ;;  %v8166_v15 = vld [vmem:[#allocation15 + $0x8] sm:$0xff]  }
 0x45e   :  { %7614 = vmatprep.mubr.msk.f32.mxu1 %vm8686_vm1, %v8685_v3 }
 0x45f   :  { %v469_v20 = vld [vmem:[#allocation2 + $0x8] sm:$0xff] }
 0x460   :  { %7613 = vmatpush3.msra.mxu1 %v469_v20 }
 0x461   :  { %7615 = vmatmul.mubr.msk.f32.vlgmr.msra.gmra.mxu1 %vm493_vm10, %v492_v19  ;;  %7629 = vmatprep.subr.bf16.mxu1 %v8685_v3  ;;  %v8168_v19 = vld [vmem:[#allocation9 + $0x8] sm:$0xff]  }
 0x462   :  { %7633 = vmatprep.mubr.msk.bf16.mxu1 %vm8686_vm1, %v8685_v3  ;;  %7630 = vmatpush3.bf16.msra.mxu1 %v8160_v21  ;;  %v8169_v21 = vld [vmem:[#allocation9] sm:$0xff]  }
 0x463   :  { %7631 = vmatprep.subr.bf16.mxu1 %v8685_v3 }
 0x466   :  { %7632 = vmatpush3.bf16.msra.mxu1 %v8161_v25 }
 0x467   :  { %7637 = vmatprep.subr.bf16.mxu1 %v8685_v3 }
 0x469   :  { %7634 = vmatmul.mubr.bf16.vlgmr.msra.gmra.mxu1 %v8684_v2 }
 0x46a   :  { %7641 = vmatprep.mubr.msk.bf16.mxu1 %vm8686_vm1, %v8685_v3 }
 0x51d   :  { %v562_v30 = vpop.f32.mrf.mxu1 }
 0x51e   :  { %v638_v34 = vpack.c.bf16 %v562_v30, %v562_v30 }
 0x51f   :  { %v7611_v32 = vpop.f32.mrf.mxu1 }
 0x520   :  { %v642_v38 = vunpack.c.l.b16 %v638_v34 }
 0x521   :  { %v634_v33 = vpop.f32.mrf.mxu1 }
 0x522   :  { %v639_v35 = vpack.c.bf16 %v634_v33, %v634_v33 }
 0x523   :  { %v7616_v36 = vpop.f32.mrf.mxu1 }
 0x524   :  { %v643_v37 = vunpack.c.l.b16 %v639_v35 }
 0x526   :  { %v644_v39 = vrot.slane %v643_v37, 7 }
 0x528   :  { %v646_v40 = vsel %vm645_vm11, %v644_v39, %v642_v38 }
 0x529   :  { %v647_v41 = vpack.c.b16 %v646_v40, %v646_v40  ;;  %v795_v43 = vpop.f32.mrf.mxu1 }
 0x52a   :  { %v796_v44 = vadd.f32 %v8949_v42, %v795_v43 }
 0x52b   :  { %648 = vrot.lane.b32.xlu0 %v647_v41, %s8678_s5  ;;  %v7635_v45 = vpop.f32.mrf.mxu1 }
 0x52d   :  { %v798_v46 = vpop.f32.mrf.mxu1 }
 0x52f   :  { %809 = vrot.lane.b32.xlu0 %v796_v44, %s8675_s21  ;;  %v7636_v47 = vpop.f32.mrf.mxu1 }
 0x59d   :  { %v649_v49 = vpop.permute.xlu0 %648 }
 0x59e   :  { %v651_v50 = vsel %vm165_vm6, %v8874_v28, %v649_v49 }
 0x59f   :  { %7626 = vmatmul.mubr.msk.bf16.vlgmr.msra.gmra.mxu0 %vm247_vm7, %v651_v50 }
 0x5a0   :  { %7649 = vmatprep.mubr.msk.bf16.mxu0 %vm8686_vm1, %v8685_v3  ;;  %7646 = vmatpush3.bf16.msra.mxu0 %v8166_v15 }
 0x5a1   :  { %v810_v5 = vpop.permute.xlu0 %809  ;;  %7647 = vmatprep.subr.bf16.mxu0 %v8685_v3 }
 0x5a4   :  { %7648 = vmatpush3.bf16.msra.mxu0 %v8167_v18 }
 0x5a5   :  { %7665 = vmatprep.subr.bf16.mxu0 %v8685_v3 }
 0x5a7   :  { %7650 = vmatmul.mubr.bf16.vlgmr.msra.gmra.mxu0 %v8684_v2 }
 0x5a8   :  { %7666 = vmatpush3.bf16.msra.mxu0 %v8168_v19  ;;  %7669 = vmatprep.mubr.msk.bf16.mxu0 %vm8686_vm1, %v8685_v3 }
 0x5a9   :  { %7667 = vmatprep.subr.bf16.mxu0 %v8685_v3 }
 0x5ac   :  { %7668 = vmatpush3.bf16.msra.mxu0 %v8169_v21 }
 0x5ad   :  { %7673 = vmatprep.subr.mxu0 %v8685_v3 }
 0x65f   :  { %v727_v52 = vpop.f32.mrf.mxu0 }
 0x660   :  { %v728_v53 = vadd.f32 %v8961_v51, %v727_v52 }
 0x661   :  { %v7627_v54 = vpop.f32.mrf.mxu0 }
 0x662   :  { %v734_v55 = vrot.slane %v728_v53, 6  ;;  %v8171_v54 = vld [vmem:[#allocation14] sm:$0xff]  }
 0x663   :  { %v730_v56 = vpop.f32.mrf.mxu0 }
 0x664   :  { %v737_v59 = vsel %vm736_vm12, %v728_v53, %v734_v55  ;;  %v8170_v53 = vld [vmem:[#allocation14 + $0x8] sm:$0xff]  }
 0x665   :  { %v801_v28 = vadd.f32 %v796_v44, %v737_v59  ;;  %v7628_v61 = vpop.f32.mrf.mxu0  ;;  %7638 = vmatpush3.bf16.msra.mxu1 %v8170_v53 }
 0x666   :  { %7639 = vmatprep.subr.bf16.mxu1 %v8685_v3 }
 0x667   :  { %v7125_v63 = vmul.f32 -1.442695, %v801_v28  ;;  %v9001_v43 = vpop.f32.mrf.mxu0 }
 0x669   :  { %8290 = vpow2.f32 %v7125_v63  ;;  %v7651_v44 = vpop.f32.mrf.mxu0  ;;  %7640 = vmatpush3.bf16.msra.mxu1 %v8171_v54 }
 0x66a   :  { %7653 = vmatprep.subr.bf16.mxu1 %v8685_v3 }
 0x66b   :  { %v990_v45 = vpop.f32.mrf.mxu0 }
 0x66d   :  { %v7652_v46 = vpop.f32.mrf.mxu0 }
 0x66e   :  { %v7113_v46 = vld [vmem:[%s10298_s3] ss:$0 sm:$0xff] }
 0x676   :  { %v8291_v1 = vpop.eup %8290 }
 0x677   :  { %v805_v4 = vadd.f32 1.0, %v8291_v1 }
 0x679   :  { %8292 = vrcp.f32 %v805_v4 }
 0x686   :  { %v8293_v6 = vpop.eup %8292 }
 0x687   :  { %v812_v7 = vmul.f32 %v8293_v6, %v810_v5  ;;  %v819_v25 = vsub.f32 1.0, %v8293_v6  ;;  %v825_v30 = vmul.f32 0.0, %v8293_v6 }
 0x689   :  { %814 = vrot.lane.b32.xlu0 %v812_v7, %s8675_s21 }
 0x68d   :  { %829 = vrot.lane.b32.xlu0 %v828_v8, %s8690_s12  ;;  %v8173_v8 = vld [vmem:[#allocation8 + $0x10] sm:$0xff]  }
 0x6fb   :  { %v815_v9 = vpop.permute.xlu0 %814 }
 0x6fc   :  { %v817_v10 = vadd.f32 %v815_v9, %v737_v59  ;;  %v8174_v9 = vld [vmem:[#allocation8 + $0x8] sm:$0xff]  }
 0x6fe   :  { %8294 = vtanh.f32 %v817_v10  ;;  %v8175_v10 = vld [vmem:[#allocation8] sm:$0xff]  }
 0x6ff   :  { %v830_v12 = vpop.permute.xlu0 %829 }
 0x700   :  { %v832_v13 = vsel %vm736_vm12, %v8829_v0, %v830_v12  ;;  %v8980_v0 = vld [vmem:[%s10317_s27 + $0x2] sm:$0x3]  ;;  %v1025_v12 = vld [vmem:[#allocation3 + $0x2] sm:$0x3] }
 0x701   :  { %v833_v14 = vsub.f32 1.0, %v832_v13  ;;  %v1029_v20 = vsel %vm174_vm0, %v8980_v0, -inf }
 0x703   :  { %836 = vperm.xlu0 %8140, %v833_v14  }
 0x707   :  { %842 = vperm.xlu0 %8140, %v832_v13  }
 0x70b   :  { %v8295_v17 = vpop.eup %8294 }
 0x70c   :  { %821 = vrot.lane.b32.xlu1 %v8295_v17, %s8688_s29  ;;  %v9031_v17 = vpack.c.bf16 %v1025_v12, %v1025_v12 }
 0x726   :  { %1030 = vmax.xlane.f32.xlu0 %v1029_v20 }
 0x73c   :  { %1159 = vrot.lane.b32.xlu0 %v1150_v24, %s8688_s29 }
 0x77e   :  { %v822_v26 = vpop.permute.xlu1 %821  ;;  %v837_v27 = vpop.permute.xlu0 %836 }
 0x77f   :  { %v824_v29 = vmul.f32 %v822_v26, %v819_v25  ;;  %v839_v34 = vmul.f32 0.0, %v837_v27 }
 0x781   :  { %v826_v32 = vadd.f32 %v825_v30, %v824_v29 }
 0x782   :  { %v843_v33 = vpop.permute.xlu0 %842 }
 0x783   :  { %v845_v35 = vmul.f32 %v843_v33, %v826_v32 }
 0x785   :  { %v8988_v36 = vadd.f32 %v845_v35, %v839_v34 }
 0x787   :  { %v850_v37 = vrot.slane %v8988_v36, 2 }
 0x789   :  { %851 = vrot.lane.b32.xlu1 %v850_v37, %s8688_s29 }
 0x7af   :  { %v1031_v38 = vpop.xlane.xlu0 %1030 }
 0x7b0   :  { %vm1032_vm13 = vcmp.ge.f32.partialorder %v8980_v0, %v1031_v38 }
 0x7b1   :  { %v1034_v39 = vsel %vm1032_vm13, 1.0, %v8685_v3 }
 0x7b2   :  { %vm1036_vm14 = vcmp.lt.f32.partialorder %v1034_v39, 0.5 }
 0x7b3   :  { %v1160_v40 = vpop.permute.xlu0 %1159  ;;  %v1037_v41 = vsel %vm1036_vm14, 1, %v8684_v2 }
 0x7b4   :  { %1038 = vrot.lane.b32.xlu1 %v1037_v41, %s8672_s28  ;;  %7670 = vmatmul.mubr.msk.bf16.vlgmr.msra.gmra.mxu0 %vm165_vm6, %v1160_v40  ;;  %v7146_v41 = vld [vmem:[#allocation6 + $0x1] ss:$0 sm:$0xff] }
 0x7b5   :  { %7675 = vmatprep.mubr.msk.f32.mxu0 %vm8686_vm1, %v8685_v3  ;;  %1249 = vrot.lane.b32.xlu0 %v7146_v41, %s8678_s5  ;;  %v8176_v41 = vld [vmem:[#allocation12 + $0x8] sm:$0xff]  }
 0x7fb   :  { %v852_v47 = vpop.permute.xlu1 %851 }
 0x7fc   :  { %v854_v49 = vmul.f32 %v852_v47, %v8870_v23  ;;  %v847_v23 = vmul.f32 %v8988_v36, %v8868_v22  ;;  %v8172_v22 = vld [vmem:[#allocation8 + $0x18] sm:$0xff]  }
 0x7fe   :  { %856 = vrot.lane.b32.xlu1 %v854_v49, %s8678_s5 }
 0x826   :  { %v1039_v50 = vpop.permute.xlu1 %1038 }
 0x827   :  { %vm1040_vm15 = vcmp.ne.s32.totalorder %v1039_v50, 0  ;;  %v1250_v53 = vpop.permute.xlu0 %1249 }
 0x828   :  { %vm1041_vm2 = vmand %vm1032_vm13, %vm1040_vm15 }
 0x829   :  { %v1042_v52 = vsel %vm1041_vm2, 1.0, %v8685_v3 }
 0x82a   :  { %1052 = vperm.xlu1 %8139, %v1042_v52  }
 0x82e   :  { %8141 = vset.pattern.permute.xlu1 %v8684_v2 }
 0x870   :  { %v857_v55 = vpop.permute.xlu1 %856 }
 0x871   :  { %v859_v56 = vadd.f32 %v857_v55, %v847_v23 }
 0x873   :  { %v864_v59 = vpack.c.bf16 %v859_v56, %v859_v56 }
 0x874   :  { %v1210_v28 = vpop.f32.mrf.mxu0 }
 0x875   :  { %873 = vrot.lane.b32.xlu1 %v864_v59, %s8688_s29  ;;  %v1211_v6 = vadd.f32 %v8864_v16, %v1210_v28 }
 0x876   :  { %v7671_v61 = vpop.f32.mrf.mxu0 }
 0x878   :  { %v1213_v63 = vpop.f32.mrf.mxu0 }
 0x879   :  { %1045 = vperm.xlu1 %8141, %v1034_v39  }
 0x87a   :  { %v7672_v1 = vpop.f32.mrf.mxu0 }
 0x8a5   :  { %v9014_v4 = vpop.permute.xlu1 %1052 }
 0x8a6   :  { %v1055_v5 = vmul.f32 %v9014_v4, %v852_v47 }
 0x8a8   :  { %1057 = vrot.lane.b32.xlu1 %v1055_v5, %s8678_s5 }
 0x8ac   :  { %1224 = vrot.lane.b32.xlu1 %v1211_v6, %s8675_s21 }
 0x8e7   :  { %v874_v7 = vpop.permute.xlu1 %873 }
 0x8e8   :  { %7642 = vmatmul.mubr.msk.bf16.vlgmr.msra.gmra.mxu1 %vm165_vm6, %v874_v7 }
 0x8e9   :  { %7654 = vmatpush3.bf16.msra.mxu1 %v8172_v22  ;;  %7661 = vmatprep.mubr.msk.bf16.mxu1 %vm8686_vm1, %v8685_v3  ;;  %v9069_v22 = vand.u32 127, %v169_v48 }
 0x8ea   :  { %7655 = vmatprep.subr.bf16.mxu1 %v8685_v3 }
 0x8eb   :  { %vm449_vm4 = vcmp.eq.s32.totalorder %v9069_v22, 0  ;;  %vm1300_vm5 = vcmp.eq.s32.totalorder %v9069_v22, 1  ;;  %vm1302_vm13 = vcmp.lt.s32.totalorder %v9069_v22, 1 }
 0x8ed   :  { %7656 = vmatpush3.bf16.msra.mxu1 %v8173_v8 }
 0x8ee   :  { %7657 = vmatprep.subr.bf16.mxu1 %v8685_v3 }
 0x8f1   :  { %7658 = vmatpush3.bf16.msra.mxu1 %v8174_v9 }
 0x8f2   :  { %7659 = vmatprep.subr.bf16.mxu1 %v8685_v3 }
 0x8f4   :  { %v9027_v16 = vpop.permute.xlu1 %1045 }
 0x8f5   :  { %7660 = vmatpush3.bf16.msra.mxu1 %v8175_v10  ;;  %v1048_v13 = vmul.f32 %v9027_v16, %v8988_v36 }
 0x8f6   :  { %7683 = vmatprep.subr.bf16.mxu1 %v8685_v3 }
 0x91a   :  { %v1058_v14 = vpop.permute.xlu1 %1057 }
 0x91b   :  { %v1060_v15 = vadd.f32 %v1058_v14, %v1048_v13 }
 0x91d   :  { %v1061_v18 = vpack.c.bf16 %v1060_v15, %v1060_v15 }
 0x91e   :  { %v1225_v39 = vpop.permute.xlu1 %1224 }
 0x91f   :  { %v1064_v19 = vsel %vm165_vm6, %v9031_v17, %v1061_v18 }
 0x920   :  { %7662 = vmatmul.mubr.msk.bf16.vlgmr.msra.gmra.mxu1 %vm247_vm7, %v1064_v19 }
 0x921   :  { %7691 = vmatprep.mubr.msk.bf16.mxu1 %vm8686_vm1, %v8685_v3 }
 0x9a8   :  { %v9038_v20 = vpop.f32.mrf.mxu1 }
 0x9aa   :  { %v7643_v21 = vpop.f32.mrf.mxu1 }
 0x9ac   :  { %v927_v24 = vpop.f32.mrf.mxu1 }
 0x9ae   :  { %v7644_v25 = vpop.f32.mrf.mxu1 }
 0x9e0   :  { %v1140_v26 = vpop.f32.mrf.mxu1 }
 0x9e1   :  { %v1141_v27 = vadd.f32 %v8884_v31, %v1140_v26 }
 0x9e2   :  { %v7663_v29 = vpop.f32.mrf.mxu1 }
 0x9e3   :  { %v1216_v30 = vadd.f32 %v1211_v6, %v1141_v27  ;;  %v1590_v6 = vpack.c.bf16 %v8988_v36, %v8988_v36 }
 0x9e4   :  { %v1143_v32 = vpop.f32.mrf.mxu1 }
 0x9e5   :  { %v7145_v33 = vmul.f32 -1.442695, %v1216_v30 }
 0x9e6   :  { %v7664_v34 = vpop.f32.mrf.mxu1 }
 0x9e7   :  { %8296 = vpow2.f32 %v7145_v33 }
 0x9f4   :  { %v8297_v35 = vpop.eup %8296 }
 0x9f5   :  { %v1220_v37 = vadd.f32 1.0, %v8297_v35 }
 0x9f7   :  { %8298 = vrcp.f32 %v1220_v37 }
 0xa04   :  { %v8299_v38 = vpop.eup %8298 }
 0xa05   :  { %v1227_v40 = vmul.f32 %v8299_v38, %v1225_v39  ;;  %v1234_v47 = vsub.f32 1.0, %v8299_v38  ;;  %v1240_v50 = vmul.f32 %v8299_v38, %v8892_v57 }
 0xa07   :  { %1229 = vrot.lane.b32.xlu1 %v1227_v40, %s8675_s21 }
 0xa79   :  { %v1230_v44 = vpop.permute.xlu1 %1229 }
 0xa7a   :  { %v1232_v45 = vadd.f32 %v1230_v44, %v1141_v27 }
 0xa7c   :  { %8300 = vtanh.f32 %v1232_v45  ;;  %v8177_v45 = vld [vmem:[#allocation12] sm:$0xff]  }
 0xa89   :  { %v8301_v31 = vpop.eup %8300 }
 0xa8a   :  { %1236 = vrot.lane.b32.xlu1 %v8301_v31, %s8688_s29 }
 0xa8e   :  { %437 = vrot.lane.b32.xlu1 %v7113_v46, %s8678_s5  ;;  %v8178_v46 = vld [vmem:[%s10303_s8 + $0x18] sm:$0xff]  }
 0xa8f   :  { %7684 = vmatpush3.bf16.msra.mxu1 %v8178_v46 }
 0xa90   :  { %7685 = vmatprep.subr.bf16.mxu1 %v8685_v3 }
 0xafc   :  { %v1237_v49 = vpop.permute.xlu1 %1236 }
 0xafd   :  { %v1239_v52 = vmul.f32 %v1237_v49, %v1234_v47  ;;  %v8179_v47 = vld [vmem:[%s10303_s8 + $0x10] sm:$0xff]   ;;  %v8180_v49 = vld [vmem:[%s10303_s8 + $0x8] sm:$0xff]  }
 0xafe   :  { %7686 = vmatpush3.bf16.msra.mxu1 %v8179_v47 }
 0xaff   :  { %v9049_v54 = vadd.f32 %v1240_v50, %v1239_v52  ;;  %7687 = vmatprep.subr.bf16.mxu1 %v8685_v3  ;;  %v8181_v50 = vld [vmem:[%s10303_s8] sm:$0xff]  }
 0xb00   :  { %v9051_v23 = vpop.permute.xlu1 %437 }
 0xb01   :  { %v1252_v55 = vadd.f32 %v1250_v53, %v9049_v54  ;;  %v440_v56 = vmul.f32 %v9051_v23, %v8897_v60 }
 0xb02   :  { %7688 = vmatpush3.bf16.msra.mxu1 %v8180_v49 }
 0xb03   :  { %442 = vrot.lane.b32.xlu0 %v440_v56, %s8688_s29  ;;  %v1292_v59 = vmul.f32 %v1252_v55, %v9051_v23  ;;  %v1260_v1 = vrot.slane %v1252_v55, %v8894_v58  ;;  %7689 = vmatprep.subr.bf16.mxu1 %v8685_v3 }
 0xb05   :  { %1294 = vrot.lane.b32.xlu1 %v1292_v59, %s8688_s29  ;;  %v1268_v5 = vrot.slane %v1260_v1, %v8894_v58  ;;  %v1261_v26 = vcombine.high %v1260_v1, %v1260_v1 }
 0xb06   :  { %7690 = vmatpush3.bf16.msra.mxu1 %v8181_v50 }
 0xb07   :  { %v1279_v60 = vrot.slane %v1268_v5, %v8901_v62  ;;  %v1275_v27 = vrot.slane %v1261_v26, %v8894_v58  ;;  %7711 = vmatprep.subr.bf16.mxu1 %v8685_v3 }
 0xb09   :  { %v1283_v29 = vrot.slane %v1275_v27, %v8901_v62 }
 0xb75   :  { %v443_v28 = vpop.permute.xlu0 %442 }
 0xb76   :  { %v446_v57 = vsel %vm445_vm3, %v443_v28, 0.0 }
 0xb77   :  { %447 = vadd.xlane.f32.xlu0 %v446_v57  ;;  %v1295_v61 = vpop.permute.xlu1 %1294 }
 0xb78   :  { %v1297_v63 = vsel %vm445_vm3, %v1295_v61, 0.0 }
 0xb79   :  { %1298 = vadd.xlane.f32.xlu1 %v1297_v63 }
 0xb8a   :  { %1284 = vrot.lane.b32.xlu1 %v1279_v60, %s8688_s29 }
 0xb8e   :  { %1599 = vrot.lane.b32.xlu1 %v1590_v6, %s8688_s29 }
 0xc00   :  { %v448_v7 = vpop.xlane.xlu0 %447 }
 0xc01   :  { %v450_v8 = vsel %vm449_vm4, %v448_v7, 0.0 }
 0xc02   :  { %v1299_v9 = vpop.xlane.xlu1 %1298 }
 0xc03   :  { %v9074_v10 = vsel %vm1300_vm5, %v1299_v9, %v450_v8  ;;  %v1683_v8 = vrot.slane %v8980_v0, 6  ;;  %vm2163_vm5 = vcmp.eq.s32.totalorder %v9069_v22, 2 }
 0xc04   :  { %v1303_v12 = vsel %vm1302_vm13, %v9074_v10, -1e+30 }
 0xc05   :  { %v1304_v13 = vsel %vm453_vm8, %v1303_v12, -inf }
 0xc06   :  { %1305 = vmax.xlane.f32.xlu0 %v1304_v13  ;;  %v1285_v48 = vpop.permute.xlu1 %1284 }
 0xc07   :  { %1290 = vst.msk [vmem:[#allocation2 + $0x1] sm:$0x1] %vm429_vm9, %v1285_v48 }
 0xc0a   :  { %v1600_v31 = vpop.permute.xlu1 %1599 }
 0xc0e   :  { %v1319_v14 = vld [vmem:[#allocation2] sm:$0xff] }
 0xc0f   :  { %7674 = vmatpush3.msra.mxu0 %v1319_v14 }
 0xc10   :  { %7678 = vmatprep.subr.mxu0 %v8685_v3 }
 0xc8f   :  { %v1306_v15 = vpop.xlane.xlu0 %1305 }
 0xc90   :  { %v1307_v18 = vsub.f32 %v1303_v12, %v1306_v15 }
 0xc92   :  { %v1308_v19 = vmul.f32 1.442695, %v1307_v18 }
 0xc94   :  { %8302 = vpow2.f32 %v1308_v19 }
 0xca1   :  { %v8303_v21 = vpop.eup %8302 }
 0xca2   :  { %v1310_v24 = vsel %vm1302_vm13, %v8303_v21, 0.0  ;;  %vm2165_vm13 = vcmp.lt.s32.totalorder %v9069_v22, 2 }
 0xca3   :  { %v1311_v25 = vsel %vm453_vm8, %v1310_v24, 0.0 }
 0xca4   :  { %1312 = vadd.xlane.f32.xlu0 %v1311_v25 }
 0xcba   :  { %1286 = vrot.lane.b32.xlu0 %v1283_v29, %s8688_s29 }
 0xd2d   :  { %v1313_v30 = vpop.xlane.xlu0 %1312 }
 0xd2e   :  { %v1314_v32 = vmax.f32 %v1313_v30, 1e-30 }
 0xd30   :  { %8304 = vrcp.f32 %v1314_v32 }
 0xd31   :  { %v1287_v33 = vpop.permute.xlu0 %1286 }
 0xd32   :  { %1291 = vst.msk [vmem:[#allocation2 + $0x9] sm:$0x1] %vm429_vm9, %v1287_v33 }
 0xd39   :  { %v1320_v40 = vld [vmem:[#allocation2 + $0x8] sm:$0xff] }
 0xd3d   :  { %v8305_v34 = vpop.eup %8304 }
 0xd3e   :  { %v1316_v35 = vmul.f32 %v8305_v34, %v1310_v24 }
 0xd40   :  { %1318 = vst.msk [vmem:[#allocation18 + $0x2] sm:$0x3] %vm453_vm8, %v1316_v35  ;;  %v1328_v37 = vrot.slane %v1316_v35, %v8894_v58  ;;  %v9140_v35 = vld [vmem:[%s10310_s15] ss:$0 sm:$0xff] }
 0xd42   :  { %v1336_v38 = vrot.slane %v1328_v37, %v8894_v58  ;;  %v1329_v39 = vcombine.high %v1328_v37, %v1328_v37  ;;  %v9149_v37 = vld [vmem:[%s10317_s27 + $0x4] sm:$0x3] }
 0xd44   :  { %7676 = vmatmul.mubr.msk.f32.vlgmr.msra.gmra.mxu0 %vm493_vm10, %v1336_v38  ;;  %v1343_v44 = vrot.slane %v1329_v39, %v8894_v58  ;;  %v1892_v38 = vsel %vm174_vm0, %v9149_v37, -inf  ;;  %v9156_v39 = vld [vmem:[%s10309_s14] ss:$0 sm:$0xff] }
 0xd45   :  { %7679 = vmatpush3.msra.mxu0 %v1320_v40  ;;  %7680 = vmatprep.mubr.msk.f32.mxu0 %vm8686_vm1, %v8685_v3 }
 0xd46   :  { %7695 = vmatprep.subr.bf16.mxu0 %v8685_v3 }
 0xd48   :  { %7681 = vmatmul.mubr.msk.f32.vlgmr.msra.gmra.mxu0 %vm493_vm10, %v1343_v44 }
 0xd49   :  { %7696 = vmatpush3.bf16.msra.mxu0 %v8176_v41  ;;  %7699 = vmatprep.mubr.msk.bf16.mxu0 %vm8686_vm1, %v8685_v3 }
 0xd4a   :  { %7697 = vmatprep.subr.bf16.mxu0 %v8685_v3 }
 0xd4d   :  { %7698 = vmatpush3.bf16.msra.mxu0 %v8177_v45 }
 0xd4e   :  { %7703 = vmatprep.subr.bf16.mxu0 %v8685_v3 }
 0xd50   :  { %7700 = vmatmul.mubr.msk.bf16.vlgmr.msra.gmra.mxu0 %vm165_vm6, %v1600_v31 }
 0xd51   :  { %7707 = vmatprep.mubr.msk.bf16.mxu0 %vm8686_vm1, %v8685_v3 }
 0xe04   :  { %v1412_v52 = vpop.f32.mrf.mxu0 }
 0xe05   :  { %v1488_v56 = vpack.c.bf16 %v1412_v52, %v1412_v52 }
 0xe06   :  { %v7677_v53 = vpop.f32.mrf.mxu0 }
 0xe07   :  { %v1492_v61 = vunpack.c.l.b16 %v1488_v56 }
 0xe08   :  { %v1484_v55 = vpop.f32.mrf.mxu0 }
 0xe09   :  { %v1489_v59 = vpack.c.bf16 %v1484_v55, %v1484_v55 }
 0xe0a   :  { %v7682_v28 = vpop.f32.mrf.mxu0 }
 0xe0b   :  { %v1493_v57 = vunpack.c.l.b16 %v1489_v59 }
 0xe0d   :  { %v1494_v63 = vrot.slane %v1493_v57, 7 }
 0xe0f   :  { %v1495_v1 = vsel %vm645_vm11, %v1494_v63, %v1492_v61 }
 0xe10   :  { %v1650_v5 = vpop.f32.mrf.mxu0  ;;  %v1496_v60 = vpack.c.b16 %v1495_v1, %v1495_v1 }
 0xe11   :  { %v1651_v6 = vadd.f32 %v8949_v42, %v1650_v5 }
 0xe12   :  { %v7701_v7 = vpop.f32.mrf.mxu0  ;;  %1497 = vrot.lane.b32.xlu1 %v1496_v60, %s8678_s5 }
 0xe13   :  { %1664 = vrot.lane.b32.xlu0 %v1651_v6, %s8675_s21 }
 0xe14   :  { %v1653_v9 = vpop.f32.mrf.mxu0 }
 0xe16   :  { %v7702_v12 = vpop.f32.mrf.mxu0 }
 0xe17   :  { %1684 = vrot.lane.b32.xlu0 %v1683_v8, %s8690_s12 }
 0xe84   :  { %v1498_v13 = vpop.permute.xlu1 %1497 }
 0xe85   :  { %v1665_v48 = vpop.permute.xlu0 %1664  ;;  %v1500_v14 = vsel %vm165_vm6, %v9031_v17, %v1498_v13 }
 0xe86   :  { %7692 = vmatmul.mubr.msk.bf16.vlgmr.msra.gmra.mxu1 %vm247_vm7, %v1500_v14  ;;  %v8183_v14 = vld [vmem:[#allocation15] sm:$0xff]  }
 0xe87   :  { %7715 = vmatprep.mubr.msk.bf16.mxu1 %vm8686_vm1, %v8685_v3 }
 0xe89   :  { %v1685_v42 = vpop.permute.xlu0 %1684 }
 0xe8a   :  { %v1687_v15 = vsel %vm736_vm12, %v8980_v0, %v1685_v42 }
 0xe8b   :  { %v1688_v18 = vsub.f32 1.0, %v1687_v15 }
 0xe8d   :  { %1691 = vperm.xlu0 %8140, %v1688_v18  }
 0xe91   :  { %8142 = vset.pattern.permute.xlu0 %v8687_v11 }
 0xf08   :  { %v1692_v53 = vpop.permute.xlu0 %1691 }
 0xf09   :  { %v1694_v1 = vmul.f32 %v1692_v53, %v8988_v36 }
 0xf46   :  { %v1576_v19 = vpop.f32.mrf.mxu1 }
 0xf47   :  { %v1577_v21 = vadd.f32 %v8961_v51, %v1576_v19  ;;  %v988_v51 = vadd.f32 %v9140_v35, %v9001_v43  ;;  %v925_v43 = vadd.f32 %v9156_v39, %v9038_v20 }
 0xf48   :  { %v7693_v24 = vpop.f32.mrf.mxu1 }
 0xf49   :  { %v1583_v25 = vrot.slane %v1577_v21, 6  ;;  %v993_v40 = vadd.f32 %v988_v51, %v925_v43 }
 0xf4a   :  { %v1579_v26 = vpop.f32.mrf.mxu1 }
 0xf4b   :  { %v1585_v17 = vsel %vm736_vm12, %v1577_v21, %v1583_v25  ;;  %v7133_v41 = vmul.f32 -1.442695, %v993_v40  ;;  %v2013_v26 = vpack.c.bf16 %v9049_v54, %v9049_v54  ;;  %v8188_v40 = vld [vmem:[#allocation8 + $0x18] sm:$0xff]  }
 0xf4c   :  { %v1656_v27 = vadd.f32 %v1651_v6, %v1585_v17  ;;  %v7694_v29 = vpop.f32.mrf.mxu1 }
 0xf4e   :  { %v7159_v30 = vmul.f32 -1.442695, %v1656_v27  ;;  %v8187_v27 = vld [vmem:[#allocation14] sm:$0xff]  }
 0xf50   :  { %8306 = vpow2.f32 %v7159_v30 }
 0xf5d   :  { %v8307_v32 = vpop.eup %8306 }
 0xf5e   :  { %v1660_v33 = vadd.f32 1.0, %v8307_v32 }
 0xf60   :  { %8308 = vrcp.f32 %v1660_v33 }
 0xf61   :  { %8310 = vpow2.f32 %v7133_v41 }
 0xf6d   :  { %v8309_v0 = vpop.eup %8308 }
 0xf6e   :  { %v1667_v34 = vmul.f32 %v8309_v0, %v1665_v48  ;;  %v8311_v44 = vpop.eup %8310  ;;  %v1674_v20 = vsub.f32 1.0, %v8309_v0  ;;  %v1680_v28 = vmul.f32 %v8309_v0, %v8988_v36  ;;  %v8182_v36 = vld [vmem:[#allocation15 + $0x8] sm:$0xff]  }
 0xf6f   :  { %v997_v31 = vadd.f32 1.0, %v8311_v44  ;;  %7712 = vmatpush3.bf16.msra.mxu1 %v8182_v36  ;;  %v8189_v44 = vld [vmem:[#allocation8 + $0x10] sm:$0xff]  }
 0xf70   :  { %1669 = vrot.lane.b32.xlu1 %v1667_v34, %s8675_s21  ;;  %7713 = vmatprep.subr.bf16.mxu1 %v8685_v3 }
 0xf73   :  { %7714 = vmatpush3.bf16.msra.mxu1 %v8183_v14 }
 0xf74   :  { %1001 = vrot.lane.b32.xlu1 %v988_v51, %s8675_s21  ;;  %7731 = vmatprep.subr.bf16.mxu1 %v8685_v3  ;;  %v8184_v51 = vld [vmem:[#allocation9 + $0x8] sm:$0xff]  }
 0xf78   :  { %1697 = vperm.xlu1 %8141, %v1687_v15  }
 0xf9c   :  { %1893 = vmax.xlane.f32.xlu1 %v1892_v38 }
 0xfe2   :  { %v1670_v45 = vpop.permute.xlu1 %1669 }
 0xfe3   :  { %v1672_v46 = vadd.f32 %v1670_v45, %v1585_v17  ;;  %v8186_v17 = vld [vmem:[#allocation14 + $0x8] sm:$0xff]  }
 0xfe4   :  { %7704 = vmatpush3.bf16.msra.mxu0 %v8186_v17  ;;  %v8190_v45 = vld [vmem:[#allocation8 + $0x8] sm:$0xff]  }
 0xfe5   :  { %8312 = vtanh.f32 %v1672_v46  ;;  %7705 = vmatprep.subr.bf16.mxu0 %v8685_v3  ;;  %v8191_v46 = vld [vmem:[#allocation8] sm:$0xff]  }
 0xfe6   :  { %8314 = vrcp.f32 %v997_v31  ;;  %v1002_v49 = vpop.permute.xlu1 %1001 }
 0xfe8   :  { %7706 = vmatpush3.bf16.msra.mxu0 %v8187_v27 }
 0xfe9   :  { %7719 = vmatprep.subr.bf16.mxu0 %v8685_v3 }
 0xff2   :  { %v8313_v47 = vpop.eup %8312 }
 0xff3   :  { %1676 = vrot.lane.b32.xlu0 %v8313_v47, %s8688_s29  ;;  %v8315_v50 = vpop.eup %8314  ;;  %v1698_v55 = vpop.permute.xlu1 %1697  ;;  %v1888_v47 = vld [vmem:[#allocation3 + $0x4] sm:$0x3] }
 0xff4   :  { %v1004_v52 = vmul.f32 %v8315_v50, %v1002_v49  ;;  %v1011_v18 = vsub.f32 1.0, %v8315_v50  ;;  %v1017_v21 = vmul.f32 0.0, %v8315_v50  ;;  %v9218_v53 = vpack.c.bf16 %v1888_v47, %v1888_v47 }
 0xff7   :  { %1006 = vrot.lane.b32.xlu0 %v1004_v52, %s8675_s21 }
0x1025   :  { %v1894_v59 = vpop.xlane.xlu1 %1893 }
0x1026   :  { %vm1895_vm14 = vcmp.ge.f32.partialorder %v9149_v37, %v1894_v59 }
0x1027   :  { %v1897_v6 = vsel %vm1895_vm14, 1.0, %v8685_v3 }
0x1028   :  { %vm1899_vm15 = vcmp.lt.f32.partialorder %v1897_v6, 0.5 }
0x1029   :  { %v1900_v9 = vsel %vm1899_vm15, 1, %v8684_v2 }
0x1065   :  { %v1677_v56 = vpop.permute.xlu0 %1676 }
0x1066   :  { %v1679_v57 = vmul.f32 %v1677_v56, %v1674_v20 }
0x1068   :  { %v1681_v61 = vadd.f32 %v1680_v28, %v1679_v57 }
0x1069   :  { %v1007_v63 = vpop.permute.xlu0 %1006 }
0x106a   :  { %v1700_v5 = vmul.f32 %v1698_v55, %v1681_v61  ;;  %v1009_v60 = vadd.f32 %v1007_v63, %v925_v43  ;;  %v8185_v43 = vld [vmem:[#allocation9] sm:$0xff]   ;;  %v9228_v61 = vld [vmem:[#allocation11] ss:$0 sm:$0xff] }
0x106c   :  { %v9168_v7 = vadd.f32 %v1700_v5, %v1694_v1  ;;  %8316 = vtanh.f32 %v1009_v60 }
0x106e   :  { %v1705_v8 = vrot.slane %v9168_v7, 2  ;;  %v1702_v29 = vmul.f32 %v9168_v7, %v9027_v16 }
0x1070   :  { %1706 = vrot.lane.b32.xlu0 %v1705_v8, %s8688_s29 }
0x1074   :  { %1901 = vrot.lane.b32.xlu0 %v1900_v9, %s8672_s28 }
0x1079   :  { %v8317_v12 = vpop.eup %8316 }
0x107a   :  { %1013 = vrot.lane.b32.xlu0 %v8317_v12, %s8688_s29 }
0x10e2   :  { %v1707_v13 = vpop.permute.xlu0 %1706 }
0x10e3   :  { %v1709_v48 = vmul.f32 %v1707_v13, %v9014_v4 }
0x10e5   :  { %1711 = vrot.lane.b32.xlu0 %v1709_v48, %s8678_s5 }
0x10e6   :  { %v1902_v42 = vpop.permute.xlu0 %1901 }
0x10e7   :  { %vm1903_vm2 = vcmp.ne.s32.totalorder %v1902_v42, 0 }
0x10e8   :  { %vm1904_vm4 = vmand %vm1895_vm14, %vm1903_vm2 }
0x10e9   :  { %v1905_v15 = vsel %vm1904_vm4, 1.0, %v8685_v3 }
0x10ea   :  { %1915 = vperm.xlu0 %8142, %v1905_v15  }
0x10ec   :  { %v1014_v19 = vpop.permute.xlu0 %1013 }
0x10ed   :  { %v1016_v24 = vmul.f32 %v1014_v19, %v1011_v18 }
0x10ee   :  { %8143 = vset.pattern.permute.xlu0 %v8684_v2 }
0x10ef   :  { %v9183_v4 = vadd.f32 %v1017_v21, %v1016_v24 }
0x10f1   :  { %v1789_v25 = vpack.c.bf16 %v9183_v4, %v9183_v4 }
0x10f3   :  { %1798 = vrot.lane.b32.xlu0 %v1789_v25, %s8688_s29 }
0x10f7   :  { %2022 = vrot.lane.b32.xlu0 %v2013_v26, %s8688_s29 }
0x10fb   :  { %1908 = vperm.xlu0 %8143, %v1897_v6  }
0x1157   :  { %v1712_v30 = vpop.permute.xlu0 %1711 }
0x1158   :  { %v1714_v32 = vadd.f32 %v1712_v30, %v1702_v29  ;;  %v7181_v29 = vld [vmem:[#allocation6 + $0x2] ss:$0 sm:$0xff] }
0x115a   :  { %v1719_v33 = vpack.c.bf16 %v1714_v32, %v1714_v32 }
0x115c   :  { %1728 = vrot.lane.b32.xlu1 %v1719_v33, %s8688_s29 }
0x1165   :  { %v9196_v0 = vpop.permute.xlu0 %1915 }
0x1166   :  { %v1918_v34 = vmul.f32 %v9196_v0, %v1707_v13  ;;  %v9237_v13 = vld [vmem:[%s10301_s6] ss:$0 sm:$0xff] }
0x1168   :  { %1920 = vrot.lane.b32.xlu0 %v1918_v34, %s8678_s5 }
0x1169   :  { %v1799_v38 = vpop.permute.xlu0 %1798 }
0x116a   :  { %7716 = vmatmul.mubr.msk.bf16.vlgmr.msra.gmra.mxu1 %vm165_vm6, %v1799_v38 }
0x116b   :  { %7732 = vmatpush3.bf16.msra.mxu1 %v8184_v51  ;;  %7735 = vmatprep.mubr.msk.bf16.mxu1 %vm8686_vm1, %v8685_v3 }
0x116c   :  { %7733 = vmatprep.subr.bf16.mxu1 %v8685_v3 }
0x116d   :  { %v2023_v16 = vpop.permute.xlu0 %2022 }
0x116f   :  { %7734 = vmatpush3.bf16.msra.mxu1 %v8185_v43 }
0x1170   :  { %7739 = vmatprep.subr.mxu1 %v8685_v3 }
0x1172   :  { %7736 = vmatmul.mubr.msk.bf16.vlgmr.msra.gmra.mxu1 %vm165_vm6, %v2023_v16 }
0x1173   :  { %7741 = vmatprep.mubr.msk.f32.mxu1 %vm8686_vm1, %v8685_v3 }
0x1176   :  { %v9213_v31 = vpop.permute.xlu0 %1908 }
0x1177   :  { %v1911_v49 = vmul.f32 %v9213_v31, %v9168_v7 }
0x11ce   :  { %v1729_v41 = vpop.permute.xlu1 %1728 }
0x11cf   :  { %7708 = vmatmul.mubr.msk.bf16.vlgmr.msra.gmra.mxu0 %vm165_vm6, %v1729_v41 }
0x11d0   :  { %7720 = vmatpush3.bf16.msra.mxu0 %v8188_v40  ;;  %7727 = vmatprep.mubr.msk.bf16.mxu0 %vm8686_vm1, %v8685_v3 }
0x11d1   :  { %7721 = vmatprep.subr.bf16.mxu0 %v8685_v3 }
0x11d4   :  { %7722 = vmatpush3.bf16.msra.mxu0 %v8189_v44 }
0x11d5   :  { %7723 = vmatprep.subr.bf16.mxu0 %v8685_v3 }
0x11d8   :  { %7724 = vmatpush3.bf16.msra.mxu0 %v8190_v45 }
0x11d9   :  { %7725 = vmatprep.subr.bf16.mxu0 %v8685_v3 }
0x11da   :  { %v1921_v50 = vpop.permute.xlu0 %1920 }
0x11db   :  { %v1923_v52 = vadd.f32 %v1921_v50, %v1911_v49 }
0x11dc   :  { %7726 = vmatpush3.bf16.msra.mxu0 %v8191_v46 }
0x11dd   :  { %v1924_v55 = vpack.c.bf16 %v1923_v52, %v1923_v52  ;;  %7749 = vmatprep.subr.bf16.mxu0 %v8685_v3  ;;  %v2453_v52 = vpack.c.bf16 %v9168_v7, %v9168_v7 }
0x11df   :  { %v1927_v20 = vsel %vm165_vm6, %v9218_v53, %v1924_v55 }
0x11e0   :  { %7728 = vmatmul.mubr.msk.bf16.vlgmr.msra.gmra.mxu0 %vm247_vm7, %v1927_v20 }
0x11e1   :  { %7757 = vmatprep.mubr.msk.bf16.mxu0 %vm8686_vm1, %v8685_v3 }
0x122a   :  { %v9226_v56 = vpop.f32.mrf.mxu1 }
0x122c   :  { %v7717_v59 = vpop.f32.mrf.mxu1 }
0x122e   :  { %v1852_v28 = vpop.f32.mrf.mxu1 }
0x1230   :  { %v7718_v57 = vpop.f32.mrf.mxu1 }
0x1232   :  { %v2073_v63 = vpop.f32.mrf.mxu1 }
0x1233   :  { %v2074_v1 = vadd.f32 %v9228_v61, %v2073_v63 }
0x1234   :  { %v7737_v5 = vpop.f32.mrf.mxu1 }
0x1235   :  { %2087 = vrot.lane.b32.xlu0 %v2074_v1, %s8675_s21 }
0x1236   :  { %v2076_v60 = vpop.f32.mrf.mxu1 }
0x1238   :  { %v7738_v6 = vpop.f32.mrf.mxu1 }
0x128f   :  { %v9232_v8 = vpop.f32.mrf.mxu0 }
0x1291   :  { %v7709_v9 = vpop.f32.mrf.mxu0 }
0x1293   :  { %v1782_v12 = vpop.f32.mrf.mxu0 }
0x1295   :  { %v7710_v36 = vpop.f32.mrf.mxu0 }
0x12a0   :  { %v2003_v48 = vpop.f32.mrf.mxu0 }
0x12a1   :  { %v2004_v14 = vadd.f32 %v9237_v13, %v2003_v48 }
0x12a2   :  { %v7729_v42 = vpop.f32.mrf.mxu0 }
0x12a3   :  { %v2079_v15 = vadd.f32 %v2074_v1, %v2004_v14 }
0x12a4   :  { %v2006_v18 = vpop.f32.mrf.mxu0 }
0x12a5   :  { %v7180_v19 = vmul.f32 -1.442695, %v2079_v15 }
0x12a6   :  { %v7730_v21 = vpop.f32.mrf.mxu0 }
0x12a7   :  { %8318 = vpow2.f32 %v7180_v19  ;;  %v2088_v17 = vpop.permute.xlu0 %2087 }
0x12b4   :  { %v8319_v24 = vpop.eup %8318 }
0x12b5   :  { %v2083_v25 = vadd.f32 1.0, %v8319_v24 }
0x12b7   :  { %8320 = vrcp.f32 %v2083_v25 }
0x12c4   :  { %v8321_v26 = vpop.eup %8320 }
0x12c5   :  { %v2090_v27 = vmul.f32 %v8321_v26, %v2088_v17  ;;  %v2097_v34 = vsub.f32 1.0, %v8321_v26  ;;  %v2103_v38 = vmul.f32 %v8321_v26, %v9049_v54  ;;  %v8192_v26 = vld [vmem:[#allocation12 + $0x8] sm:$0xff]  }
0x12c7   :  { %2092 = vrot.lane.b32.xlu1 %v2090_v27, %s8675_s21  ;;  %v8193_v27 = vld [vmem:[#allocation12] sm:$0xff]  }
0x12cb   :  { %2112 = vrot.lane.b32.xlu1 %v7181_v29, %s8678_s5 }
0x1339   :  { %v2093_v30 = vpop.permute.xlu1 %2092 }
0x133a   :  { %v2095_v32 = vadd.f32 %v2093_v30, %v2004_v14  ;;  %v8194_v30 = vld [vmem:[%s10303_s8 + $0x18] sm:$0xff]  }
0x133b   :  { %7750 = vmatpush3.bf16.msra.mxu0 %v8194_v30  ;;  %v1780_v30 = vadd.f32 %v9156_v39, %v9232_v8 }
0x133c   :  { %8322 = vtanh.f32 %v2095_v32  ;;  %v8195_v32 = vld [vmem:[%s10303_s8 + $0x10] sm:$0xff]   ;;  %7751 = vmatprep.subr.bf16.mxu0 %v8685_v3 }
0x133d   :  { %v2113_v16 = vpop.permute.xlu1 %2112 }
0x133f   :  { %7752 = vmatpush3.bf16.msra.mxu0 %v8195_v32 }
0x1340   :  { %7753 = vmatprep.subr.bf16.mxu0 %v8685_v3 }
0x1349   :  { %v8323_v33 = vpop.eup %8322 }
0x134a   :  { %2099 = vrot.lane.b32.xlu0 %v8323_v33, %s8688_s29  ;;  %v8196_v33 = vld [vmem:[%s10303_s8 + $0x8] sm:$0xff]  }
0x134b   :  { %7754 = vmatpush3.bf16.msra.mxu0 %v8196_v33 }
0x134c   :  { %7755 = vmatprep.subr.bf16.mxu0 %v8685_v3 }
0x13bc   :  { %v2100_v51 = vpop.permute.xlu0 %2099 }
0x13bd   :  { %v2102_v43 = vmul.f32 %v2100_v51, %v2097_v34  ;;  %v8197_v34 = vld [vmem:[%s10303_s8] sm:$0xff]  }
0x13be   :  { %7756 = vmatpush3.bf16.msra.mxu0 %v8197_v34 }
0x13bf   :  { %v9244_v40 = vadd.f32 %v2103_v38, %v2102_v43  ;;  %7777 = vmatprep.subr.bf16.mxu0 %v8685_v3 }
0x13c1   :  { %v2115_v41 = vadd.f32 %v2113_v16, %v9244_v40 }
0x13c3   :  { %v2155_v44 = vmul.f32 %v2115_v41, %v9051_v23  ;;  %v2123_v47 = vrot.slane %v2115_v41, %v8894_v58 }
0x13c5   :  { %2157 = vrot.lane.b32.xlu0 %v2155_v44, %s8688_s29  ;;  %v2124_v49 = vcombine.high %v2123_v47, %v2123_v47 }
0x13c7   :  { %v2138_v50 = vrot.slane %v2124_v49, %v8894_v58  ;;  %v9306_v49 = vld [vmem:[%s10306_s11] ss:$0 sm:$0xff] }
0x13c9   :  { %v2146_v54 = vrot.slane %v2138_v50, %v8901_v62 }
0x1437   :  { %v2158_v45 = vpop.permute.xlu0 %2157 }
0x1438   :  { %v2160_v46 = vsel %vm445_vm3, %v2158_v45, 0.0 }
0x1439   :  { %2161 = vadd.xlane.f32.xlu1 %v2160_v46 }
0x144a   :  { %2149 = vrot.lane.b32.xlu1 %v2146_v54, %s8688_s29 }
0x144e   :  { %2462 = vrot.lane.b32.xlu1 %v2453_v52, %s8688_s29 }
0x14c2   :  { %v2162_v55 = vpop.xlane.xlu1 %2161 }
0x14c3   :  { %v9260_v20 = vsel %vm2163_vm5, %v2162_v55, %v9074_v10  ;;  %v2131_v10 = vrot.slane %v2123_v47, %v8894_v58  ;;  %vm3026_vm5 = vcmp.eq.s32.totalorder %v9069_v22, 3 }
0x14c4   :  { %v2166_v59 = vsel %vm2165_vm13, %v9260_v20, -1e+30 }
0x14c5   :  { %v2167_v28 = vsel %vm453_vm8, %v2166_v59, -inf  ;;  %v2142_v12 = vrot.slane %v2131_v10, %v8901_v62 }
0x14c6   :  { %2168 = vmax.xlane.f32.xlu0 %v2167_v28  ;;  %v2150_v57 = vpop.permute.xlu1 %2149  ;;  %v2546_v28 = vrot.slane %v9149_v37, 6 }
0x14c7   :  { %2154 = vst.msk [vmem:[#allocation2 + $0xa] sm:$0x1] %vm429_vm9, %v2150_v57 }
0x14ca   :  { %v2463_v29 = vpop.permute.xlu1 %2462 }
0x14ce   :  { %v2183_v25 = vld [vmem:[#allocation2 + $0x8] sm:$0xff] }
0x154f   :  { %v2169_v63 = vpop.xlane.xlu0 %2168 }
0x1550   :  { %v2170_v1 = vsub.f32 %v2166_v59, %v2169_v63 }
0x1552   :  { %v2171_v5 = vmul.f32 1.442695, %v2170_v1 }
0x1554   :  { %8324 = vpow2.f32 %v2171_v5 }
0x1561   :  { %v8325_v60 = vpop.eup %8324 }
0x1562   :  { %v2173_v6 = vsel %vm2165_vm13, %v8325_v60, 0.0  ;;  %vm3028_vm13 = vcmp.lt.s32.totalorder %v9069_v22, 3 }
0x1563   :  { %v2174_v9 = vsel %vm453_vm8, %v2173_v6, 0.0 }
0x1564   :  { %2175 = vadd.xlane.f32.xlu0 %v2174_v9 }
0x157a   :  { %2147 = vrot.lane.b32.xlu0 %v2142_v12, %s8688_s29  ;;  %v9325_v12 = vld [vmem:[%s10305_s10] ss:$0 sm:$0xff] }
0x15ed   :  { %v2176_v36 = vpop.xlane.xlu0 %2175 }
0x15ee   :  { %v2177_v48 = vmax.f32 %v2176_v36, 1e-30 }
0x15f0   :  { %8326 = vrcp.f32 %v2177_v48 }
0x15f1   :  { %v2148_v14 = vpop.permute.xlu0 %2147 }
0x15f2   :  { %2153 = vst.msk [vmem:[#allocation2 + $0x2] sm:$0x1] %vm429_vm9, %v2148_v14 }
0x15f9   :  { %v2182_v42 = vld [vmem:[#allocation2] sm:$0xff] }
0x15fa   :  { %7740 = vmatpush3.msra.mxu1 %v2182_v42 }
0x15fb   :  { %7744 = vmatprep.subr.mxu1 %v8685_v3 }
0x15fd   :  { %v8327_v15 = vpop.eup %8326 }
0x15fe   :  { %v2179_v18 = vmul.f32 %v8327_v15, %v2173_v6 }
0x1600   :  { %2181 = vst.msk [vmem:[#allocation18 + $0x4] sm:$0x3] %vm453_vm8, %v2179_v18  ;;  %v2191_v19 = vrot.slane %v2179_v18, %v8894_v58 }
0x1602   :  { %v2199_v21 = vrot.slane %v2191_v19, %v8894_v58  ;;  %v2192_v24 = vcombine.high %v2191_v19, %v2191_v19 }
0x1604   :  { %7742 = vmatmul.mubr.msk.f32.vlgmr.msra.gmra.mxu1 %vm493_vm10, %v2199_v21  ;;  %v2206_v17 = vrot.slane %v2192_v24, %v8894_v58 }
0x1605   :  { %7745 = vmatpush3.msra.mxu1 %v2183_v25  ;;  %7746 = vmatprep.mubr.msk.f32.mxu1 %vm8686_vm1, %v8685_v3 }
0x1606   :  { %7761 = vmatprep.subr.bf16.mxu1 %v8685_v3 }
0x1608   :  { %7747 = vmatmul.mubr.msk.f32.vlgmr.msra.gmra.mxu1 %vm493_vm10, %v2206_v17  ;;  %v1850_v17 = vadd.f32 %v9140_v35, %v9226_v56 }
0x1609   :  { %7762 = vmatpush3.bf16.msra.mxu1 %v8192_v26  ;;  %7765 = vmatprep.mubr.msk.bf16.mxu1 %vm8686_vm1, %v8685_v3 }
0x160a   :  { %7763 = vmatprep.subr.bf16.mxu1 %v8685_v3  ;;  %v1855_v32 = vadd.f32 %v1850_v17, %v1780_v30 }
0x160c   :  { %v7168_v33 = vmul.f32 -1.442695, %v1855_v32  ;;  %v8200_v32 = vld [vmem:[#allocation9 + $0x8] sm:$0xff]  }
0x160d   :  { %7764 = vmatpush3.bf16.msra.mxu1 %v8193_v27  ;;  %v9336_v27 = vld [vmem:[%s10317_s27 + $0x6] sm:$0x3] }
0x160e   :  { %7769 = vmatprep.subr.bf16.mxu1 %v8685_v3 }
0x1610   :  { %7766 = vmatmul.mubr.msk.bf16.vlgmr.msra.gmra.mxu1 %vm165_vm6, %v2463_v29  ;;  %v2755_v29 = vsel %vm174_vm0, %v9336_v27, -inf }
0x1611   :  { %7773 = vmatprep.mubr.msk.bf16.mxu1 %vm8686_vm1, %v8685_v3 }
0x16c4   :  { %v2275_v51 = vpop.f32.mrf.mxu1 }
0x16c5   :  { %v2351_v16 = vpack.c.bf16 %v2275_v51, %v2275_v51 }
0x16c6   :  { %v7743_v38 = vpop.f32.mrf.mxu1 }
0x16c7   :  { %v2355_v46 = vunpack.c.l.b16 %v2351_v16 }
0x16c8   :  { %v2347_v43 = vpop.f32.mrf.mxu1 }
0x16c9   :  { %v2352_v41 = vpack.c.bf16 %v2347_v43, %v2347_v43 }
0x16ca   :  { %v7748_v44 = vpop.f32.mrf.mxu1 }
0x16cb   :  { %v2356_v45 = vunpack.c.l.b16 %v2352_v41 }
0x16cd   :  { %v2357_v47 = vrot.slane %v2356_v45, 7 }
0x16cf   :  { %v2358_v50 = vsel %vm645_vm11, %v2357_v47, %v2355_v46 }
0x16d0   :  { %v2513_v54 = vpop.f32.mrf.mxu1  ;;  %v2359_v52 = vpack.c.b16 %v2358_v50, %v2358_v50 }
0x16d1   :  { %v2514_v55 = vadd.f32 %v9306_v49, %v2513_v54 }
0x16d2   :  { %v7767_v59 = vpop.f32.mrf.mxu1  ;;  %2360 = vrot.lane.b32.xlu1 %v2359_v52, %s8678_s5 }
0x16d3   :  { %2527 = vrot.lane.b32.xlu0 %v2514_v55, %s8675_s21 }
0x16d4   :  { %v2516_v57 = vpop.f32.mrf.mxu1 }
0x16d6   :  { %v7768_v63 = vpop.f32.mrf.mxu1 }
0x16d7   :  { %2547 = vrot.lane.b32.xlu0 %v2546_v28, %s8690_s12 }
0x1744   :  { %v2361_v1 = vpop.permute.xlu1 %2360 }
0x1745   :  { %v2363_v5 = vsel %vm165_vm6, %v9218_v53, %v2361_v1  ;;  %v2528_v60 = vpop.permute.xlu0 %2527 }
0x1746   :  { %7758 = vmatmul.mubr.msk.bf16.vlgmr.msra.gmra.mxu0 %vm247_vm7, %v2363_v5 }
0x1747   :  { %7781 = vmatprep.mubr.msk.bf16.mxu0 %vm8686_vm1, %v8685_v3 }
0x1749   :  { %v2548_v6 = vpop.permute.xlu0 %2547 }
0x174a   :  { %v2550_v9 = vsel %vm736_vm12, %v9149_v37, %v2548_v6 }
0x174b   :  { %v2551_v10 = vsub.f32 1.0, %v2550_v9 }
0x174d   :  { %2554 = vperm.xlu0 %8143, %v2551_v10  }
0x1751   :  { %8144 = vset.pattern.permute.xlu0 %v8687_v11 }
0x17c8   :  { %v2555_v44 = vpop.permute.xlu0 %2554 }
0x1806   :  { %v2439_v53 = vpop.f32.mrf.mxu0 }
0x1807   :  { %v2440_v36 = vadd.f32 %v9325_v12, %v2439_v53  ;;  %v8199_v53 = vld [vmem:[#allocation15] sm:$0xff]  }
0x1808   :  { %v7759_v48 = vpop.f32.mrf.mxu0 }
0x1809   :  { %v2446_v14 = vrot.slane %v2440_v36, 6 }
0x180a   :  { %v2442_v42 = vpop.f32.mrf.mxu0 }
0x180b   :  { %v2448_v15 = vsel %vm736_vm12, %v2440_v36, %v2446_v14 }
0x180c   :  { %v2519_v18 = vadd.f32 %v2514_v55, %v2448_v15  ;;  %v7760_v19 = vpop.f32.mrf.mxu0  ;;  %v2557_v55 = vmul.f32 %v2555_v44, %v9168_v7 }
0x180d   :  { %v2876_v19 = vpack.c.bf16 %v9244_v40, %v9244_v40 }
0x180e   :  { %v7194_v37 = vmul.f32 -1.442695, %v2519_v18 }
0x1810   :  { %8328 = vpow2.f32 %v7194_v37  ;;  %v8202_v37 = vld [vmem:[#allocation14 + $0x8] sm:$0xff]  }
0x1811   :  { %7770 = vmatpush3.bf16.msra.mxu1 %v8202_v37 }
0x1812   :  { %7771 = vmatprep.subr.bf16.mxu1 %v8685_v3 }
0x181d   :  { %v8329_v21 = vpop.eup %8328 }
0x181e   :  { %v2523_v24 = vadd.f32 1.0, %v8329_v21  ;;  %v8203_v21 = vld [vmem:[#allocation14] sm:$0xff]  }
0x181f   :  { %7772 = vmatpush3.bf16.msra.mxu1 %v8203_v21 }
0x1820   :  { %8330 = vrcp.f32 %v2523_v24  ;;  %7785 = vmatprep.subr.bf16.mxu1 %v8685_v3 }
0x1821   :  { %8332 = vpow2.f32 %v7168_v33 }
0x182d   :  { %v8331_v25 = vpop.eup %8330 }
0x182e   :  { %v2530_v26 = vmul.f32 %v8331_v25, %v2528_v60  ;;  %v8333_v34 = vpop.eup %8332  ;;  %v2537_v39 = vsub.f32 1.0, %v8331_v25  ;;  %v2543_v47 = vmul.f32 %v8331_v25, %v9168_v7  ;;  %v8198_v7 = vld [vmem:[#allocation15 + $0x8] sm:$0xff]  }
0x182f   :  { %v1859_v56 = vadd.f32 1.0, %v8333_v34  ;;  %7778 = vmatpush3.bf16.msra.mxu0 %v8198_v7  ;;  %v8201_v34 = vld [vmem:[#allocation9] sm:$0xff]  }
0x1830   :  { %2532 = vrot.lane.b32.xlu1 %v2530_v26, %s8675_s21  ;;  %7779 = vmatprep.subr.bf16.mxu0 %v8685_v3 }
0x1833   :  { %7780 = vmatpush3.bf16.msra.mxu0 %v8199_v53 }
0x1834   :  { %1863 = vrot.lane.b32.xlu1 %v1850_v17, %s8675_s21  ;;  %7797 = vmatprep.subr.bf16.mxu0 %v8685_v3 }
0x1838   :  { %2560 = vperm.xlu1 %8141, %v2550_v9  }
0x185c   :  { %2756 = vmax.xlane.f32.xlu1 %v2755_v29 }
0x18a2   :  { %v2533_v35 = vpop.permute.xlu1 %2532 }
0x18a3   :  { %v2535_v51 = vadd.f32 %v2533_v35, %v2448_v15  ;;  %v8204_v35 = vld [vmem:[#allocation8 + $0x18] sm:$0xff]  }
0x18a5   :  { %8334 = vtanh.f32 %v2535_v51  ;;  %v8205_v51 = vld [vmem:[#allocation8 + $0x10] sm:$0xff]  }
0x18a6   :  { %8336 = vrcp.f32 %v1859_v56  ;;  %v1864_v43 = vpop.permute.xlu1 %1863 }
0x18b2   :  { %v8335_v38 = vpop.eup %8334 }
0x18b3   :  { %2539 = vrot.lane.b32.xlu0 %v8335_v38, %s8688_s29  ;;  %v8337_v16 = vpop.eup %8336  ;;  %v2561_v45 = vpop.permute.xlu1 %2560  ;;  %v8206_v38 = vld [vmem:[#allocation8 + $0x8] sm:$0xff]  }
0x18b4   :  { %v1866_v41 = vmul.f32 %v8337_v16, %v1864_v43  ;;  %v1873_v48 = vsub.f32 1.0, %v8337_v16  ;;  %v1879_v42 = vmul.f32 %v8337_v16, %v9183_v4  ;;  %v8207_v16 = vld [vmem:[#allocation8] sm:$0xff]  }
0x18b7   :  { %1868 = vrot.lane.b32.xlu0 %v1866_v41, %s8675_s21  ;;  %v2751_v41 = vld [vmem:[#allocation3 + $0x6] sm:$0x3] }
0x18e5   :  { %v2757_v46 = vpop.xlane.xlu1 %2756 }
0x18e6   :  { %vm2758_vm14 = vcmp.ge.f32.partialorder %v9336_v27, %v2757_v46 }
0x18e7   :  { %v2760_v57 = vsel %vm2758_vm14, 1.0, %v8685_v3 }
0x18e8   :  { %vm2762_vm15 = vcmp.lt.f32.partialorder %v2760_v57, 0.5 }
0x18e9   :  { %v2763_v5 = vsel %vm2762_vm15, 1, %v8684_v2 }
0x1925   :  { %v2540_v8 = vpop.permute.xlu0 %2539 }
0x1926   :  { %v2542_v50 = vmul.f32 %v2540_v8, %v2537_v39  ;;  %v9401_v8 = vpack.c.bf16 %v2751_v41, %v2751_v41 }
0x1928   :  { %v2544_v54 = vadd.f32 %v2543_v47, %v2542_v50 }
0x1929   :  { %v1869_v52 = vpop.permute.xlu0 %1868 }
0x192a   :  { %v2563_v59 = vmul.f32 %v2561_v45, %v2544_v54  ;;  %v1871_v28 = vadd.f32 %v1869_v52, %v1780_v30 }
0x192c   :  { %v9350_v63 = vadd.f32 %v2563_v59, %v2557_v55  ;;  %8338 = vtanh.f32 %v1871_v28 }
0x192e   :  { %v2568_v1 = vrot.slane %v9350_v63, 2  ;;  %v2565_v24 = vmul.f32 %v9350_v63, %v9213_v31 }
0x1930   :  { %2569 = vrot.lane.b32.xlu0 %v2568_v1, %s8688_s29 }
0x1934   :  { %2764 = vrot.lane.b32.xlu0 %v2763_v5, %s8672_s28 }
0x1939   :  { %v8339_v60 = vpop.eup %8338 }
0x193a   :  { %1875 = vrot.lane.b32.xlu0 %v8339_v60, %s8688_s29 }
0x19a2   :  { %v2570_v6 = vpop.permute.xlu0 %2569 }
0x19a3   :  { %v2572_v9 = vmul.f32 %v2570_v6, %v9196_v0 }
0x19a5   :  { %2574 = vrot.lane.b32.xlu0 %v2572_v9, %s8678_s5 }
0x19a6   :  { %v2765_v10 = vpop.permute.xlu0 %2764 }
0x19a7   :  { %vm2766_vm2 = vcmp.ne.s32.totalorder %v2765_v10, 0 }
0x19a8   :  { %vm2767_vm4 = vmand %vm2758_vm14, %vm2766_vm2 }
0x19a9   :  { %v2768_v36 = vsel %vm2767_vm4, 1.0, %v8685_v3 }
0x19aa   :  { %2778 = vperm.xlu0 %8144, %v2768_v36  }
0x19ac   :  { %v1876_v14 = vpop.permute.xlu0 %1875 }
0x19ad   :  { %v1878_v15 = vmul.f32 %v1876_v14, %v1873_v48 }
0x19ae   :  { %8145 = vset.pattern.permute.xlu0 %v8684_v2 }
0x19af   :  { %v9366_v0 = vadd.f32 %v1879_v42, %v1878_v15 }
0x19b1   :  { %v2652_v18 = vpack.c.bf16 %v9366_v0, %v9366_v0 }
0x19b3   :  { %2661 = vrot.lane.b32.xlu0 %v2652_v18, %s8688_s29 }
0x19b7   :  { %2885 = vrot.lane.b32.xlu0 %v2876_v19, %s8688_s29 }
0x19bb   :  { %2771 = vperm.xlu0 %8145, %v2760_v57  }
0x1a17   :  { %v2575_v25 = vpop.permute.xlu0 %2574 }
0x1a18   :  { %v2577_v26 = vadd.f32 %v2575_v25, %v2565_v24  ;;  %v7216_v24 = vld [vmem:[#allocation6 + $0x3] ss:$0 sm:$0xff] }
0x1a1a   :  { %v2582_v17 = vpack.c.bf16 %v2577_v26, %v2577_v26 }
0x1a1c   :  { %2591 = vrot.lane.b32.xlu1 %v2582_v17, %s8688_s29 }
0x1a25   :  { %v9379_v29 = vpop.permute.xlu0 %2778 }
0x1a26   :  { %v2781_v30 = vmul.f32 %v9379_v29, %v2570_v6 }
0x1a28   :  { %2783 = vrot.lane.b32.xlu0 %v2781_v30, %s8678_s5 }
0x1a29   :  { %v2662_v33 = vpop.permute.xlu0 %2661 }
0x1a2a   :  { %7782 = vmatmul.mubr.msk.bf16.vlgmr.msra.gmra.mxu0 %vm165_vm6, %v2662_v33 }
0x1a2b   :  { %7798 = vmatpush3.bf16.msra.mxu0 %v8200_v32  ;;  %7801 = vmatprep.mubr.msk.bf16.mxu0 %vm8686_vm1, %v8685_v3 }
0x1a2c   :  { %7799 = vmatprep.subr.bf16.mxu0 %v8685_v3 }
0x1a2d   :  { %v2886_v31 = vpop.permute.xlu0 %2885 }
0x1a2f   :  { %7800 = vmatpush3.bf16.msra.mxu0 %v8201_v34 }
0x1a30   :  { %7805 = vmatprep.subr.mxu0 %v8685_v3 }
0x1a32   :  { %7802 = vmatmul.mubr.msk.bf16.vlgmr.msra.gmra.mxu0 %vm165_vm6, %v2886_v31 }
0x1a33   :  { %7807 = vmatprep.mubr.msk.f32.mxu0 %vm8686_vm1, %v8685_v3 }
0x1a36   :  { %v9396_v43 = vpop.permute.xlu0 %2771 }
0x1a37   :  { %v2774_v44 = vmul.f32 %v9396_v43, %v9350_v63 }
0x1a8e   :  { %v2592_v56 = vpop.permute.xlu1 %2591 }
0x1a8f   :  { %7774 = vmatmul.mubr.msk.bf16.vlgmr.msra.gmra.mxu1 %vm165_vm6, %v2592_v56 }
0x1a90   :  { %7786 = vmatpush3.bf16.msra.mxu1 %v8204_v35  ;;  %7793 = vmatprep.mubr.msk.bf16.mxu1 %vm8686_vm1, %v8685_v3 }
0x1a91   :  { %7787 = vmatprep.subr.bf16.mxu1 %v8685_v3 }
0x1a94   :  { %7788 = vmatpush3.bf16.msra.mxu1 %v8205_v51 }
0x1a95   :  { %7789 = vmatprep.subr.bf16.mxu1 %v8685_v3 }
0x1a98   :  { %7790 = vmatpush3.bf16.msra.mxu1 %v8206_v38 }
0x1a99   :  { %7791 = vmatprep.subr.bf16.mxu1 %v8685_v3 }
0x1a9a   :  { %v2784_v45 = vpop.permute.xlu0 %2783 }
0x1a9b   :  { %v2786_v39 = vadd.f32 %v2784_v45, %v2774_v44 }
0x1a9c   :  { %7792 = vmatpush3.bf16.msra.mxu1 %v8207_v16 }
0x1a9d   :  { %v2787_v46 = vpack.c.bf16 %v2786_v39, %v2786_v39  ;;  %7815 = vmatprep.subr.bf16.mxu1 %v8685_v3 }
0x1a9f   :  { %v2790_v47 = vsel %vm165_vm6, %v9401_v8, %v2787_v46 }
0x1aa0   :  { %7794 = vmatmul.mubr.msk.bf16.vlgmr.msra.gmra.mxu1 %vm247_vm7, %v2790_v47 }
0x1aa1   :  { %7823 = vmatprep.mubr.msk.bf16.mxu1 %vm8686_vm1, %v8685_v3 }
0x1aea   :  { %v9409_v50 = vpop.f32.mrf.mxu0 }
0x1aec   :  { %v7783_v54 = vpop.f32.mrf.mxu0 }
0x1aee   :  { %v2715_v52 = vpop.f32.mrf.mxu0 }
0x1af0   :  { %v7784_v55 = vpop.f32.mrf.mxu0 }
0x1af2   :  { %v2936_v59 = vpop.f32.mrf.mxu0 }
0x1af3   :  { %v2937_v28 = vadd.f32 %v9228_v61, %v2936_v59 }
0x1af4   :  { %v7803_v57 = vpop.f32.mrf.mxu0 }
0x1af5   :  { %2950 = vrot.lane.b32.xlu0 %v2937_v28, %s8675_s21 }
0x1af6   :  { %v2939_v1 = vpop.f32.mrf.mxu0 }
0x1af8   :  { %v7804_v5 = vpop.f32.mrf.mxu0 }
0x1b4f   :  { %v9413_v60 = vpop.f32.mrf.mxu1 }
0x1b51   :  { %v7775_v7 = vpop.f32.mrf.mxu1 }
0x1b53   :  { %v2645_v6 = vpop.f32.mrf.mxu1 }
0x1b55   :  { %v7776_v9 = vpop.f32.mrf.mxu1 }
0x1b60   :  { %v2866_v10 = vpop.f32.mrf.mxu1 }
0x1b61   :  { %v2867_v53 = vadd.f32 %v9237_v13, %v2866_v10 }
0x1b62   :  { %v7795_v36 = vpop.f32.mrf.mxu1 }
0x1b63   :  { %v2942_v48 = vadd.f32 %v2937_v28, %v2867_v53 }
0x1b64   :  { %v2869_v14 = vpop.f32.mrf.mxu1 }
0x1b65   :  { %v7215_v42 = vmul.f32 -1.442695, %v2942_v48 }
0x1b66   :  { %v7796_v15 = vpop.f32.mrf.mxu1 }
0x1b67   :  { %8340 = vpow2.f32 %v7215_v42  ;;  %v2951_v37 = vpop.permute.xlu0 %2950 }
0x1b74   :  { %v8341_v61 = vpop.eup %8340 }
0x1b75   :  { %v2946_v18 = vadd.f32 1.0, %v8341_v61 }
0x1b77   :  { %8342 = vrcp.f32 %v2946_v18  ;;  %v8208_v18 = vld [vmem:[#allocation12 + $0x8] sm:$0xff]  }
0x1b84   :  { %v8343_v19 = vpop.eup %8342 }
0x1b85   :  { %v2953_v21 = vmul.f32 %v8343_v19, %v2951_v37  ;;  %v2960_v17 = vsub.f32 1.0, %v8343_v19  ;;  %v2966_v32 = vmul.f32 %v8343_v19, %v9244_v40  ;;  %v8209_v37 = vld [vmem:[#allocation12] sm:$0xff]  }
0x1b87   :  { %2955 = vrot.lane.b32.xlu0 %v2953_v21, %s8675_s21 }
0x1b8b   :  { %2975 = vrot.lane.b32.xlu0 %v7216_v24, %s8678_s5  ;;  %v8210_v24 = vld [vmem:[%s10303_s8 + $0x18] sm:$0xff]  }
0x1b8c   :  { %7816 = vmatpush3.bf16.msra.mxu1 %v8210_v24 }
0x1b8d   :  { %7817 = vmatprep.subr.bf16.mxu1 %v8685_v3 }
0x1bf9   :  { %v2956_v25 = vpop.permute.xlu0 %2955 }
0x1bfa   :  { %v2958_v26 = vadd.f32 %v2956_v25, %v2867_v53  ;;  %v8211_v25 = vld [vmem:[%s10303_s8 + $0x10] sm:$0xff]  }
0x1bfb   :  { %7818 = vmatpush3.bf16.msra.mxu1 %v8211_v25 }
0x1bfc   :  { %8344 = vtanh.f32 %v2958_v26  ;;  %v8212_v26 = vld [vmem:[%s10303_s8 + $0x8] sm:$0xff]   ;;  %7819 = vmatprep.subr.bf16.mxu1 %v8685_v3 }
0x1bfd   :  { %v2976_v34 = vpop.permute.xlu0 %2975 }
0x1bff   :  { %7820 = vmatpush3.bf16.msra.mxu1 %v8212_v26 }
0x1c00   :  { %7821 = vmatprep.subr.bf16.mxu1 %v8685_v3 }
0x1c09   :  { %v8345_v13 = vpop.eup %8344 }
0x1c0a   :  { %2962 = vrot.lane.b32.xlu1 %v8345_v13, %s8688_s29  ;;  %v8213_v13 = vld [vmem:[%s10303_s8] sm:$0xff]  }
0x1c0b   :  { %7822 = vmatpush3.bf16.msra.mxu1 %v8213_v13 }
0x1c0c   :  { %7843 = vmatprep.subr.bf16.mxu1 %v8685_v3 }
0x1c7c   :  { %v2963_v30 = vpop.permute.xlu1 %2962 }
0x1c7d   :  { %v2965_v33 = vmul.f32 %v2963_v30, %v2960_v17 }
0x1c7f   :  { %v9420_v31 = vadd.f32 %v2966_v32, %v2965_v33 }
0x1c81   :  { %v2978_v35 = vadd.f32 %v2976_v34, %v9420_v31 }
0x1c83   :  { %v3018_v56 = vmul.f32 %v2978_v35, %v9051_v23  ;;  %v2986_v45 = vrot.slane %v2978_v35, %v8894_v58 }
0x1c85   :  { %3020 = vrot.lane.b32.xlu1 %v3018_v56, %s8688_s29  ;;  %v2987_v39 = vcombine.high %v2986_v45, %v2986_v45  ;;  %v2994_v5 = vrot.slane %v2986_v45, %v8894_v58 }
0x1c87   :  { %v3001_v46 = vrot.slane %v2987_v39, %v8894_v58  ;;  %v3005_v7 = vrot.slane %v2994_v5, %v8901_v62 }
0x1c89   :  { %v3009_v47 = vrot.slane %v3001_v46, %v8901_v62  ;;  %v3409_v46 = vrot.slane %v9336_v27, 6 }
0x1cf7   :  { %v3021_v51 = vpop.permute.xlu1 %3020 }
0x1cf8   :  { %v3023_v38 = vsel %vm445_vm3, %v3021_v51, 0.0 }
0x1cf9   :  { %3024 = vadd.xlane.f32.xlu0 %v3023_v38 }
0x1d82   :  { %v3025_v16 = vpop.xlane.xlu0 %3024 }
0x1d83   :  { %v9429_v40 = vsel %vm3026_vm5, %v3025_v16, %v9260_v20  ;;  %v3316_v20 = vpack.c.bf16 %v9350_v63, %v9350_v63  ;;  %vm3889_vm5 = vcmp.eq.s32.totalorder %v9069_v22, 4 }
0x1d84   :  { %v3029_v41 = vsel %vm3028_vm13, %v9429_v40, -1e+30 }
0x1d85   :  { %v3030_v44 = vsel %vm453_vm8, %v3029_v41, -inf }
0x1d86   :  { %3031 = vmax.xlane.f32.xlu1 %v3030_v44 }
0x1d97   :  { %3012 = vrot.lane.b32.xlu1 %v3009_v47, %s8688_s29 }
0x1d9b   :  { %3325 = vrot.lane.b32.xlu1 %v3316_v20, %s8688_s29 }
0x1e0f   :  { %v3032_v54 = vpop.xlane.xlu1 %3031 }
0x1e10   :  { %v3033_v52 = vsub.f32 %v3029_v41, %v3032_v54 }
0x1e12   :  { %v3034_v55 = vmul.f32 1.442695, %v3033_v52 }
0x1e13   :  { %v3013_v59 = vpop.permute.xlu1 %3012 }
0x1e14   :  { %8346 = vpow2.f32 %v3034_v55  ;;  %3017 = vst.msk [vmem:[#allocation2 + $0xb] sm:$0x1] %vm429_vm9, %v3013_v59 }
0x1e17   :  { %v3326_v21 = vpop.permute.xlu1 %3325 }
0x1e1b   :  { %v3046_v61 = vld [vmem:[#allocation2 + $0x8] sm:$0xff] }
0x1e21   :  { %v8347_v28 = vpop.eup %8346 }
0x1e22   :  { %v3036_v57 = vsel %vm3028_vm13, %v8347_v28, 0.0  ;;  %vm3891_vm13 = vcmp.lt.s32.totalorder %v9069_v22, 4 }
0x1e23   :  { %v3037_v1 = vsel %vm453_vm8, %v3036_v57, 0.0 }
0x1e24   :  { %3038 = vadd.xlane.f32.xlu0 %v3037_v1 }
0x1e3a   :  { %3010 = vrot.lane.b32.xlu0 %v3005_v7, %s8688_s29 }
0x1ead   :  { %v3039_v6 = vpop.xlane.xlu0 %3038 }
0x1eae   :  { %v3040_v9 = vmax.f32 %v3039_v6, 1e-30 }
0x1eb0   :  { %8348 = vrcp.f32 %v3040_v9 }
0x1eb1   :  { %v3011_v10 = vpop.permute.xlu0 %3010 }
0x1eb2   :  { %3016 = vst.msk [vmem:[#allocation2 + $0x3] sm:$0x1] %vm429_vm9, %v3011_v10 }
0x1eb9   :  { %v3045_v53 = vld [vmem:[#allocation2] sm:$0xff] }
0x1eba   :  { %7806 = vmatpush3.msra.mxu0 %v3045_v53 }
0x1ebb   :  { %7810 = vmatprep.subr.mxu0 %v8685_v3 }
0x1ebd   :  { %v8349_v36 = vpop.eup %8348 }
0x1ebe   :  { %v3042_v48 = vmul.f32 %v8349_v36, %v3036_v57 }
0x1ec0   :  { %3044 = vst.msk [vmem:[#allocation18 + $0x6] sm:$0x3] %vm453_vm8, %v3042_v48  ;;  %v3054_v14 = vrot.slane %v3042_v48, %v8894_v58 }
0x1ec2   :  { %v3062_v42 = vrot.slane %v3054_v14, %v8894_v58  ;;  %v3055_v15 = vcombine.high %v3054_v14, %v3054_v14 }
0x1ec4   :  { %7808 = vmatmul.mubr.msk.f32.vlgmr.msra.gmra.mxu0 %vm493_vm10, %v3062_v42  ;;  %v3069_v19 = vrot.slane %v3055_v15, %v8894_v58  ;;  %v9502_v42 = vld [vmem:[%s10310_s15] ss:$0 sm:$0xff]  ;;  %v9511_v15 = vld [vmem:[%s10317_s27 + $0x8] sm:$0x3] }
0x1ec5   :  { %7811 = vmatpush3.msra.mxu0 %v3046_v61  ;;  %7812 = vmatprep.mubr.msk.f32.mxu0 %vm8686_vm1, %v8685_v3  ;;  %v3618_v61 = vsel %vm174_vm0, %v9511_v15, -inf }
0x1ec6   :  { %7827 = vmatprep.subr.bf16.mxu0 %v8685_v3 }
0x1ec8   :  { %7813 = vmatmul.mubr.msk.f32.vlgmr.msra.gmra.mxu0 %vm493_vm10, %v3069_v19 }
0x1ec9   :  { %7828 = vmatpush3.bf16.msra.mxu0 %v8208_v18  ;;  %7831 = vmatprep.mubr.msk.bf16.mxu0 %vm8686_vm1, %v8685_v3  ;;  %v9518_v18 = vld [vmem:[%s10309_s14] ss:$0 sm:$0xff] }
0x1eca   :  { %7829 = vmatprep.subr.bf16.mxu0 %v8685_v3 }
0x1ecd   :  { %7830 = vmatpush3.bf16.msra.mxu0 %v8209_v37 }
0x1ece   :  { %7835 = vmatprep.subr.bf16.mxu0 %v8685_v3 }
0x1ed0   :  { %7832 = vmatmul.mubr.msk.bf16.vlgmr.msra.gmra.mxu0 %vm165_vm6, %v3326_v21 }
0x1ed1   :  { %7839 = vmatprep.mubr.msk.bf16.mxu0 %vm8686_vm1, %v8685_v3 }
0x1f84   :  { %v3138_v17 = vpop.f32.mrf.mxu0 }
0x1f85   :  { %v3214_v33 = vpack.c.bf16 %v3138_v17, %v3138_v17 }
0x1f86   :  { %v7809_v30 = vpop.f32.mrf.mxu0 }
0x1f87   :  { %v3218_v51 = vunpack.c.l.b16 %v3214_v33 }
0x1f88   :  { %v3210_v32 = vpop.f32.mrf.mxu0 }
0x1f89   :  { %v3215_v34 = vpack.c.bf16 %v3210_v32, %v3210_v32 }
0x1f8a   :  { %v7814_v35 = vpop.f32.mrf.mxu0 }
0x1f8b   :  { %v3219_v56 = vunpack.c.l.b16 %v3215_v34 }
0x1f8d   :  { %v3220_v38 = vrot.slane %v3219_v56, 7 }
0x1f8f   :  { %v3221_v16 = vsel %vm645_vm11, %v3220_v38, %v3218_v51 }
0x1f90   :  { %v3376_v41 = vpop.f32.mrf.mxu0  ;;  %v3222_v44 = vpack.c.b16 %v3221_v16, %v3221_v16 }
0x1f91   :  { %v3377_v45 = vadd.f32 %v9306_v49, %v3376_v41 }
0x1f92   :  { %v7833_v39 = vpop.f32.mrf.mxu0  ;;  %3223 = vrot.lane.b32.xlu0 %v3222_v44, %s8678_s5 }
0x1f93   :  { %3390 = vrot.lane.b32.xlu1 %v3377_v45, %s8675_s21 }
0x1f94   :  { %v3379_v47 = vpop.f32.mrf.mxu0 }
0x1f96   :  { %v7834_v20 = vpop.f32.mrf.mxu0 }
0x1f97   :  { %3410 = vrot.lane.b32.xlu1 %v3409_v46, %s8690_s12 }
0x2004   :  { %v3224_v54 = vpop.permute.xlu0 %3223 }
0x2005   :  { %v3226_v52 = vsel %vm165_vm6, %v9401_v8, %v3224_v54  ;;  %v3391_v55 = vpop.permute.xlu1 %3390 }
0x2006   :  { %7824 = vmatmul.mubr.msk.bf16.vlgmr.msra.gmra.mxu1 %vm247_vm7, %v3226_v52 }
0x2007   :  { %7847 = vmatprep.mubr.msk.bf16.mxu1 %vm8686_vm1, %v8685_v3 }
0x2009   :  { %v3411_v49 = vpop.permute.xlu1 %3410 }
0x200a   :  { %v3413_v59 = vsel %vm736_vm12, %v9336_v27, %v3411_v49 }
0x200b   :  { %v3414_v28 = vsub.f32 1.0, %v3413_v59 }
0x200d   :  { %3417 = vperm.xlu1 %8141, %v3414_v28   ;;  %v8215_v28 = vld [vmem:[#allocation15] sm:$0xff]  }
0x2011   :  { %8146 = vset.pattern.permute.xlu1 %v8687_v11 }
0x2088   :  { %v3418_v33 = vpop.permute.xlu1 %3417 }
0x2089   :  { %v3420_v44 = vmul.f32 %v3418_v33, %v9350_v63 }
0x20c6   :  { %v3302_v57 = vpop.f32.mrf.mxu1 }
0x20c7   :  { %v3303_v1 = vadd.f32 %v9325_v12, %v3302_v57  ;;  %v2713_v12 = vadd.f32 %v9502_v42, %v9409_v50  ;;  %v2643_v50 = vadd.f32 %v9518_v18, %v9413_v60 }
0x20c8   :  { %v7825_v5 = vpop.f32.mrf.mxu1 }
0x20c9   :  { %v3309_v7 = vrot.slane %v3303_v1, 6  ;;  %v2718_v19 = vadd.f32 %v2713_v12, %v2643_v50 }
0x20ca   :  { %v3305_v8 = vpop.f32.mrf.mxu1 }
0x20cb   :  { %v3311_v6 = vsel %vm736_vm12, %v3303_v1, %v3309_v7  ;;  %v7203_v37 = vmul.f32 -1.442695, %v2718_v19 }
0x20cc   :  { %v3382_v9 = vadd.f32 %v3377_v45, %v3311_v6  ;;  %v7826_v10 = vpop.f32.mrf.mxu1 }
0x20cd   :  { %v8218_v10 = vld [vmem:[#allocation14 + $0x8] sm:$0xff]  }
0x20ce   :  { %v7229_v53 = vmul.f32 -1.442695, %v3382_v9  ;;  %v3739_v9 = vpack.c.bf16 %v9420_v31, %v9420_v31  ;;  %7836 = vmatpush3.bf16.msra.mxu0 %v8218_v10 }
0x20cf   :  { %7837 = vmatprep.subr.bf16.mxu0 %v8685_v3 }
0x20d0   :  { %8350 = vpow2.f32 %v7229_v53  ;;  %v8219_v53 = vld [vmem:[#allocation14] sm:$0xff]  }
0x20d2   :  { %7838 = vmatpush3.bf16.msra.mxu0 %v8219_v53 }
0x20d3   :  { %7851 = vmatprep.subr.bf16.mxu0 %v8685_v3 }
0x20dd   :  { %v8351_v36 = vpop.eup %8350 }
0x20de   :  { %v3386_v48 = vadd.f32 1.0, %v8351_v36 }
0x20e0   :  { %8352 = vrcp.f32 %v3386_v48 }
0x20e1   :  { %8354 = vpow2.f32 %v7203_v37  ;;  %v8217_v37 = vld [vmem:[#allocation9] sm:$0xff]  }
0x20ed   :  { %v8353_v27 = vpop.eup %8352 }
0x20ee   :  { %v3393_v14 = vmul.f32 %v8353_v27, %v3391_v55  ;;  %v8355_v21 = vpop.eup %8354  ;;  %v3400_v60 = vsub.f32 1.0, %v8353_v27  ;;  %v3406_v51 = vmul.f32 %v8353_v27, %v9350_v63  ;;  %v8214_v63 = vld [vmem:[#allocation15 + $0x8] sm:$0xff]  }
0x20ef   :  { %v2722_v25 = vadd.f32 1.0, %v8355_v21  ;;  %7844 = vmatpush3.bf16.msra.mxu1 %v8214_v63  ;;  %v8220_v21 = vld [vmem:[#allocation8 + $0x18] sm:$0xff]  }
0x20f0   :  { %3395 = vrot.lane.b32.xlu0 %v3393_v14, %s8675_s21  ;;  %7845 = vmatprep.subr.bf16.mxu1 %v8685_v3 }
0x20f3   :  { %7846 = vmatpush3.bf16.msra.mxu1 %v8215_v28 }
0x20f4   :  { %2726 = vrot.lane.b32.xlu0 %v2713_v12, %s8675_s21  ;;  %7863 = vmatprep.subr.bf16.mxu1 %v8685_v3 }
0x20f8   :  { %3423 = vperm.xlu0 %8145, %v3413_v59  }
0x2117   :  { %3619 = vmax.xlane.f32.xlu0 %v3618_v61 }
0x2162   :  { %v3396_v24 = vpop.permute.xlu0 %3395 }
0x2163   :  { %v3398_v26 = vadd.f32 %v3396_v24, %v3311_v6 }
0x2165   :  { %8356 = vtanh.f32 %v3398_v26  ;;  %v8222_v26 = vld [vmem:[#allocation8 + $0x8] sm:$0xff]  }
0x2166   :  { %8358 = vrcp.f32 %v2722_v25  ;;  %v2727_v17 = vpop.permute.xlu0 %2726  ;;  %v8221_v25 = vld [vmem:[#allocation8 + $0x10] sm:$0xff]  }
0x2172   :  { %v8357_v13 = vpop.eup %8356 }
0x2173   :  { %3402 = vrot.lane.b32.xlu1 %v8357_v13, %s8688_s29  ;;  %v8359_v30 = vpop.eup %8358  ;;  %v3424_v34 = vpop.permute.xlu0 %3423 }
0x2174   :  { %v2729_v32 = vmul.f32 %v8359_v30, %v2727_v17  ;;  %v2736_v1 = vsub.f32 1.0, %v8359_v30  ;;  %v2742_v7 = vmul.f32 %v8359_v30, %v9366_v0  ;;  %v8223_v17 = vld [vmem:[#allocation8] sm:$0xff]   ;;  %v3614_v30 = vld [vmem:[#allocation3 + $0x8] sm:$0x3] }
0x2177   :  { %2731 = vrot.lane.b32.xlu1 %v2729_v32, %s8675_s21 }
0x21a0   :  { %v3620_v56 = vpop.xlane.xlu0 %3619 }
0x21a1   :  { %vm3621_vm14 = vcmp.ge.f32.partialorder %v9511_v15, %v3620_v56 }
0x21a2   :  { %v3623_v46 = vsel %vm3621_vm14, 1.0, %v8685_v3 }
0x21a3   :  { %vm3625_vm15 = vcmp.lt.f32.partialorder %v3623_v46, 0.5 }
0x21a4   :  { %v3626_v54 = vsel %vm3625_vm15, 1, %v8684_v2 }
0x21e5   :  { %v3403_v35 = vpop.permute.xlu1 %3402 }
0x21e6   :  { %v3405_v38 = vmul.f32 %v3403_v35, %v3400_v60  ;;  %v9581_v60 = vpack.c.bf16 %v3614_v30, %v3614_v30 }
0x21e8   :  { %v3407_v16 = vadd.f32 %v3406_v51, %v3405_v38 }
0x21e9   :  { %v2732_v41 = vpop.permute.xlu1 %2731 }
0x21ea   :  { %v3426_v45 = vmul.f32 %v3424_v34, %v3407_v16  ;;  %v2734_v39 = vadd.f32 %v2732_v41, %v2643_v50  ;;  %v8216_v50 = vld [vmem:[#allocation9 + $0x8] sm:$0xff]  }
0x21ec   :  { %v9530_v47 = vadd.f32 %v3426_v45, %v3420_v44  ;;  %8360 = vtanh.f32 %v2734_v39  ;;  %v9591_v44 = vld [vmem:[#allocation11] ss:$0 sm:$0xff] }
0x21ee   :  { %v3431_v20 = vrot.slane %v9530_v47, 2  ;;  %v3428_v36 = vmul.f32 %v9530_v47, %v9396_v43 }
0x21f0   :  { %3432 = vrot.lane.b32.xlu1 %v3431_v20, %s8688_s29 }
0x21f4   :  { %3627 = vrot.lane.b32.xlu1 %v3626_v54, %s8672_s28 }
0x21f9   :  { %v8361_v52 = vpop.eup %8360 }
0x21fa   :  { %2738 = vrot.lane.b32.xlu1 %v8361_v52, %s8688_s29 }
0x2262   :  { %v3433_v55 = vpop.permute.xlu1 %3432 }
0x2263   :  { %v3435_v49 = vmul.f32 %v3433_v55, %v9379_v29 }
0x2265   :  { %3437 = vrot.lane.b32.xlu1 %v3435_v49, %s8678_s5 }
0x2266   :  { %v3628_v59 = vpop.permute.xlu1 %3627 }
0x2267   :  { %vm3629_vm2 = vcmp.ne.s32.totalorder %v3628_v59, 0  ;;  %v9600_v59 = vld [vmem:[%s10301_s6] ss:$0 sm:$0xff] }
0x2268   :  { %vm3630_vm4 = vmand %vm3621_vm14, %vm3629_vm2 }
0x2269   :  { %v3631_v57 = vsel %vm3630_vm4, 1.0, %v8685_v3 }
0x226a   :  { %3641 = vperm.xlu1 %8146, %v3631_v57  }
0x226c   :  { %v2739_v5 = vpop.permute.xlu1 %2738 }
0x226d   :  { %v2741_v8 = vmul.f32 %v2739_v5, %v2736_v1 }
0x226e   :  { %8147 = vset.pattern.permute.xlu1 %v8684_v2 }
0x226f   :  { %v9546_v29 = vadd.f32 %v2742_v7, %v2741_v8 }
0x2271   :  { %v3515_v6 = vpack.c.bf16 %v9546_v29, %v9546_v29 }
0x2273   :  { %3524 = vrot.lane.b32.xlu1 %v3515_v6, %s8688_s29 }
0x2277   :  { %3748 = vrot.lane.b32.xlu1 %v3739_v9, %s8688_s29 }
0x227b   :  { %3634 = vperm.xlu1 %8147, %v3623_v46  }
0x22d7   :  { %v3438_v48 = vpop.permute.xlu1 %3437 }
0x22d8   :  { %v3440_v27 = vadd.f32 %v3438_v48, %v3428_v36 }
0x22da   :  { %v3445_v14 = vpack.c.bf16 %v3440_v27, %v3440_v27 }
0x22dc   :  { %3454 = vrot.lane.b32.xlu0 %v3445_v14, %s8688_s29 }
0x22e5   :  { %v9559_v12 = vpop.permute.xlu1 %3641 }
0x22e6   :  { %v3644_v61 = vmul.f32 %v9559_v12, %v3433_v55 }
0x22e8   :  { %3646 = vrot.lane.b32.xlu1 %v3644_v61, %s8678_s5 }
0x22e9   :  { %v3525_v19 = vpop.permute.xlu1 %3524 }
0x22ea   :  { %7848 = vmatmul.mubr.msk.bf16.vlgmr.msra.gmra.mxu1 %vm165_vm6, %v3525_v19 }
0x22eb   :  { %7864 = vmatpush3.bf16.msra.mxu1 %v8216_v50  ;;  %7867 = vmatprep.mubr.msk.bf16.mxu1 %vm8686_vm1, %v8685_v3  ;;  %v7251_v50 = vld [vmem:[#allocation6 + $0x4] ss:$0 sm:$0xff] }
0x22ec   :  { %7865 = vmatprep.subr.bf16.mxu1 %v8685_v3 }
0x22ed   :  { %v3749_v43 = vpop.permute.xlu1 %3748 }
0x22ef   :  { %7866 = vmatpush3.bf16.msra.mxu1 %v8217_v37 }
0x22f0   :  { %7871 = vmatprep.subr.mxu1 %v8685_v3 }
0x22f2   :  { %7868 = vmatmul.mubr.msk.bf16.vlgmr.msra.gmra.mxu1 %vm165_vm6, %v3749_v43 }
0x22f3   :  { %7873 = vmatprep.mubr.msk.f32.mxu1 %vm8686_vm1, %v8685_v3 }
0x22f6   :  { %v9576_v13 = vpop.permute.xlu1 %3634 }
0x22f7   :  { %v3637_v32 = vmul.f32 %v9576_v13, %v9530_v47 }
0x234e   :  { %v3455_v24 = vpop.permute.xlu0 %3454 }
0x234f   :  { %7840 = vmatmul.mubr.msk.bf16.vlgmr.msra.gmra.mxu0 %vm165_vm6, %v3455_v24 }
0x2350   :  { %7852 = vmatpush3.bf16.msra.mxu0 %v8220_v21  ;;  %7859 = vmatprep.mubr.msk.bf16.mxu0 %vm8686_vm1, %v8685_v3 }
0x2351   :  { %7853 = vmatprep.subr.bf16.mxu0 %v8685_v3 }
0x2354   :  { %7854 = vmatpush3.bf16.msra.mxu0 %v8221_v25 }
0x2355   :  { %7855 = vmatprep.subr.bf16.mxu0 %v8685_v3 }
0x2358   :  { %7856 = vmatpush3.bf16.msra.mxu0 %v8222_v26 }
0x2359   :  { %7857 = vmatprep.subr.bf16.mxu0 %v8685_v3 }
0x235a   :  { %v3647_v33 = vpop.permute.xlu1 %3646 }
0x235b   :  { %v3649_v34 = vadd.f32 %v3647_v33, %v3637_v32 }
0x235c   :  { %7858 = vmatpush3.bf16.msra.mxu0 %v8223_v17 }
0x235d   :  { %v3650_v35 = vpack.c.bf16 %v3649_v34, %v3649_v34  ;;  %7881 = vmatprep.subr.bf16.mxu0 %v8685_v3 }
0x235f   :  { %v3653_v56 = vsel %vm165_vm6, %v9581_v60, %v3650_v35 }
0x2360   :  { %7860 = vmatmul.mubr.msk.bf16.vlgmr.msra.gmra.mxu0 %vm247_vm7, %v3653_v56  ;;  %v4179_v56 = vpack.c.bf16 %v9530_v47, %v9530_v47 }
0x2361   :  { %7889 = vmatprep.mubr.msk.bf16.mxu0 %vm8686_vm1, %v8685_v3 }
0x23aa   :  { %v9589_v51 = vpop.f32.mrf.mxu1 }
0x23ac   :  { %v7849_v38 = vpop.f32.mrf.mxu1 }
0x23ae   :  { %v3578_v16 = vpop.f32.mrf.mxu1 }
0x23b0   :  { %v7850_v41 = vpop.f32.mrf.mxu1 }
0x23b2   :  { %v3799_v45 = vpop.f32.mrf.mxu1 }
0x23b3   :  { %v3800_v39 = vadd.f32 %v9591_v44, %v3799_v45 }
0x23b4   :  { %v7869_v46 = vpop.f32.mrf.mxu1 }
0x23b5   :  { %3813 = vrot.lane.b32.xlu1 %v3800_v39, %s8675_s21 }
0x23b6   :  { %v3802_v20 = vpop.f32.mrf.mxu1 }
0x23b8   :  { %v7870_v54 = vpop.f32.mrf.mxu1 }
0x240f   :  { %v9595_v52 = vpop.f32.mrf.mxu0 }
0x2411   :  { %v7841_v63 = vpop.f32.mrf.mxu0 }
0x2413   :  { %v3508_v55 = vpop.f32.mrf.mxu0 }
0x2415   :  { %v7842_v49 = vpop.f32.mrf.mxu0 }
0x2420   :  { %v3729_v28 = vpop.f32.mrf.mxu0 }
0x2421   :  { %v3730_v57 = vadd.f32 %v9600_v59, %v3729_v28 }
0x2422   :  { %v7861_v1 = vpop.f32.mrf.mxu0 }
0x2423   :  { %v3805_v5 = vadd.f32 %v3800_v39, %v3730_v57 }
0x2424   :  { %v3732_v7 = vpop.f32.mrf.mxu0 }
0x2425   :  { %v7250_v8 = vmul.f32 -1.442695, %v3805_v5 }
0x2426   :  { %v7862_v6 = vpop.f32.mrf.mxu0 }
0x2427   :  { %8362 = vpow2.f32 %v7250_v8  ;;  %v3814_v36 = vpop.permute.xlu1 %3813 }
0x2434   :  { %v8363_v9 = vpop.eup %8362 }
0x2435   :  { %v3809_v10 = vadd.f32 1.0, %v8363_v9 }
0x2437   :  { %8364 = vrcp.f32 %v3809_v10 }
0x2444   :  { %v8365_v53 = vpop.eup %8364 }
0x2445   :  { %v3816_v48 = vmul.f32 %v8365_v53, %v3814_v36  ;;  %v3823_v19 = vsub.f32 1.0, %v8365_v53  ;;  %v3829_v43 = vmul.f32 %v8365_v53, %v9420_v31 }
0x2447   :  { %3818 = vrot.lane.b32.xlu1 %v3816_v48, %s8675_s21  ;;  %v8224_v48 = vld [vmem:[#allocation12 + $0x8] sm:$0xff]  }
0x24b9   :  { %v3819_v27 = vpop.permute.xlu1 %3818 }
0x24ba   :  { %v3821_v14 = vadd.f32 %v3819_v27, %v3730_v57 }
0x24bc   :  { %8366 = vtanh.f32 %v3821_v14  ;;  %v8225_v14 = vld [vmem:[#allocation12] sm:$0xff]  }
0x24c9   :  { %v8367_v61 = vpop.eup %8366 }
0x24ca   :  { %3825 = vrot.lane.b32.xlu1 %v8367_v61, %s8688_s29 }
0x24ce   :  { %3838 = vrot.lane.b32.xlu1 %v7251_v50, %s8678_s5  ;;  %v8226_v50 = vld [vmem:[%s10303_s8 + $0x18] sm:$0xff]  }
0x24cf   :  { %7882 = vmatpush3.bf16.msra.mxu0 %v8226_v50  ;;  %v9699_v50 = vld [vmem:[%s10317_s27 + $0xa] sm:$0x3] }
0x24d0   :  { %7883 = vmatprep.subr.bf16.mxu0 %v8685_v3 }
0x253c   :  { %v3826_v37 = vpop.permute.xlu1 %3825 }
0x253d   :  { %v3828_v21 = vmul.f32 %v3826_v37, %v3823_v19  ;;  %v8227_v19 = vld [vmem:[%s10303_s8 + $0x10] sm:$0xff]   ;;  %v8228_v37 = vld [vmem:[%s10303_s8 + $0x8] sm:$0xff]  }
0x253e   :  { %7884 = vmatpush3.bf16.msra.mxu0 %v8227_v19  ;;  %v4481_v19 = vsel %vm174_vm0, %v9699_v50, -inf }
0x253f   :  { %v9607_v24 = vadd.f32 %v3829_v43, %v3828_v21  ;;  %7885 = vmatprep.subr.bf16.mxu0 %v8685_v3  ;;  %v8229_v43 = vld [vmem:[%s10303_s8] sm:$0xff]  }
0x2540   :  { %v3839_v25 = vpop.permute.xlu1 %3838 }
0x2541   :  { %v3841_v26 = vadd.f32 %v3839_v25, %v9607_v24 }
0x2542   :  { %7886 = vmatpush3.bf16.msra.mxu0 %v8228_v37  ;;  %v3506_v37 = vadd.f32 %v9518_v18, %v9595_v52 }
0x2543   :  { %v3881_v17 = vmul.f32 %v3841_v26, %v9051_v23  ;;  %v3849_v33 = vrot.slane %v3841_v26, %v8894_v58  ;;  %7887 = vmatprep.subr.bf16.mxu0 %v8685_v3 }
0x2545   :  { %3883 = vrot.lane.b32.xlu0 %v3881_v17, %s8688_s29  ;;  %v3850_v34 = vcombine.high %v3849_v33, %v3849_v33 }
0x2546   :  { %7888 = vmatpush3.bf16.msra.mxu0 %v8229_v43 }
0x2547   :  { %v3864_v35 = vrot.slane %v3850_v34, %v8894_v58  ;;  %7909 = vmatprep.subr.bf16.mxu0 %v8685_v3 }
0x2549   :  { %v3872_v31 = vrot.slane %v3864_v35, %v8901_v62 }
0x25b7   :  { %v3884_v30 = vpop.permute.xlu0 %3883 }
0x25b8   :  { %v3886_v32 = vsel %vm445_vm3, %v3884_v30, 0.0 }
0x25b9   :  { %3887 = vadd.xlane.f32.xlu1 %v3886_v32 }
0x25ca   :  { %3875 = vrot.lane.b32.xlu1 %v3872_v31, %s8688_s29  ;;  %v9669_v31 = vld [vmem:[%s10306_s11] ss:$0 sm:$0xff] }
0x25ce   :  { %4188 = vrot.lane.b32.xlu1 %v4179_v56, %s8688_s29 }
0x2642   :  { %v3888_v38 = vpop.xlane.xlu1 %3887 }
0x2643   :  { %v9623_v16 = vsel %vm3889_vm5, %v3888_v38, %v9429_v40  ;;  %v3857_v40 = vrot.slane %v3849_v33, %v8894_v58  ;;  %vm4752_vm5 = vcmp.eq.s32.totalorder %v9069_v22, 5 }
0x2644   :  { %v3892_v41 = vsel %vm3891_vm13, %v9623_v16, -1e+30 }
0x2645   :  { %v3893_v45 = vsel %vm453_vm8, %v3892_v41, -inf  ;;  %v3868_v28 = vrot.slane %v3857_v40, %v8901_v62 }
0x2646   :  { %3894 = vmax.xlane.f32.xlu0 %v3893_v45  ;;  %v3876_v39 = vpop.permute.xlu1 %3875 }
0x2647   :  { %3880 = vst.msk [vmem:[#allocation2 + $0xc] sm:$0x1] %vm429_vm9, %v3876_v39 }
0x264a   :  { %v4189_v61 = vpop.permute.xlu1 %4188 }
0x264e   :  { %v3909_v36 = vld [vmem:[#allocation2 + $0x8] sm:$0xff] }
0x26cf   :  { %v3895_v46 = vpop.xlane.xlu0 %3894 }
0x26d0   :  { %v3896_v20 = vsub.f32 %v3892_v41, %v3895_v46  ;;  %v4272_v46 = vrot.slane %v9511_v15, 6 }
0x26d2   :  { %v3897_v54 = vmul.f32 1.442695, %v3896_v20 }
0x26d4   :  { %8368 = vpow2.f32 %v3897_v54 }
0x26e1   :  { %v8369_v63 = vpop.eup %8368 }
0x26e2   :  { %v3899_v55 = vsel %vm3891_vm13, %v8369_v63, 0.0  ;;  %vm4754_vm13 = vcmp.lt.s32.totalorder %v9069_v22, 5 }
0x26e3   :  { %v3900_v49 = vsel %vm453_vm8, %v3899_v55, 0.0 }
0x26e4   :  { %3901 = vadd.xlane.f32.xlu0 %v3900_v49 }
0x26fa   :  { %3873 = vrot.lane.b32.xlu0 %v3868_v28, %s8688_s29 }
0x276d   :  { %v3902_v57 = vpop.xlane.xlu0 %3901 }
0x276e   :  { %v3903_v1 = vmax.f32 %v3902_v57, 1e-30 }
0x2770   :  { %8370 = vrcp.f32 %v3903_v1  ;;  %v9688_v1 = vld [vmem:[%s10305_s10] ss:$0 sm:$0xff] }
0x2771   :  { %v3874_v5 = vpop.permute.xlu0 %3873 }
0x2772   :  { %3879 = vst.msk [vmem:[#allocation2 + $0x4] sm:$0x1] %vm429_vm9, %v3874_v5 }
0x2779   :  { %v3908_v7 = vld [vmem:[#allocation2] sm:$0xff] }
0x277a   :  { %7872 = vmatpush3.msra.mxu1 %v3908_v7 }
0x277b   :  { %7876 = vmatprep.subr.mxu1 %v8685_v3 }
0x277d   :  { %v8371_v8 = vpop.eup %8370 }
0x277e   :  { %v3905_v6 = vmul.f32 %v8371_v8, %v3899_v55 }
0x2780   :  { %3907 = vst.msk [vmem:[#allocation18 + $0x8] sm:$0x3] %vm453_vm8, %v3905_v6  ;;  %v3917_v9 = vrot.slane %v3905_v6, %v8894_v58 }
0x2782   :  { %v3925_v10 = vrot.slane %v3917_v9, %v8894_v58  ;;  %v3918_v53 = vcombine.high %v3917_v9, %v3917_v9 }
0x2784   :  { %7874 = vmatmul.mubr.msk.f32.vlgmr.msra.gmra.mxu1 %vm493_vm10, %v3925_v10  ;;  %v3932_v27 = vrot.slane %v3918_v53, %v8894_v58 }
0x2785   :  { %7877 = vmatpush3.msra.mxu1 %v3909_v36  ;;  %7878 = vmatprep.mubr.msk.f32.mxu1 %vm8686_vm1, %v8685_v3 }
0x2786   :  { %7893 = vmatprep.subr.bf16.mxu1 %v8685_v3 }
0x2788   :  { %7879 = vmatmul.mubr.msk.f32.vlgmr.msra.gmra.mxu1 %vm493_vm10, %v3932_v27 }
0x2789   :  { %7894 = vmatpush3.bf16.msra.mxu1 %v8224_v48  ;;  %7897 = vmatprep.mubr.msk.bf16.mxu1 %vm8686_vm1, %v8685_v3 }
0x278a   :  { %7895 = vmatprep.subr.bf16.mxu1 %v8685_v3 }
0x278d   :  { %7896 = vmatpush3.bf16.msra.mxu1 %v8225_v14 }
0x278e   :  { %7901 = vmatprep.subr.bf16.mxu1 %v8685_v3 }
0x2790   :  { %7898 = vmatmul.mubr.msk.bf16.vlgmr.msra.gmra.mxu1 %vm165_vm6, %v4189_v61  ;;  %v3576_v61 = vadd.f32 %v9502_v42, %v9589_v51 }
0x2791   :  { %7905 = vmatprep.mubr.msk.bf16.mxu1 %vm8686_vm1, %v8685_v3 }
0x2792   :  { %v3581_v43 = vadd.f32 %v3576_v61, %v3506_v37 }
0x2844   :  { %v4001_v21 = vpop.f32.mrf.mxu1 }
0x2845   :  { %v4077_v17 = vpack.c.bf16 %v4001_v21, %v4001_v21  ;;  %v7238_v21 = vmul.f32 -1.442695, %v3581_v43 }
0x2846   :  { %v7875_v25 = vpop.f32.mrf.mxu1 }
0x2847   :  { %v4081_v34 = vunpack.c.l.b16 %v4077_v17 }
0x2848   :  { %v4073_v26 = vpop.f32.mrf.mxu1 }
0x2849   :  { %v4078_v30 = vpack.c.bf16 %v4073_v26, %v4073_v26 }
0x284a   :  { %v7880_v32 = vpop.f32.mrf.mxu1 }
0x284b   :  { %v4082_v33 = vunpack.c.l.b16 %v4078_v30 }
0x284d   :  { %v4083_v35 = vrot.slane %v4082_v33, 7 }
0x284f   :  { %v4084_v56 = vsel %vm645_vm11, %v4083_v35, %v4081_v34 }
0x2850   :  { %v4239_v38 = vpop.f32.mrf.mxu1  ;;  %v4085_v41 = vpack.c.b16 %v4084_v56, %v4084_v56 }
0x2851   :  { %v4240_v45 = vadd.f32 %v9669_v31, %v4239_v38 }
0x2852   :  { %v7899_v39 = vpop.f32.mrf.mxu1  ;;  %4086 = vrot.lane.b32.xlu1 %v4085_v41, %s8678_s5 }
0x2853   :  { %4253 = vrot.lane.b32.xlu0 %v4240_v45, %s8675_s21 }
0x2854   :  { %v4242_v20 = vpop.f32.mrf.mxu1 }
0x2856   :  { %v7900_v54 = vpop.f32.mrf.mxu1 }
0x2857   :  { %4273 = vrot.lane.b32.xlu0 %v4272_v46, %s8690_s12 }
0x28c4   :  { %v4087_v63 = vpop.permute.xlu1 %4086 }
0x28c5   :  { %v4089_v55 = vsel %vm165_vm6, %v9581_v60, %v4087_v63  ;;  %v4254_v49 = vpop.permute.xlu0 %4253 }
0x28c6   :  { %7890 = vmatmul.mubr.msk.bf16.vlgmr.msra.gmra.mxu0 %vm247_vm7, %v4089_v55 }
0x28c7   :  { %7913 = vmatprep.mubr.msk.bf16.mxu0 %vm8686_vm1, %v8685_v3 }
0x28c9   :  { %v4274_v40 = vpop.permute.xlu0 %4273 }
0x28ca   :  { %v4276_v28 = vsel %vm736_vm12, %v9511_v15, %v4274_v40 }
0x28cb   :  { %v4277_v57 = vsub.f32 1.0, %v4276_v28 }
0x28cd   :  { %4280 = vperm.xlu0 %8145, %v4277_v57  }
0x28d1   :  { %8148 = vset.pattern.permute.xlu0 %v8687_v11 }
0x2948   :  { %v4281_v34 = vpop.permute.xlu0 %4280 }
0x2949   :  { %v4283_v46 = vmul.f32 %v4281_v34, %v9530_v47  ;;  %v8239_v34 = vld [vmem:[#allocation8] sm:$0xff]  }
0x2986   :  { %v4165_v60 = vpop.f32.mrf.mxu0 }
0x2987   :  { %v4166_v5 = vadd.f32 %v9688_v1, %v4165_v60 }
0x2988   :  { %v7891_v7 = vpop.f32.mrf.mxu0 }
0x2989   :  { %v4172_v8 = vrot.slane %v4166_v5, 6  ;;  %v8231_v7 = vld [vmem:[#allocation15] sm:$0xff]  }
0x298a   :  { %v4168_v6 = vpop.f32.mrf.mxu0 }
0x298b   :  { %v4174_v9 = vsel %vm736_vm12, %v4166_v5, %v4172_v8 }
0x298c   :  { %v4245_v10 = vadd.f32 %v4240_v45, %v4174_v9  ;;  %v7892_v53 = vpop.f32.mrf.mxu0 }
0x298e   :  { %v7264_v15 = vmul.f32 -1.442695, %v4245_v10 }
0x2990   :  { %8372 = vpow2.f32 %v7264_v15 }
0x299d   :  { %v8373_v36 = vpop.eup %8372 }
0x299e   :  { %v4249_v48 = vadd.f32 1.0, %v8373_v36  ;;  %v4602_v36 = vpack.c.bf16 %v9607_v24, %v9607_v24 }
0x29a0   :  { %8374 = vrcp.f32 %v4249_v48  ;;  %v8234_v48 = vld [vmem:[#allocation14 + $0x8] sm:$0xff]  }
0x29a1   :  { %8376 = vpow2.f32 %v7238_v21  ;;  %7902 = vmatpush3.bf16.msra.mxu1 %v8234_v48 }
0x29a2   :  { %7903 = vmatprep.subr.bf16.mxu1 %v8685_v3 }
0x29ad   :  { %v8375_v27 = vpop.eup %8374 }
0x29ae   :  { %v4256_v14 = vmul.f32 %v8375_v27, %v4254_v49  ;;  %v8377_v25 = vpop.eup %8376  ;;  %v4263_v18 = vsub.f32 1.0, %v8375_v27  ;;  %v4269_v38 = vmul.f32 %v8375_v27, %v9530_v47  ;;  %v8230_v47 = vld [vmem:[#allocation15 + $0x8] sm:$0xff]   ;;  %v8235_v27 = vld [vmem:[#allocation14] sm:$0xff]  }
0x29af   :  { %v3585_v51 = vadd.f32 1.0, %v8377_v25  ;;  %7910 = vmatpush3.bf16.msra.mxu0 %v8230_v47  ;;  %7904 = vmatpush3.bf16.msra.mxu1 %v8235_v27  ;;  %v8232_v25 = vld [vmem:[#allocation9 + $0x8] sm:$0xff]  }
0x29b0   :  { %4258 = vrot.lane.b32.xlu1 %v4256_v14, %s8675_s21  ;;  %7911 = vmatprep.subr.bf16.mxu0 %v8685_v3 }
0x29b1   :  { %7917 = vmatprep.subr.bf16.mxu1 %v8685_v3 }
0x29b3   :  { %7912 = vmatpush3.bf16.msra.mxu0 %v8231_v7 }
0x29b4   :  { %3589 = vrot.lane.b32.xlu1 %v3576_v61, %s8675_s21  ;;  %7929 = vmatprep.subr.bf16.mxu0 %v8685_v3 }
0x29b8   :  { %4286 = vperm.xlu1 %8147, %v4276_v28  }
0x29dc   :  { %4482 = vmax.xlane.f32.xlu1 %v4481_v19 }
0x2a22   :  { %v4259_v42 = vpop.permute.xlu1 %4258 }
0x2a23   :  { %v4261_v26 = vadd.f32 %v4259_v42, %v4174_v9 }
0x2a25   :  { %8378 = vtanh.f32 %v4261_v26  ;;  %v8236_v26 = vld [vmem:[#allocation8 + $0x18] sm:$0xff]  }
0x2a26   :  { %8380 = vrcp.f32 %v3585_v51  ;;  %v3590_v30 = vpop.permute.xlu1 %3589  ;;  %v8233_v51 = vld [vmem:[#allocation9] sm:$0xff]  }
0x2a32   :  { %v8379_v17 = vpop.eup %8378 }
0x2a33   :  { %4265 = vrot.lane.b32.xlu0 %v8379_v17, %s8688_s29  ;;  %v8381_v32 = vpop.eup %8380  ;;  %v4287_v35 = vpop.permute.xlu1 %4286 }
0x2a34   :  { %v3592_v33 = vmul.f32 %v8381_v32, %v3590_v30  ;;  %v3599_v6 = vsub.f32 1.0, %v8381_v32  ;;  %v3605_v10 = vmul.f32 %v8381_v32, %v9546_v29  ;;  %v8237_v30 = vld [vmem:[#allocation8 + $0x10] sm:$0xff]   ;;  %v8238_v32 = vld [vmem:[#allocation8 + $0x8] sm:$0xff]  }
0x2a37   :  { %3594 = vrot.lane.b32.xlu0 %v3592_v33, %s8675_s21 }
0x2a65   :  { %v4483_v56 = vpop.xlane.xlu1 %4482 }
0x2a66   :  { %vm4484_vm14 = vcmp.ge.f32.partialorder %v9699_v50, %v4483_v56 }
0x2a67   :  { %v4486_v63 = vsel %vm4484_vm14, 1.0, %v8685_v3 }
0x2a68   :  { %vm4488_vm15 = vcmp.lt.f32.partialorder %v4486_v63, 0.5 }
0x2a69   :  { %v4489_v40 = vsel %vm4488_vm15, 1, %v8684_v2 }
0x2aa5   :  { %v4266_v52 = vpop.permute.xlu0 %4265 }
0x2aa6   :  { %v4268_v41 = vmul.f32 %v4266_v52, %v4263_v18 }
0x2aa8   :  { %v4270_v45 = vadd.f32 %v4269_v38, %v4268_v41 }
0x2aa9   :  { %v3595_v39 = vpop.permute.xlu0 %3594 }
0x2aaa   :  { %v4289_v20 = vmul.f32 %v4287_v35, %v4270_v45  ;;  %v3597_v54 = vadd.f32 %v3595_v39, %v3506_v37  ;;  %v4477_v35 = vld [vmem:[#allocation3 + $0xa] sm:$0x3] }
0x2aab   :  { %v9764_v38 = vpack.c.bf16 %v4477_v35, %v4477_v35 }
0x2aac   :  { %v9713_v55 = vadd.f32 %v4289_v20, %v4283_v46  ;;  %8382 = vtanh.f32 %v3597_v54 }
0x2aae   :  { %v4294_v49 = vrot.slane %v9713_v55, 2  ;;  %v4291_v14 = vmul.f32 %v9713_v55, %v9576_v13 }
0x2ab0   :  { %4295 = vrot.lane.b32.xlu0 %v4294_v49, %s8688_s29 }
0x2ab4   :  { %4490 = vrot.lane.b32.xlu0 %v4489_v40, %s8672_s28 }
0x2ab9   :  { %v8383_v28 = vpop.eup %8382 }
0x2aba   :  { %3601 = vrot.lane.b32.xlu0 %v8383_v28, %s8688_s29 }
0x2b22   :  { %v4296_v57 = vpop.permute.xlu0 %4295 }
0x2b23   :  { %v4298_v60 = vmul.f32 %v4296_v57, %v9559_v12 }
0x2b25   :  { %4300 = vrot.lane.b32.xlu0 %v4298_v60, %s8678_s5 }
0x2b26   :  { %v4491_v5 = vpop.permute.xlu0 %4490 }
0x2b27   :  { %vm4492_vm2 = vcmp.ne.s32.totalorder %v4491_v5, 0 }
0x2b28   :  { %vm4493_vm4 = vmand %vm4484_vm14, %vm4492_vm2 }
0x2b29   :  { %v4494_v8 = vsel %vm4493_vm4, 1.0, %v8685_v3 }
0x2b2a   :  { %4504 = vperm.xlu0 %8148, %v4494_v8  }
0x2b2c   :  { %v3602_v9 = vpop.permute.xlu0 %3601 }
0x2b2d   :  { %v3604_v53 = vmul.f32 %v3602_v9, %v3599_v6 }
0x2b2e   :  { %8149 = vset.pattern.permute.xlu0 %v8684_v2 }
0x2b2f   :  { %v9729_v12 = vadd.f32 %v3605_v10, %v3604_v53 }
0x2b31   :  { %v4378_v15 = vpack.c.bf16 %v9729_v12, %v9729_v12 }
0x2b33   :  { %4387 = vrot.lane.b32.xlu0 %v4378_v15, %s8688_s29 }
0x2b37   :  { %4611 = vrot.lane.b32.xlu0 %v4602_v36, %s8688_s29 }
0x2b3b   :  { %4497 = vperm.xlu0 %8149, %v4486_v63  }
0x2b97   :  { %v4301_v61 = vpop.permute.xlu0 %4300 }
0x2b98   :  { %v4303_v19 = vadd.f32 %v4301_v61, %v4291_v14 }
0x2b9a   :  { %v4308_v37 = vpack.c.bf16 %v4303_v19, %v4303_v19  ;;  %v7286_v19 = vld [vmem:[#allocation6 + $0x5] ss:$0 sm:$0xff] }
0x2b9c   :  { %4317 = vrot.lane.b32.xlu1 %v4308_v37, %s8688_s29 }
0x2ba5   :  { %v9742_v43 = vpop.permute.xlu0 %4504 }
0x2ba6   :  { %v4507_v21 = vmul.f32 %v9742_v43, %v4296_v57 }
0x2ba8   :  { %4509 = vrot.lane.b32.xlu0 %v4507_v21, %s8678_s5 }
0x2ba9   :  { %v4388_v42 = vpop.permute.xlu0 %4387 }
0x2baa   :  { %7914 = vmatmul.mubr.msk.bf16.vlgmr.msra.gmra.mxu0 %vm165_vm6, %v4388_v42 }
0x2bab   :  { %7930 = vmatpush3.bf16.msra.mxu0 %v8232_v25  ;;  %7933 = vmatprep.mubr.msk.bf16.mxu0 %vm8686_vm1, %v8685_v3 }
0x2bac   :  { %7931 = vmatprep.subr.bf16.mxu0 %v8685_v3 }
0x2bad   :  { %v4612_v13 = vpop.permute.xlu0 %4611 }
0x2baf   :  { %7932 = vmatpush3.bf16.msra.mxu0 %v8233_v51 }
0x2bb0   :  { %7937 = vmatprep.subr.mxu0 %v8685_v3 }
0x2bb2   :  { %7934 = vmatmul.mubr.msk.bf16.vlgmr.msra.gmra.mxu0 %vm165_vm6, %v4612_v13 }
0x2bb3   :  { %7939 = vmatprep.mubr.msk.f32.mxu0 %vm8686_vm1, %v8685_v3 }
0x2bb6   :  { %v9759_v33 = vpop.permute.xlu0 %4497 }
0x2bb7   :  { %v4500_v18 = vmul.f32 %v9759_v33, %v9713_v55 }
0x2c0e   :  { %v4318_v17 = vpop.permute.xlu1 %4317 }
0x2c0f   :  { %7906 = vmatmul.mubr.msk.bf16.vlgmr.msra.gmra.mxu1 %vm165_vm6, %v4318_v17 }
0x2c10   :  { %7918 = vmatpush3.bf16.msra.mxu1 %v8236_v26  ;;  %7925 = vmatprep.mubr.msk.bf16.mxu1 %vm8686_vm1, %v8685_v3 }
0x2c11   :  { %7919 = vmatprep.subr.bf16.mxu1 %v8685_v3 }
0x2c14   :  { %7920 = vmatpush3.bf16.msra.mxu1 %v8237_v30 }
0x2c15   :  { %7921 = vmatprep.subr.bf16.mxu1 %v8685_v3 }
0x2c18   :  { %7922 = vmatpush3.bf16.msra.mxu1 %v8238_v32 }
0x2c19   :  { %7923 = vmatprep.subr.bf16.mxu1 %v8685_v3 }
0x2c1a   :  { %v4510_v52 = vpop.permute.xlu0 %4509 }
0x2c1b   :  { %v4512_v56 = vadd.f32 %v4510_v52, %v4500_v18 }
0x2c1c   :  { %7924 = vmatpush3.bf16.msra.mxu1 %v8239_v34 }
0x2c1d   :  { %v4513_v41 = vpack.c.bf16 %v4512_v56, %v4512_v56  ;;  %7947 = vmatprep.subr.bf16.mxu1 %v8685_v3 }
0x2c1f   :  { %v4516_v45 = vsel %vm165_vm6, %v9764_v38, %v4513_v41 }
0x2c20   :  { %7926 = vmatmul.mubr.msk.bf16.vlgmr.msra.gmra.mxu1 %vm247_vm7, %v4516_v45 }
0x2c21   :  { %7955 = vmatprep.mubr.msk.bf16.mxu1 %vm8686_vm1, %v8685_v3 }
0x2c6a   :  { %v9772_v39 = vpop.f32.mrf.mxu0 }
0x2c6c   :  { %v7915_v46 = vpop.f32.mrf.mxu0 }
0x2c6e   :  { %v4441_v20 = vpop.f32.mrf.mxu0 }
0x2c70   :  { %v7916_v54 = vpop.f32.mrf.mxu0 }
0x2c72   :  { %v4662_v63 = vpop.f32.mrf.mxu0 }
0x2c73   :  { %v4663_v49 = vadd.f32 %v9591_v44, %v4662_v63 }
0x2c74   :  { %v7935_v40 = vpop.f32.mrf.mxu0 }
0x2c75   :  { %4676 = vrot.lane.b32.xlu0 %v4663_v49, %s8675_s21 }
0x2c76   :  { %v4665_v28 = vpop.f32.mrf.mxu0 }
0x2c78   :  { %v7936_v47 = vpop.f32.mrf.mxu0 }
0x2ccf   :  { %v9776_v57 = vpop.f32.mrf.mxu1 }
0x2cd1   :  { %v7907_v60 = vpop.f32.mrf.mxu1 }
0x2cd3   :  { %v4371_v5 = vpop.f32.mrf.mxu1 }
0x2cd5   :  { %v7908_v7 = vpop.f32.mrf.mxu1 }
0x2ce0   :  { %v4592_v8 = vpop.f32.mrf.mxu1 }
0x2ce1   :  { %v4593_v6 = vadd.f32 %v9600_v59, %v4592_v8 }
0x2ce2   :  { %v7927_v9 = vpop.f32.mrf.mxu1 }
0x2ce3   :  { %v4668_v10 = vadd.f32 %v4663_v49, %v4593_v6 }
0x2ce4   :  { %v4595_v53 = vpop.f32.mrf.mxu1 }
0x2ce5   :  { %v7285_v15 = vmul.f32 -1.442695, %v4668_v10 }
0x2ce6   :  { %v7928_v36 = vpop.f32.mrf.mxu1 }
0x2ce7   :  { %8384 = vpow2.f32 %v7285_v15  ;;  %v4677_v14 = vpop.permute.xlu0 %4676 }
0x2cf4   :  { %v8385_v44 = vpop.eup %8384 }
0x2cf5   :  { %v4672_v48 = vadd.f32 1.0, %v8385_v44 }
0x2cf7   :  { %8386 = vrcp.f32 %v4672_v48 }
0x2d04   :  { %v8387_v27 = vpop.eup %8386 }
0x2d05   :  { %v4679_v61 = vmul.f32 %v8387_v27, %v4677_v14  ;;  %v4686_v25 = vsub.f32 1.0, %v8387_v27  ;;  %v4692_v51 = vmul.f32 %v8387_v27, %v9607_v24  ;;  %v8240_v14 = vld [vmem:[#allocation12 + $0x8] sm:$0xff]  }
0x2d07   :  { %4681 = vrot.lane.b32.xlu0 %v4679_v61, %s8675_s21 }
0x2d0b   :  { %4701 = vrot.lane.b32.xlu0 %v7286_v19, %s8678_s5  ;;  %v8241_v19 = vld [vmem:[#allocation12] sm:$0xff]  }
0x2d79   :  { %v4682_v37 = vpop.permute.xlu0 %4681 }
0x2d7a   :  { %v4684_v21 = vadd.f32 %v4682_v37, %v4593_v6 }
0x2d7c   :  { %8388 = vtanh.f32 %v4684_v21  ;;  %v8242_v21 = vld [vmem:[%s10303_s8 + $0x18] sm:$0xff]  }
0x2d7d   :  { %v4702_v26 = vpop.permute.xlu0 %4701  ;;  %7948 = vmatpush3.bf16.msra.mxu1 %v8242_v21 }
0x2d7e   :  { %7949 = vmatprep.subr.bf16.mxu1 %v8685_v3 }
0x2d89   :  { %v8389_v59 = vpop.eup %8388 }
0x2d8a   :  { %4688 = vrot.lane.b32.xlu1 %v8389_v59, %s8688_s29  ;;  %v8243_v59 = vld [vmem:[%s10303_s8 + $0x10] sm:$0xff]  }
0x2d8b   :  { %7950 = vmatpush3.bf16.msra.mxu1 %v8243_v59 }
0x2d8c   :  { %7951 = vmatprep.subr.bf16.mxu1 %v8685_v3 }
0x2dfc   :  { %v4689_v42 = vpop.permute.xlu1 %4688 }
0x2dfd   :  { %v4691_v13 = vmul.f32 %v4689_v42, %v4686_v25  ;;  %v8244_v25 = vld [vmem:[%s10303_s8 + $0x8] sm:$0xff]   ;;  %v8245_v42 = vld [vmem:[%s10303_s8] sm:$0xff]  }
0x2dfe   :  { %7952 = vmatpush3.bf16.msra.mxu1 %v8244_v25 }
0x2dff   :  { %v9783_v17 = vadd.f32 %v4692_v51, %v4691_v13  ;;  %7953 = vmatprep.subr.bf16.mxu1 %v8685_v3 }
0x2e01   :  { %v4704_v30 = vadd.f32 %v4702_v26, %v9783_v17 }
0x2e02   :  { %7954 = vmatpush3.bf16.msra.mxu1 %v8245_v42 }
0x2e03   :  { %v4744_v32 = vmul.f32 %v4704_v30, %v9051_v23  ;;  %v4712_v41 = vrot.slane %v4704_v30, %v8894_v58  ;;  %7975 = vmatprep.subr.bf16.mxu1 %v8685_v3 }
0x2e05   :  { %4746 = vrot.lane.b32.xlu1 %v4744_v32, %s8688_s29  ;;  %v4713_v45 = vcombine.high %v4712_v41, %v4712_v41  ;;  %v4720_v5 = vrot.slane %v4712_v41, %v8894_v58 }
0x2e07   :  { %v4727_v46 = vrot.slane %v4713_v45, %v8894_v58  ;;  %v4731_v7 = vrot.slane %v4720_v5, %v8901_v62 }
0x2e09   :  { %v4735_v20 = vrot.slane %v4727_v46, %v8901_v62 }
0x2e77   :  { %v4747_v34 = vpop.permute.xlu1 %4746 }
0x2e78   :  { %v4749_v35 = vsel %vm445_vm3, %v4747_v34, 0.0 }
0x2e79   :  { %4750 = vadd.xlane.f32.xlu0 %v4749_v35 }
0x2f02   :  { %v4751_v18 = vpop.xlane.xlu0 %4750 }
0x2f03   :  { %v9792_v24 = vsel %vm4752_vm5, %v4751_v18, %v9623_v16  ;;  %v5042_v16 = vpack.c.bf16 %v9713_v55, %v9713_v55  ;;  %vm5615_vm5 = vcmp.eq.s32.totalorder %v9069_v22, 6 }
0x2f04   :  { %v4755_v52 = vsel %vm4754_vm13, %v9792_v24, -1e+30 }
0x2f05   :  { %v4756_v56 = vsel %vm453_vm8, %v4755_v52, -inf }
0x2f06   :  { %4757 = vmax.xlane.f32.xlu1 %v4756_v56 }
0x2f17   :  { %4738 = vrot.lane.b32.xlu1 %v4735_v20, %s8688_s29 }
0x2f1b   :  { %5051 = vrot.lane.b32.xlu1 %v5042_v16, %s8688_s29  ;;  %v5135_v16 = vrot.slane %v9699_v50, 6 }
0x2f8f   :  { %v4758_v54 = vpop.xlane.xlu1 %4757 }
0x2f90   :  { %v4759_v63 = vsub.f32 %v4755_v52, %v4758_v54 }
0x2f92   :  { %v4760_v49 = vmul.f32 1.442695, %v4759_v63 }
0x2f93   :  { %v4739_v40 = vpop.permute.xlu1 %4738 }
0x2f94   :  { %8390 = vpow2.f32 %v4760_v49  ;;  %4743 = vst.msk [vmem:[#allocation2 + $0xd] sm:$0x1] %vm429_vm9, %v4739_v40 }
0x2f97   :  { %v5052_v37 = vpop.permute.xlu1 %5051 }
0x2f9b   :  { %v4772_v27 = vld [vmem:[#allocation2 + $0x8] sm:$0xff] }
0x2fa1   :  { %v8391_v28 = vpop.eup %8390 }
0x2fa2   :  { %v4762_v47 = vsel %vm4754_vm13, %v8391_v28, 0.0  ;;  %vm5617_vm13 = vcmp.lt.s32.totalorder %v9069_v22, 6 }
0x2fa3   :  { %v4763_v60 = vsel %vm453_vm8, %v4762_v47, 0.0 }
0x2fa4   :  { %4764 = vadd.xlane.f32.xlu0 %v4763_v60 }
0x2fba   :  { %4736 = vrot.lane.b32.xlu0 %v4731_v7, %s8688_s29 }
0x302d   :  { %v4765_v8 = vpop.xlane.xlu0 %4764 }
0x302e   :  { %v4766_v6 = vmax.f32 %v4765_v8, 1e-30 }
0x3030   :  { %8392 = vrcp.f32 %v4766_v6 }
0x3031   :  { %v4737_v9 = vpop.permute.xlu0 %4736 }
0x3032   :  { %4742 = vst.msk [vmem:[#allocation2 + $0x5] sm:$0x1] %vm429_vm9, %v4737_v9 }
0x3039   :  { %v4771_v10 = vld [vmem:[#allocation2] sm:$0xff] }
0x303a   :  { %7938 = vmatpush3.msra.mxu0 %v4771_v10 }
0x303b   :  { %7942 = vmatprep.subr.mxu0 %v8685_v3 }
0x303d   :  { %v8393_v53 = vpop.eup %8392 }
0x303e   :  { %v4768_v15 = vmul.f32 %v8393_v53, %v4762_v47 }
0x3040   :  { %4770 = vst.msk [vmem:[#allocation18 + $0xa] sm:$0x3] %vm453_vm8, %v4768_v15  ;;  %v4780_v36 = vrot.slane %v4768_v15, %v8894_v58 }
0x3042   :  { %v4788_v44 = vrot.slane %v4780_v36, %v8894_v58  ;;  %v4781_v48 = vcombine.high %v4780_v36, %v4780_v36 }
0x3044   :  { %7940 = vmatmul.mubr.msk.f32.vlgmr.msra.gmra.mxu0 %vm493_vm10, %v4788_v44  ;;  %v4795_v61 = vrot.slane %v4781_v48, %v8894_v58 }
0x3045   :  { %7943 = vmatpush3.msra.mxu0 %v4772_v27  ;;  %7944 = vmatprep.mubr.msk.f32.mxu0 %vm8686_vm1, %v8685_v3  ;;  %v9865_v27 = vld [vmem:[%s10310_s15] ss:$0 sm:$0xff] }
0x3046   :  { %7959 = vmatprep.subr.bf16.mxu0 %v8685_v3 }
0x3048   :  { %7945 = vmatmul.mubr.msk.f32.vlgmr.msra.gmra.mxu0 %vm493_vm10, %v4795_v61 }
0x3049   :  { %7960 = vmatpush3.bf16.msra.mxu0 %v8240_v14  ;;  %7963 = vmatprep.mubr.msk.bf16.mxu0 %vm8686_vm1, %v8685_v3  ;;  %v9874_v14 = vld [vmem:[%s10317_s27 + $0xc] sm:$0x3] }
0x304a   :  { %7961 = vmatprep.subr.bf16.mxu0 %v8685_v3  ;;  %v5344_v61 = vsel %vm174_vm0, %v9874_v14, -inf }
0x304d   :  { %7962 = vmatpush3.bf16.msra.mxu0 %v8241_v19  ;;  %v9881_v19 = vld [vmem:[%s10309_s14] ss:$0 sm:$0xff] }
0x304e   :  { %7967 = vmatprep.subr.bf16.mxu0 %v8685_v3 }
0x3050   :  { %7964 = vmatmul.mubr.msk.bf16.vlgmr.msra.gmra.mxu0 %vm165_vm6, %v5052_v37 }
0x3051   :  { %7971 = vmatprep.mubr.msk.bf16.mxu0 %vm8686_vm1, %v8685_v3 }
0x3104   :  { %v4864_v51 = vpop.f32.mrf.mxu0 }
0x3105   :  { %v4940_v30 = vpack.c.bf16 %v4864_v51, %v4864_v51 }
0x3106   :  { %v7941_v13 = vpop.f32.mrf.mxu0 }
0x3107   :  { %v4944_v18 = vunpack.c.l.b16 %v4940_v30 }
0x3108   :  { %v4936_v26 = vpop.f32.mrf.mxu0 }
0x3109   :  { %v4941_v32 = vpack.c.bf16 %v4936_v26, %v4936_v26 }
0x310a   :  { %v7946_v34 = vpop.f32.mrf.mxu0 }
0x310b   :  { %v4945_v35 = vunpack.c.l.b16 %v4941_v32 }
0x310d   :  { %v4946_v52 = vrot.slane %v4945_v35, 7 }
0x310f   :  { %v4947_v56 = vsel %vm645_vm11, %v4946_v52, %v4944_v18 }
0x3110   :  { %v5102_v41 = vpop.f32.mrf.mxu0  ;;  %v4948_v45 = vpack.c.b16 %v4947_v56, %v4947_v56 }
0x3111   :  { %v5103_v46 = vadd.f32 %v9669_v31, %v5102_v41 }
0x3112   :  { %v7965_v20 = vpop.f32.mrf.mxu0  ;;  %4949 = vrot.lane.b32.xlu0 %v4948_v45, %s8678_s5 }
0x3113   :  { %5116 = vrot.lane.b32.xlu1 %v5103_v46, %s8675_s21 }
0x3114   :  { %v5105_v54 = vpop.f32.mrf.mxu0 }
0x3116   :  { %v7966_v63 = vpop.f32.mrf.mxu0 }
0x3117   :  { %5136 = vrot.lane.b32.xlu1 %v5135_v16, %s8690_s12 }
0x3184   :  { %v4950_v49 = vpop.permute.xlu0 %4949 }
0x3185   :  { %v4952_v40 = vsel %vm165_vm6, %v9764_v38, %v4950_v49  ;;  %v5117_v28 = vpop.permute.xlu1 %5116 }
0x3186   :  { %7956 = vmatmul.mubr.msk.bf16.vlgmr.msra.gmra.mxu1 %vm247_vm7, %v4952_v40 }
0x3187   :  { %7979 = vmatprep.mubr.msk.bf16.mxu1 %vm8686_vm1, %v8685_v3 }
0x3189   :  { %v5137_v31 = vpop.permute.xlu1 %5136 }
0x318a   :  { %v5139_v47 = vsel %vm736_vm12, %v9699_v50, %v5137_v31 }
0x318b   :  { %v5140_v60 = vsub.f32 1.0, %v5139_v47 }
0x318d   :  { %5143 = vperm.xlu1 %8147, %v5140_v60  }
0x3191   :  { %8150 = vset.pattern.permute.xlu1 %v8687_v11 }
0x3208   :  { %v5144_v34 = vpop.permute.xlu1 %5143 }
0x3209   :  { %v5146_v20 = vmul.f32 %v5144_v34, %v9713_v55  ;;  %v8255_v34 = vld [vmem:[#allocation8] sm:$0xff]  }
0x3246   :  { %v5028_v5 = vpop.f32.mrf.mxu1 }
0x3247   :  { %v5029_v7 = vadd.f32 %v9688_v1, %v5028_v5  ;;  %v4439_v1 = vadd.f32 %v9865_v27, %v9772_v39  ;;  %v4369_v39 = vadd.f32 %v9881_v19, %v9776_v57 }
0x3248   :  { %v7957_v8 = vpop.f32.mrf.mxu1 }
0x3249   :  { %v5035_v6 = vrot.slane %v5029_v7, 6  ;;  %v4444_v37 = vadd.f32 %v4439_v1, %v4369_v39 }
0x324a   :  { %v5031_v38 = vpop.f32.mrf.mxu1 }
0x324b   :  { %v5037_v9 = vsel %vm736_vm12, %v5029_v7, %v5035_v6  ;;  %v7273_v21 = vmul.f32 -1.442695, %v4444_v37  ;;  %v8247_v7 = vld [vmem:[#allocation15] sm:$0xff]  }
0x324c   :  { %v5108_v10 = vadd.f32 %v5103_v46, %v5037_v9  ;;  %v7958_v53 = vpop.f32.mrf.mxu1 }
0x324e   :  { %v7299_v15 = vmul.f32 -1.442695, %v5108_v10 }
0x3250   :  { %8394 = vpow2.f32 %v7299_v15  ;;  %v5465_v15 = vpack.c.bf16 %v9783_v17, %v9783_v17 }
0x325d   :  { %v8395_v36 = vpop.eup %8394 }
0x325e   :  { %v5112_v44 = vadd.f32 1.0, %v8395_v36  ;;  %v8250_v36 = vld [vmem:[#allocation14 + $0x8] sm:$0xff]  }
0x325f   :  { %7968 = vmatpush3.bf16.msra.mxu0 %v8250_v36 }
0x3260   :  { %8396 = vrcp.f32 %v5112_v44  ;;  %v8251_v44 = vld [vmem:[#allocation14] sm:$0xff]   ;;  %7969 = vmatprep.subr.bf16.mxu0 %v8685_v3 }
0x3261   :  { %8398 = vpow2.f32 %v7273_v21  ;;  %v8248_v21 = vld [vmem:[#allocation9 + $0x8] sm:$0xff]  }
0x3263   :  { %7970 = vmatpush3.bf16.msra.mxu0 %v8251_v44 }
0x3264   :  { %7983 = vmatprep.subr.bf16.mxu0 %v8685_v3 }
0x326d   :  { %v8397_v50 = vpop.eup %8396 }
0x326e   :  { %v5119_v48 = vmul.f32 %v8397_v50, %v5117_v28  ;;  %v8399_v59 = vpop.eup %8398  ;;  %v5126_v57 = vsub.f32 1.0, %v8397_v50  ;;  %v5132_v56 = vmul.f32 %v8397_v50, %v9713_v55  ;;  %v8246_v55 = vld [vmem:[#allocation15 + $0x8] sm:$0xff]  }
0x326f   :  { %v4448_v42 = vadd.f32 1.0, %v8399_v59  ;;  %7976 = vmatpush3.bf16.msra.mxu1 %v8246_v55 }
0x3270   :  { %5121 = vrot.lane.b32.xlu0 %v5119_v48, %s8675_s21  ;;  %7977 = vmatprep.subr.bf16.mxu1 %v8685_v3 }
0x3273   :  { %7978 = vmatpush3.bf16.msra.mxu1 %v8247_v7 }
0x3274   :  { %4452 = vrot.lane.b32.xlu0 %v4439_v1, %s8675_s21  ;;  %7995 = vmatprep.subr.bf16.mxu1 %v8685_v3 }
0x3278   :  { %5149 = vperm.xlu0 %8149, %v5139_v47  }
0x3297   :  { %5345 = vmax.xlane.f32.xlu0 %v5344_v61 }
0x32e2   :  { %v5122_v25 = vpop.permute.xlu0 %5121 }
0x32e3   :  { %v5124_v51 = vadd.f32 %v5122_v25, %v5037_v9  ;;  %v8249_v25 = vld [vmem:[#allocation9] sm:$0xff]  }
0x32e5   :  { %8400 = vtanh.f32 %v5124_v51 }
0x32e6   :  { %8402 = vrcp.f32 %v4448_v42  ;;  %v4453_v26 = vpop.permute.xlu0 %4452  ;;  %v8252_v42 = vld [vmem:[#allocation8 + $0x18] sm:$0xff]  }
0x32f2   :  { %v8401_v13 = vpop.eup %8400 }
0x32f3   :  { %5128 = vrot.lane.b32.xlu1 %v8401_v13, %s8688_s29  ;;  %v8403_v30 = vpop.eup %8402  ;;  %v5150_v35 = vpop.permute.xlu0 %5149  ;;  %v8253_v13 = vld [vmem:[#allocation8 + $0x10] sm:$0xff]  }
0x32f4   :  { %v4455_v32 = vmul.f32 %v8403_v30, %v4453_v26  ;;  %v4462_v6 = vsub.f32 1.0, %v8403_v30  ;;  %v4468_v9 = vmul.f32 %v8403_v30, %v9729_v12  ;;  %v8254_v26 = vld [vmem:[#allocation8 + $0x8] sm:$0xff]  }
0x32f7   :  { %4457 = vrot.lane.b32.xlu1 %v4455_v32, %s8675_s21  ;;  %v5340_v32 = vld [vmem:[#allocation3 + $0xc] sm:$0x3] }
0x3320   :  { %v5346_v52 = vpop.xlane.xlu0 %5345 }
0x3321   :  { %vm5347_vm14 = vcmp.ge.f32.partialorder %v9874_v14, %v5346_v52 }
0x3322   :  { %v5349_v63 = vsel %vm5347_vm14, 1.0, %v8685_v3 }
0x3323   :  { %vm5351_vm15 = vcmp.lt.f32.partialorder %v5349_v63, 0.5 }
0x3324   :  { %v5352_v28 = vsel %vm5351_vm15, 1, %v8684_v2 }
0x3365   :  { %v5129_v18 = vpop.permute.xlu1 %5128 }
0x3366   :  { %v5131_v41 = vmul.f32 %v5129_v18, %v5126_v57  ;;  %v9944_v18 = vpack.c.bf16 %v5340_v32, %v5340_v32 }
0x3368   :  { %v5133_v45 = vadd.f32 %v5132_v56, %v5131_v41 }
0x3369   :  { %v4458_v46 = vpop.permute.xlu1 %4457 }
0x336a   :  { %v5152_v16 = vmul.f32 %v5150_v35, %v5133_v45  ;;  %v4460_v54 = vadd.f32 %v4458_v46, %v4369_v39 }
0x336c   :  { %v9893_v49 = vadd.f32 %v5152_v16, %v5146_v20  ;;  %8404 = vtanh.f32 %v4460_v54  ;;  %v9954_v54 = vld [vmem:[#allocation11] ss:$0 sm:$0xff] }
0x336e   :  { %v5157_v40 = vrot.slane %v9893_v49, 2  ;;  %v5154_v50 = vmul.f32 %v9893_v49, %v9759_v33 }
0x3370   :  { %5158 = vrot.lane.b32.xlu1 %v5157_v40, %s8688_s29 }
0x3374   :  { %5353 = vrot.lane.b32.xlu1 %v5352_v28, %s8672_s28 }
0x3379   :  { %v8405_v31 = vpop.eup %8404 }
0x337a   :  { %4464 = vrot.lane.b32.xlu1 %v8405_v31, %s8688_s29 }
0x33e2   :  { %v5159_v47 = vpop.permute.xlu1 %5158 }
0x33e3   :  { %v5161_v60 = vmul.f32 %v5159_v47, %v9742_v43 }
0x33e5   :  { %5163 = vrot.lane.b32.xlu1 %v5161_v60, %s8678_s5 }
0x33e6   :  { %v5354_v5 = vpop.permute.xlu1 %5353 }
0x33e7   :  { %vm5355_vm2 = vcmp.ne.s32.totalorder %v5354_v5, 0 }
0x33e8   :  { %vm5356_vm4 = vmand %vm5347_vm14, %vm5355_vm2 }
0x33e9   :  { %v5357_v8 = vsel %vm5356_vm4, 1.0, %v8685_v3  ;;  %vm6478_vm4 = vcmp.eq.s32.totalorder %v9069_v22, 7 }
0x33ea   :  { %5367 = vperm.xlu1 %8150, %v5357_v8   ;;  %v9963_v8 = vld [vmem:[%s10301_s6] ss:$0 sm:$0xff] }
0x33ec   :  { %v4465_v38 = vpop.permute.xlu1 %4464 }
0x33ed   :  { %v4467_v10 = vmul.f32 %v4465_v38, %v4462_v6 }
0x33ee   :  { %8151 = vset.pattern.permute.xlu1 %v8684_v2 }
0x33ef   :  { %v9909_v43 = vadd.f32 %v4468_v9, %v4467_v10 }
0x33f1   :  { %v5241_v53 = vpack.c.bf16 %v9909_v43, %v9909_v43 }
0x33f3   :  { %5250 = vrot.lane.b32.xlu1 %v5241_v53, %s8688_s29 }
0x33f7   :  { %5474 = vrot.lane.b32.xlu1 %v5465_v15, %s8688_s29 }
0x33fb   :  { %5360 = vperm.xlu1 %8151, %v5349_v63  }
0x3457   :  { %v5164_v48 = vpop.permute.xlu1 %5163 }
0x3458   :  { %v5166_v1 = vadd.f32 %v5164_v48, %v5154_v50 }
0x345a   :  { %v5171_v61 = vpack.c.bf16 %v5166_v1, %v5166_v1 }
0x345c   :  { %5180 = vrot.lane.b32.xlu0 %v5171_v61, %s8688_s29 }
0x3465   :  { %v9922_v39 = vpop.permute.xlu1 %5367 }
0x3466   :  { %v5370_v37 = vmul.f32 %v9922_v39, %v5159_v47 }
0x3468   :  { %5372 = vrot.lane.b32.xlu1 %v5370_v37, %s8678_s5 }
0x3469   :  { %v5251_v59 = vpop.permute.xlu1 %5250 }
0x346a   :  { %7980 = vmatmul.mubr.msk.bf16.vlgmr.msra.gmra.mxu1 %vm165_vm6, %v5251_v59 }
0x346b   :  { %7996 = vmatpush3.bf16.msra.mxu1 %v8248_v21  ;;  %7999 = vmatprep.mubr.msk.bf16.mxu1 %vm8686_vm1, %v8685_v3 }
0x346c   :  { %7997 = vmatprep.subr.bf16.mxu1 %v8685_v3 }
0x346d   :  { %v5475_v33 = vpop.permute.xlu1 %5474 }
0x346f   :  { %7998 = vmatpush3.bf16.msra.mxu1 %v8249_v25  ;;  %v7321_v25 = vld [vmem:[#allocation6 + $0x6] ss:$0 sm:$0xff] }
0x3470   :  { %8003 = vmatprep.subr.mxu1 %v8685_v3 }
0x3472   :  { %8000 = vmatmul.mubr.msk.bf16.vlgmr.msra.gmra.mxu1 %vm165_vm6, %v5475_v33 }
0x3473   :  { %8005 = vmatprep.mubr.msk.f32.mxu1 %vm8686_vm1, %v8685_v3 }
0x3476   :  { %v9939_v30 = vpop.permute.xlu1 %5360 }
0x3477   :  { %v5363_v35 = vmul.f32 %v9939_v30, %v9893_v49 }
0x34ce   :  { %v5181_v51 = vpop.permute.xlu0 %5180 }
0x34cf   :  { %7972 = vmatmul.mubr.msk.bf16.vlgmr.msra.gmra.mxu0 %vm165_vm6, %v5181_v51 }
0x34d0   :  { %7984 = vmatpush3.bf16.msra.mxu0 %v8252_v42  ;;  %7991 = vmatprep.mubr.msk.bf16.mxu0 %vm8686_vm1, %v8685_v3 }
0x34d1   :  { %7985 = vmatprep.subr.bf16.mxu0 %v8685_v3 }
0x34d4   :  { %7986 = vmatpush3.bf16.msra.mxu0 %v8253_v13 }
0x34d5   :  { %7987 = vmatprep.subr.bf16.mxu0 %v8685_v3 }
0x34d8   :  { %7988 = vmatpush3.bf16.msra.mxu0 %v8254_v26 }
0x34d9   :  { %7989 = vmatprep.subr.bf16.mxu0 %v8685_v3 }
0x34da   :  { %v5373_v57 = vpop.permute.xlu1 %5372 }
0x34db   :  { %v5375_v52 = vadd.f32 %v5373_v57, %v5363_v35 }
0x34dc   :  { %7990 = vmatpush3.bf16.msra.mxu0 %v8255_v34 }
0x34dd   :  { %v5376_v56 = vpack.c.bf16 %v5375_v52, %v5375_v52  ;;  %8013 = vmatprep.subr.bf16.mxu0 %v8685_v3 }
0x34df   :  { %v5379_v41 = vsel %vm165_vm6, %v9944_v18, %v5376_v56 }
0x34e0   :  { %7992 = vmatmul.mubr.msk.bf16.vlgmr.msra.gmra.mxu0 %vm247_vm7, %v5379_v41 }
0x34e1   :  { %8021 = vmatprep.mubr.msk.bf16.mxu0 %vm8686_vm1, %v8685_v3 }
0x352a   :  { %v9952_v45 = vpop.f32.mrf.mxu1 }
0x352c   :  { %v7981_v46 = vpop.f32.mrf.mxu1 }
0x352e   :  { %v5304_v20 = vpop.f32.mrf.mxu1 }
0x352f   :  { %v5905_v20 = vpack.c.bf16 %v9893_v49, %v9893_v49 }
0x3530   :  { %v7982_v16 = vpop.f32.mrf.mxu1 }
0x3532   :  { %v5525_v63 = vpop.f32.mrf.mxu1 }
0x3533   :  { %v5526_v40 = vadd.f32 %v9954_v54, %v5525_v63 }
0x3534   :  { %v8001_v28 = vpop.f32.mrf.mxu1 }
0x3535   :  { %5539 = vrot.lane.b32.xlu1 %v5526_v40, %s8675_s21 }
0x3536   :  { %v5528_v31 = vpop.f32.mrf.mxu1 }
0x3538   :  { %v8002_v55 = vpop.f32.mrf.mxu1 }
0x358f   :  { %v9958_v47 = vpop.f32.mrf.mxu0 }
0x3591   :  { %v7973_v60 = vpop.f32.mrf.mxu0 }
0x3593   :  { %v5234_v5 = vpop.f32.mrf.mxu0 }
0x3595   :  { %v7974_v7 = vpop.f32.mrf.mxu0 }
0x35a0   :  { %v5455_v6 = vpop.f32.mrf.mxu0 }
0x35a1   :  { %v5456_v38 = vadd.f32 %v9963_v8, %v5455_v6 }
0x35a2   :  { %v7993_v9 = vpop.f32.mrf.mxu0 }
0x35a3   :  { %v5531_v10 = vadd.f32 %v5526_v40, %v5456_v38 }
0x35a4   :  { %v5458_v53 = vpop.f32.mrf.mxu0 }
0x35a5   :  { %v7320_v15 = vmul.f32 -1.442695, %v5531_v10 }
0x35a6   :  { %v7994_v36 = vpop.f32.mrf.mxu0 }
0x35a7   :  { %8406 = vpow2.f32 %v7320_v15  ;;  %v5540_v1 = vpop.permute.xlu1 %5539 }
0x35b4   :  { %v8407_v44 = vpop.eup %8406 }
0x35b5   :  { %v5535_v50 = vadd.f32 1.0, %v8407_v44 }
0x35b7   :  { %8408 = vrcp.f32 %v5535_v50 }
0x35c4   :  { %v8409_v48 = vpop.eup %8408 }
0x35c5   :  { %v5542_v61 = vmul.f32 %v8409_v48, %v5540_v1  ;;  %v5549_v33 = vsub.f32 1.0, %v8409_v48  ;;  %v5555_v51 = vmul.f32 %v8409_v48, %v9783_v17 }
0x35c7   :  { %5544 = vrot.lane.b32.xlu1 %v5542_v61, %s8675_s21 }
0x3639   :  { %v5545_v37 = vpop.permute.xlu1 %5544 }
0x363a   :  { %v5547_v21 = vadd.f32 %v5545_v37, %v5456_v38 }
0x363c   :  { %8410 = vtanh.f32 %v5547_v21  ;;  %v8256_v21 = vld [vmem:[#allocation12 + $0x8] sm:$0xff]  }
0x3649   :  { %v8411_v59 = vpop.eup %8410 }
0x364a   :  { %5551 = vrot.lane.b32.xlu1 %v8411_v59, %s8688_s29 }
0x364e   :  { %5564 = vrot.lane.b32.xlu1 %v7321_v25, %s8678_s5  ;;  %v8257_v25 = vld [vmem:[#allocation12] sm:$0xff]  }
0x36bc   :  { %v5552_v42 = vpop.permute.xlu1 %5551 }
0x36bd   :  { %v5554_v13 = vmul.f32 %v5552_v42, %v5549_v33  ;;  %v8258_v42 = vld [vmem:[%s10303_s8 + $0x18] sm:$0xff]  }
0x36be   :  { %8014 = vmatpush3.bf16.msra.mxu0 %v8258_v42  ;;  %v5302_v42 = vadd.f32 %v9865_v27, %v9952_v45 }
0x36bf   :  { %v9970_v26 = vadd.f32 %v5555_v51, %v5554_v13  ;;  %v8259_v51 = vld [vmem:[%s10303_s8 + $0x10] sm:$0xff]   ;;  %8015 = vmatprep.subr.bf16.mxu0 %v8685_v3  ;;  %v8260_v13 = vld [vmem:[%s10303_s8 + $0x8] sm:$0xff]  }
0x36c0   :  { %v5565_v32 = vpop.permute.xlu1 %5564 }
0x36c1   :  { %v5567_v34 = vadd.f32 %v5565_v32, %v9970_v26  ;;  %v8261_v32 = vld [vmem:[%s10303_s8] sm:$0xff]  }
0x36c2   :  { %8016 = vmatpush3.bf16.msra.mxu0 %v8259_v51  ;;  %v10062_v51 = vld [vmem:[%s10317_s27 + $0xe] sm:$0x3] }
0x36c3   :  { %v5607_v35 = vmul.f32 %v5567_v34, %v9051_v23  ;;  %v5575_v56 = vrot.slane %v5567_v34, %v8894_v58  ;;  %8017 = vmatprep.subr.bf16.mxu0 %v8685_v3 }
0x36c5   :  { %5609 = vrot.lane.b32.xlu0 %v5607_v35, %s8688_s29  ;;  %v5576_v41 = vcombine.high %v5575_v56, %v5575_v56 }
0x36c6   :  { %8018 = vmatpush3.bf16.msra.mxu0 %v8260_v13  ;;  %v6207_v13 = vsel %vm174_vm0, %v10062_v51, -inf }
0x36c7   :  { %v5590_v46 = vrot.slane %v5576_v41, %v8894_v58  ;;  %8019 = vmatprep.subr.bf16.mxu0 %v8685_v3 }
0x36c9   :  { %v5598_v17 = vrot.slane %v5590_v46, %v8901_v62 }
0x36ca   :  { %8020 = vmatpush3.bf16.msra.mxu0 %v8261_v32  ;;  %v5232_v32 = vadd.f32 %v9881_v19, %v9958_v47 }
0x36cb   :  { %8041 = vmatprep.subr.bf16.mxu0 %v8685_v3 }
0x3737   :  { %v5610_v57 = vpop.permute.xlu0 %5609 }
0x3738   :  { %v5612_v52 = vsel %vm445_vm3, %v5610_v57, 0.0 }
0x3739   :  { %5613 = vadd.xlane.f32.xlu1 %v5612_v52 }
0x374a   :  { %5601 = vrot.lane.b32.xlu1 %v5598_v17, %s8688_s29 }
0x374e   :  { %5914 = vrot.lane.b32.xlu1 %v5905_v20, %s8688_s29 }
0x37c2   :  { %v5614_v16 = vpop.xlane.xlu1 %5613 }
0x37c3   :  { %v9986_v63 = vsel %vm5615_vm5, %v5614_v16, %v9792_v24  ;;  %v5583_v24 = vrot.slane %v5575_v56, %v8894_v58  ;;  %v10032_v16 = vld [vmem:[%s10306_s11] ss:$0 sm:$0xff]  ;;  %vm6480_vm5 = vcmp.lt.s32.totalorder %v9069_v22, 7 }
0x37c4   :  { %v5618_v40 = vsel %vm5617_vm13, %v9986_v63, -1e+30 }
0x37c5   :  { %v5619_v28 = vsel %vm453_vm8, %v5618_v40, -inf  ;;  %v5594_v9 = vrot.slane %v5583_v24, %v8901_v62 }
0x37c6   :  { %5620 = vmax.xlane.f32.xlu0 %v5619_v28  ;;  %v5602_v31 = vpop.permute.xlu1 %5601 }
0x37c7   :  { %5606 = vst.msk [vmem:[#allocation2 + $0xe] sm:$0x1] %vm429_vm9, %v5602_v31 }
0x37ca   :  { %v5915_v33 = vpop.permute.xlu1 %5914 }
0x37ce   :  { %v5635_v37 = vld [vmem:[#allocation2 + $0x8] sm:$0xff] }
0x384f   :  { %v5621_v55 = vpop.xlane.xlu0 %5620 }
0x3850   :  { %v5622_v60 = vsub.f32 %v5618_v40, %v5621_v55 }
0x3852   :  { %v5623_v5 = vmul.f32 1.442695, %v5622_v60 }
0x3854   :  { %8412 = vpow2.f32 %v5623_v5  ;;  %v5998_v5 = vrot.slane %v9874_v14, 6 }
0x3861   :  { %v8413_v7 = vpop.eup %8412 }
0x3862   :  { %v5625_v6 = vsel %vm5617_vm13, %v8413_v7, 0.0 }
0x3863   :  { %v5626_v38 = vsel %vm453_vm8, %v5625_v6, 0.0 }
0x3864   :  { %5627 = vadd.xlane.f32.xlu0 %v5626_v38 }
0x387a   :  { %5599 = vrot.lane.b32.xlu0 %v5594_v9, %s8688_s29 }
0x38ed   :  { %v5628_v10 = vpop.xlane.xlu0 %5627 }
0x38ee   :  { %v5629_v53 = vmax.f32 %v5628_v10, 1e-30 }
0x38f0   :  { %8414 = vrcp.f32 %v5629_v53 }
0x38f1   :  { %v5600_v15 = vpop.permute.xlu0 %5599 }
0x38f2   :  { %5605 = vst.msk [vmem:[#allocation2 + $0x6] sm:$0x1] %vm429_vm9, %v5600_v15 }
0x38f9   :  { %v5634_v36 = vld [vmem:[#allocation2] sm:$0xff] }
0x38fa   :  { %8004 = vmatpush3.msra.mxu1 %v5634_v36  ;;  %v10051_v36 = vld [vmem:[%s10305_s10] ss:$0 sm:$0xff] }
0x38fb   :  { %8008 = vmatprep.subr.mxu1 %v8685_v3 }
0x38fd   :  { %v8415_v44 = vpop.eup %8414 }
0x38fe   :  { %v5631_v50 = vmul.f32 %v8415_v44, %v5625_v6 }
0x3900   :  { %5633 = vst.msk [vmem:[#allocation18 + $0xc] sm:$0x3] %vm453_vm8, %v5631_v50  ;;  %v5643_v48 = vrot.slane %v5631_v50, %v8894_v58 }
0x3902   :  { %v5651_v1 = vrot.slane %v5643_v48, %v8894_v58  ;;  %v5644_v61 = vcombine.high %v5643_v48, %v5643_v48 }
0x3904   :  { %8006 = vmatmul.mubr.msk.f32.vlgmr.msra.gmra.mxu1 %vm493_vm10, %v5651_v1  ;;  %v5658_v59 = vrot.slane %v5644_v61, %v8894_v58 }
0x3905   :  { %8009 = vmatpush3.msra.mxu1 %v5635_v37  ;;  %8010 = vmatprep.mubr.msk.f32.mxu1 %vm8686_vm1, %v8685_v3 }
0x3906   :  { %8025 = vmatprep.subr.bf16.mxu1 %v8685_v3 }
0x3908   :  { %8011 = vmatmul.mubr.msk.f32.vlgmr.msra.gmra.mxu1 %vm493_vm10, %v5658_v59 }
0x3909   :  { %8026 = vmatpush3.bf16.msra.mxu1 %v8256_v21  ;;  %8029 = vmatprep.mubr.msk.bf16.mxu1 %vm8686_vm1, %v8685_v3 }
0x390a   :  { %8027 = vmatprep.subr.bf16.mxu1 %v8685_v3 }
0x390d   :  { %8028 = vmatpush3.bf16.msra.mxu1 %v8257_v25 }
0x390e   :  { %8033 = vmatprep.subr.bf16.mxu1 %v8685_v3 }
0x3910   :  { %8030 = vmatmul.mubr.msk.bf16.vlgmr.msra.gmra.mxu1 %vm165_vm6, %v5915_v33 }
0x3911   :  { %8037 = vmatprep.mubr.msk.bf16.mxu1 %vm8686_vm1, %v8685_v3 }
0x39c4   :  { %v5727_v34 = vpop.f32.mrf.mxu1 }
0x39c5   :  { %v5803_v52 = vpack.c.bf16 %v5727_v34, %v5727_v34  ;;  %v5307_v34 = vadd.f32 %v5302_v42, %v5232_v32 }
0x39c6   :  { %v8007_v35 = vpop.f32.mrf.mxu1 }
0x39c7   :  { %v5807_v17 = vunpack.c.l.b16 %v5803_v52  ;;  %v7308_v35 = vmul.f32 -1.442695, %v5307_v34 }
0x39c8   :  { %v5799_v57 = vpop.f32.mrf.mxu1 }
0x39c9   :  { %v5804_v56 = vpack.c.bf16 %v5799_v57, %v5799_v57 }
0x39ca   :  { %v8012_v41 = vpop.f32.mrf.mxu1 }
0x39cb   :  { %v5808_v46 = vunpack.c.l.b16 %v5804_v56 }
0x39cd   :  { %v5809_v20 = vrot.slane %v5808_v46, 7 }
0x39cf   :  { %v5810_v40 = vsel %vm645_vm11, %v5809_v20, %v5807_v17 }
0x39d0   :  { %v5965_v28 = vpop.f32.mrf.mxu1  ;;  %v5811_v31 = vpack.c.b16 %v5810_v40, %v5810_v40 }
0x39d1   :  { %v5966_v55 = vadd.f32 %v10032_v16, %v5965_v28 }
0x39d2   :  { %v8031_v60 = vpop.f32.mrf.mxu1  ;;  %5812 = vrot.lane.b32.xlu1 %v5811_v31, %s8678_s5 }
0x39d3   :  { %5979 = vrot.lane.b32.xlu0 %v5966_v55, %s8675_s21 }
0x39d4   :  { %v5968_v7 = vpop.f32.mrf.mxu1 }
0x39d6   :  { %v8032_v6 = vpop.f32.mrf.mxu1 }
0x39d7   :  { %5999 = vrot.lane.b32.xlu0 %v5998_v5, %s8690_s12 }
0x3a44   :  { %v5813_v38 = vpop.permute.xlu1 %5812 }
0x3a45   :  { %v5815_v24 = vsel %vm165_vm6, %v9944_v18, %v5813_v38  ;;  %v5980_v9 = vpop.permute.xlu0 %5979 }
0x3a46   :  { %8022 = vmatmul.mubr.msk.bf16.vlgmr.msra.gmra.mxu0 %vm247_vm7, %v5815_v24 }
0x3a47   :  { %8045 = vmatprep.mubr.msk.bf16.mxu0 %vm8686_vm1, %v8685_v3 }
0x3a49   :  { %v6000_v10 = vpop.permute.xlu0 %5999 }
0x3a4a   :  { %v6002_v53 = vsel %vm736_vm12, %v9874_v14, %v6000_v10 }
0x3a4b   :  { %v6003_v15 = vsub.f32 1.0, %v6002_v53 }
0x3a4d   :  { %6006 = vperm.xlu0 %8149, %v6003_v15  }
0x3a51   :  { %8152 = vset.pattern.permute.xlu0 %v8687_v11 }
0x3ac8   :  { %v6007_v20 = vpop.permute.xlu0 %6006 }
0x3ac9   :  { %v6009_v7 = vmul.f32 %v6007_v20, %v9893_v49  ;;  %v6203_v20 = vld [vmem:[#allocation3 + $0xe] sm:$0x3] }
0x3b06   :  { %v5891_v18 = vpop.f32.mrf.mxu0 }
0x3b07   :  { %v5892_v44 = vadd.f32 %v10051_v36, %v5891_v18 }
0x3b08   :  { %v8023_v50 = vpop.f32.mrf.mxu0 }
0x3b09   :  { %v5898_v48 = vrot.slane %v5892_v44, 6 }
0x3b0a   :  { %v5894_v1 = vpop.f32.mrf.mxu0 }
0x3b0b   :  { %v5900_v61 = vsel %vm736_vm12, %v5892_v44, %v5898_v48  ;;  %v8263_v48 = vld [vmem:[#allocation15] sm:$0xff]  }
0x3b0c   :  { %v5971_v37 = vadd.f32 %v5966_v55, %v5900_v61  ;;  %v8024_v21 = vpop.f32.mrf.mxu0 }
0x3b0e   :  { %v7334_v14 = vmul.f32 -1.442695, %v5971_v37 }
0x3b10   :  { %8416 = vpow2.f32 %v7334_v14 }
0x3b1d   :  { %v8417_v59 = vpop.eup %8416 }
0x3b1e   :  { %v5975_v25 = vadd.f32 1.0, %v8417_v59 }
0x3b20   :  { %8418 = vrcp.f32 %v5975_v25  ;;  %v6328_v25 = vpack.c.bf16 %v9970_v26, %v9970_v26 }
0x3b21   :  { %8420 = vpow2.f32 %v7308_v35 }
0x3b2d   :  { %v8419_v11 = vpop.eup %8418 }
0x3b2e   :  { %v5982_v33 = vmul.f32 %v8419_v11, %v5980_v9  ;;  %v8421_v57 = vpop.eup %8420  ;;  %v5989_v19 = vsub.f32 1.0, %v8419_v11  ;;  %v5995_v31 = vmul.f32 %v8419_v11, %v9893_v49  ;;  %v8262_v49 = vld [vmem:[#allocation15 + $0x8] sm:$0xff]   ;;  %v8266_v11 = vld [vmem:[#allocation14 + $0x8] sm:$0xff]  }
0x3b2f   :  { %v5311_v45 = vadd.f32 1.0, %v8421_v57  ;;  %8042 = vmatpush3.bf16.msra.mxu0 %v8262_v49  ;;  %8034 = vmatpush3.bf16.msra.mxu1 %v8266_v11  ;;  %v8264_v57 = vld [vmem:[#allocation9 + $0x8] sm:$0xff]  }
0x3b30   :  { %5984 = vrot.lane.b32.xlu1 %v5982_v33, %s8675_s21  ;;  %8043 = vmatprep.subr.bf16.mxu0 %v8685_v3  ;;  %v8267_v33 = vld [vmem:[#allocation14] sm:$0xff]  }
0x3b31   :  { %8035 = vmatprep.subr.bf16.mxu1 %v8685_v3 }
0x3b33   :  { %8044 = vmatpush3.bf16.msra.mxu0 %v8263_v48  ;;  %8036 = vmatpush3.bf16.msra.mxu1 %v8267_v33 }
0x3b34   :  { %5315 = vrot.lane.b32.xlu1 %v5302_v42, %s8675_s21  ;;  %8061 = vmatprep.subr.bf16.mxu0 %v8685_v3 }
0x3b35   :  { %8049 = vmatprep.subr.bf16.mxu1 %v8685_v3 }
0x3b38   :  { %6012 = vperm.xlu1 %8151, %v6002_v53  }
0x3b5c   :  { %6208 = vmax.xlane.f32.xlu1 %v6207_v13 }
0x3ba2   :  { %v5985_v27 = vpop.permute.xlu1 %5984 }
0x3ba3   :  { %v5987_v52 = vadd.f32 %v5985_v27, %v5900_v61 }
0x3ba5   :  { %8422 = vtanh.f32 %v5987_v52  ;;  %v8268_v52 = vld [vmem:[#allocation8 + $0x18] sm:$0xff]  }
0x3ba6   :  { %8424 = vrcp.f32 %v5311_v45  ;;  %v5316_v41 = vpop.permute.xlu1 %5315  ;;  %v8265_v45 = vld [vmem:[#allocation9] sm:$0xff]  }
0x3bb2   :  { %v8423_v56 = vpop.eup %8422 }
0x3bb3   :  { %5991 = vrot.lane.b32.xlu0 %v8423_v56, %s8688_s29  ;;  %v8425_v46 = vpop.eup %8424  ;;  %v6013_v40 = vpop.permute.xlu1 %6012 }
0x3bb4   :  { %v5318_v17 = vmul.f32 %v8425_v46, %v5316_v41  ;;  %v5325_v61 = vsub.f32 1.0, %v8425_v46  ;;  %v5331_v21 = vmul.f32 %v8425_v46, %v9909_v43  ;;  %v8269_v41 = vld [vmem:[#allocation8 + $0x10] sm:$0xff]   ;;  %v8270_v46 = vld [vmem:[#allocation8 + $0x8] sm:$0xff]  }
0x3bb7   :  { %5320 = vrot.lane.b32.xlu0 %v5318_v17, %s8675_s21 }
0x3be5   :  { %v6209_v28 = vpop.xlane.xlu1 %6208 }
0x3be6   :  { %vm6210_vm0 = vcmp.ge.f32.partialorder %v10062_v51, %v6209_v28  ;;  %v10127_v28 = vpack.c.bf16 %v6203_v20, %v6203_v20 }
0x3be7   :  { %v6212_v24 = vsel %vm6210_vm0, 1.0, %v8685_v3 }
0x3be8   :  { %vm6214_vm14 = vcmp.lt.f32.partialorder %v6212_v24, 0.5 }
0x3be9   :  { %v6215_v53 = vsel %vm6214_vm14, 1, %v8684_v2 }
0x3c25   :  { %v5992_v47 = vpop.permute.xlu0 %5991 }
0x3c26   :  { %v5994_v55 = vmul.f32 %v5992_v47, %v5989_v19 }
0x3c28   :  { %v5996_v60 = vadd.f32 %v5995_v31, %v5994_v55 }
0x3c29   :  { %v5321_v5 = vpop.permute.xlu0 %5320 }
0x3c2a   :  { %v6015_v6 = vmul.f32 %v6013_v40, %v5996_v60  ;;  %v5323_v38 = vadd.f32 %v5321_v5, %v5232_v32  ;;  %v8271_v40 = vld [vmem:[#allocation8] sm:$0xff]  }
0x3c2c   :  { %v10076_v9 = vadd.f32 %v6015_v6, %v6009_v7  ;;  %8426 = vtanh.f32 %v5323_v38 }
0x3c2e   :  { %v6020_v10 = vrot.slane %v10076_v9, 2 }
0x3c30   :  { %6021 = vrot.lane.b32.xlu0 %v6020_v10, %s8688_s29 }
0x3c34   :  { %6216 = vrot.lane.b32.xlu0 %v6215_v53, %s8672_s28 }
0x3c39   :  { %v8427_v15 = vpop.eup %8426 }
0x3c3a   :  { %5327 = vrot.lane.b32.xlu0 %v8427_v15, %s8688_s29 }
0x3ca2   :  { %v6022_v18 = vpop.permute.xlu0 %6021 }
0x3ca3   :  { %v6024_v44 = vmul.f32 %v6022_v18, %v9922_v39 }
0x3ca5   :  { %6026 = vrot.lane.b32.xlu0 %v6024_v44, %s8678_s5 }
0x3ca6   :  { %v6217_v50 = vpop.permute.xlu0 %6216 }
0x3ca7   :  { %vm6218_vm15 = vcmp.ne.s32.totalorder %v6217_v50, 0 }
0x3ca8   :  { %vm6219_vm2 = vmand %vm6210_vm0, %vm6218_vm15 }
0x3ca9   :  { %v6220_v1 = vsel %vm6219_vm2, 1.0, %v8685_v3 }
0x3caa   :  { %6230 = vperm.xlu0 %8152, %v6220_v1  }
0x3cac   :  { %v5328_v37 = vpop.permute.xlu0 %5327 }
0x3cad   :  { %v5330_v14 = vmul.f32 %v5328_v37, %v5325_v61 }
0x3cae   :  { %8153 = vset.pattern.permute.xlu0 %v8684_v2  ;;  %v6017_v2 = vmul.f32 %v10076_v9, %v9939_v30 }
0x3caf   :  { %v10092_v39 = vadd.f32 %v5331_v21, %v5330_v14 }
0x3cb1   :  { %v6104_v59 = vpack.c.bf16 %v10092_v39, %v10092_v39 }
0x3cb3   :  { %6113 = vrot.lane.b32.xlu0 %v6104_v59, %s8688_s29 }
0x3cb7   :  { %6337 = vrot.lane.b32.xlu0 %v6328_v25, %s8688_s29 }
0x3cbb   :  { %6223 = vperm.xlu0 %8153, %v6212_v24  }
0x3d17   :  { %v6027_v42 = vpop.permute.xlu0 %6026 }
0x3d18   :  { %v6029_v13 = vadd.f32 %v6027_v42, %v6017_v2 }
0x3d1a   :  { %v6034_v32 = vpack.c.bf16 %v6029_v13, %v6029_v13  ;;  %v7356_v13 = vld [vmem:[#allocation6 + $0x7] ss:$0 sm:$0xff] }
0x3d1c   :  { %6043 = vrot.lane.b32.xlu1 %v6034_v32, %s8688_s29 }
0x3d25   :  { %v10105_v34 = vpop.permute.xlu0 %6230 }
0x3d26   :  { %v6233_v35 = vmul.f32 %v10105_v34, %v6022_v18 }
0x3d28   :  { %6235 = vrot.lane.b32.xlu0 %v6233_v35, %s8678_s5 }
0x3d29   :  { %v6114_v27 = vpop.permute.xlu0 %6113 }
0x3d2a   :  { %8046 = vmatmul.mubr.msk.bf16.vlgmr.msra.gmra.mxu0 %vm165_vm6, %v6114_v27 }
0x3d2b   :  { %8062 = vmatpush3.bf16.msra.mxu0 %v8264_v57  ;;  %8065 = vmatprep.mubr.msk.bf16.mxu0 %vm8686_vm1, %v8685_v3 }
0x3d2c   :  { %8063 = vmatprep.subr.bf16.mxu0 %v8685_v3 }
0x3d2d   :  { %v6338_v30 = vpop.permute.xlu0 %6337 }
0x3d2f   :  { %8064 = vmatpush3.bf16.msra.mxu0 %v8265_v45 }
0x3d30   :  { %8069 = vmatprep.subr.mxu0 %v8685_v3 }
0x3d32   :  { %8066 = vmatmul.mubr.msk.bf16.vlgmr.msra.gmra.mxu0 %vm165_vm6, %v6338_v30 }
0x3d33   :  { %8071 = vmatprep.mubr.msk.f32.mxu0 %vm8686_vm1, %v8685_v3 }
0x3d36   :  { %v10122_v17 = vpop.permute.xlu0 %6223 }
0x3d37   :  { %v6226_v19 = vmul.f32 %v10122_v17, %v10076_v9 }
0x3d8e   :  { %v6044_v56 = vpop.permute.xlu1 %6043 }
0x3d8f   :  { %8038 = vmatmul.mubr.msk.bf16.vlgmr.msra.gmra.mxu1 %vm165_vm6, %v6044_v56 }
0x3d90   :  { %8050 = vmatpush3.bf16.msra.mxu1 %v8268_v52  ;;  %8057 = vmatprep.mubr.msk.bf16.mxu1 %vm8686_vm1, %v8685_v3 }
0x3d91   :  { %8051 = vmatprep.subr.bf16.mxu1 %v8685_v3 }
0x3d94   :  { %8052 = vmatpush3.bf16.msra.mxu1 %v8269_v41 }
0x3d95   :  { %8053 = vmatprep.subr.bf16.mxu1 %v8685_v3 }
0x3d98   :  { %8054 = vmatpush3.bf16.msra.mxu1 %v8270_v46 }
0x3d99   :  { %8055 = vmatprep.subr.bf16.mxu1 %v8685_v3 }
0x3d9a   :  { %v6236_v47 = vpop.permute.xlu0 %6235 }
0x3d9b   :  { %v6238_v31 = vadd.f32 %v6236_v47, %v6226_v19 }
0x3d9c   :  { %8056 = vmatpush3.bf16.msra.mxu1 %v8271_v40 }
0x3d9d   :  { %v6239_v55 = vpack.c.bf16 %v6238_v31, %v6238_v31  ;;  %8079 = vmatprep.subr.bf16.mxu1 %v8685_v3 }
0x3d9f   :  { %v6242_v60 = vsel %vm165_vm6, %v10127_v28, %v6239_v55 }
0x3da0   :  { %8058 = vmatmul.mubr.msk.bf16.vlgmr.msra.gmra.mxu1 %vm247_vm7, %v6242_v60 }
0x3da1   :  { %8087 = vmatprep.mubr.msk.bf16.mxu1 %vm8686_vm1, %v8685_v3 }
0x3dea   :  { %v10135_v5 = vpop.f32.mrf.mxu0 }
0x3dec   :  { %v8047_v7 = vpop.f32.mrf.mxu0 }
0x3dee   :  { %v6167_v6 = vpop.f32.mrf.mxu0 }
0x3def   :  { %v6768_v6 = vpack.c.bf16 %v10076_v9, %v10076_v9 }
0x3df0   :  { %v8048_v38 = vpop.f32.mrf.mxu0 }
0x3df2   :  { %v6388_v24 = vpop.f32.mrf.mxu0 }
0x3df3   :  { %v6389_v10 = vadd.f32 %v9954_v54, %v6388_v24 }
0x3df4   :  { %v8067_v53 = vpop.f32.mrf.mxu0 }
0x3df5   :  { %6402 = vrot.lane.b32.xlu0 %v6389_v10, %s8675_s21 }
0x3df6   :  { %v6391_v15 = vpop.f32.mrf.mxu0 }
0x3df8   :  { %v8068_v49 = vpop.f32.mrf.mxu0 }
0x3e4f   :  { %v10139_v18 = vpop.f32.mrf.mxu1 }
0x3e51   :  { %v8039_v44 = vpop.f32.mrf.mxu1 }
0x3e53   :  { %v6097_v50 = vpop.f32.mrf.mxu1 }
0x3e55   :  { %v8040_v48 = vpop.f32.mrf.mxu1 }
0x3e60   :  { %v6318_v1 = vpop.f32.mrf.mxu1 }
0x3e61   :  { %v6319_v61 = vadd.f32 %v9963_v8, %v6318_v1 }
0x3e62   :  { %v8059_v37 = vpop.f32.mrf.mxu1 }
0x3e63   :  { %v6394_v21 = vadd.f32 %v6389_v10, %v6319_v61 }
0x3e64   :  { %v6321_v14 = vpop.f32.mrf.mxu1 }
0x3e65   :  { %v7355_v59 = vmul.f32 -1.442695, %v6394_v21 }
0x3e66   :  { %v8060_v25 = vpop.f32.mrf.mxu1 }
0x3e67   :  { %8428 = vpow2.f32 %v7355_v59  ;;  %v6403_v2 = vpop.permute.xlu0 %6402 }
0x3e74   :  { %v8429_v54 = vpop.eup %8428 }
0x3e75   :  { %v6398_v11 = vadd.f32 1.0, %v8429_v54  ;;  %v8272_v54 = vld [vmem:[#allocation12 + $0x8] sm:$0xff]  }
0x3e77   :  { %8430 = vrcp.f32 %v6398_v11 }
0x3e84   :  { %v8431_v33 = vpop.eup %8430 }
0x3e85   :  { %v6405_v42 = vmul.f32 %v8431_v33, %v6403_v2  ;;  %v6412_v57 = vsub.f32 1.0, %v8431_v33  ;;  %v6418_v30 = vmul.f32 %v8431_v33, %v9970_v26  ;;  %v8273_v33 = vld [vmem:[#allocation12] sm:$0xff]  }
0x3e87   :  { %6407 = vrot.lane.b32.xlu0 %v6405_v42, %s8675_s21  ;;  %v8275_v42 = vld [vmem:[%s10303_s8 + $0x10] sm:$0xff]  }
0x3e8b   :  { %6427 = vrot.lane.b32.xlu0 %v7356_v13, %s8678_s5  ;;  %v8276_v13 = vld [vmem:[%s10303_s8 + $0x8] sm:$0xff]  }
0x3ef9   :  { %v6408_v32 = vpop.permute.xlu0 %6407 }
0x3efa   :  { %v6410_v35 = vadd.f32 %v6408_v32, %v6319_v61  ;;  %v8277_v32 = vld [vmem:[%s10303_s8] sm:$0xff]  }
0x3efc   :  { %8432 = vtanh.f32 %v6410_v35 }
0x3efd   :  { %v6428_v52 = vpop.permute.xlu0 %6427 }
0x3f09   :  { %v8433_v8 = vpop.eup %8432 }
0x3f0a   :  { %6414 = vrot.lane.b32.xlu1 %v8433_v8, %s8688_s29 }
0x3f7c   :  { %v6415_v27 = vpop.permute.xlu1 %6414 }
0x3f7d   :  { %v6417_v45 = vmul.f32 %v6415_v27, %v6412_v57 }
0x3f7f   :  { %v6419_v56 = vadd.f32 %v6418_v30, %v6417_v45 }
0x3f81   :  { %v6430_v41 = vadd.f32 %v6428_v52, %v6419_v56 }
0x3f83   :  { %v6470_v46 = vmul.f32 %v6430_v41, %v9051_v23  ;;  %v6438_v23 = vrot.slane %v6430_v41, %v8894_v58 }
0x3f85   :  { %6472 = vrot.lane.b32.xlu1 %v6470_v46, %s8688_s29  ;;  %v6439_v55 = vcombine.high %v6438_v23, %v6438_v23  ;;  %v6446_v44 = vrot.slane %v6438_v23, %v8894_v58 }
0x3f87   :  { %v6453_v60 = vrot.slane %v6439_v55, %v8894_v58  ;;  %v6457_v50 = vrot.slane %v6446_v44, %v8901_v62 }
0x3f89   :  { %v6461_v7 = vrot.slane %v6453_v60, %v8901_v62 }
0x3ff7   :  { %v6473_v20 = vpop.permute.xlu1 %6472 }
0x3ff8   :  { %v6475_v40 = vsel %vm445_vm3, %v6473_v20, 0.0 }
0x3ff9   :  { %6476 = vadd.xlane.f32.xlu0 %v6475_v40 }
0x4082   :  { %v6477_v19 = vpop.xlane.xlu0 %6476 }
0x4083   :  { %v6479_v47 = vsel %vm6478_vm4, %v6477_v19, %v9986_v63 }
0x4084   :  { %v6481_v26 = vsel %vm6480_vm5, %v6479_v47, -1e+30 }
0x4085   :  { %v6482_v31 = vsel %vm453_vm8, %v6481_v26, -inf }
0x4086   :  { %6483 = vmax.xlane.f32.xlu1 %v6482_v31 }
0x4097   :  { %6464 = vrot.lane.b32.xlu1 %v6461_v7, %s8688_s29 }
0x409b   :  { %6777 = vrot.lane.b32.xlu1 %v6768_v6, %s8688_s29 }
0x410f   :  { %v6484_v63 = vpop.xlane.xlu1 %6483 }
0x4110   :  { %v6485_v38 = vsub.f32 %v6481_v26, %v6484_v63  ;;  %v6861_v26 = vrot.slane %v10062_v51, 6 }
0x4112   :  { %v6486_v24 = vmul.f32 1.442695, %v6485_v38 }
0x4113   :  { %v6465_v10 = vpop.permute.xlu1 %6464 }
0x4114   :  { %8434 = vpow2.f32 %v6486_v24  ;;  %6469 = vst.msk [vmem:[#allocation2 + $0xf] sm:$0x1] %vm429_vm9, %v6465_v10 }
0x4117   :  { %v6778_v2 = vpop.permute.xlu1 %6777 }
0x411b   :  { %v6498_v25 = vld [vmem:[#allocation2 + $0x8] sm:$0xff] }
0x4121   :  { %v8435_v53 = vpop.eup %8434 }
0x4122   :  { %v6488_v15 = vsel %vm6480_vm5, %v8435_v53, 0.0 }
0x4123   :  { %v6489_v49 = vsel %vm453_vm8, %v6488_v15, 0.0 }
0x4124   :  { %6490 = vadd.xlane.f32.xlu0 %v6489_v49 }
0x413a   :  { %6462 = vrot.lane.b32.xlu0 %v6457_v50, %s8688_s29 }
0x41ad   :  { %v6491_v48 = vpop.xlane.xlu0 %6490 }
0x41ae   :  { %v6492_v1 = vmax.f32 %v6491_v48, 1e-30 }
0x41b0   :  { %8436 = vrcp.f32 %v6492_v1 }
0x41b1   :  { %v6463_v61 = vpop.permute.xlu0 %6462 }
0x41b2   :  { %6468 = vst.msk [vmem:[#allocation2 + $0x7] sm:$0x1] %vm429_vm9, %v6463_v61 }
0x41b9   :  { %v6497_v37 = vld [vmem:[#allocation2] sm:$0xff] }
0x41ba   :  { %8070 = vmatpush3.msra.mxu0 %v6497_v37 }
0x41bb   :  { %8074 = vmatprep.subr.mxu0 %v8685_v3 }
0x41bd   :  { %v8437_v22 = vpop.eup %8436 }
0x41be   :  { %v6494_v21 = vmul.f32 %v8437_v22, %v6488_v15  ;;  %v10230_v22 = vld [vmem:[%s10309_s14] ss:$0 sm:$0xff]  ;;  %s8691_s14 = smov [#allocation18]  }
0x41c0   :  { %6496 = vst.msk [vmem:[#allocation18 + $0xe] sm:$0x3] %vm453_vm8, %v6494_v21  ;;  %v6506_v14 = vrot.slane %v6494_v21, %v8894_v58  ;;  %v6095_v21 = vadd.f32 %v10230_v22, %v10139_v18 }
0x41c2   :  { %v6514_v62 = vrot.slane %v6506_v14, %v8894_v58  ;;  %v6507_v59 = vcombine.high %v6506_v14, %v6506_v14 }
0x41c4   :  { %8072 = vmatmul.mubr.msk.f32.vlgmr.msra.gmra.mxu0 %vm493_vm10, %v6514_v62  ;;  %v6521_v11 = vrot.slane %v6507_v59, %v8894_v58  ;;  %v8274_v58 = vld [vmem:[%s10303_s8 + $0x18] sm:$0xff]  }
0x41c5   :  { %8075 = vmatpush3.msra.mxu0 %v6498_v25  ;;  %8076 = vmatprep.mubr.msk.f32.mxu0 %vm8686_vm1, %v8685_v3 }
0x41c6   :  { %8091 = vmatprep.subr.bf16.mxu0 %v8685_v3  ;;  %8080 = vmatpush3.bf16.msra.mxu1 %v8274_v58 }
0x41c7   :  { %8081 = vmatprep.subr.bf16.mxu1 %v8685_v3 }
0x41c8   :  { %8077 = vmatmul.mubr.msk.f32.vlgmr.msra.gmra.mxu0 %vm493_vm10, %v6521_v11 }
0x41c9   :  { %8092 = vmatpush3.bf16.msra.mxu0 %v8272_v54  ;;  %8095 = vmatprep.mubr.msk.bf16.mxu0 %vm8686_vm1, %v8685_v3 }
0x41ca   :  { %8093 = vmatprep.subr.bf16.mxu0 %v8685_v3  ;;  %8082 = vmatpush3.bf16.msra.mxu1 %v8275_v42 }
0x41cb   :  { %8083 = vmatprep.subr.bf16.mxu1 %v8685_v3 }
0x41cd   :  { %8094 = vmatpush3.bf16.msra.mxu0 %v8273_v33 }
0x41ce   :  { %8099 = vmatprep.subr.bf16.mxu0 %v8685_v3  ;;  %8084 = vmatpush3.bf16.msra.mxu1 %v8276_v13 }
0x41cf   :  { %8085 = vmatprep.subr.bf16.mxu1 %v8685_v3 }
0x41d0   :  { %8096 = vmatmul.mubr.msk.bf16.vlgmr.msra.gmra.mxu0 %vm165_vm6, %v6778_v2 }
0x41d1   :  { %8103 = vmatprep.mubr.msk.bf16.mxu0 %vm8686_vm1, %v8685_v3 }
0x41d2   :  { %8086 = vmatpush3.bf16.msra.mxu1 %v8277_v32 }
0x41d3   :  { %8107 = vmatprep.subr.bf16.mxu1 %v8685_v3 }
0x4284   :  { %v6590_v35 = vpop.f32.mrf.mxu0 }
0x4285   :  { %v6666_v27 = vpack.c.bf16 %v6590_v35, %v6590_v35 }
0x4286   :  { %v8073_v8 = vpop.f32.mrf.mxu0 }
0x4287   :  { %v6670_v56 = vunpack.c.l.b16 %v6666_v27 }
0x4288   :  { %v6662_v57 = vpop.f32.mrf.mxu0 }
0x4289   :  { %v6667_v45 = vpack.c.bf16 %v6662_v57, %v6662_v57  ;;  %v8278_v57 = vld [vmem:[#allocation15 + $0x8] sm:$0xff]  }
0x428a   :  { %v8078_v30 = vpop.f32.mrf.mxu0 }
0x428b   :  { %v6671_v52 = vunpack.c.l.b16 %v6667_v45  ;;  %v8279_v30 = vld [vmem:[#allocation15] sm:$0xff]  }
0x428d   :  { %v6672_v41 = vrot.slane %v6671_v52, 7 }
0x428f   :  { %v6673_v46 = vsel %vm645_vm11, %v6672_v41, %v6670_v56 }
0x4290   :  { %v6828_v20 = vpop.f32.mrf.mxu0  ;;  %v6674_v40 = vpack.c.b16 %v6673_v46, %v6673_v46 }
0x4291   :  { %v6829_v19 = vadd.f32 %v10032_v16, %v6828_v20 }
0x4292   :  { %v8097_v47 = vpop.f32.mrf.mxu0  ;;  %6675 = vrot.lane.b32.xlu0 %v6674_v40, %s8678_s5 }
0x4293   :  { %6842 = vrot.lane.b32.xlu1 %v6829_v19, %s8675_s21 }
0x4294   :  { %v6831_v31 = vpop.f32.mrf.mxu0 }
0x4295   :  { %v8281_v31 = vld [vmem:[#allocation14] sm:$0xff]  }
0x4296   :  { %v8098_v23 = vpop.f32.mrf.mxu0 }
0x4297   :  { %6862 = vrot.lane.b32.xlu1 %v6861_v26, %s8690_s12 }
0x4304   :  { %v6676_v55 = vpop.permute.xlu0 %6675 }
0x4305   :  { %v6678_v60 = vsel %vm165_vm6, %v10127_v28, %v6676_v55  ;;  %v6843_v7 = vpop.permute.xlu1 %6842 }
0x4306   :  { %8088 = vmatmul.mubr.msk.bf16.vlgmr.msra.gmra.mxu1 %vm247_vm7, %v6678_v60 }
0x4307   :  { %8111 = vmatprep.mubr.msk.bf16.mxu1 %vm8686_vm1, %v8685_v3  ;;  %8108 = vmatpush3.bf16.msra.mxu1 %v8278_v57 }
0x4308   :  { %8109 = vmatprep.subr.bf16.mxu1 %v8685_v3 }
0x4309   :  { %v6863_v16 = vpop.permute.xlu1 %6862 }
0x430a   :  { %v6865_v6 = vsel %vm736_vm12, %v10062_v51, %v6863_v16  ;;  %v10221_v51 = vld [vmem:[%s10310_s15] ss:$0 sm:$0xff]  ;;  %s7082_s15 = sshll.u32 %s8691_s14, 4  ;;  %s7083_s15 = int_to_ptr.vmem [resolvable:$true] %s7082_s15 }
0x430b   :  { %v6866_v63 = vsub.f32 1.0, %v6865_v6  ;;  %8110 = vmatpush3.bf16.msra.mxu1 %v8279_v30  ;;  %p8621_p13 = scmp.lt.s32.totalorder %s7083_s15, %s7083_s15 }
0x430d   :  { %6869 = vperm.xlu1 %8151, %v6866_v63  }
0x4388   :  { %v6870_v32 = vpop.permute.xlu1 %6869 }
0x4389   :  { %v6872_v56 = vmul.f32 %v6870_v32, %v10076_v9 }
0x43c6   :  { %v6754_v38 = vpop.f32.mrf.mxu1 }
0x43c7   :  { %v6755_v24 = vadd.f32 %v10051_v36, %v6754_v38  ;;  %v6165_v36 = vadd.f32 %v10221_v51, %v10135_v5 }
0x43c8   :  { %v8089_v10 = vpop.f32.mrf.mxu1 }
0x43c9   :  { %v6761_v53 = vrot.slane %v6755_v24, 6  ;;  %v6170_v14 = vadd.f32 %v6165_v36, %v6095_v21 }
0x43ca   :  { %v6757_v15 = vpop.f32.mrf.mxu1 }
0x43cb   :  { %v6763_v28 = vsel %vm736_vm12, %v6755_v24, %v6761_v53  ;;  %v7343_v62 = vmul.f32 -1.442695, %v6170_v14 }
0x43cc   :  { %v6834_v49 = vadd.f32 %v6829_v19, %v6763_v28  ;;  %v8090_v44 = vpop.f32.mrf.mxu1  ;;  %v8280_v19 = vld [vmem:[#allocation14 + $0x8] sm:$0xff]  }
0x43cd   :  { %8100 = vmatpush3.bf16.msra.mxu0 %v8280_v19 }
0x43ce   :  { %v7369_v50 = vmul.f32 -1.442695, %v6834_v49  ;;  %8101 = vmatprep.subr.bf16.mxu0 %v8685_v3 }
0x43d0   :  { %8438 = vpow2.f32 %v7369_v50 }
0x43d1   :  { %8102 = vmatpush3.bf16.msra.mxu0 %v8281_v31 }
0x43dd   :  { %v8439_v48 = vpop.eup %8438 }
0x43de   :  { %v6838_v1 = vadd.f32 1.0, %v8439_v48 }
0x43e0   :  { %8440 = vrcp.f32 %v6838_v1 }
0x43e1   :  { %8442 = vpow2.f32 %v7343_v62 }
0x43ed   :  { %v8441_v61 = vpop.eup %8440 }
0x43ee   :  { %v6845_v37 = vmul.f32 %v8441_v61, %v6843_v7  ;;  %v8443_v59 = vpop.eup %8442  ;;  %v6852_v35 = vsub.f32 1.0, %v8441_v61  ;;  %v6858_v27 = vmul.f32 %v8441_v61, %v10076_v9 }
0x43ef   :  { %v6174_v25 = vadd.f32 1.0, %v8443_v59 }
0x43f0   :  { %6847 = vrot.lane.b32.xlu0 %v6845_v37, %s8675_s21 }
0x43f1   :  { %8444 = vrcp.f32 %v6174_v25 }
0x43f4   :  { %6178 = vrot.lane.b32.xlu0 %v6165_v36, %s8675_s21 }
0x43f8   :  { %6875 = vperm.xlu0 %8153, %v6865_v6  }
0x43fe   :  { %v8445_v5 = vpop.eup %8444 }
0x43ff   :  { %v6188_v47 = vsub.f32 1.0, %v8445_v5  ;;  %v6194_v23 = vmul.f32 %v8445_v5, %v10092_v39 }
0x4462   :  { %v6848_v54 = vpop.permute.xlu0 %6847 }
0x4463   :  { %v6850_v11 = vadd.f32 %v6848_v54, %v6763_v28 }
0x4465   :  { %8446 = vtanh.f32 %v6850_v11 }
0x4466   :  { %v6179_v33 = vpop.permute.xlu0 %6178 }
0x4467   :  { %v6181_v2 = vmul.f32 %v8445_v5, %v6179_v33 }
0x4469   :  { %6183 = vrot.lane.b32.xlu0 %v6181_v2, %s8675_s21 }
0x4472   :  { %v8447_v58 = vpop.eup %8446 }
0x4473   :  { %6854 = vrot.lane.b32.xlu1 %v8447_v58, %s8688_s29  ;;  %v6876_v42 = vpop.permute.xlu0 %6875 }
0x44db   :  { %v6184_v13 = vpop.permute.xlu0 %6183 }
0x44dc   :  { %v6186_v18 = vadd.f32 %v6184_v13, %v6095_v21 }
0x44de   :  { %8448 = vtanh.f32 %v6186_v18 }
0x44e5   :  { %v6855_v8 = vpop.permute.xlu1 %6854 }
0x44e6   :  { %v6857_v45 = vmul.f32 %v6855_v8, %v6852_v35 }
0x44e8   :  { %v6859_v52 = vadd.f32 %v6858_v27, %v6857_v45 }
0x44ea   :  { %v6878_v41 = vmul.f32 %v6876_v42, %v6859_v52 }
0x44eb   :  { %v8449_v46 = vpop.eup %8448 }
0x44ec   :  { %v6879_v20 = vadd.f32 %v6878_v41, %v6872_v56  ;;  %6190 = vrot.lane.b32.xlu0 %v8449_v46, %s8688_s29 }
0x44ee   :  { %v6883_v40 = vrot.slane %v6879_v20, 2  ;;  %v6880_v6 = vmul.f32 %v6879_v20, %v10122_v17 }
0x44f0   :  { %6884 = vrot.lane.b32.xlu1 %v6883_v40, %s8688_s29 }
0x455e   :  { %v6191_v26 = vpop.permute.xlu0 %6190 }
0x455f   :  { %v6193_v55 = vmul.f32 %v6191_v26, %v6188_v47 }
0x4561   :  { %v10243_v9 = vadd.f32 %v6194_v23, %v6193_v55 }
0x4562   :  { %v6885_v60 = vpop.permute.xlu1 %6884 }
0x4563   :  { %v6967_v7 = vpack.c.bf16 %v10243_v9, %v10243_v9  ;;  %v6887_v16 = vmul.f32 %v6885_v60, %v10105_v34 }
0x4565   :  { %6889 = vrot.lane.b32.xlu1 %v6887_v16, %s8678_s5  ;;  %6976 = vrot.lane.b32.xlu0 %v6967_v7, %s8688_s29 }
0x45d7   :  { %v6890_v63 = vpop.permute.xlu1 %6889  ;;  %v6977_v38 = vpop.permute.xlu0 %6976 }
0x45d8   :  { %v6892_v24 = vadd.f32 %v6890_v63, %v6880_v6  ;;  %8112 = vmatmul.mubr.msk.bf16.vlgmr.msra.gmra.mxu1 %vm165_vm6, %v6977_v38 }
0x45da   :  { %v6897_v3 = vpack.c.bf16 %v6892_v24, %v6892_v24 }
0x45dc   :  { %6906 = vrot.lane.b32.xlu1 %v6897_v3, %s8688_s29 }
0x464e   :  { %v6907_v10 = vpop.permute.xlu1 %6906 }
0x464f   :  { %8104 = vmatmul.mubr.msk.bf16.vlgmr.msra.gmra.mxu0 %vm165_vm6, %v6907_v10 }
0x4698   :  { %v7027_v53 = vpop.f32.mrf.mxu1 }
0x4699   :  { %v7028_v34 = vadd.f32 %v10221_v51, %v7027_v53 }
0x469a   :  { %v8113_v15 = vpop.f32.mrf.mxu1 }
0x469b   :  { %7041 = vrot.lane.b32.xlu0 %v7028_v34, %s8675_s21 }
0x469c   :  { %v7030_v28 = vpop.f32.mrf.mxu1 }
0x469e   :  { %v8114_v49 = vpop.f32.mrf.mxu1 }
0x470d   :  { %v7042_v62 = vpop.permute.xlu0 %7041 }
0x470f   :  { %v6957_v17 = vpop.f32.mrf.mxu0 }
0x4710   :  { %v6958_v44 = vadd.f32 %v10230_v22, %v6957_v17 }
0x4711   :  { %v8105_v50 = vpop.f32.mrf.mxu0 }
0x4712   :  { %v7033_v48 = vadd.f32 %v7028_v34, %v6958_v44 }
0x4713   :  { %v6960_v1 = vpop.f32.mrf.mxu0 }
0x4714   :  { %v7378_v61 = vmul.f32 -1.442695, %v7033_v48 }
0x4715   :  { %v8106_v37 = vpop.f32.mrf.mxu0 }
0x4716   :  { %8450 = vpow2.f32 %v7378_v61 }
0x4723   :  { %v8451_v36 = vpop.eup %8450 }
0x4724   :  { %v7037_v21 = vadd.f32 1.0, %v8451_v36 }
0x4726   :  { %8452 = vrcp.f32 %v7037_v21 }
0x4733   :  { %v8453_v14 = vpop.eup %8452 }
0x4734   :  { %v7044_v51 = vmul.f32 %v8453_v14, %v7042_v62 }
0x4736   :  { %7046 = vrot.lane.b32.xlu1 %v7044_v51, %s8675_s21  ;;  %s8616_s21 = scalar_lea.vmem %s7083_s15, 256 }
0x4737   :  { %p8617_p12 = scmp.ne.s32.totalorder %s7083_s15, %s8616_s21  ;;  %p8622_p0 = scmp.lt.s32.totalorder %s8616_s21, %s8616_s21 }
0x4739   :  { %p8623_p1 = por %p8622_p0, %p8621_p13 }
0x473a   :  { %1020 = vrot.lane.b32.xlu1 %v9183_v4, %s8688_s29 }
0x473b   :  { %p8624_p2 = pnand %p8623_p1, %p8617_p12 }
0x473e   :  { %2745 = vrot.lane.b32.xlu1 %v9546_v29, %s8688_s29 }
0x4742   :  { %4471 = vrot.lane.b32.xlu1 %v9909_v43, %s8688_s29 }
0x4746   :  { %6197 = vrot.lane.b32.xlu1 %v10243_v9, %s8688_s29 }
0x47a8   :  { %v7047_v22 = vpop.permute.xlu1 %7046 }
0x47a9   :  { %v7049_v59 = vadd.f32 %v7047_v22, %v6958_v44 }
0x47ab   :  { %8454 = vtanh.f32 %v7049_v59 }
0x47ac   :  { %v1021_v25 = vpop.permute.xlu1 %1020 }
0x47ad   :  { %1023 = vst.msk [vmem:[#allocation17] sm:$0x3] %vm445_vm3, %v1021_v25 }
0x47b0   :  { %v2746_v54 = vpop.permute.xlu1 %2745 }
0x47b1   :  { %2749 = vst.msk [vmem:[#allocation17 + $0x4] sm:$0x3] %vm445_vm3, %v2746_v54 }
0x47b4   :  { %v4472_v11 = vpop.permute.xlu1 %4471 }
0x47b5   :  { %4475 = vst.msk [vmem:[#allocation17 + $0x8] sm:$0x3] %vm445_vm3, %v4472_v11 }
0x47b8   :  { %v8455_v4 = vpop.eup %8454  ;;  %v6198_v29 = vpop.permute.xlu1 %6197 }
0x47b9   :  { %6201 = vst.msk [vmem:[#allocation17 + $0xc] sm:$0x3] %vm445_vm3, %v6198_v29  ;;  %7053 = vrot.lane.b32.xlu0 %v8455_v4, %s8688_s29 }
0x47bd   :  { %1882 = vrot.lane.b32.xlu0 %v9366_v0, %s8688_s29 }
0x47c1   :  { %3608 = vrot.lane.b32.xlu0 %v9729_v12, %s8688_s29 }
0x47c5   :  { %5334 = vrot.lane.b32.xlu0 %v10092_v39, %s8688_s29 }
0x47c6   :  { %8627 = shalt.err (!%p8624_p2)
}
0x47c7   :  { %7088 = dma.vmem_to_hbm [thread:$0]  %s7083_s15, 256, %s10312_s17, [#allocation19], %s8678_s5, %s8678_s5, %s8679_s30   ;;  %v7051_v0 = vsub.f32 1.0, %v8453_v14  ;;  %v7057_v43 = vmul.f32 %v8453_v14, %v10243_v9 }
0x47c8   :  { %s8692_s3 = smov [#allocation17]  }
0x47c9   :  { %s7070_s18 = sshll.u32 %s8692_s3, 4  ;;  %s7071_s18 = int_to_ptr.vmem [resolvable:$true] %s7070_s18 }
0x47ca   :  { %s8636_s17 = scalar_lea.vmem %s7071_s18, 256  ;;  %p8641_p4 = scmp.lt.s32.totalorder %s7071_s18, %s7071_s18 }
0x47cb   :  { %p8637_p3 = scmp.ne.s32.totalorder %s7071_s18, %s8636_s17  ;;  %p8642_p5 = scmp.lt.s32.totalorder %s8636_s17, %s8636_s17 }
0x47cd   :  { %p8643_p6 = por %p8642_p5, %p8641_p4 }
0x47cf   :  { %p8644_p7 = pnand %p8643_p6, %p8637_p3 }
0x482b   :  { %v7054_v12 = vpop.permute.xlu0 %7053 }
0x482c   :  { %v7056_v39 = vmul.f32 %v7054_v12, %v7051_v0 }
0x482e   :  { %v7058_v5 = vadd.f32 %v7057_v43, %v7056_v39 }
0x482f   :  { %v1883_v33 = vpop.permute.xlu0 %1882 }
0x4830   :  { %1886 = vst.msk [vmem:[#allocation17 + $0x2] sm:$0x3] %vm445_vm3, %v1883_v33  ;;  %7060 = vrot.lane.b32.xlu0 %v7058_v5, %s8688_s29 }
0x4833   :  { %v3609_v2 = vpop.permute.xlu0 %3608 }
0x4834   :  { %3612 = vst.msk [vmem:[#allocation17 + $0x6] sm:$0x3] %vm445_vm3, %v3609_v2 }
0x4837   :  { %v5335_v58 = vpop.permute.xlu0 %5334 }
0x4838   :  { %5338 = vst.msk [vmem:[#allocation17 + $0xa] sm:$0x3] %vm445_vm3, %v5335_v58 }
0x48a2   :  { %v7061_v42 = vpop.permute.xlu0 %7060 }
0x48a3   :  { %7064 = vst.msk [vmem:[#allocation17 + $0xe] sm:$0x3] %vm445_vm3, %v7061_v42 }
0x48a4   :  { %8647 = shalt.err (!%p8644_p7)
}
0x48a5   :  { %7076 = dma.vmem_to_hbm [thread:$0]  %s7071_s18, 256, %s10311_s16, [#allocation5], %s8678_s5, %s8678_s5, %s8679_s30  }
0x48a6   :  { %8666 = dma.done.wait [#allocation5], 256  }
0x48a7   :  { %8667 = vsyncadd [#allocation5], 4294967040 }
0x48a8   :  { %8668 = dma.done.wait [#allocation19], 256  }
0x48a9   :  { %8669 = vsyncadd [#allocation19], 4294967040 }
0x48aa   :  { %7095 = vsyncpa [#allocation4], 1 }
0x48ab   :  { %7096 = vsyncpa [#allocation7], 1 }
0x48ac   :  { %7097 = vsyncpa [#allocation10], 1 }
0x48ad   :  { %7098 = vsyncpa [#allocation13], 1 }
0x48ae   :  { %7099 = vsyncpa [#allocation16], 1 }
0x48af   :  { %7100 = vsyncpa [#allocation5], 1 }
0x48b0   :  { %7101 = vsyncpa [#allocation19], 1 }

</bundles_post_ra>
